<compile_context>
chip_gen: v7x
topology: tpu7x:2x2x1
jax: 0.10.0
libtpu: 0.0.40
codegen_flags: <defaults>
</compile_context>

<pallas_src>
import functools

import jax
import jax.numpy as jnp
from jax.experimental import pallas as pl
from jax.experimental.pallas import tpu as pltpu


_VMEM_LIMIT = 48 * 1024 * 1024  # valid on v5e/v6e (128 MiB) and v7x (64 MiB physical)


def _largest_divisor_leq(n, cap):
    for d in range(min(n, cap), 0, -1):
        if n % d == 0:
            return d
    return 1


def _pick_row_tile(h, w, max_pixels=1024):
    # Row tile TH such that the im2col matmul has M = TH*W (>= 256 when the
    # image is large enough for the 256-wide v6e/v7x MXU) while keeping the
    # (TH*W, 9*Cin) patch to a few MiB of VMEM.
    cap = max(1, max_pixels // max(w, 1))
    return _largest_divisor_leq(h, min(cap, h))


# ----------------------------------------------------------------------------
# Conv 3x3 + bias + ReLU (im2col, one MXU matmul per row-tile)
# ----------------------------------------------------------------------------
def _conv3x3_relu_kernel(x_ref, w_ref, b_ref, o_ref, *, row_tile):
    # x_ref: (1, H+2, W+2, Cin)  bf16, zero-padded input (one batch element)
    # w_ref: (9*Cin, Cout)       bf16, HWIO taps flattened in im2col order
    # b_ref: (1, Cout)           f32
    # o_ref: (1, H, W, Cout)     bf16
    _, hp, wp, cin = x_ref.shape
    h, w = hp - 2, wp - 2
    cout = o_ref.shape[-1]
    th = row_tile

    wmat = w_ref[...]                     # (9*Cin, Cout) bf16, hoisted
    bias = b_ref[...]                     # (1, Cout)     f32,  hoisted

    for t in range(h // th):              # few row-tiles, not per-row unroll
        r0 = t * th
        # im2col: 9 shifted (TH, W, Cin) windows concatenated on the lane axis.
        taps = []
        for ky in range(3):
            for kx in range(3):
                taps.append(x_ref[0, r0 + ky:r0 + ky + th, kx:kx + w, :])
        patch = jnp.concatenate(taps, axis=-1)           # (TH, W, 9*Cin) bf16
        patch = patch.reshape(th * w, 9 * cin)           # (TH*W, 9*Cin)
        acc = jnp.dot(patch, wmat,
                      preferred_element_type=jnp.float32)  # (TH*W, Cout) f32
        out = jnp.maximum(acc + bias, 0.0)                 # bias + ReLU in f32
        o_ref[0, r0:r0 + th, :, :] = out.astype(o_ref.dtype).reshape(th, w, cout)


def conv3x3_relu(x, w, b):
    # x: (B, H, W, Cin) bf16;  w: (3, 3, Cin, Cout) f32;  b: (Cout,) f32
    B, H, W, Cin = x.shape
    Cout = w.shape[-1]
    th = _pick_row_tile(H, W)

    # NOTE: whole-image (per batch element) blocks; with bf16 activations this
    # fits VGG-224 on v7x's 64 MiB VMEM.  Larger images would need an H grid
    # axis with halo'd input tiles (element-indexed blocks or manual DMA).
    xp = jnp.pad(x, ((0, 0), (1, 1), (1, 1), (0, 0)))        # SAME zero pad
    wf = w.reshape(9 * Cin, Cout).astype(jnp.bfloat16)       # im2col weight
    bf = b.reshape(1, Cout).astype(jnp.float32)

    kernel = functools.partial(_conv3x3_relu_kernel, row_tile=th)
    return pl.pallas_call(
        kernel,
        out_shape=jax.ShapeDtypeStruct((B, H, W, Cout), jnp.bfloat16),
        grid=(B,),
        in_specs=[
            pl.BlockSpec((1, H + 2, W + 2, Cin), lambda i: (i, 0, 0, 0)),
            pl.BlockSpec((9 * Cin, Cout), lambda i: (0, 0)),
            pl.BlockSpec((1, Cout), lambda i: (0, 0)),
        ],
        out_specs=pl.BlockSpec((1, H, W, Cout), lambda i: (i, 0, 0, 0)),
        compiler_params=pltpu.CompilerParams(
            dimension_semantics=("parallel",),
            vmem_limit_bytes=_VMEM_LIMIT,
        ),
    )(xp, wf, bf)


# ----------------------------------------------------------------------------
# MaxPool 2x2 / stride 2 (single gridded kernel, no HBM strided-gather copies)
# ----------------------------------------------------------------------------
def _maxpool2x2_kernel(x_ref, o_ref):
    # x_ref: (1, TH2, 2, W2, 2*C)  -- row pair explicit, col pair folded in lanes
    # o_ref: (1, TH2, W2, C)
    c = o_ref.shape[-1]
    top = x_ref[0, :, 0, :, :].astype(jnp.float32)   # (TH2, W2, 2C)
    bot = x_ref[0, :, 1, :, :].astype(jnp.float32)
    m = jnp.maximum(top, bot)                        # max over the H pair
    m = jnp.maximum(m[..., :c], m[..., c:])          # max over the W pair
    o_ref[0] = m.astype(o_ref.dtype)


def maxpool2x2(x):
    # x: (B, H, W, C), H and W even (MaxPool2d(2, 2) floor semantics).
    B, H, W, C = x.shape
    assert H % 2 == 0 and W % 2 == 0, "maxpool2x2 expects even H and W"
    H2, W2 = H // 2, W // 2
    # Metadata-only row-major reshape: no extra HBM traffic in the wrapper.
    xr = x.reshape(B, H2, 2, W2, 2 * C)
    th2 = _largest_divisor_leq(H2, 16)
    return pl.pallas_call(
        _maxpool2x2_kernel,
        out_shape=jax.ShapeDtypeStruct((B, H2, W2, C), x.dtype),
        grid=(B, H2 // th2),
        in_specs=[pl.BlockSpec((1, th2, 2, W2, 2 * C),
                               lambda i, j: (i, j, 0, 0, 0))],
        out_specs=pl.BlockSpec((1, th2, W2, C), lambda i, j: (i, j, 0, 0)),
        compiler_params=pltpu.CompilerParams(
            dimension_semantics=("parallel", "parallel"),
            vmem_limit_bytes=_VMEM_LIMIT,
        ),
    )(xr)


# ----------------------------------------------------------------------------
# MSE between the x-half and y-half of the doubled batch (tiled reduction)
# ----------------------------------------------------------------------------
def _sqdiff_acc_kernel(x_ref, y_ref, o_ref):
    # Resident SMEM scalar accumulator across the batch grid axis.
    @pl.when(pl.program_id(0) == 0)
    def _():
        o_ref[0, 0] = jnp.float32(0.0)

    d = x_ref[...].astype(jnp.float32) - y_ref[...].astype(jnp.float32)
    o_ref[0, 0] += jnp.sum(d * d)


def mse_pair(xy, n):
    # xy: (2n, H, W, C) with x = xy[:n], y = xy[n:];  returns mean((x-y)^2).
    _, H, W, C = xy.shape
    ssq = pl.pallas_call(
        _sqdiff_acc_kernel,
        out_shape=jax.ShapeDtypeStruct((1, 1), jnp.float32),
        grid=(n,),
        in_specs=[
            pl.BlockSpec((1, H, W, C), lambda i: (i, 0, 0, 0)),
            pl.BlockSpec((1, H, W, C), lambda i: (i + n, 0, 0, 0)),
        ],
        out_specs=pl.BlockSpec(memory_space=pltpu.MemorySpace.SMEM),
        compiler_params=pltpu.CompilerParams(
            dimension_semantics=("arbitrary",),
            vmem_limit_bytes=_VMEM_LIMIT,
        ),
    )(xy, xy)
    return ssq[0, 0] / jnp.float32(n * H * W * C)


# ----------------------------------------------------------------------------
# Parameters (deterministic synthetic init, VGG16 shapes for features 0..15)
# ----------------------------------------------------------------------------
VGG_CFG = [
    [(3, 64), (64, 64)],                     # block 0 (features 0-3)
    [(64, 128), (128, 128)],                 # block 1 (features 4-8, pool first)
    [(128, 256), (256, 256), (256, 256)],    # block 2 (features 9-15, pool first)
]


def init_params(key):
    params = []
    for block_cfg in VGG_CFG:
        blk = []
        for cin, cout in block_cfg:
            key, kw, kb = jax.random.split(key, 3)
            scale = (2.0 / (9.0 * cin)) ** 0.5
            w = jax.random.normal(kw, (3, 3, cin, cout), jnp.float32) * scale
            b = jax.random.normal(kb, (cout,), jnp.float32) * 0.01
            blk.append((w, b))
        params.append(blk)
    return params


IMAGENET_MEAN = jnp.array([0.485, 0.456, 0.406], jnp.float32).reshape(1, 1, 1, 3)
IMAGENET_INV_STD = (1.0 / jnp.array([0.229, 0.224, 0.225], jnp.float32)).reshape(1, 1, 1, 3)


# ----------------------------------------------------------------------------
# Forward pass (matches VGGPerceptualLoss.forward)
# ----------------------------------------------------------------------------
def vgg_perceptual_loss(x_nchw, y_nchw, params, do_normalize=True):
    n = x_nchw.shape[0]
    # NCHW (PyTorch) -> NHWC, and batch x with y so every layer runs once.
    x = jnp.transpose(x_nchw, (0, 2, 3, 1)).astype(jnp.float32)
    y = jnp.transpose(y_nchw, (0, 2, 3, 1)).astype(jnp.float32)
    xy = jnp.concatenate([x, y], axis=0)

    if do_normalize:
        # Fused by XLA into the first conv's pad copy — no separate Pallas
        # normalization pass over HBM.  (Folding the shift fully into the conv
        # bias would change the zero-padding semantics at the image border.)
        xy = (xy - IMAGENET_MEAN) * IMAGENET_INV_STD

    xy = xy.astype(jnp.bfloat16)             # bf16 activations between layers

    loss = jnp.float32(0.0)
    for bi, blk in enumerate(params):
        if bi > 0:                           # blocks 1 and 2 start with MaxPool2d(2, 2)
            xy = maxpool2x2(xy)
        for (w, b) in blk:
            xy = conv3x3_relu(xy, w, b)
        loss = loss + mse_pair(xy, n)
    return loss


if __name__ == "__main__":
    key = jax.random.PRNGKey(0)
    k_x, k_y, k_p = jax.random.split(key, 3)

    # Small inputs consistent with the module: NCHW, 3 channels, values in [0,1]
    x = jax.random.uniform(k_x, (2, 3, 16, 16), jnp.float32)
    y = jax.random.uniform(k_y, (2, 3, 16, 16), jnp.float32)

    params = init_params(k_p)

    loss = jax.jit(vgg_perceptual_loss)(x, y, params)
    jax.block_until_ready(loss)
    print("KERNEL_OK")
</pallas_src>

<mosaic_0001>
module attributes {stable_mosaic.version = 11 : i64} {
  func.func @_conv3x3_relu_kernel(%arg0: i32, %arg1: memref<1x18x18x3xbf16, #tpu.memory_space<vmem>>, %arg2: memref<27x64xbf16, #tpu.memory_space<vmem>>, %arg3: memref<1x64xf32, #tpu.memory_space<vmem>>, %arg4: memref<1x16x16x64xbf16, #tpu.memory_space<vmem>>) attributes {dimension_semantics = [#tpu.dimension_semantics<parallel>], iteration_bounds = array<i64: 4>, scalar_prefetch = 0 : i64, scratch_operands = 0 : i64, tpu.core_type = #tpu.core_type<tc>, window_params = [{transform_indices = @transform_0, window_bounds = array<i64: 1, 18, 18, 3>}, {pipeline_mode = #tpu.pipeline_mode<synchronous>, transform_indices = @transform_1, window_bounds = array<i64: 27, 64>}, {pipeline_mode = #tpu.pipeline_mode<synchronous>, transform_indices = @transform_2, window_bounds = array<i64: 1, 64>}, {transform_indices = @transform_3, window_bounds = array<i64: 1, 16, 16, 64>}]} {
    %c0 = arith.constant 0 : index
    %c0_0 = arith.constant 0 : index
    %0 = vector.load %arg2[%c0, %c0_0] : memref<27x64xbf16, #tpu.memory_space<vmem>>, vector<27x64xbf16>
    %c0_1 = arith.constant 0 : index
    %c0_2 = arith.constant 0 : index
    %1 = vector.load %arg3[%c0_1, %c0_2] : memref<1x64xf32, #tpu.memory_space<vmem>>, vector<1x64xf32>
    %c0_3 = arith.constant 0 : index
    %c0_4 = arith.constant 0 : index
    %c0_5 = arith.constant 0 : index
    %c0_6 = arith.constant 0 : index
    %2 = vector.load %arg1[%c0_3, %c0_4, %c0_5, %c0_6] : memref<1x18x18x3xbf16, #tpu.memory_space<vmem>>, vector<1x16x16x3xbf16>
    %3 = vector.shape_cast %2 : vector<1x16x16x3xbf16> to vector<16x16x3xbf16>
    %c0_7 = arith.constant 0 : index
    %c0_8 = arith.constant 0 : index
    %c1 = arith.constant 1 : index
    %c0_9 = arith.constant 0 : index
    %4 = vector.load %arg1[%c0_7, %c0_8, %c1, %c0_9] : memref<1x18x18x3xbf16, #tpu.memory_space<vmem>>, vector<1x16x16x3xbf16>
    %5 = vector.shape_cast %4 : vector<1x16x16x3xbf16> to vector<16x16x3xbf16>
    %c0_10 = arith.constant 0 : index
    %c0_11 = arith.constant 0 : index
    %c2 = arith.constant 2 : index
    %c0_12 = arith.constant 0 : index
    %6 = vector.load %arg1[%c0_10, %c0_11, %c2, %c0_12] : memref<1x18x18x3xbf16, #tpu.memory_space<vmem>>, vector<1x16x16x3xbf16>
    %7 = vector.shape_cast %6 : vector<1x16x16x3xbf16> to vector<16x16x3xbf16>
    %c0_13 = arith.constant 0 : index
    %c1_14 = arith.constant 1 : index
    %c0_15 = arith.constant 0 : index
    %c0_16 = arith.constant 0 : index
    %8 = vector.load %arg1[%c0_13, %c1_14, %c0_15, %c0_16] : memref<1x18x18x3xbf16, #tpu.memory_space<vmem>>, vector<1x16x16x3xbf16>
    %9 = vector.shape_cast %8 : vector<1x16x16x3xbf16> to vector<16x16x3xbf16>
    %c0_17 = arith.constant 0 : index
    %c1_18 = arith.constant 1 : index
    %c1_19 = arith.constant 1 : index
    %c0_20 = arith.constant 0 : index
    %10 = vector.load %arg1[%c0_17, %c1_18, %c1_19, %c0_20] : memref<1x18x18x3xbf16, #tpu.memory_space<vmem>>, vector<1x16x16x3xbf16>
    %11 = vector.shape_cast %10 : vector<1x16x16x3xbf16> to vector<16x16x3xbf16>
    %c0_21 = arith.constant 0 : index
    %c1_22 = arith.constant 1 : index
    %c2_23 = arith.constant 2 : index
    %c0_24 = arith.constant 0 : index
    %12 = vector.load %arg1[%c0_21, %c1_22, %c2_23, %c0_24] : memref<1x18x18x3xbf16, #tpu.memory_space<vmem>>, vector<1x16x16x3xbf16>
    %13 = vector.shape_cast %12 : vector<1x16x16x3xbf16> to vector<16x16x3xbf16>
    %c0_25 = arith.constant 0 : index
    %c2_26 = arith.constant 2 : index
    %c0_27 = arith.constant 0 : index
    %c0_28 = arith.constant 0 : index
    %14 = vector.load %arg1[%c0_25, %c2_26, %c0_27, %c0_28] : memref<1x18x18x3xbf16, #tpu.memory_space<vmem>>, vector<1x16x16x3xbf16>
    %15 = vector.shape_cast %14 : vector<1x16x16x3xbf16> to vector<16x16x3xbf16>
    %c0_29 = arith.constant 0 : index
    %c2_30 = arith.constant 2 : index
    %c1_31 = arith.constant 1 : index
    %c0_32 = arith.constant 0 : index
    %16 = vector.load %arg1[%c0_29, %c2_30, %c1_31, %c0_32] : memref<1x18x18x3xbf16, #tpu.memory_space<vmem>>, vector<1x16x16x3xbf16>
    %17 = vector.shape_cast %16 : vector<1x16x16x3xbf16> to vector<16x16x3xbf16>
    %c0_33 = arith.constant 0 : index
    %c2_34 = arith.constant 2 : index
    %c2_35 = arith.constant 2 : index
    %c0_36 = arith.constant 0 : index
    %18 = vector.load %arg1[%c0_33, %c2_34, %c2_35, %c0_36] : memref<1x18x18x3xbf16, #tpu.memory_space<vmem>>, vector<1x16x16x3xbf16>
    %19 = vector.shape_cast %18 : vector<1x16x16x3xbf16> to vector<16x16x3xbf16>
    %20 = tpu.concatenate %3, %5, %7, %9, %11, %13, %15, %17, %19 in 2 : vector<16x16x3xbf16>, vector<16x16x3xbf16>, vector<16x16x3xbf16>, vector<16x16x3xbf16>, vector<16x16x3xbf16>, vector<16x16x3xbf16>, vector<16x16x3xbf16>, vector<16x16x3xbf16>, vector<16x16x3xbf16> -> vector<16x16x27xbf16>
    %21 = vector.shape_cast %20 : vector<16x16x27xbf16> to vector<256x27xbf16>
    %cst = arith.constant dense<0.000000e+00> : vector<256x64xf32>
    %22 = tpu.matmul %21, %0, %cst {dimension_numbers = #tpu.dot_dimension_numbers<[1], [0], [0], [1], [0, 0, 1, 1], [], []>} : vector<256x27xbf16>, vector<27x64xbf16>, vector<256x64xf32> -> vector<256x64xf32>
    %23 = vector.broadcast %1 : vector<1x64xf32> to vector<256x64xf32>
    %24 = arith.addf %22, %23 : vector<256x64xf32>
    %cst_37 = arith.constant 0.000000e+00 : f32
    %25 = vector.broadcast %cst_37 : f32 to vector<256x64xf32>
    %26 = arith.maximumf %24, %25 : vector<256x64xf32>
    %27 = arith.truncf %26 : vector<256x64xf32> to vector<256x64xbf16>
    %28 = vector.shape_cast %27 : vector<256x64xbf16> to vector<16x16x64xbf16>
    %c0_38 = arith.constant 0 : index
    %c0_39 = arith.constant 0 : index
    %c0_40 = arith.constant 0 : index
    %c0_41 = arith.constant 0 : index
    %29 = vector.load %arg4[%c0_38, %c0_39, %c0_40, %c0_41] : memref<1x16x16x64xbf16, #tpu.memory_space<vmem>>, vector<1x16x16x64xbf16>
    %30 = vector.shape_cast %29 : vector<1x16x16x64xbf16> to vector<16x16x64xbf16>
    %31 = vector.shape_cast %28 : vector<16x16x64xbf16> to vector<1x16x16x64xbf16>
    tpu.vector_store %arg4[%c0_38, %c0_39, %c0_40, %c0_41], %31 {strides = array<i32>} : memref<1x16x16x64xbf16, #tpu.memory_space<vmem>>, vector<1x16x16x64xbf16>,
    return
  }
  func.func @transform_0(%arg0: i32) -> (i32, i32, i32, i32) {
    %c0_i32 = arith.constant 0 : i32
    %c0_i32_0 = arith.constant 0 : i32
    %c0_i32_1 = arith.constant 0 : i32
    %c0_i32_2 = arith.constant 0 : i32
    return %arg0, %c0_i32, %c0_i32_0, %c0_i32_1 : i32, i32, i32, i32
  }
  func.func @transform_1(%arg0: i32) -> (i32, i32) {
    %c0_i32 = arith.constant 0 : i32
    %c0_i32_0 = arith.constant 0 : i32
    %c0_i32_1 = arith.constant 0 : i32
    return %c0_i32, %c0_i32_0 : i32, i32
  }
  func.func @transform_2(%arg0: i32) -> (i32, i32) {
    %c0_i32 = arith.constant 0 : i32
    %c0_i32_0 = arith.constant 0 : i32
    %c0_i32_1 = arith.constant 0 : i32
    return %c0_i32, %c0_i32_0 : i32, i32
  }
  func.func @transform_3(%arg0: i32) -> (i32, i32, i32, i32) {
    %c0_i32 = arith.constant 0 : i32
    %c0_i32_0 = arith.constant 0 : i32
    %c0_i32_1 = arith.constant 0 : i32
    %c0_i32_2 = arith.constant 0 : i32
    return %arg0, %c0_i32, %c0_i32_0, %c0_i32_1 : i32, i32, i32, i32
  }
}

module attributes {stable_mosaic.version = 11 : i64} {
  func.func @_conv3x3_relu_kernel(%arg0: i32, %arg1: memref<1x18x18x64xbf16, #tpu.memory_space<vmem>>, %arg2: memref<576x64xbf16, #tpu.memory_space<vmem>>, %arg3: memref<1x64xf32, #tpu.memory_space<vmem>>, %arg4: memref<1x16x16x64xbf16, #tpu.memory_space<vmem>>) attributes {dimension_semantics = [#tpu.dimension_semantics<parallel>], iteration_bounds = array<i64: 4>, scalar_prefetch = 0 : i64, scratch_operands = 0 : i64, tpu.core_type = #tpu.core_type<tc>, window_params = [{transform_indices = @transform_0, window_bounds = array<i64: 1, 18, 18, 64>}, {pipeline_mode = #tpu.pipeline_mode<synchronous>, transform_indices = @transform_1, window_bounds = array<i64: 576, 64>}, {pipeline_mode = #tpu.pipeline_mode<synchronous>, transform_indices = @transform_2, window_bounds = array<i64: 1, 64>}, {transform_indices = @transform_3, window_bounds = array<i64: 1, 16, 16, 64>}]} {
    %c0 = arith.constant 0 : index
    %c0_0 = arith.constant 0 : index
    %0 = vector.load %arg2[%c0, %c0_0] : memref<576x64xbf16, #tpu.memory_space<vmem>>, vector<576x64xbf16>
    %c0_1 = arith.constant 0 : index
    %c0_2 = arith.constant 0 : index
    %1 = vector.load %arg3[%c0_1, %c0_2] : memref<1x64xf32, #tpu.memory_space<vmem>>, vector<1x64xf32>
    %c0_3 = arith.constant 0 : index
    %c0_4 = arith.constant 0 : index
    %c0_5 = arith.constant 0 : index
    %c0_6 = arith.constant 0 : index
    %2 = vector.load %arg1[%c0_3, %c0_4, %c0_5, %c0_6] : memref<1x18x18x64xbf16, #tpu.memory_space<vmem>>, vector<1x16x16x64xbf16>
    %3 = vector.shape_cast %2 : vector<1x16x16x64xbf16> to vector<16x16x64xbf16>
    %c0_7 = arith.constant 0 : index
    %c0_8 = arith.constant 0 : index
    %c1 = arith.constant 1 : index
    %c0_9 = arith.constant 0 : index
    %4 = vector.load %arg1[%c0_7, %c0_8, %c1, %c0_9] : memref<1x18x18x64xbf16, #tpu.memory_space<vmem>>, vector<1x16x16x64xbf16>
    %5 = vector.shape_cast %4 : vector<1x16x16x64xbf16> to vector<16x16x64xbf16>
    %c0_10 = arith.constant 0 : index
    %c0_11 = arith.constant 0 : index
    %c2 = arith.constant 2 : index
    %c0_12 = arith.constant 0 : index
    %6 = vector.load %arg1[%c0_10, %c0_11, %c2, %c0_12] : memref<1x18x18x64xbf16, #tpu.memory_space<vmem>>, vector<1x16x16x64xbf16>
    %7 = vector.shape_cast %6 : vector<1x16x16x64xbf16> to vector<16x16x64xbf16>
    %c0_13 = arith.constant 0 : index
    %c1_14 = arith.constant 1 : index
    %c0_15 = arith.constant 0 : index
    %c0_16 = arith.constant 0 : index
    %8 = vector.load %arg1[%c0_13, %c1_14, %c0_15, %c0_16] : memref<1x18x18x64xbf16, #tpu.memory_space<vmem>>, vector<1x16x16x64xbf16>
    %9 = vector.shape_cast %8 : vector<1x16x16x64xbf16> to vector<16x16x64xbf16>
    %c0_17 = arith.constant 0 : index
    %c1_18 = arith.constant 1 : index
    %c1_19 = arith.constant 1 : index
    %c0_20 = arith.constant 0 : index
    %10 = vector.load %arg1[%c0_17, %c1_18, %c1_19, %c0_20] : memref<1x18x18x64xbf16, #tpu.memory_space<vmem>>, vector<1x16x16x64xbf16>
    %11 = vector.shape_cast %10 : vector<1x16x16x64xbf16> to vector<16x16x64xbf16>
    %c0_21 = arith.constant 0 : index
    %c1_22 = arith.constant 1 : index
    %c2_23 = arith.constant 2 : index
    %c0_24 = arith.constant 0 : index
    %12 = vector.load %arg1[%c0_21, %c1_22, %c2_23, %c0_24] : memref<1x18x18x64xbf16, #tpu.memory_space<vmem>>, vector<1x16x16x64xbf16>
    %13 = vector.shape_cast %12 : vector<1x16x16x64xbf16> to vector<16x16x64xbf16>
    %c0_25 = arith.constant 0 : index
    %c2_26 = arith.constant 2 : index
    %c0_27 = arith.constant 0 : index
    %c0_28 = arith.constant 0 : index
    %14 = vector.load %arg1[%c0_25, %c2_26, %c0_27, %c0_28] : memref<1x18x18x64xbf16, #tpu.memory_space<vmem>>, vector<1x16x16x64xbf16>
    %15 = vector.shape_cast %14 : vector<1x16x16x64xbf16> to vector<16x16x64xbf16>
    %c0_29 = arith.constant 0 : index
    %c2_30 = arith.constant 2 : index
    %c1_31 = arith.constant 1 : index
    %c0_32 = arith.constant 0 : index
    %16 = vector.load %arg1[%c0_29, %c2_30, %c1_31, %c0_32] : memref<1x18x18x64xbf16, #tpu.memory_space<vmem>>, vector<1x16x16x64xbf16>
    %17 = vector.shape_cast %16 : vector<1x16x16x64xbf16> to vector<16x16x64xbf16>
    %c0_33 = arith.constant 0 : index
    %c2_34 = arith.constant 2 : index
    %c2_35 = arith.constant 2 : index
    %c0_36 = arith.constant 0 : index
    %18 = vector.load %arg1[%c0_33, %c2_34, %c2_35, %c0_36] : memref<1x18x18x64xbf16, #tpu.memory_space<vmem>>, vector<1x16x16x64xbf16>
    %19 = vector.shape_cast %18 : vector<1x16x16x64xbf16> to vector<16x16x64xbf16>
    %20 = tpu.concatenate %3, %5, %7, %9, %11, %13, %15, %17, %19 in 2 : vector<16x16x64xbf16>, vector<16x16x64xbf16>, vector<16x16x64xbf16>, vector<16x16x64xbf16>, vector<16x16x64xbf16>, vector<16x16x64xbf16>, vector<16x16x64xbf16>, vector<16x16x64xbf16>, vector<16x16x64xbf16> -> vector<16x16x576xbf16>
    %21 = vector.shape_cast %20 : vector<16x16x576xbf16> to vector<256x576xbf16>
    %cst = arith.constant dense<0.000000e+00> : vector<256x64xf32>
    %22 = tpu.matmul %21, %0, %cst {dimension_numbers = #tpu.dot_dimension_numbers<[1], [0], [0], [1], [0, 0, 1, 1], [], []>} : vector<256x576xbf16>, vector<576x64xbf16>, vector<256x64xf32> -> vector<256x64xf32>
    %23 = vector.broadcast %1 : vector<1x64xf32> to vector<256x64xf32>
    %24 = arith.addf %22, %23 : vector<256x64xf32>
    %cst_37 = arith.constant 0.000000e+00 : f32
    %25 = vector.broadcast %cst_37 : f32 to vector<256x64xf32>
    %26 = arith.maximumf %24, %25 : vector<256x64xf32>
    %27 = arith.truncf %26 : vector<256x64xf32> to vector<256x64xbf16>
    %28 = vector.shape_cast %27 : vector<256x64xbf16> to vector<16x16x64xbf16>
    %c0_38 = arith.constant 0 : index
    %c0_39 = arith.constant 0 : index
    %c0_40 = arith.constant 0 : index
    %c0_41 = arith.constant 0 : index
    %29 = vector.load %arg4[%c0_38, %c0_39, %c0_40, %c0_41] : memref<1x16x16x64xbf16, #tpu.memory_space<vmem>>, vector<1x16x16x64xbf16>
    %30 = vector.shape_cast %29 : vector<1x16x16x64xbf16> to vector<16x16x64xbf16>
    %31 = vector.shape_cast %28 : vector<16x16x64xbf16> to vector<1x16x16x64xbf16>
    tpu.vector_store %arg4[%c0_38, %c0_39, %c0_40, %c0_41], %31 {strides = array<i32>} : memref<1x16x16x64xbf16, #tpu.memory_space<vmem>>, vector<1x16x16x64xbf16>,
    return
  }
  func.func @transform_0(%arg0: i32) -> (i32, i32, i32, i32) {
    %c0_i32 = arith.constant 0 : i32
    %c0_i32_0 = arith.constant 0 : i32
    %c0_i32_1 = arith.constant 0 : i32
    %c0_i32_2 = arith.constant 0 : i32
    return %arg0, %c0_i32, %c0_i32_0, %c0_i32_1 : i32, i32, i32, i32
  }
  func.func @transform_1(%arg0: i32) -> (i32, i32) {
    %c0_i32 = arith.constant 0 : i32
    %c0_i32_0 = arith.constant 0 : i32
    %c0_i32_1 = arith.constant 0 : i32
    return %c0_i32, %c0_i32_0 : i32, i32
  }
  func.func @transform_2(%arg0: i32) -> (i32, i32) {
    %c0_i32 = arith.constant 0 : i32
    %c0_i32_0 = arith.constant 0 : i32
    %c0_i32_1 = arith.constant 0 : i32
    return %c0_i32, %c0_i32_0 : i32, i32
  }
  func.func @transform_3(%arg0: i32) -> (i32, i32, i32, i32) {
    %c0_i32 = arith.constant 0 : i32
    %c0_i32_0 = arith.constant 0 : i32
    %c0_i32_1 = arith.constant 0 : i32
    %c0_i32_2 = arith.constant 0 : i32
    return %arg0, %c0_i32, %c0_i32_0, %c0_i32_1 : i32, i32, i32, i32
  }
}

module attributes {stable_mosaic.version = 11 : i64} {
  func.func @_maxpool2x2_kernel(%arg0: i32, %arg1: i32, %arg2: memref<1x8x2x8x128xbf16, #tpu.memory_space<vmem>>, %arg3: memref<1x8x8x64xbf16, #tpu.memory_space<vmem>>) attributes {dimension_semantics = [#tpu.dimension_semantics<parallel>, #tpu.dimension_semantics<parallel>], iteration_bounds = array<i64: 4, 1>, scalar_prefetch = 0 : i64, scratch_operands = 0 : i64, tpu.core_type = #tpu.core_type<tc>, window_params = [{transform_indices = @transform_0, window_bounds = array<i64: 1, 8, 2, 8, 128>}, {transform_indices = @transform_1, window_bounds = array<i64: 1, 8, 8, 64>}]} {
    %c0 = arith.constant 0 : index
    %c0_0 = arith.constant 0 : index
    %c0_1 = arith.constant 0 : index
    %c0_2 = arith.constant 0 : index
    %c0_3 = arith.constant 0 : index
    %0 = vector.load %arg2[%c0, %c0_0, %c0_1, %c0_2, %c0_3] : memref<1x8x2x8x128xbf16, #tpu.memory_space<vmem>>, vector<1x8x1x8x128xbf16>
    %1 = vector.shape_cast %0 : vector<1x8x1x8x128xbf16> to vector<8x8x128xbf16>
    %2 = arith.extf %1 : vector<8x8x128xbf16> to vector<8x8x128xf32>
    %c0_4 = arith.constant 0 : index
    %c0_5 = arith.constant 0 : index
    %c1 = arith.constant 1 : index
    %c0_6 = arith.constant 0 : index
    %c0_7 = arith.constant 0 : index
    %3 = vector.load %arg2[%c0_4, %c0_5, %c1, %c0_6, %c0_7] : memref<1x8x2x8x128xbf16, #tpu.memory_space<vmem>>, vector<1x8x1x8x128xbf16>
    %4 = vector.shape_cast %3 : vector<1x8x1x8x128xbf16> to vector<8x8x128xbf16>
    %5 = arith.extf %4 : vector<8x8x128xbf16> to vector<8x8x128xf32>
    %6 = arith.maximumf %2, %5 : vector<8x8x128xf32>
    %7 = vector.extract_strided_slice %6 {offsets = [0, 0, 0], sizes = [8, 8, 64], strides = [1, 1, 1]} : vector<8x8x128xf32> to vector<8x8x64xf32>
    %8 = vector.extract_strided_slice %6 {offsets = [0, 0, 64], sizes = [8, 8, 64], strides = [1, 1, 1]} : vector<8x8x128xf32> to vector<8x8x64xf32>
    %9 = arith.maximumf %7, %8 : vector<8x8x64xf32>
    %10 = arith.truncf %9 : vector<8x8x64xf32> to vector<8x8x64xbf16>
    %c0_8 = arith.constant 0 : index
    %c0_9 = arith.constant 0 : index
    %c0_10 = arith.constant 0 : index
    %c0_11 = arith.constant 0 : index
    %11 = vector.load %arg3[%c0_8, %c0_9, %c0_10, %c0_11] : memref<1x8x8x64xbf16, #tpu.memory_space<vmem>>, vector<1x8x8x64xbf16>
    %12 = vector.shape_cast %11 : vector<1x8x8x64xbf16> to vector<8x8x64xbf16>
    %13 = vector.shape_cast %10 : vector<8x8x64xbf16> to vector<1x8x8x64xbf16>
    tpu.vector_store %arg3[%c0_8, %c0_9, %c0_10, %c0_11], %13 {strides = array<i32>} : memref<1x8x8x64xbf16, #tpu.memory_space<vmem>>, vector<1x8x8x64xbf16>,
    return
  }
  func.func @transform_0(%arg0: i32, %arg1: i32) -> (i32, i32, i32, i32, i32) {
    %c0_i32 = arith.constant 0 : i32
    %c0_i32_0 = arith.constant 0 : i32
    %c0_i32_1 = arith.constant 0 : i32
    %c0_i32_2 = arith.constant 0 : i32
    return %arg0, %arg1, %c0_i32, %c0_i32_0, %c0_i32_1 : i32, i32, i32, i32, i32
  }
  func.func @transform_1(%arg0: i32, %arg1: i32) -> (i32, i32, i32, i32) {
    %c0_i32 = arith.constant 0 : i32
    %c0_i32_0 = arith.constant 0 : i32
    %c0_i32_1 = arith.constant 0 : i32
    return %arg0, %arg1, %c0_i32, %c0_i32_0 : i32, i32, i32, i32
  }
}

module attributes {stable_mosaic.version = 11 : i64} {
  func.func @_conv3x3_relu_kernel(%arg0: i32, %arg1: memref<1x10x10x64xbf16, #tpu.memory_space<vmem>>, %arg2: memref<576x128xbf16, #tpu.memory_space<vmem>>, %arg3: memref<1x128xf32, #tpu.memory_space<vmem>>, %arg4: memref<1x8x8x128xbf16, #tpu.memory_space<vmem>>) attributes {dimension_semantics = [#tpu.dimension_semantics<parallel>], iteration_bounds = array<i64: 4>, scalar_prefetch = 0 : i64, scratch_operands = 0 : i64, tpu.core_type = #tpu.core_type<tc>, window_params = [{transform_indices = @transform_0, window_bounds = array<i64: 1, 10, 10, 64>}, {pipeline_mode = #tpu.pipeline_mode<synchronous>, transform_indices = @transform_1, window_bounds = array<i64: 576, 128>}, {pipeline_mode = #tpu.pipeline_mode<synchronous>, transform_indices = @transform_2, window_bounds = array<i64: 1, 128>}, {transform_indices = @transform_3, window_bounds = array<i64: 1, 8, 8, 128>}]} {
    %c0 = arith.constant 0 : index
    %c0_0 = arith.constant 0 : index
    %0 = vector.load %arg2[%c0, %c0_0] : memref<576x128xbf16, #tpu.memory_space<vmem>>, vector<576x128xbf16>
    %c0_1 = arith.constant 0 : index
    %c0_2 = arith.constant 0 : index
    %1 = vector.load %arg3[%c0_1, %c0_2] : memref<1x128xf32, #tpu.memory_space<vmem>>, vector<1x128xf32>
    %c0_3 = arith.constant 0 : index
    %c0_4 = arith.constant 0 : index
    %c0_5 = arith.constant 0 : index
    %c0_6 = arith.constant 0 : index
    %2 = vector.load %arg1[%c0_3, %c0_4, %c0_5, %c0_6] : memref<1x10x10x64xbf16, #tpu.memory_space<vmem>>, vector<1x8x8x64xbf16>
    %3 = vector.shape_cast %2 : vector<1x8x8x64xbf16> to vector<8x8x64xbf16>
    %c0_7 = arith.constant 0 : index
    %c0_8 = arith.constant 0 : index
    %c1 = arith.constant 1 : index
    %c0_9 = arith.constant 0 : index
    %4 = vector.load %arg1[%c0_7, %c0_8, %c1, %c0_9] : memref<1x10x10x64xbf16, #tpu.memory_space<vmem>>, vector<1x8x8x64xbf16>
    %5 = vector.shape_cast %4 : vector<1x8x8x64xbf16> to vector<8x8x64xbf16>
    %c0_10 = arith.constant 0 : index
    %c0_11 = arith.constant 0 : index
    %c2 = arith.constant 2 : index
    %c0_12 = arith.constant 0 : index
    %6 = vector.load %arg1[%c0_10, %c0_11, %c2, %c0_12] : memref<1x10x10x64xbf16, #tpu.memory_space<vmem>>, vector<1x8x8x64xbf16>
    %7 = vector.shape_cast %6 : vector<1x8x8x64xbf16> to vector<8x8x64xbf16>
    %c0_13 = arith.constant 0 : index
    %c1_14 = arith.constant 1 : index
    %c0_15 = arith.constant 0 : index
    %c0_16 = arith.constant 0 : index
    %8 = vector.load %arg1[%c0_13, %c1_14, %c0_15, %c0_16] : memref<1x10x10x64xbf16, #tpu.memory_space<vmem>>, vector<1x8x8x64xbf16>
    %9 = vector.shape_cast %8 : vector<1x8x8x64xbf16> to vector<8x8x64xbf16>
    %c0_17 = arith.constant 0 : index
    %c1_18 = arith.constant 1 : index
    %c1_19 = arith.constant 1 : index
    %c0_20 = arith.constant 0 : index
    %10 = vector.load %arg1[%c0_17, %c1_18, %c1_19, %c0_20] : memref<1x10x10x64xbf16, #tpu.memory_space<vmem>>, vector<1x8x8x64xbf16>
    %11 = vector.shape_cast %10 : vector<1x8x8x64xbf16> to vector<8x8x64xbf16>
    %c0_21 = arith.constant 0 : index
    %c1_22 = arith.constant 1 : index
    %c2_23 = arith.constant 2 : index
    %c0_24 = arith.constant 0 : index
    %12 = vector.load %arg1[%c0_21, %c1_22, %c2_23, %c0_24] : memref<1x10x10x64xbf16, #tpu.memory_space<vmem>>, vector<1x8x8x64xbf16>
    %13 = vector.shape_cast %12 : vector<1x8x8x64xbf16> to vector<8x8x64xbf16>
    %c0_25 = arith.constant 0 : index
    %c2_26 = arith.constant 2 : index
    %c0_27 = arith.constant 0 : index
    %c0_28 = arith.constant 0 : index
    %14 = vector.load %arg1[%c0_25, %c2_26, %c0_27, %c0_28] : memref<1x10x10x64xbf16, #tpu.memory_space<vmem>>, vector<1x8x8x64xbf16>
    %15 = vector.shape_cast %14 : vector<1x8x8x64xbf16> to vector<8x8x64xbf16>
    %c0_29 = arith.constant 0 : index
    %c2_30 = arith.constant 2 : index
    %c1_31 = arith.constant 1 : index
    %c0_32 = arith.constant 0 : index
    %16 = vector.load %arg1[%c0_29, %c2_30, %c1_31, %c0_32] : memref<1x10x10x64xbf16, #tpu.memory_space<vmem>>, vector<1x8x8x64xbf16>
    %17 = vector.shape_cast %16 : vector<1x8x8x64xbf16> to vector<8x8x64xbf16>
    %c0_33 = arith.constant 0 : index
    %c2_34 = arith.constant 2 : index
    %c2_35 = arith.constant 2 : index
    %c0_36 = arith.constant 0 : index
    %18 = vector.load %arg1[%c0_33, %c2_34, %c2_35, %c0_36] : memref<1x10x10x64xbf16, #tpu.memory_space<vmem>>, vector<1x8x8x64xbf16>
    %19 = vector.shape_cast %18 : vector<1x8x8x64xbf16> to vector<8x8x64xbf16>
    %20 = tpu.concatenate %3, %5, %7, %9, %11, %13, %15, %17, %19 in 2 : vector<8x8x64xbf16>, vector<8x8x64xbf16>, vector<8x8x64xbf16>, vector<8x8x64xbf16>, vector<8x8x64xbf16>, vector<8x8x64xbf16>, vector<8x8x64xbf16>, vector<8x8x64xbf16>, vector<8x8x64xbf16> -> vector<8x8x576xbf16>
    %21 = vector.shape_cast %20 : vector<8x8x576xbf16> to vector<64x576xbf16>
    %cst = arith.constant dense<0.000000e+00> : vector<64x128xf32>
    %22 = tpu.matmul %21, %0, %cst {dimension_numbers = #tpu.dot_dimension_numbers<[1], [0], [0], [1], [0, 0, 1, 1], [], []>} : vector<64x576xbf16>, vector<576x128xbf16>, vector<64x128xf32> -> vector<64x128xf32>
    %23 = vector.broadcast %1 : vector<1x128xf32> to vector<64x128xf32>
    %24 = arith.addf %22, %23 : vector<64x128xf32>
    %cst_37 = arith.constant 0.000000e+00 : f32
    %25 = vector.broadcast %cst_37 : f32 to vector<64x128xf32>
    %26 = arith.maximumf %24, %25 : vector<64x128xf32>
    %27 = arith.truncf %26 : vector<64x128xf32> to vector<64x128xbf16>
    %28 = vector.shape_cast %27 : vector<64x128xbf16> to vector<8x8x128xbf16>
    %c0_38 = arith.constant 0 : index
    %c0_39 = arith.constant 0 : index
    %c0_40 = arith.constant 0 : index
    %c0_41 = arith.constant 0 : index
    %29 = vector.load %arg4[%c0_38, %c0_39, %c0_40, %c0_41] : memref<1x8x8x128xbf16, #tpu.memory_space<vmem>>, vector<1x8x8x128xbf16>
    %30 = vector.shape_cast %29 : vector<1x8x8x128xbf16> to vector<8x8x128xbf16>
    %31 = vector.shape_cast %28 : vector<8x8x128xbf16> to vector<1x8x8x128xbf16>
    tpu.vector_store %arg4[%c0_38, %c0_39, %c0_40, %c0_41], %31 {strides = array<i32>} : memref<1x8x8x128xbf16, #tpu.memory_space<vmem>>, vector<1x8x8x128xbf16>,
    return
  }
  func.func @transform_0(%arg0: i32) -> (i32, i32, i32, i32) {
    %c0_i32 = arith.constant 0 : i32
    %c0_i32_0 = arith.constant 0 : i32
    %c0_i32_1 = arith.constant 0 : i32
    %c0_i32_2 = arith.constant 0 : i32
    return %arg0, %c0_i32, %c0_i32_0, %c0_i32_1 : i32, i32, i32, i32
  }
  func.func @transform_1(%arg0: i32) -> (i32, i32) {
    %c0_i32 = arith.constant 0 : i32
    %c0_i32_0 = arith.constant 0 : i32
    %c0_i32_1 = arith.constant 0 : i32
    return %c0_i32, %c0_i32_0 : i32, i32
  }
  func.func @transform_2(%arg0: i32) -> (i32, i32) {
    %c0_i32 = arith.constant 0 : i32
    %c0_i32_0 = arith.constant 0 : i32
    %c0_i32_1 = arith.constant 0 : i32
    return %c0_i32, %c0_i32_0 : i32, i32
  }
  func.func @transform_3(%arg0: i32) -> (i32, i32, i32, i32) {
    %c0_i32 = arith.constant 0 : i32
    %c0_i32_0 = arith.constant 0 : i32
    %c0_i32_1 = arith.constant 0 : i32
    %c0_i32_2 = arith.constant 0 : i32
    return %arg0, %c0_i32, %c0_i32_0, %c0_i32_1 : i32, i32, i32, i32
  }
}

module attributes {stable_mosaic.version = 11 : i64} {
  func.func @_conv3x3_relu_kernel(%arg0: i32, %arg1: memref<1x10x10x128xbf16, #tpu.memory_space<vmem>>, %arg2: memref<1152x128xbf16, #tpu.memory_space<vmem>>, %arg3: memref<1x128xf32, #tpu.memory_space<vmem>>, %arg4: memref<1x8x8x128xbf16, #tpu.memory_space<vmem>>) attributes {dimension_semantics = [#tpu.dimension_semantics<parallel>], iteration_bounds = array<i64: 4>, scalar_prefetch = 0 : i64, scratch_operands = 0 : i64, tpu.core_type = #tpu.core_type<tc>, window_params = [{transform_indices = @transform_0, window_bounds = array<i64: 1, 10, 10, 128>}, {pipeline_mode = #tpu.pipeline_mode<synchronous>, transform_indices = @transform_1, window_bounds = array<i64: 1152, 128>}, {pipeline_mode = #tpu.pipeline_mode<synchronous>, transform_indices = @transform_2, window_bounds = array<i64: 1, 128>}, {transform_indices = @transform_3, window_bounds = array<i64: 1, 8, 8, 128>}]} {
    %c0 = arith.constant 0 : index
    %c0_0 = arith.constant 0 : index
    %0 = vector.load %arg2[%c0, %c0_0] : memref<1152x128xbf16, #tpu.memory_space<vmem>>, vector<1152x128xbf16>
    %c0_1 = arith.constant 0 : index
    %c0_2 = arith.constant 0 : index
    %1 = vector.load %arg3[%c0_1, %c0_2] : memref<1x128xf32, #tpu.memory_space<vmem>>, vector<1x128xf32>
    %c0_3 = arith.constant 0 : index
    %c0_4 = arith.constant 0 : index
    %c0_5 = arith.constant 0 : index
    %c0_6 = arith.constant 0 : index
    %2 = vector.load %arg1[%c0_3, %c0_4, %c0_5, %c0_6] : memref<1x10x10x128xbf16, #tpu.memory_space<vmem>>, vector<1x8x8x128xbf16>
    %3 = vector.shape_cast %2 : vector<1x8x8x128xbf16> to vector<8x8x128xbf16>
    %c0_7 = arith.constant 0 : index
    %c0_8 = arith.constant 0 : index
    %c1 = arith.constant 1 : index
    %c0_9 = arith.constant 0 : index
    %4 = vector.load %arg1[%c0_7, %c0_8, %c1, %c0_9] : memref<1x10x10x128xbf16, #tpu.memory_space<vmem>>, vector<1x8x8x128xbf16>
    %5 = vector.shape_cast %4 : vector<1x8x8x128xbf16> to vector<8x8x128xbf16>
    %c0_10 = arith.constant 0 : index
    %c0_11 = arith.constant 0 : index
    %c2 = arith.constant 2 : index
    %c0_12 = arith.constant 0 : index
    %6 = vector.load %arg1[%c0_10, %c0_11, %c2, %c0_12] : memref<1x10x10x128xbf16, #tpu.memory_space<vmem>>, vector<1x8x8x128xbf16>
    %7 = vector.shape_cast %6 : vector<1x8x8x128xbf16> to vector<8x8x128xbf16>
    %c0_13 = arith.constant 0 : index
    %c1_14 = arith.constant 1 : index
    %c0_15 = arith.constant 0 : index
    %c0_16 = arith.constant 0 : index
    %8 = vector.load %arg1[%c0_13, %c1_14, %c0_15, %c0_16] : memref<1x10x10x128xbf16, #tpu.memory_space<vmem>>, vector<1x8x8x128xbf16>
    %9 = vector.shape_cast %8 : vector<1x8x8x128xbf16> to vector<8x8x128xbf16>
    %c0_17 = arith.constant 0 : index
    %c1_18 = arith.constant 1 : index
    %c1_19 = arith.constant 1 : index
    %c0_20 = arith.constant 0 : index
    %10 = vector.load %arg1[%c0_17, %c1_18, %c1_19, %c0_20] : memref<1x10x10x128xbf16, #tpu.memory_space<vmem>>, vector<1x8x8x128xbf16>
    %11 = vector.shape_cast %10 : vector<1x8x8x128xbf16> to vector<8x8x128xbf16>
    %c0_21 = arith.constant 0 : index
    %c1_22 = arith.constant 1 : index
    %c2_23 = arith.constant 2 : index
    %c0_24 = arith.constant 0 : index
    %12 = vector.load %arg1[%c0_21, %c1_22, %c2_23, %c0_24] : memref<1x10x10x128xbf16, #tpu.memory_space<vmem>>, vector<1x8x8x128xbf16>
    %13 = vector.shape_cast %12 : vector<1x8x8x128xbf16> to vector<8x8x128xbf16>
    %c0_25 = arith.constant 0 : index
    %c2_26 = arith.constant 2 : index
    %c0_27 = arith.constant 0 : index
    %c0_28 = arith.constant 0 : index
    %14 = vector.load %arg1[%c0_25, %c2_26, %c0_27, %c0_28] : memref<1x10x10x128xbf16, #tpu.memory_space<vmem>>, vector<1x8x8x128xbf16>
    %15 = vector.shape_cast %14 : vector<1x8x8x128xbf16> to vector<8x8x128xbf16>
    %c0_29 = arith.constant 0 : index
    %c2_30 = arith.constant 2 : index
    %c1_31 = arith.constant 1 : index
    %c0_32 = arith.constant 0 : index
    %16 = vector.load %arg1[%c0_29, %c2_30, %c1_31, %c0_32] : memref<1x10x10x128xbf16, #tpu.memory_space<vmem>>, vector<1x8x8x128xbf16>
    %17 = vector.shape_cast %16 : vector<1x8x8x128xbf16> to vector<8x8x128xbf16>
    %c0_33 = arith.constant 0 : index
    %c2_34 = arith.constant 2 : index
    %c2_35 = arith.constant 2 : index
    %c0_36 = arith.constant 0 : index
    %18 = vector.load %arg1[%c0_33, %c2_34, %c2_35, %c0_36] : memref<1x10x10x128xbf16, #tpu.memory_space<vmem>>, vector<1x8x8x128xbf16>
    %19 = vector.shape_cast %18 : vector<1x8x8x128xbf16> to vector<8x8x128xbf16>
    %20 = tpu.concatenate %3, %5, %7, %9, %11, %13, %15, %17, %19 in 2 : vector<8x8x128xbf16>, vector<8x8x128xbf16>, vector<8x8x128xbf16>, vector<8x8x128xbf16>, vector<8x8x128xbf16>, vector<8x8x128xbf16>, vector<8x8x128xbf16>, vector<8x8x128xbf16>, vector<8x8x128xbf16> -> vector<8x8x1152xbf16>
    %21 = vector.shape_cast %20 : vector<8x8x1152xbf16> to vector<64x1152xbf16>
    %cst = arith.constant dense<0.000000e+00> : vector<64x128xf32>
    %22 = tpu.matmul %21, %0, %cst {dimension_numbers = #tpu.dot_dimension_numbers<[1], [0], [0], [1], [0, 0, 1, 1], [], []>} : vector<64x1152xbf16>, vector<1152x128xbf16>, vector<64x128xf32> -> vector<64x128xf32>
    %23 = vector.broadcast %1 : vector<1x128xf32> to vector<64x128xf32>
    %24 = arith.addf %22, %23 : vector<64x128xf32>
    %cst_37 = arith.constant 0.000000e+00 : f32
    %25 = vector.broadcast %cst_37 : f32 to vector<64x128xf32>
    %26 = arith.maximumf %24, %25 : vector<64x128xf32>
    %27 = arith.truncf %26 : vector<64x128xf32> to vector<64x128xbf16>
    %28 = vector.shape_cast %27 : vector<64x128xbf16> to vector<8x8x128xbf16>
    %c0_38 = arith.constant 0 : index
    %c0_39 = arith.constant 0 : index
    %c0_40 = arith.constant 0 : index
    %c0_41 = arith.constant 0 : index
    %29 = vector.load %arg4[%c0_38, %c0_39, %c0_40, %c0_41] : memref<1x8x8x128xbf16, #tpu.memory_space<vmem>>, vector<1x8x8x128xbf16>
    %30 = vector.shape_cast %29 : vector<1x8x8x128xbf16> to vector<8x8x128xbf16>
    %31 = vector.shape_cast %28 : vector<8x8x128xbf16> to vector<1x8x8x128xbf16>
    tpu.vector_store %arg4[%c0_38, %c0_39, %c0_40, %c0_41], %31 {strides = array<i32>} : memref<1x8x8x128xbf16, #tpu.memory_space<vmem>>, vector<1x8x8x128xbf16>,
    return
  }
  func.func @transform_0(%arg0: i32) -> (i32, i32, i32, i32) {
    %c0_i32 = arith.constant 0 : i32
    %c0_i32_0 = arith.constant 0 : i32
    %c0_i32_1 = arith.constant 0 : i32
    %c0_i32_2 = arith.constant 0 : i32
    return %arg0, %c0_i32, %c0_i32_0, %c0_i32_1 : i32, i32, i32, i32
  }
  func.func @transform_1(%arg0: i32) -> (i32, i32) {
    %c0_i32 = arith.constant 0 : i32
    %c0_i32_0 = arith.constant 0 : i32
    %c0_i32_1 = arith.constant 0 : i32
    return %c0_i32, %c0_i32_0 : i32, i32
  }
  func.func @transform_2(%arg0: i32) -> (i32, i32) {
    %c0_i32 = arith.constant 0 : i32
    %c0_i32_0 = arith.constant 0 : i32
    %c0_i32_1 = arith.constant 0 : i32
    return %c0_i32, %c0_i32_0 : i32, i32
  }
  func.func @transform_3(%arg0: i32) -> (i32, i32, i32, i32) {
    %c0_i32 = arith.constant 0 : i32
    %c0_i32_0 = arith.constant 0 : i32
    %c0_i32_1 = arith.constant 0 : i32
    %c0_i32_2 = arith.constant 0 : i32
    return %arg0, %c0_i32, %c0_i32_0, %c0_i32_1 : i32, i32, i32, i32
  }
}

module attributes {stable_mosaic.version = 11 : i64} {
  func.func @_sqdiff_acc_kernel(%arg0: i32, %arg1: memref<1x16x16x64xbf16, #tpu.memory_space<vmem>>, %arg2: memref<1x16x16x64xbf16, #tpu.memory_space<vmem>>, %arg3: memref<1x1xf32, #tpu.memory_space<smem>>) attributes {dimension_semantics = [#tpu.dimension_semantics<arbitrary>], iteration_bounds = array<i64: 2>, scalar_prefetch = 0 : i64, scratch_operands = 0 : i64, tpu.core_type = #tpu.core_type<tc>, window_params = [{transform_indices = @transform_0, window_bounds = array<i64: 1, 16, 16, 64>}, {transform_indices = @transform_1, window_bounds = array<i64: 1, 16, 16, 64>}, {transform_indices = @transform_2, window_bounds = array<i64: 1, 1>}]} {
    %c0_i32 = arith.constant 0 : i32
    %0 = arith.cmpi eq, %arg0, %c0_i32 : i32
    %1 = arith.extui %0 : i1 to i32
    %c0_i32_0 = arith.constant 0 : i32
    %2 = arith.cmpi ne, %1, %c0_i32_0 : i32
    scf.if %2 {
      %cst_12 = arith.constant 0.000000e+00 : f32
      %c0_13 = arith.constant 0 : index
      %c0_14 = arith.constant 0 : index
      %16 = memref.load %arg3[%c0_13, %c0_14] : memref<1x1xf32, #tpu.memory_space<smem>>
      memref.store %cst_12, %arg3[%c0_13, %c0_14] : memref<1x1xf32, #tpu.memory_space<smem>>
    } else {
    }
    %c0 = arith.constant 0 : index
    %c0_1 = arith.constant 0 : index
    %c0_2 = arith.constant 0 : index
    %c0_3 = arith.constant 0 : index
    %3 = vector.load %arg1[%c0, %c0_1, %c0_2, %c0_3] : memref<1x16x16x64xbf16, #tpu.memory_space<vmem>>, vector<1x16x16x64xbf16>
    %4 = arith.extf %3 : vector<1x16x16x64xbf16> to vector<1x16x16x64xf32>
    %c0_4 = arith.constant 0 : index
    %c0_5 = arith.constant 0 : index
    %c0_6 = arith.constant 0 : index
    %c0_7 = arith.constant 0 : index
    %5 = vector.load %arg2[%c0_4, %c0_5, %c0_6, %c0_7] : memref<1x16x16x64xbf16, #tpu.memory_space<vmem>>, vector<1x16x16x64xbf16>
    %6 = arith.extf %5 : vector<1x16x16x64xbf16> to vector<1x16x16x64xf32>
    %7 = arith.subf %4, %6 : vector<1x16x16x64xf32>
    %c0_8 = arith.constant 0 : index
    %c0_9 = arith.constant 0 : index
    %8 = memref.load %arg3[%c0_8, %c0_9] : memref<1x1xf32, #tpu.memory_space<smem>>
    %9 = arith.mulf %7, %7 : vector<1x16x16x64xf32>
    %10 = vector.shape_cast %9 : vector<1x16x16x64xf32> to vector<1x1x16x16x64xf32>
    %cst = arith.constant dense<0.000000e+00> : vector<1xf32>
    %11 = vector.multi_reduction <add>, %10, %cst [1, 2, 3, 4] : vector<1x1x16x16x64xf32> to vector<1xf32>
    %12 = vector.shape_cast %11 : vector<1xf32> to vector<1x1x1x1x1xf32>
    %13 = vector.extract %12[0, 0, 0, 0, 0] : f32 from vector<1x1x1x1x1xf32>
    %14 = arith.addf %8, %13 : f32
    %c0_10 = arith.constant 0 : index
    %c0_11 = arith.constant 0 : index
    %15 = memref.load %arg3[%c0_10, %c0_11] : memref<1x1xf32, #tpu.memory_space<smem>>
    memref.store %14, %arg3[%c0_10, %c0_11] : memref<1x1xf32, #tpu.memory_space<smem>>
    return
  }
  func.func @transform_0(%arg0: i32) -> (i32, i32, i32, i32) {
    %c0_i32 = arith.constant 0 : i32
    %c0_i32_0 = arith.constant 0 : i32
    %c0_i32_1 = arith.constant 0 : i32
    %c0_i32_2 = arith.constant 0 : i32
    return %arg0, %c0_i32, %c0_i32_0, %c0_i32_1 : i32, i32, i32, i32
  }
  func.func @transform_1(%arg0: i32) -> (i32, i32, i32, i32) {
    %c2_i32 = arith.constant 2 : i32
    %0 = arith.addi %arg0, %c2_i32 : i32
    %c0_i32 = arith.constant 0 : i32
    %c0_i32_0 = arith.constant 0 : i32
    %c0_i32_1 = arith.constant 0 : i32
    %c0_i32_2 = arith.constant 0 : i32
    return %0, %c0_i32, %c0_i32_0, %c0_i32_1 : i32, i32, i32, i32
  }
  func.func @transform_2(%arg0: i32) -> (i32, i32) {
    %c0_i32 = arith.constant 0 : i32
    %c0_i32_0 = arith.constant 0 : i32
    %c0_i32_1 = arith.constant 0 : i32
    return %c0_i32, %c0_i32_0 : i32, i32
  }
}

module attributes {stable_mosaic.version = 11 : i64} {
  func.func @_sqdiff_acc_kernel(%arg0: i32, %arg1: memref<1x8x8x128xbf16, #tpu.memory_space<vmem>>, %arg2: memref<1x8x8x128xbf16, #tpu.memory_space<vmem>>, %arg3: memref<1x1xf32, #tpu.memory_space<smem>>) attributes {dimension_semantics = [#tpu.dimension_semantics<arbitrary>], iteration_bounds = array<i64: 2>, scalar_prefetch = 0 : i64, scratch_operands = 0 : i64, tpu.core_type = #tpu.core_type<tc>, window_params = [{transform_indices = @transform_0, window_bounds = array<i64: 1, 8, 8, 128>}, {transform_indices = @transform_1, window_bounds = array<i64: 1, 8, 8, 128>}, {transform_indices = @transform_2, window_bounds = array<i64: 1, 1>}]} {
    %c0_i32 = arith.constant 0 : i32
    %0 = arith.cmpi eq, %arg0, %c0_i32 : i32
    %1 = arith.extui %0 : i1 to i32
    %c0_i32_0 = arith.constant 0 : i32
    %2 = arith.cmpi ne, %1, %c0_i32_0 : i32
    scf.if %2 {
      %cst_12 = arith.constant 0.000000e+00 : f32
      %c0_13 = arith.constant 0 : index
      %c0_14 = arith.constant 0 : index
      %16 = memref.load %arg3[%c0_13, %c0_14] : memref<1x1xf32, #tpu.memory_space<smem>>
      memref.store %cst_12, %arg3[%c0_13, %c0_14] : memref<1x1xf32, #tpu.memory_space<smem>>
    } else {
    }
    %c0 = arith.constant 0 : index
    %c0_1 = arith.constant 0 : index
    %c0_2 = arith.constant 0 : index
    %c0_3 = arith.constant 0 : index
    %3 = vector.load %arg1[%c0, %c0_1, %c0_2, %c0_3] : memref<1x8x8x128xbf16, #tpu.memory_space<vmem>>, vector<1x8x8x128xbf16>
    %4 = arith.extf %3 : vector<1x8x8x128xbf16> to vector<1x8x8x128xf32>
    %c0_4 = arith.constant 0 : index
    %c0_5 = arith.constant 0 : index
    %c0_6 = arith.constant 0 : index
    %c0_7 = arith.constant 0 : index
    %5 = vector.load %arg2[%c0_4, %c0_5, %c0_6, %c0_7] : memref<1x8x8x128xbf16, #tpu.memory_space<vmem>>, vector<1x8x8x128xbf16>
    %6 = arith.extf %5 : vector<1x8x8x128xbf16> to vector<1x8x8x128xf32>
    %7 = arith.subf %4, %6 : vector<1x8x8x128xf32>
    %c0_8 = arith.constant 0 : index
    %c0_9 = arith.constant 0 : index
    %8 = memref.load %arg3[%c0_8, %c0_9] : memref<1x1xf32, #tpu.memory_space<smem>>
    %9 = arith.mulf %7, %7 : vector<1x8x8x128xf32>
    %10 = vector.shape_cast %9 : vector<1x8x8x128xf32> to vector<1x1x8x8x128xf32>
    %cst = arith.constant dense<0.000000e+00> : vector<1xf32>
    %11 = vector.multi_reduction <add>, %10, %cst [1, 2, 3, 4] : vector<1x1x8x8x128xf32> to vector<1xf32>
    %12 = vector.shape_cast %11 : vector<1xf32> to vector<1x1x1x1x1xf32>
    %13 = vector.extract %12[0, 0, 0, 0, 0] : f32 from vector<1x1x1x1x1xf32>
    %14 = arith.addf %8, %13 : f32
    %c0_10 = arith.constant 0 : index
    %c0_11 = arith.constant 0 : index
    %15 = memref.load %arg3[%c0_10, %c0_11] : memref<1x1xf32, #tpu.memory_space<smem>>
    memref.store %14, %arg3[%c0_10, %c0_11] : memref<1x1xf32, #tpu.memory_space<smem>>
    return
  }
  func.func @transform_0(%arg0: i32) -> (i32, i32, i32, i32) {
    %c0_i32 = arith.constant 0 : i32
    %c0_i32_0 = arith.constant 0 : i32
    %c0_i32_1 = arith.constant 0 : i32
    %c0_i32_2 = arith.constant 0 : i32
    return %arg0, %c0_i32, %c0_i32_0, %c0_i32_1 : i32, i32, i32, i32
  }
  func.func @transform_1(%arg0: i32) -> (i32, i32, i32, i32) {
    %c2_i32 = arith.constant 2 : i32
    %0 = arith.addi %arg0, %c2_i32 : i32
    %c0_i32 = arith.constant 0 : i32
    %c0_i32_0 = arith.constant 0 : i32
    %c0_i32_1 = arith.constant 0 : i32
    %c0_i32_2 = arith.constant 0 : i32
    return %0, %c0_i32, %c0_i32_0, %c0_i32_1 : i32, i32, i32, i32
  }
  func.func @transform_2(%arg0: i32) -> (i32, i32) {
    %c0_i32 = arith.constant 0 : i32
    %c0_i32_0 = arith.constant 0 : i32
    %c0_i32_1 = arith.constant 0 : i32
    return %c0_i32, %c0_i32_0 : i32, i32
  }
}

module attributes {stable_mosaic.version = 11 : i64} {
  func.func @_maxpool2x2_kernel(%arg0: i32, %arg1: i32, %arg2: memref<1x4x2x4x256xbf16, #tpu.memory_space<vmem>>, %arg3: memref<1x4x4x128xbf16, #tpu.memory_space<vmem>>) attributes {dimension_semantics = [#tpu.dimension_semantics<parallel>, #tpu.dimension_semantics<parallel>], iteration_bounds = array<i64: 4, 1>, scalar_prefetch = 0 : i64, scratch_operands = 0 : i64, tpu.core_type = #tpu.core_type<tc>, window_params = [{transform_indices = @transform_0, window_bounds = array<i64: 1, 4, 2, 4, 256>}, {transform_indices = @transform_1, window_bounds = array<i64: 1, 4, 4, 128>}]} {
    %c0 = arith.constant 0 : index
    %c0_0 = arith.constant 0 : index
    %c0_1 = arith.constant 0 : index
    %c0_2 = arith.constant 0 : index
    %c0_3 = arith.constant 0 : index
    %0 = vector.load %arg2[%c0, %c0_0, %c0_1, %c0_2, %c0_3] : memref<1x4x2x4x256xbf16, #tpu.memory_space<vmem>>, vector<1x4x1x4x256xbf16>
    %1 = vector.shape_cast %0 : vector<1x4x1x4x256xbf16> to vector<4x4x256xbf16>
    %2 = arith.extf %1 : vector<4x4x256xbf16> to vector<4x4x256xf32>
    %c0_4 = arith.constant 0 : index
    %c0_5 = arith.constant 0 : index
    %c1 = arith.constant 1 : index
    %c0_6 = arith.constant 0 : index
    %c0_7 = arith.constant 0 : index
    %3 = vector.load %arg2[%c0_4, %c0_5, %c1, %c0_6, %c0_7] : memref<1x4x2x4x256xbf16, #tpu.memory_space<vmem>>, vector<1x4x1x4x256xbf16>
    %4 = vector.shape_cast %3 : vector<1x4x1x4x256xbf16> to vector<4x4x256xbf16>
    %5 = arith.extf %4 : vector<4x4x256xbf16> to vector<4x4x256xf32>
    %6 = arith.maximumf %2, %5 : vector<4x4x256xf32>
    %7 = vector.extract_strided_slice %6 {offsets = [0, 0, 0], sizes = [4, 4, 128], strides = [1, 1, 1]} : vector<4x4x256xf32> to vector<4x4x128xf32>
    %8 = vector.extract_strided_slice %6 {offsets = [0, 0, 128], sizes = [4, 4, 128], strides = [1, 1, 1]} : vector<4x4x256xf32> to vector<4x4x128xf32>
    %9 = arith.maximumf %7, %8 : vector<4x4x128xf32>
    %10 = arith.truncf %9 : vector<4x4x128xf32> to vector<4x4x128xbf16>
    %c0_8 = arith.constant 0 : index
    %c0_9 = arith.constant 0 : index
    %c0_10 = arith.constant 0 : index
    %c0_11 = arith.constant 0 : index
    %11 = vector.load %arg3[%c0_8, %c0_9, %c0_10, %c0_11] : memref<1x4x4x128xbf16, #tpu.memory_space<vmem>>, vector<1x4x4x128xbf16>
    %12 = vector.shape_cast %11 : vector<1x4x4x128xbf16> to vector<4x4x128xbf16>
    %13 = vector.shape_cast %10 : vector<4x4x128xbf16> to vector<1x4x4x128xbf16>
    tpu.vector_store %arg3[%c0_8, %c0_9, %c0_10, %c0_11], %13 {strides = array<i32>} : memref<1x4x4x128xbf16, #tpu.memory_space<vmem>>, vector<1x4x4x128xbf16>,
    return
  }
  func.func @transform_0(%arg0: i32, %arg1: i32) -> (i32, i32, i32, i32, i32) {
    %c0_i32 = arith.constant 0 : i32
    %c0_i32_0 = arith.constant 0 : i32
    %c0_i32_1 = arith.constant 0 : i32
    %c0_i32_2 = arith.constant 0 : i32
    return %arg0, %arg1, %c0_i32, %c0_i32_0, %c0_i32_1 : i32, i32, i32, i32, i32
  }
  func.func @transform_1(%arg0: i32, %arg1: i32) -> (i32, i32, i32, i32) {
    %c0_i32 = arith.constant 0 : i32
    %c0_i32_0 = arith.constant 0 : i32
    %c0_i32_1 = arith.constant 0 : i32
    return %arg0, %arg1, %c0_i32, %c0_i32_0 : i32, i32, i32, i32
  }
}

module attributes {stable_mosaic.version = 11 : i64} {
  func.func @_conv3x3_relu_kernel(%arg0: i32, %arg1: memref<1x6x6x128xbf16, #tpu.memory_space<vmem>>, %arg2: memref<1152x256xbf16, #tpu.memory_space<vmem>>, %arg3: memref<1x256xf32, #tpu.memory_space<vmem>>, %arg4: memref<1x4x4x256xbf16, #tpu.memory_space<vmem>>) attributes {dimension_semantics = [#tpu.dimension_semantics<parallel>], iteration_bounds = array<i64: 4>, scalar_prefetch = 0 : i64, scratch_operands = 0 : i64, tpu.core_type = #tpu.core_type<tc>, window_params = [{transform_indices = @transform_0, window_bounds = array<i64: 1, 6, 6, 128>}, {pipeline_mode = #tpu.pipeline_mode<synchronous>, transform_indices = @transform_1, window_bounds = array<i64: 1152, 256>}, {pipeline_mode = #tpu.pipeline_mode<synchronous>, transform_indices = @transform_2, window_bounds = array<i64: 1, 256>}, {transform_indices = @transform_3, window_bounds = array<i64: 1, 4, 4, 256>}]} {
    %c0 = arith.constant 0 : index
    %c0_0 = arith.constant 0 : index
    %0 = vector.load %arg2[%c0, %c0_0] : memref<1152x256xbf16, #tpu.memory_space<vmem>>, vector<1152x256xbf16>
    %c0_1 = arith.constant 0 : index
    %c0_2 = arith.constant 0 : index
    %1 = vector.load %arg3[%c0_1, %c0_2] : memref<1x256xf32, #tpu.memory_space<vmem>>, vector<1x256xf32>
    %c0_3 = arith.constant 0 : index
    %c0_4 = arith.constant 0 : index
    %c0_5 = arith.constant 0 : index
    %c0_6 = arith.constant 0 : index
    %2 = vector.load %arg1[%c0_3, %c0_4, %c0_5, %c0_6] : memref<1x6x6x128xbf16, #tpu.memory_space<vmem>>, vector<1x4x4x128xbf16>
    %3 = vector.shape_cast %2 : vector<1x4x4x128xbf16> to vector<4x4x128xbf16>
    %c0_7 = arith.constant 0 : index
    %c0_8 = arith.constant 0 : index
    %c1 = arith.constant 1 : index
    %c0_9 = arith.constant 0 : index
    %4 = vector.load %arg1[%c0_7, %c0_8, %c1, %c0_9] : memref<1x6x6x128xbf16, #tpu.memory_space<vmem>>, vector<1x4x4x128xbf16>
    %5 = vector.shape_cast %4 : vector<1x4x4x128xbf16> to vector<4x4x128xbf16>
    %c0_10 = arith.constant 0 : index
    %c0_11 = arith.constant 0 : index
    %c2 = arith.constant 2 : index
    %c0_12 = arith.constant 0 : index
    %6 = vector.load %arg1[%c0_10, %c0_11, %c2, %c0_12] : memref<1x6x6x128xbf16, #tpu.memory_space<vmem>>, vector<1x4x4x128xbf16>
    %7 = vector.shape_cast %6 : vector<1x4x4x128xbf16> to vector<4x4x128xbf16>
    %c0_13 = arith.constant 0 : index
    %c1_14 = arith.constant 1 : index
    %c0_15 = arith.constant 0 : index
    %c0_16 = arith.constant 0 : index
    %8 = vector.load %arg1[%c0_13, %c1_14, %c0_15, %c0_16] : memref<1x6x6x128xbf16, #tpu.memory_space<vmem>>, vector<1x4x4x128xbf16>
    %9 = vector.shape_cast %8 : vector<1x4x4x128xbf16> to vector<4x4x128xbf16>
    %c0_17 = arith.constant 0 : index
    %c1_18 = arith.constant 1 : index
    %c1_19 = arith.constant 1 : index
    %c0_20 = arith.constant 0 : index
    %10 = vector.load %arg1[%c0_17, %c1_18, %c1_19, %c0_20] : memref<1x6x6x128xbf16, #tpu.memory_space<vmem>>, vector<1x4x4x128xbf16>
    %11 = vector.shape_cast %10 : vector<1x4x4x128xbf16> to vector<4x4x128xbf16>
    %c0_21 = arith.constant 0 : index
    %c1_22 = arith.constant 1 : index
    %c2_23 = arith.constant 2 : index
    %c0_24 = arith.constant 0 : index
    %12 = vector.load %arg1[%c0_21, %c1_22, %c2_23, %c0_24] : memref<1x6x6x128xbf16, #tpu.memory_space<vmem>>, vector<1x4x4x128xbf16>
    %13 = vector.shape_cast %12 : vector<1x4x4x128xbf16> to vector<4x4x128xbf16>
    %c0_25 = arith.constant 0 : index
    %c2_26 = arith.constant 2 : index
    %c0_27 = arith.constant 0 : index
    %c0_28 = arith.constant 0 : index
    %14 = vector.load %arg1[%c0_25, %c2_26, %c0_27, %c0_28] : memref<1x6x6x128xbf16, #tpu.memory_space<vmem>>, vector<1x4x4x128xbf16>
    %15 = vector.shape_cast %14 : vector<1x4x4x128xbf16> to vector<4x4x128xbf16>
    %c0_29 = arith.constant 0 : index
    %c2_30 = arith.constant 2 : index
    %c1_31 = arith.constant 1 : index
    %c0_32 = arith.constant 0 : index
    %16 = vector.load %arg1[%c0_29, %c2_30, %c1_31, %c0_32] : memref<1x6x6x128xbf16, #tpu.memory_space<vmem>>, vector<1x4x4x128xbf16>
    %17 = vector.shape_cast %16 : vector<1x4x4x128xbf16> to vector<4x4x128xbf16>
    %c0_33 = arith.constant 0 : index
    %c2_34 = arith.constant 2 : index
    %c2_35 = arith.constant 2 : index
    %c0_36 = arith.constant 0 : index
    %18 = vector.load %arg1[%c0_33, %c2_34, %c2_35, %c0_36] : memref<1x6x6x128xbf16, #tpu.memory_space<vmem>>, vector<1x4x4x128xbf16>
    %19 = vector.shape_cast %18 : vector<1x4x4x128xbf16> to vector<4x4x128xbf16>
    %20 = tpu.concatenate %3, %5, %7, %9, %11, %13, %15, %17, %19 in 2 : vector<4x4x128xbf16>, vector<4x4x128xbf16>, vector<4x4x128xbf16>, vector<4x4x128xbf16>, vector<4x4x128xbf16>, vector<4x4x128xbf16>, vector<4x4x128xbf16>, vector<4x4x128xbf16>, vector<4x4x128xbf16> -> vector<4x4x1152xbf16>
    %21 = vector.shape_cast %20 : vector<4x4x1152xbf16> to vector<16x1152xbf16>
    %cst = arith.constant dense<0.000000e+00> : vector<16x256xf32>
    %22 = tpu.matmul %21, %0, %cst {dimension_numbers = #tpu.dot_dimension_numbers<[1], [0], [0], [1], [0, 0, 1, 1], [], []>} : vector<16x1152xbf16>, vector<1152x256xbf16>, vector<16x256xf32> -> vector<16x256xf32>
    %23 = vector.broadcast %1 : vector<1x256xf32> to vector<16x256xf32>
    %24 = arith.addf %22, %23 : vector<16x256xf32>
    %cst_37 = arith.constant 0.000000e+00 : f32
    %25 = vector.broadcast %cst_37 : f32 to vector<16x256xf32>
    %26 = arith.maximumf %24, %25 : vector<16x256xf32>
    %27 = arith.truncf %26 : vector<16x256xf32> to vector<16x256xbf16>
    %28 = vector.shape_cast %27 : vector<16x256xbf16> to vector<4x4x256xbf16>
    %c0_38 = arith.constant 0 : index
    %c0_39 = arith.constant 0 : index
    %c0_40 = arith.constant 0 : index
    %c0_41 = arith.constant 0 : index
    %29 = vector.load %arg4[%c0_38, %c0_39, %c0_40, %c0_41] : memref<1x4x4x256xbf16, #tpu.memory_space<vmem>>, vector<1x4x4x256xbf16>
    %30 = vector.shape_cast %29 : vector<1x4x4x256xbf16> to vector<4x4x256xbf16>
    %31 = vector.shape_cast %28 : vector<4x4x256xbf16> to vector<1x4x4x256xbf16>
    tpu.vector_store %arg4[%c0_38, %c0_39, %c0_40, %c0_41], %31 {strides = array<i32>} : memref<1x4x4x256xbf16, #tpu.memory_space<vmem>>, vector<1x4x4x256xbf16>,
    return
  }
  func.func @transform_0(%arg0: i32) -> (i32, i32, i32, i32) {
    %c0_i32 = arith.constant 0 : i32
    %c0_i32_0 = arith.constant 0 : i32
    %c0_i32_1 = arith.constant 0 : i32
    %c0_i32_2 = arith.constant 0 : i32
    return %arg0, %c0_i32, %c0_i32_0, %c0_i32_1 : i32, i32, i32, i32
  }
  func.func @transform_1(%arg0: i32) -> (i32, i32) {
    %c0_i32 = arith.constant 0 : i32
    %c0_i32_0 = arith.constant 0 : i32
    %c0_i32_1 = arith.constant 0 : i32
    return %c0_i32, %c0_i32_0 : i32, i32
  }
  func.func @transform_2(%arg0: i32) -> (i32, i32) {
    %c0_i32 = arith.constant 0 : i32
    %c0_i32_0 = arith.constant 0 : i32
    %c0_i32_1 = arith.constant 0 : i32
    return %c0_i32, %c0_i32_0 : i32, i32
  }
  func.func @transform_3(%arg0: i32) -> (i32, i32, i32, i32) {
    %c0_i32 = arith.constant 0 : i32
    %c0_i32_0 = arith.constant 0 : i32
    %c0_i32_1 = arith.constant 0 : i32
    %c0_i32_2 = arith.constant 0 : i32
    return %arg0, %c0_i32, %c0_i32_0, %c0_i32_1 : i32, i32, i32, i32
  }
}

module attributes {stable_mosaic.version = 11 : i64} {
  func.func @_conv3x3_relu_kernel(%arg0: i32, %arg1: memref<1x6x6x256xbf16, #tpu.memory_space<vmem>>, %arg2: memref<2304x256xbf16, #tpu.memory_space<vmem>>, %arg3: memref<1x256xf32, #tpu.memory_space<vmem>>, %arg4: memref<1x4x4x256xbf16, #tpu.memory_space<vmem>>) attributes {dimension_semantics = [#tpu.dimension_semantics<parallel>], iteration_bounds = array<i64: 4>, scalar_prefetch = 0 : i64, scratch_operands = 0 : i64, tpu.core_type = #tpu.core_type<tc>, window_params = [{transform_indices = @transform_0, window_bounds = array<i64: 1, 6, 6, 256>}, {pipeline_mode = #tpu.pipeline_mode<synchronous>, transform_indices = @transform_1, window_bounds = array<i64: 2304, 256>}, {pipeline_mode = #tpu.pipeline_mode<synchronous>, transform_indices = @transform_2, window_bounds = array<i64: 1, 256>}, {transform_indices = @transform_3, window_bounds = array<i64: 1, 4, 4, 256>}]} {
    %c0 = arith.constant 0 : index
    %c0_0 = arith.constant 0 : index
    %0 = vector.load %arg2[%c0, %c0_0] : memref<2304x256xbf16, #tpu.memory_space<vmem>>, vector<2304x256xbf16>
    %c0_1 = arith.constant 0 : index
    %c0_2 = arith.constant 0 : index
    %1 = vector.load %arg3[%c0_1, %c0_2] : memref<1x256xf32, #tpu.memory_space<vmem>>, vector<1x256xf32>
    %c0_3 = arith.constant 0 : index
    %c0_4 = arith.constant 0 : index
    %c0_5 = arith.constant 0 : index
    %c0_6 = arith.constant 0 : index
    %2 = vector.load %arg1[%c0_3, %c0_4, %c0_5, %c0_6] : memref<1x6x6x256xbf16, #tpu.memory_space<vmem>>, vector<1x4x4x256xbf16>
    %3 = vector.shape_cast %2 : vector<1x4x4x256xbf16> to vector<4x4x256xbf16>
    %c0_7 = arith.constant 0 : index
    %c0_8 = arith.constant 0 : index
    %c1 = arith.constant 1 : index
    %c0_9 = arith.constant 0 : index
    %4 = vector.load %arg1[%c0_7, %c0_8, %c1, %c0_9] : memref<1x6x6x256xbf16, #tpu.memory_space<vmem>>, vector<1x4x4x256xbf16>
    %5 = vector.shape_cast %4 : vector<1x4x4x256xbf16> to vector<4x4x256xbf16>
    %c0_10 = arith.constant 0 : index
    %c0_11 = arith.constant 0 : index
    %c2 = arith.constant 2 : index
    %c0_12 = arith.constant 0 : index
    %6 = vector.load %arg1[%c0_10, %c0_11, %c2, %c0_12] : memref<1x6x6x256xbf16, #tpu.memory_space<vmem>>, vector<1x4x4x256xbf16>
    %7 = vector.shape_cast %6 : vector<1x4x4x256xbf16> to vector<4x4x256xbf16>
    %c0_13 = arith.constant 0 : index
    %c1_14 = arith.constant 1 : index
    %c0_15 = arith.constant 0 : index
    %c0_16 = arith.constant 0 : index
    %8 = vector.load %arg1[%c0_13, %c1_14, %c0_15, %c0_16] : memref<1x6x6x256xbf16, #tpu.memory_space<vmem>>, vector<1x4x4x256xbf16>
    %9 = vector.shape_cast %8 : vector<1x4x4x256xbf16> to vector<4x4x256xbf16>
    %c0_17 = arith.constant 0 : index
    %c1_18 = arith.constant 1 : index
    %c1_19 = arith.constant 1 : index
    %c0_20 = arith.constant 0 : index
    %10 = vector.load %arg1[%c0_17, %c1_18, %c1_19, %c0_20] : memref<1x6x6x256xbf16, #tpu.memory_space<vmem>>, vector<1x4x4x256xbf16>
    %11 = vector.shape_cast %10 : vector<1x4x4x256xbf16> to vector<4x4x256xbf16>
    %c0_21 = arith.constant 0 : index
    %c1_22 = arith.constant 1 : index
    %c2_23 = arith.constant 2 : index
    %c0_24 = arith.constant 0 : index
    %12 = vector.load %arg1[%c0_21, %c1_22, %c2_23, %c0_24] : memref<1x6x6x256xbf16, #tpu.memory_space<vmem>>, vector<1x4x4x256xbf16>
    %13 = vector.shape_cast %12 : vector<1x4x4x256xbf16> to vector<4x4x256xbf16>
    %c0_25 = arith.constant 0 : index
    %c2_26 = arith.constant 2 : index
    %c0_27 = arith.constant 0 : index
    %c0_28 = arith.constant 0 : index
    %14 = vector.load %arg1[%c0_25, %c2_26, %c0_27, %c0_28] : memref<1x6x6x256xbf16, #tpu.memory_space<vmem>>, vector<1x4x4x256xbf16>
    %15 = vector.shape_cast %14 : vector<1x4x4x256xbf16> to vector<4x4x256xbf16>
    %c0_29 = arith.constant 0 : index
    %c2_30 = arith.constant 2 : index
    %c1_31 = arith.constant 1 : index
    %c0_32 = arith.constant 0 : index
    %16 = vector.load %arg1[%c0_29, %c2_30, %c1_31, %c0_32] : memref<1x6x6x256xbf16, #tpu.memory_space<vmem>>, vector<1x4x4x256xbf16>
    %17 = vector.shape_cast %16 : vector<1x4x4x256xbf16> to vector<4x4x256xbf16>
    %c0_33 = arith.constant 0 : index
    %c2_34 = arith.constant 2 : index
    %c2_35 = arith.constant 2 : index
    %c0_36 = arith.constant 0 : index
    %18 = vector.load %arg1[%c0_33, %c2_34, %c2_35, %c0_36] : memref<1x6x6x256xbf16, #tpu.memory_space<vmem>>, vector<1x4x4x256xbf16>
    %19 = vector.shape_cast %18 : vector<1x4x4x256xbf16> to vector<4x4x256xbf16>
    %20 = tpu.concatenate %3, %5, %7, %9, %11, %13, %15, %17, %19 in 2 : vector<4x4x256xbf16>, vector<4x4x256xbf16>, vector<4x4x256xbf16>, vector<4x4x256xbf16>, vector<4x4x256xbf16>, vector<4x4x256xbf16>, vector<4x4x256xbf16>, vector<4x4x256xbf16>, vector<4x4x256xbf16> -> vector<4x4x2304xbf16>
    %21 = vector.shape_cast %20 : vector<4x4x2304xbf16> to vector<16x2304xbf16>
    %cst = arith.constant dense<0.000000e+00> : vector<16x256xf32>
    %22 = tpu.matmul %21, %0, %cst {dimension_numbers = #tpu.dot_dimension_numbers<[1], [0], [0], [1], [0, 0, 1, 1], [], []>} : vector<16x2304xbf16>, vector<2304x256xbf16>, vector<16x256xf32> -> vector<16x256xf32>
    %23 = vector.broadcast %1 : vector<1x256xf32> to vector<16x256xf32>
    %24 = arith.addf %22, %23 : vector<16x256xf32>
    %cst_37 = arith.constant 0.000000e+00 : f32
    %25 = vector.broadcast %cst_37 : f32 to vector<16x256xf32>
    %26 = arith.maximumf %24, %25 : vector<16x256xf32>
    %27 = arith.truncf %26 : vector<16x256xf32> to vector<16x256xbf16>
    %28 = vector.shape_cast %27 : vector<16x256xbf16> to vector<4x4x256xbf16>
    %c0_38 = arith.constant 0 : index
    %c0_39 = arith.constant 0 : index
    %c0_40 = arith.constant 0 : index
    %c0_41 = arith.constant 0 : index
    %29 = vector.load %arg4[%c0_38, %c0_39, %c0_40, %c0_41] : memref<1x4x4x256xbf16, #tpu.memory_space<vmem>>, vector<1x4x4x256xbf16>
    %30 = vector.shape_cast %29 : vector<1x4x4x256xbf16> to vector<4x4x256xbf16>
    %31 = vector.shape_cast %28 : vector<4x4x256xbf16> to vector<1x4x4x256xbf16>
    tpu.vector_store %arg4[%c0_38, %c0_39, %c0_40, %c0_41], %31 {strides = array<i32>} : memref<1x4x4x256xbf16, #tpu.memory_space<vmem>>, vector<1x4x4x256xbf16>,
    return
  }
  func.func @transform_0(%arg0: i32) -> (i32, i32, i32, i32) {
    %c0_i32 = arith.constant 0 : i32
    %c0_i32_0 = arith.constant 0 : i32
    %c0_i32_1 = arith.constant 0 : i32
    %c0_i32_2 = arith.constant 0 : i32
    return %arg0, %c0_i32, %c0_i32_0, %c0_i32_1 : i32, i32, i32, i32
  }
  func.func @transform_1(%arg0: i32) -> (i32, i32) {
    %c0_i32 = arith.constant 0 : i32
    %c0_i32_0 = arith.constant 0 : i32
    %c0_i32_1 = arith.constant 0 : i32
    return %c0_i32, %c0_i32_0 : i32, i32
  }
  func.func @transform_2(%arg0: i32) -> (i32, i32) {
    %c0_i32 = arith.constant 0 : i32
    %c0_i32_0 = arith.constant 0 : i32
    %c0_i32_1 = arith.constant 0 : i32
    return %c0_i32, %c0_i32_0 : i32, i32
  }
  func.func @transform_3(%arg0: i32) -> (i32, i32, i32, i32) {
    %c0_i32 = arith.constant 0 : i32
    %c0_i32_0 = arith.constant 0 : i32
    %c0_i32_1 = arith.constant 0 : i32
    %c0_i32_2 = arith.constant 0 : i32
    return %arg0, %c0_i32, %c0_i32_0, %c0_i32_1 : i32, i32, i32, i32
  }
}

module attributes {stable_mosaic.version = 11 : i64} {
  func.func @_sqdiff_acc_kernel(%arg0: i32, %arg1: memref<1x4x4x256xbf16, #tpu.memory_space<vmem>>, %arg2: memref<1x4x4x256xbf16, #tpu.memory_space<vmem>>, %arg3: memref<1x1xf32, #tpu.memory_space<smem>>) attributes {dimension_semantics = [#tpu.dimension_semantics<arbitrary>], iteration_bounds = array<i64: 2>, scalar_prefetch = 0 : i64, scratch_operands = 0 : i64, tpu.core_type = #tpu.core_type<tc>, window_params = [{transform_indices = @transform_0, window_bounds = array<i64: 1, 4, 4, 256>}, {transform_indices = @transform_1, window_bounds = array<i64: 1, 4, 4, 256>}, {transform_indices = @transform_2, window_bounds = array<i64: 1, 1>}]} {
    %c0_i32 = arith.constant 0 : i32
    %0 = arith.cmpi eq, %arg0, %c0_i32 : i32
    %1 = arith.extui %0 : i1 to i32
    %c0_i32_0 = arith.constant 0 : i32
    %2 = arith.cmpi ne, %1, %c0_i32_0 : i32
    scf.if %2 {
      %cst_12 = arith.constant 0.000000e+00 : f32
      %c0_13 = arith.constant 0 : index
      %c0_14 = arith.constant 0 : index
      %16 = memref.load %arg3[%c0_13, %c0_14] : memref<1x1xf32, #tpu.memory_space<smem>>
      memref.store %cst_12, %arg3[%c0_13, %c0_14] : memref<1x1xf32, #tpu.memory_space<smem>>
    } else {
    }
    %c0 = arith.constant 0 : index
    %c0_1 = arith.constant 0 : index
    %c0_2 = arith.constant 0 : index
    %c0_3 = arith.constant 0 : index
    %3 = vector.load %arg1[%c0, %c0_1, %c0_2, %c0_3] : memref<1x4x4x256xbf16, #tpu.memory_space<vmem>>, vector<1x4x4x256xbf16>
    %4 = arith.extf %3 : vector<1x4x4x256xbf16> to vector<1x4x4x256xf32>
    %c0_4 = arith.constant 0 : index
    %c0_5 = arith.constant 0 : index
    %c0_6 = arith.constant 0 : index
    %c0_7 = arith.constant 0 : index
    %5 = vector.load %arg2[%c0_4, %c0_5, %c0_6, %c0_7] : memref<1x4x4x256xbf16, #tpu.memory_space<vmem>>, vector<1x4x4x256xbf16>
    %6 = arith.extf %5 : vector<1x4x4x256xbf16> to vector<1x4x4x256xf32>
    %7 = arith.subf %4, %6 : vector<1x4x4x256xf32>
    %c0_8 = arith.constant 0 : index
    %c0_9 = arith.constant 0 : index
    %8 = memref.load %arg3[%c0_8, %c0_9] : memref<1x1xf32, #tpu.memory_space<smem>>
    %9 = arith.mulf %7, %7 : vector<1x4x4x256xf32>
    %10 = vector.shape_cast %9 : vector<1x4x4x256xf32> to vector<1x1x4x4x256xf32>
    %cst = arith.constant dense<0.000000e+00> : vector<1xf32>
    %11 = vector.multi_reduction <add>, %10, %cst [1, 2, 3, 4] : vector<1x1x4x4x256xf32> to vector<1xf32>
    %12 = vector.shape_cast %11 : vector<1xf32> to vector<1x1x1x1x1xf32>
    %13 = vector.extract %12[0, 0, 0, 0, 0] : f32 from vector<1x1x1x1x1xf32>
    %14 = arith.addf %8, %13 : f32
    %c0_10 = arith.constant 0 : index
    %c0_11 = arith.constant 0 : index
    %15 = memref.load %arg3[%c0_10, %c0_11] : memref<1x1xf32, #tpu.memory_space<smem>>
    memref.store %14, %arg3[%c0_10, %c0_11] : memref<1x1xf32, #tpu.memory_space<smem>>
    return
  }
  func.func @transform_0(%arg0: i32) -> (i32, i32, i32, i32) {
    %c0_i32 = arith.constant 0 : i32
    %c0_i32_0 = arith.constant 0 : i32
    %c0_i32_1 = arith.constant 0 : i32
    %c0_i32_2 = arith.constant 0 : i32
    return %arg0, %c0_i32, %c0_i32_0, %c0_i32_1 : i32, i32, i32, i32
  }
  func.func @transform_1(%arg0: i32) -> (i32, i32, i32, i32) {
    %c2_i32 = arith.constant 2 : i32
    %0 = arith.addi %arg0, %c2_i32 : i32
    %c0_i32 = arith.constant 0 : i32
    %c0_i32_0 = arith.constant 0 : i32
    %c0_i32_1 = arith.constant 0 : i32
    %c0_i32_2 = arith.constant 0 : i32
    return %0, %c0_i32, %c0_i32_0, %c0_i32_1 : i32, i32, i32, i32
  }
  func.func @transform_2(%arg0: i32) -> (i32, i32) {
    %c0_i32 = arith.constant 0 : i32
    %c0_i32_0 = arith.constant 0 : i32
    %c0_i32_1 = arith.constant 0 : i32
    return %c0_i32, %c0_i32_0 : i32, i32
  }
}

</mosaic_0001>

<bundles_post_ra>
// kernel: vgg_perceptual_loss.15
= control target key start
LH: loop header
LB: loop body
LE: loop exit
PB: predicated region body
PF: predicated region fallthrough
CT: control target
= control target key end

     0   :  { %s448_s6 = smov 0   ;;  %s450_s7 = smov 0   ;;  %s493_s0 = inlined_call_operand.vmem [shape: bf16[4,8,2,8,128], index: 0, kind: input, shape index: {}]   ;;  %s494_s1 = inlined_call_operand.vmem [shape: bf16[4,8,8,64], index: 1, kind: output, shape index: {}]  }
   0x1   :  { %s452_s8 = smov 0  }
   0x2 LB: > { %s23_s9 = sadd.s32 1, %s431_s7  ;;  %p351_p0 = scmp.ge.s32.totalorder %s435_s8, 1  ;;  %s435_s8 = sphi %s452_s8, %s11_s8   ;;  %s431_s7 = sphi %s450_s7, %s496_s7   ;;  %s427_s6 = sphi %s448_s6, %s495_s6  }
   0x3   : > { %p25_p1 = scmp.ge.s32.totalorder %s23_s9, 4  ;;  %p109_p2 = scmp.lt.s32.totalorder %s435_s8, 5 }
   0x5   : > { %s498_s9 = smov (%p25_p1, %s23_s9), 0  ;;  %p110_p3 = pnand %p351_p0, %p109_p2 }
   0x6   : > { %p139_p4 = scmp.lt.s32.totalorder (!%p110_p3), %s427_s6, 3  ;;  %s437_s14 = smov (!%p110_p3), 64   ;;  %vm248_vm0 = vcmask (!%p110_p3), 519168  }
   0x7   : > { %113 = sbr.rel (%p110_p3) target bundleno = 151 (0x97), region = 24 }
   0xe   : > { %s500_s6 = smov (!%p139_p4, %s427_s6), 3 }
   0xf   : > { %s366_s10 = sshll.u32 %s500_s6, 6  ;;  %s367_s15 = sshll.u32 %s500_s6, 5 }
  0x10   : > { %s147_s13 = scalar_lea.vmem %s493_s0, %s366_s10  ;;  %s157_s18 = scalar_lea.vmem %s494_s1, %s367_s15 }
  0x11   : > { %v163_v0 = vld [vmem:[%s147_s13 + $0x20] sm:$0xff]   ;;  %v164_v1 = vld [vmem:[%s147_s13 + $0x28] sm:$0xff]   ;;  %v165_v8 = vld [vmem:[%s147_s13 + $0x30] sm:$0xff]  }
  0x12   : > { %v159_v2 = vld [vmem:[%s147_s13] sm:$0xff]   ;;  %v171_v3 = vunpack.c.l.bf16 %v163_v0  ;;  %v172_v4 = vunpack.c.l.bf16 %v164_v1  ;;  %v188_v5 = vunpack.c.h.bf16 %v163_v0  ;;  %v189_v6 = vunpack.c.h.bf16 %v164_v1  ;;  %v160_v7 = vld [vmem:[%s147_s13 + $0x8] sm:$0xff]   ;;  %v166_v9 = vld [vmem:[%s147_s13 + $0x38] sm:$0xff]  }
  0x13   : > { %v167_v10 = vunpack.c.l.bf16 %v159_v2  ;;  %v168_v11 = vunpack.c.l.bf16 %v160_v7  ;;  %v184_v12 = vunpack.c.h.bf16 %v159_v2  ;;  %v185_v13 = vunpack.c.h.bf16 %v160_v7  ;;  %v161_v14 = vld [vmem:[%s147_s13 + $0x10] sm:$0xff]   ;;  %v162_v15 = vld [vmem:[%s147_s13 + $0x18] sm:$0xff]  }
  0x14   : > { %v196_v16 = vmax.f32 %v171_v3, %v188_v5  ;;  %v197_v17 = vmax.f32 %v172_v4, %v189_v6  ;;  %v173_v18 = vunpack.c.l.bf16 %v165_v8  ;;  %v174_v19 = vunpack.c.l.bf16 %v166_v9 }
  0x15   : > { %v192_v20 = vmax.f32 %v167_v10, %v184_v12  ;;  %v193_v21 = vmax.f32 %v168_v11, %v185_v13  ;;  %v190_v22 = vunpack.c.h.bf16 %v165_v8  ;;  %v191_v23 = vunpack.c.h.bf16 %v166_v9 }
  0x16   : > { %v403_v24 = vpack.i.bf16 %v197_v17, %v196_v16  ;;  %v169_v25 = vunpack.c.l.bf16 %v161_v14  ;;  %v170_v26 = vunpack.c.l.bf16 %v162_v15  ;;  %v186_v27 = vunpack.c.h.bf16 %v161_v14 }
  0x17   : > { %v393_v28 = vpack.i.bf16 %v193_v21, %v192_v20  ;;  %v198_v29 = vmax.f32 %v173_v18, %v190_v22  ;;  %v199_v30 = vmax.f32 %v174_v19, %v191_v23  ;;  %v187_v31 = vunpack.c.h.bf16 %v162_v15 }
  0x18   : > { %404 = vrot.lane.b32.xlu1 %v403_v24, %s437_s14  ;;  %v194_v32 = vmax.f32 %v169_v25, %v186_v27 }
  0x19   : > { %394 = vrot.lane.b32.xlu0 %v393_v28, %s437_s14  ;;  %v408_v33 = vpack.i.bf16 %v199_v30, %v198_v29  ;;  %v195_v34 = vmax.f32 %v170_v26, %v187_v31 }
  0x1b   : > { %v398_v35 = vpack.i.bf16 %v195_v34, %v194_v32 }
  0x1c   : > { %409 = vrot.lane.b32.xlu1 %v408_v33, %s437_s14 }
  0x1d   : > { %399 = vrot.lane.b32.xlu0 %v398_v35, %s437_s14 }
  0x8a   : > { %v405_v36 = vpop.permute.xlu1 %404 }
  0x8b   : > { %v407_v37 = vunpack.i.h.bf16 %v405_v36  ;;  %v406_v38 = vunpack.i.l.bf16 %v405_v36  ;;  %v395_v39 = vpop.permute.xlu0 %394 }
  0x8c   : > { %v397_v40 = vunpack.i.h.bf16 %v395_v39  ;;  %v396_v41 = vunpack.i.l.bf16 %v395_v39 }
  0x8d   : > { %v237_v42 = vmax.f32 %v197_v17, %v407_v37  ;;  %v236_v43 = vmax.f32 %v196_v16, %v406_v38 }
  0x8e   : > { %v233_v44 = vmax.f32 %v193_v21, %v397_v40  ;;  %v232_v45 = vmax.f32 %v192_v20, %v396_v41  ;;  %v410_v46 = vpop.permute.xlu1 %409 }
  0x8f   : > { %v245_v47 = vpack.c.bf16 %v237_v42, %v237_v42  ;;  %v244_v48 = vpack.c.bf16 %v236_v43, %v236_v43  ;;  %v412_v49 = vunpack.i.h.bf16 %v410_v46  ;;  %v411_v50 = vunpack.i.l.bf16 %v410_v46  ;;  %v400_v51 = vpop.permute.xlu0 %399 }
  0x90   : > { %v241_v52 = vpack.c.bf16 %v233_v44, %v233_v44  ;;  %v240_v53 = vpack.c.bf16 %v232_v45, %v232_v45  ;;  %v402_v54 = vunpack.i.h.bf16 %v400_v51  ;;  %v401_v55 = vunpack.i.l.bf16 %v400_v51 }
  0x91   : > { %254 = vst.msk [vmem:[%s157_s18 + $0x14] sm:$0xf] %vm248_vm0, %v245_v47  ;;  %253 = vst.msk [vmem:[%s157_s18 + $0x10] sm:$0xf] %vm248_vm0, %v244_v48  ;;  %v239_v56 = vmax.f32 %v199_v30, %v412_v49  ;;  %v238_v57 = vmax.f32 %v198_v29, %v411_v50 }
  0x92   : > { %250 = vst.msk [vmem:[%s157_s18 + $0x4] sm:$0xf] %vm248_vm0, %v241_v52  ;;  %249 = vst.msk [vmem:[%s157_s18] sm:$0xf] %vm248_vm0, %v240_v53  ;;  %v235_v58 = vmax.f32 %v195_v34, %v402_v54  ;;  %v234_v59 = vmax.f32 %v194_v32, %v401_v55 }
  0x93   : > { %v247_v60 = vpack.c.bf16 %v239_v56, %v239_v56  ;;  %v246_v61 = vpack.c.bf16 %v238_v57, %v238_v57 }
  0x94   : > { %v243_v62 = vpack.c.bf16 %v235_v58, %v235_v58  ;;  %v242_v63 = vpack.c.bf16 %v234_v59, %v234_v59 }
  0x95   : > { %256 = vst.msk [vmem:[%s157_s18 + $0x1c] sm:$0xf] %vm248_vm0, %v247_v60  ;;  %255 = vst.msk [vmem:[%s157_s18 + $0x18] sm:$0xf] %vm248_vm0, %v246_v61 }
  0x96   : > { %252 = vst.msk [vmem:[%s157_s18 + $0xc] sm:$0xf] %vm248_vm0, %v243_v62  ;;  %251 = vst.msk [vmem:[%s157_s18 + $0x8] sm:$0xf] %vm248_vm0, %v242_v63 }
  0x97 PF: > { %s11_s8 = sadd.s32 1, %s435_s8   ;;  %s495_s6 = smov %s431_s7 }
  0x98   : > { %p8_p5 = scmp.ge.s32.totalorder %s11_s8, 6   ;;  %s496_s7 = smov %s498_s9 }
  0x9a   :  { %10 = sbr.rel (!%p8_p5) target bundleno = 2 (0x2), region = 55 }

// kernel: vgg_perceptual_loss.12
= control target key start
LH: loop header
LB: loop body
LE: loop exit
PB: predicated region body
PF: predicated region fallthrough
CT: control target
= control target key end

     0   :  { %s3232_s12 = smov 0   ;;  %s4566_s0 = inlined_call_operand.vmem [shape: bf16[4,18,18,3], index: 0, kind: input, shape index: {}]   ;;  %s4567_s1 = inlined_call_operand.vmem [shape: bf16[27,64], index: 1, kind: input, shape index: {}]   ;;  %s4568_s2 = inlined_call_operand.vmem [shape: f32[1,64], index: 2, kind: input, shape index: {}]   ;;  %s4569_s3 = inlined_call_operand.vmem [shape: bf16[4,16,16,64], index: 3, kind: output, shape index: {}]  }
   0x1 LB: > { %s2607_s13 = sadd.s32 4294967295, %s3201_s12   ;;  %p2611_p0 = scmp.ge.s32.totalorder %s3201_s12, 1  ;;  %s3201_s12 = sphi %s3232_s12, %s13_s12  }
   0x2   : > { %p137_p1 = scmp.lt.s32.totalorder %s3201_s12, 5 }
   0x4   : > { %p138_p2 = pnand %p2611_p0, %p137_p1 }
   0x6   : > { %141 = sbr.rel (%p138_p2) target bundleno = 615 (0x267), region = 32 }
   0xd   : > { %p161_p3 = scmp.lt.s32.totalorder %s2607_s13, 3  ;;  %s3203_s18 = smov 9   ;;  %vm772_vm0 = vcmask 1046528   ;;  %vm499_vm1 = vsmask.f32 7424  ;;  %vm2191_vm2 = vcmask 1044480  }
   0xe   : > { %s3204_s19 = smov 6   ;;  %s3205_s20 = smov 3   ;;  %vm2192_vm3 = vcmask 1045504   ;;  %vm1877_vm4 = vcmask 23552   ;;  %vm1910_vm5 = vcmask 48128   ;;  %vm1943_vm6 = vcmask 72704  }
   0xf   : > { %s4589_s13 = smov (!%p161_p3, %s2607_s13), 3  ;;  %s3206_s21 = smov 12   ;;  %vm1976_vm7 = vcmask 97280   ;;  %vm2009_vm8 = vcmask 121856   ;;  %vm2042_vm9 = vcmask 146432   ;;  %vm2075_vm10 = vcmask 171008  }
  0x10   : > { %s3031_s14 = smul.u32 216, %s4589_s13  ;;  %s3207_s22 = smov 15   ;;  %vm2108_vm11 = vcmask 195584   ;;  %vm2158_vm12 = vcmask 220160   ;;  %vm2519_vm13 = vcmask 519168  }
  0x11   : > { %s3208_s23 = smov 18   ;;  %s3209_s26 = smov 21  }
  0x12   : > { %s3246_s17 = scalar_lea.vmem %s4566_s0, %s3031_s14  ;;  %s3210_s27 = smov 24  }
  0x13   : > { %v2631_v0 = vld [vmem:[%s3246_s17 + $0x6c] sm:$0xf]  ;;  %v3250_v1 = vld [vmem:[%s3246_s17 + $0x70] sm:$0xf]  ;;  %v194_v6 = vld [vmem:[%s3246_s17 + $0x64] sm:$0xf] }
  0x14   : > { %v3253_v2 = vcombine.low %v2631_v0, %v3250_v1  ;;  %v2615_v3 = vld [vmem:[%s3246_s17 + $0xc] sm:$0xf]  ;;  %v3257_v4 = vld [vmem:[%s3246_s17 + $0x10] sm:$0xf]  ;;  %v233_v7 = vld [vmem:[%s3246_s17 + $0x60] sm:$0xe] }
  0x15   : > { %v3260_v5 = vcombine.low %v2615_v3, %v3257_v4  ;;  %v3267_v8 = vld [vmem:[%s3246_s17 + $0x68] ss:$0 sps:$4 sm:$0x11]   ;;  %v2783_v9 = vcombine.low %v233_v7, %v194_v6  ;;  %v193_v10 = vld [vmem:[%s3246_s17 + $0x60] sm:$0xf]  ;;  %s2940_s5 = sshll.u32 %s4589_s13, 7 }
  0x16   : > { %949 = vrot.lane.b32.xlu1 %v3253_v2, %s3203_s18  ;;  %v1112_v11 = vshll.u32 %v3253_v2, 16  ;;  %v178_v12 = vld [vmem:[%s3246_s17 + $0x4] sm:$0xf]  ;;  %v798_v14 = vrot.slane %v3267_v8, 1  ;;  %v225_v15 = vld [vmem:[%s3246_s17] sm:$0xe]  ;;  %v3278_v18 = vcombine.low %v193_v10, %v194_v6  ;;  %s4470_s8 = scalar_lea.vmem %s4569_s3, %s2940_s5 }
  0x17   : > { %933 = vrot.lane.b32.xlu0 %v3260_v5, %s3203_s18  ;;  %v797_v13 = vrot.slane %v2783_v9, 1  ;;  %v177_v16 = vld [vmem:[%s3246_s17] sm:$0xf]  ;;  %v1016_v17 = vshll.u32 %v3260_v5, 16  ;;  %v2775_v20 = vcombine.low %v225_v15, %v178_v12  ;;  %v195_v21 = vld [vmem:[%s3246_s17 + $0x6c] sm:$0xf] }
  0x18   : > { %v3056_v19 = vld [vmem:[%s3246_s17 + $0x8] ss:$0 sps:$4 sm:$0x11]   ;;  %v3283_v23 = vcombine.low %v177_v16, %v178_v12  ;;  %v196_v24 = vld [vmem:[%s3246_s17 + $0x70] sm:$0xf]  ;;  %v597_v30 = vshrl.u32 %v3278_v18, 16 }
  0x19   : > { %v799_v22 = vsel %vm772_vm0, %v797_v13, %v798_v14  ;;  %v234_v25 = vld [vmem:[%s3246_s17 + $0x6c] sm:$0xe]  ;;  %v773_v26 = vrot.slane %v2775_v20, 1  ;;  %v774_v27 = vrot.slane %v3056_v19, 1  ;;  %v3290_v31 = vcombine.low %v195_v21, %v196_v24  ;;  %v180_v33 = vld [vmem:[%s3246_s17 + $0x10] sm:$0xf] }
  0x1a   : > { %837 = vrot.lane.b32.xlu1 %v799_v22, %s3204_s19  ;;  %v3060_v28 = vld [vmem:[%s3246_s17 + $0x74] ss:$0 sps:$4 sm:$0x11]   ;;  %v2784_v29 = vcombine.low %v234_v25, %v196_v24  ;;  %v179_v32 = vld [vmem:[%s3246_s17 + $0xc] sm:$0xf]  ;;  %v501_v41 = vshrl.u32 %v3283_v23, 16 }
  0x1b   : > { %v775_v34 = vsel %vm772_vm0, %v773_v26, %v774_v27  ;;  %v801_v36 = vrot.slane %v3060_v28, 1  ;;  %v226_v37 = vld [vmem:[%s3246_s17 + $0xc] sm:$0xe]  ;;  %v3296_v38 = vcombine.low %v179_v32, %v180_v33  ;;  %v3063_v39 = vld [vmem:[%s3246_s17 + $0x14] ss:$0 sps:$4 sm:$0x11]  }
  0x1c   : > { %v800_v35 = vrot.slane %v2784_v29, 1  ;;  %821 = vrot.lane.b32.xlu0 %v775_v34, %s3204_s19  ;;  %v2776_v40 = vcombine.low %v226_v37, %v180_v33  ;;  %v503_v42 = vshll.u32 %v3283_v23, 16  ;;  %v508_v43 = vshll.u32 %v3056_v19, 16  ;;  %v2633_v52 = vld [vmem:[%s3246_s17 + $0x78] sm:$0xf] }
  0x1d   : > { %v513_v45 = vshrl.u32 %v3296_v38, 16  ;;  %v515_v46 = vshll.u32 %v3296_v38, 16  ;;  %v609_v47 = vshrl.u32 %v3290_v31, 16  ;;  %v777_v49 = vrot.slane %v3063_v39, 1  ;;  %v3310_v57 = vld [vmem:[%s3246_s17 + $0x7c] sm:$0xf] }
  0x1e   : > { %v802_v44 = vsel %vm772_vm0, %v800_v35, %v801_v36  ;;  %v776_v48 = vrot.slane %v2776_v40, 1  ;;  %v520_v50 = vshll.u32 %v3063_v39, 16  ;;  %v505_v51 = vrot.slane %v503_v42, 1  ;;  %v2617_v62 = vld [vmem:[%s3246_s17 + $0x18] sm:$0xf] }
  0x1f   : > { %839 = vrot.lane.b32.xlu1 %v802_v44, %s3204_s19  ;;  %v517_v53 = vrot.slane %v515_v46, 1  ;;  %v510_v54 = vrot.slane %v508_v43, 1  ;;  %v611_v55 = vshll.u32 %v3290_v31, 16  ;;  %v616_v56 = vshll.u32 %v3060_v28, 16  ;;  %v3316_v63 = vld [vmem:[%s3246_s17 + $0x1c] sm:$0xf] }
  0x20   : > { %v778_v58 = vsel %vm772_vm0, %v776_v48, %v777_v49  ;;  %v522_v59 = vrot.slane %v520_v50, 1  ;;  %v506_v60 = vor.u32 %v505_v51, %v501_v41  ;;  %v599_v61 = vshll.u32 %v3278_v18, 16  ;;  %v3323_v13 = vld [vmem:[%s3246_s17 + $0x74] ss:$0 sps:$4 sm:$0x11]  }
  0x21   : > { %823 = vrot.lane.b32.xlu0 %v778_v58, %s3204_s19  ;;  %v518_v0 = vor.u32 %v517_v53, %v513_v45  ;;  %v613_v3 = vrot.slane %v611_v55, 1  ;;  %v618_v6 = vrot.slane %v616_v56, 1  ;;  %v604_v7 = vshll.u32 %v3267_v8, 16  ;;  %v3328_v20 = vld [vmem:[%s3246_s17 + $0x14] ss:$0 sps:$4 sm:$0x11]  }
  0x22   : > { %v511_v9 = vsel %vm499_vm1, %v506_v60, %v510_v54  ;;  %v601_v10 = vrot.slane %v599_v61, 1  ;;  %v2800_v12 = vcombine.low %v2633_v52, %v3310_v57  ;;  %v2792_v19 = vcombine.low %v2617_v62, %v3316_v63  ;;  %v3335_v24 = vld [vmem:[%s3246_s17 + $0x80] ss:$0 sps:$4 sm:$0x11]   ;;  %v2671_v35 = vld [vmem:[%s3246_s17 + $0x6c] sm:$0xe] }
  0x23   : > { %v523_v14 = vsel %vm499_vm1, %v518_v0, %v522_v59  ;;  %v614_v15 = vor.u32 %v613_v3, %v609_v47  ;;  %v606_v16 = vrot.slane %v604_v7, 1  ;;  %v1110_v21 = vshrl.u32 %v3253_v2, 16  ;;  %v2663_v43 = vld [vmem:[%s3246_s17 + $0xc] sm:$0xe]  ;;  %v2672_v45 = vld [vmem:[%s3246_s17 + $0x78] sm:$0xe] }
  0x24   : > { %694 = vrot.lane.b32.xlu1 %v523_v14, %s3205_s20  ;;  %v602_v8 = vor.u32 %v601_v10, %v597_v30  ;;  %v1114_v22 = vrot.slane %v1112_v11, 1  ;;  %v1124_v26 = vshll.u32 %v2800_v12, 16  ;;  %v1117_v27 = vshll.u32 %v3323_v13, 16  ;;  %v3346_v11 = vld [vmem:[%s3246_s17 + $0x20] ss:$0 sps:$4 sm:$0x11]  }
  0x25   : > { %692 = vrot.lane.b32.xlu0 %v511_v9, %s3205_s20  ;;  %v619_v25 = vsel %vm499_vm1, %v614_v15, %v618_v6  ;;  %v1014_v28 = vshrl.u32 %v3260_v5, 16  ;;  %v1028_v30 = vshll.u32 %v2792_v19, 16  ;;  %v1018_v32 = vrot.slane %v1016_v17, 1  ;;  %v2664_v50 = vld [vmem:[%s3246_s17 + $0x18] sm:$0xe] }
  0x26   : > { %v607_v29 = vsel %vm499_vm1, %v602_v8, %v606_v16  ;;  %v1021_v2 = vshll.u32 %v3328_v20, 16  ;;  %v1115_v33 = vor.u32 %v1114_v22, %v1110_v21  ;;  %v1119_v34 = vrot.slane %v1117_v27, 1  ;;  %v2695_v55 = vld [vmem:[%s3246_s17 + $0x78] sm:$0xf]  ;;  %v3366_v56 = vld [vmem:[%s3246_s17 + $0x7c] sm:$0xf] }
  0x27   : > { %v1019_v36 = vor.u32 %v1018_v32, %v1014_v28  ;;  %v1122_v37 = vshrl.u32 %v2800_v12, 16  ;;  %v1126_v39 = vrot.slane %v1124_v26, 1  ;;  %v1129_v5 = vshll.u32 %v3335_v24, 16  ;;  %v2679_v3 = vld [vmem:[%s3246_s17 + $0x18] sm:$0xf] }
  0x28   : > { %710 = vrot.lane.b32.xlu1 %v619_v25, %s3205_s20  ;;  %v1023_v17 = vrot.slane %v1021_v2, 1  ;;  %v1026_v40 = vshrl.u32 %v2792_v19, 16  ;;  %v1030_v41 = vrot.slane %v1028_v30, 1  ;;  %v1033_v42 = vshll.u32 %v3346_v11, 16  ;;  %v3377_v6 = vld [vmem:[%s3246_s17 + $0x1c] sm:$0xf] }
  0x29   : > { %708 = vrot.lane.b32.xlu0 %v607_v29, %s3205_s20  ;;  %v2831_v44 = vcombine.low %v2671_v35, %v3250_v1  ;;  %v1120_v46 = vsel %vm499_vm1, %v1115_v33, %v1119_v34  ;;  %v1127_v47 = vor.u32 %v1126_v39, %v1122_v37  ;;  %v1131_v48 = vrot.slane %v1129_v5, 1  ;;  %v2681_v16 = vld [vmem:[%s3246_s17 + $0x24] sm:$0xf]  ;;  %v3397_v21 = vld [vmem:[%s3246_s17 + $0x80] ss:$0 sps:$4 sm:$0x11]  }
  0x2a   : > { %v2823_v49 = vcombine.low %v2663_v43, %v3257_v4  ;;  %v1024_v51 = vsel %vm499_vm1, %v1019_v36, %v1023_v17  ;;  %v1031_v52 = vor.u32 %v1030_v41, %v1026_v40  ;;  %v1035_v53 = vrot.slane %v1033_v42, 1  ;;  %v3404_v27 = vld [vmem:[%s3246_s17 + $0x20] ss:$0 sps:$4 sm:$0x11]   ;;  %v197_v37 = vld [vmem:[%s3246_s17 + $0x78] sm:$0xf] }
  0x2b   : > { %v1309_v1 = vrot.slane %v2831_v44, 1  ;;  %v1310_v54 = vrot.slane %v3323_v13, 1  ;;  %v2832_v58 = vcombine.low %v2672_v45, %v3310_v57  ;;  %v2824_v4 = vcombine.low %v2664_v50, %v3316_v63  ;;  %v2697_v63 = vld [vmem:[%s3246_s17 + $0x84] sm:$0xf]  ;;  %v3386_v13 = vld [vmem:[%s3246_s17 + $0x88] sm:$0xf] }
  0x2c   : > { %951 = vrot.lane.b32.xlu1 %v2800_v12, %s3203_s18  ;;  %v1132_v59 = vsel %vm499_vm1, %v1127_v47, %v1131_v48  ;;  %v1036_v60 = vsel %vm499_vm1, %v1031_v52, %v1035_v53  ;;  %v1285_v61 = vrot.slane %v2823_v49, 1  ;;  %v1286_v62 = vrot.slane %v3328_v20, 1  ;;  %v3413_v34 = vld [vmem:[%s3246_s17 + $0x2c] ss:$0 sps:$4 sm:$0x11]  }
  0x2d   : > { %935 = vrot.lane.b32.xlu0 %v2792_v19, %s3203_s18  ;;  %v2847_v0 = vcombine.low %v2695_v55, %v3366_v56  ;;  %v1311_v57 = vsel %vm772_vm0, %v1309_v1, %v1310_v54  ;;  %v1312_v7 = vrot.slane %v2832_v58, 1  ;;  %v1313_v9 = vrot.slane %v3335_v24, 1  ;;  %v3392_v19 = vld [vmem:[%s3246_s17 + $0x28] sm:$0xf]  ;;  %v3418_v39 = vld [vmem:[%s3246_s17 + $0x7c] sm:$0xf] }
  0x2e   : > { %v1288_v10 = vrot.slane %v2824_v4, 1  ;;  %v1289_v12 = vrot.slane %v3346_v11, 1  ;;  %v1287_v14 = vsel %vm772_vm0, %v1285_v61, %v1286_v62  ;;  %v2839_v15 = vcombine.low %v2679_v3, %v3377_v6  ;;  %v3409_v11 = vld [vmem:[%s3246_s17 + $0x8c] ss:$0 sps:$4 sm:$0x11]   ;;  %v3149_v54 = vld [vmem:[%s4567_s1] sm:$0xff]  }
  0x2f   : > { %v1624_v20 = vshll.u32 %v2847_v0, 16  ;;  %v2848_v8 = vcombine.low %v2697_v63, %v3386_v13  ;;  %v1314_v22 = vsel %vm772_vm0, %v1312_v7, %v1313_v9  ;;  %v2840_v24 = vcombine.low %v2681_v16, %v3392_v19  ;;  %v181_v17 = vld [vmem:[%s3246_s17 + $0x18] sm:$0xf]  ;;  %v3422_v40 = vld [vmem:[%s3246_s17 + $0x1c] sm:$0xf]  ;;  %2991 = vmatprep.subr.bf16.mxu0 %v3149_v54  ;;  %3027 = vmatprep.subr.bf16.mxu1 %v3149_v54 }
  0x30   : > { %1221 = vrot.lane.b32.xlu1 %v1120_v46, %s3206_s21  ;;  %v1290_v25 = vsel %vm772_vm0, %v1288_v10, %v1289_v12  ;;  %v1528_v26 = vshll.u32 %v2839_v15, 16  ;;  %v1622_v28 = vshrl.u32 %v2847_v0, 16  ;;  %v1629_v32 = vshll.u32 %v3397_v21, 16  ;;  %v2735_v41 = vld [vmem:[%s3246_s17 + $0x78] sm:$0xe]  ;;  %2992 = vmatpush3.bf16.msra.mxu0 %v3149_v54 }
  0x31   : > { %1205 = vrot.lane.b32.xlu0 %v1024_v51, %s3206_s21  ;;  %v1626_v29 = vrot.slane %v1624_v20, 1  ;;  %v1636_v30 = vshll.u32 %v2848_v8, 16  ;;  %v1526_v2 = vshrl.u32 %v2839_v15, 16  ;;  %v1540_v33 = vshll.u32 %v2840_v24, 16  ;;  %v2727_v46 = vld [vmem:[%s3246_s17 + $0x18] sm:$0xe]  ;;  %3029 = vmatpush3.bf16.msra.mxu1 %v3149_v54 }
  0x32   : > { %v1530_v35 = vrot.slane %v1528_v26, 1  ;;  %v1533_v36 = vshll.u32 %v3404_v27, 16  ;;  %v1631_v42 = vrot.slane %v1629_v32, 1  ;;  %v1634_v43 = vshrl.u32 %v2848_v8, 16  ;;  %v3455_v63 = vld [vmem:[%s3246_s17 + $0x88] sm:$0xf] }
  0x33   : > { %v1627_v5 = vor.u32 %v1626_v29, %v1622_v28  ;;  %v1638_v44 = vrot.slane %v1636_v30, 1  ;;  %v1641_v45 = vshll.u32 %v3409_v11, 16  ;;  %v1538_v47 = vshrl.u32 %v2840_v24, 16  ;;  %v183_v10 = vld [vmem:[%s3246_s17 + $0x24] sm:$0xf] }
  0x34   : > { %1223 = vrot.lane.b32.xlu1 %v1132_v59, %s3206_s21  ;;  %v1542_v48 = vrot.slane %v1540_v33, 1  ;;  %v1545_v49 = vshll.u32 %v3413_v34, 16  ;;  %v3431_v50 = vcombine.low %v197_v37, %v3418_v39  ;;  %v1531_v51 = vor.u32 %v1530_v35, %v1526_v2  ;;  %v3443_v59 = vld [vmem:[%s3246_s17 + $0x80] ss:$0 sps:$4 sm:$0x11]  }
  0x35   : > { %1207 = vrot.lane.b32.xlu0 %v1036_v60, %s3206_s21  ;;  %v1535_v52 = vrot.slane %v1533_v36, 1  ;;  %v3434_v53 = vcombine.low %v181_v17, %v3422_v40  ;;  %v2879_v1 = vcombine.low %v2735_v41, %v3366_v56  ;;  %v2871_v55 = vcombine.low %v2727_v46, %v3377_v6  ;;  %v3460_v12 = vld [vmem:[%s3246_s17 + $0x28] sm:$0xf]  ;;  %v3485_v37 = vld [vmem:[%s3246_s17 + $0x8c] ss:$0 sps:$4 sm:$0x11]  }
  0x36   : > { %v1639_v58 = vor.u32 %v1638_v44, %v1634_v43  ;;  %v1643_v4 = vrot.slane %v1641_v45, 1  ;;  %v1632_v56 = vsel %vm499_vm1, %v1627_v5, %v1631_v42  ;;  %v1543_v60 = vor.u32 %v1542_v48, %v1538_v47 }
  0x37   : > { %v1547_v61 = vrot.slane %v1545_v49, 1  ;;  %v623_v62 = vshll.u32 %v3431_v50, 16  ;;  %v1536_v3 = vsel %vm499_vm1, %v1531_v51, %v1535_v52  ;;  %v527_v6 = vshll.u32 %v3434_v53, 16  ;;  %v235_v52 = vld [vmem:[%s3246_s17 + $0x78] sm:$0xe] }
  0x38   : > { %1349 = vrot.lane.b32.xlu1 %v1311_v57, %s3207_s22  ;;  %v199_v57 = vld [vmem:[%s3246_s17 + $0x84] sm:$0xf]  ;;  %v1821_v7 = vrot.slane %v2879_v1, 1  ;;  %v1822_v9 = vrot.slane %v3397_v21, 1  ;;  %v1797_v16 = vrot.slane %v2871_v55, 1  ;;  %v1798_v20 = vrot.slane %v3404_v27, 1 }
  0x39   : > { %1333 = vrot.lane.b32.xlu0 %v1287_v14, %s3207_s22  ;;  %v2736_v14 = vld [vmem:[%s3246_s17 + $0x84] sm:$0xe]  ;;  %v1548_v21 = vsel %vm499_vm1, %v1543_v60, %v1547_v61  ;;  %v3472_v26 = vcombine.low %v199_v57, %v3455_v63  ;;  %v525_v28 = vshrl.u32 %v3434_v53, 16  ;;  %v529_v29 = vrot.slane %v527_v6, 1 }
  0x3a   : > { %v3477_v30 = vcombine.low %v183_v10, %v3460_v12  ;;  %v2880_v32 = vcombine.low %v2736_v14, %v3386_v13  ;;  %v1823_v35 = vsel %vm772_vm0, %v1821_v7, %v1822_v9  ;;  %v1799_v17 = vsel %vm772_vm0, %v1797_v16, %v1798_v20  ;;  %v3490_v13 = vld [vmem:[%s3246_s17 + $0x2c] ss:$0 sps:$4 sm:$0x11]   ;;  %v228_v7 = vld [vmem:[%s3246_s17 + $0x24] sm:$0xe] }
  0x3b   : > { %4576 = vst [vmem:[#allocation2_spill] sm:$0xff] %v3472_v26  ;;  %v635_v5 = vshll.u32 %v3472_v26, 16  ;;  %v530_v41 = vor.u32 %v529_v29, %v525_v28  ;;  %v1825_v44 = vrot.slane %v3409_v11, 1  ;;  %v1801_v46 = vrot.slane %v3413_v34, 1  ;;  %v227_v34 = vld [vmem:[%s3246_s17 + $0x18] sm:$0xe] }
  0x3c   : > { %1351 = vrot.lane.b32.xlu1 %v1314_v22, %s3207_s22  ;;  %v2728_v22 = vld [vmem:[%s3246_s17 + $0x24] sm:$0xe]  ;;  %4577 = vst [vmem:[#allocation3_spill] sm:$0xff] %v3477_v30  ;;  %v1824_v43 = vrot.slane %v2880_v32, 1  ;;  %v633_v48 = vshrl.u32 %v3472_v26, 16  ;;  %v640_v51 = vshll.u32 %v3485_v37, 16  ;;  %v2785_v60 = vcombine.low %v235_v52, %v3418_v39 }
  0x3d   : > { %1335 = vrot.lane.b32.xlu0 %v1290_v25, %s3207_s22  ;;  %v625_v25 = vrot.slane %v623_v62, 1  ;;  %v2872_v2 = vcombine.low %v2728_v22, %v3392_v19  ;;  %v539_v19 = vshll.u32 %v3477_v30, 16  ;;  %v637_v49 = vrot.slane %v635_v5, 1  ;;  %v236_v62 = vld [vmem:[%s3246_s17 + $0x84] sm:$0xe] }
  0x3e   : > { %v537_v54 = vshrl.u32 %v3477_v30, 16  ;;  %v544_v55 = vshll.u32 %v3490_v13, 16  ;;  %v2777_v61 = vcombine.low %v227_v34, %v3422_v40  ;;  %v804_v9 = vrot.slane %v3443_v59, 1  ;;  %v2635_v16 = vld [vmem:[%s3246_s17 + $0x84] sm:$0xf] }
  0x3f   : > { %v1800_v45 = vrot.slane %v2872_v2, 1  ;;  %v541_v11 = vrot.slane %v539_v19, 1  ;;  %v2786_v14 = vcombine.low %v236_v62, %v3455_v63  ;;  %v803_v40 = vrot.slane %v2785_v60, 1  ;;  %v3521_v20 = vld [vmem:[%s3246_s17 + $0x88] sm:$0xf] }
  0x40   : > { %1461 = vrot.lane.b32.xlu1 %v2847_v0, %s3208_s23  ;;  %v3449_v0 = vld [vmem:[%s3246_s17 + $0x20] ss:$0 sps:$4 sm:$0x11]   ;;  %v546_v57 = vrot.slane %v544_v55, 1  ;;  %v3527_v22 = vld [vmem:[%s3246_s17 + $0x28] sm:$0xf] }
  0x41   : > { %1445 = vrot.lane.b32.xlu0 %v2839_v15, %s3208_s23  ;;  %v1644_v15 = vsel %vm499_vm1, %v1639_v58, %v1643_v4  ;;  %v532_v27 = vshll.u32 %v3449_v0, 16  ;;  %v1826_v58 = vsel %vm772_vm0, %v1824_v43, %v1825_v44  ;;  %v638_v4 = vor.u32 %v637_v49, %v633_v48  ;;  %v2637_v29 = vld [vmem:[%s3246_s17 + $0x90] sm:$0xf]  ;;  %v3555_v19 = vld [vmem:[%s3246_s17 + $0x2c] ss:$0 sps:$4 sm:$0x11]  }
  0x42   : > { %v542_v6 = vor.u32 %v541_v11, %v537_v54  ;;  %v780_v10 = vrot.slane %v3449_v0, 1  ;;  %v2619_v0 = vld [vmem:[%s3246_s17 + $0x24] sm:$0xf]  ;;  %v806_v63 = vrot.slane %v2786_v14, 1  ;;  %v783_v2 = vrot.slane %v3490_v13, 1 }
  0x43   : > { %v534_v42 = vrot.slane %v532_v27, 1  ;;  %v2793_v28 = vcombine.low %v2619_v0, %v3527_v22  ;;  %v1045_v52 = vshll.u32 %v3555_v19, 16  ;;  %v2673_v54 = vld [vmem:[%s3246_s17 + $0x84] sm:$0xe]  ;;  %v2699_v0 = vld [vmem:[%s3246_s17 + $0x90] sm:$0xf] }
  0x44   : > { %1463 = vrot.lane.b32.xlu1 %v2848_v8, %s3208_s23  ;;  %v628_v8 = vshll.u32 %v3443_v59, 16  ;;  %v2778_v59 = vcombine.low %v228_v7, %v3460_v12  ;;  %v3537_v12 = vld [vmem:[%s3246_s17 + $0x94] sm:$0xf]  ;;  %v2665_v34 = vld [vmem:[%s3246_s17 + $0x24] sm:$0xe] }
  0x45   : > { %1447 = vrot.lane.b32.xlu0 %v2840_v24, %s3208_s23  ;;  %v621_v24 = vshrl.u32 %v3431_v50, 16  ;;  %v535_v1 = vsel %vm499_vm1, %v530_v41, %v534_v42  ;;  %v3551_v42 = vld [vmem:[%s3246_s17 + $0x8c] ss:$0 sps:$4 sm:$0x11]   ;;  %v2825_v7 = vcombine.low %v2665_v34, %v3527_v22  ;;  %v3584_v22 = vld [vmem:[%s3246_s17 + $0x94] sm:$0xf] }
  0x46   : > { %v630_v33 = vrot.slane %v628_v8, 1  ;;  %v547_v8 = vsel %vm499_vm1, %v542_v6, %v546_v57  ;;  %v782_v32 = vrot.slane %v2778_v59, 1  ;;  %v1141_v48 = vshll.u32 %v3551_v42, 16  ;;  %v189_v30 = vld [vmem:[%s3246_s17 + $0x48] sm:$0xf] }
  0x47   : > { %v626_v36 = vor.u32 %v625_v25, %v621_v24  ;;  %v2801_v24 = vcombine.low %v2635_v16, %v3521_v20  ;;  %v805_v25 = vsel %vm772_vm0, %v803_v40, %v804_v9  ;;  %v2833_v57 = vcombine.low %v2673_v54, %v3521_v20  ;;  %v2674_v9 = vld [vmem:[%s3246_s17 + $0x90] sm:$0xe]  ;;  %v3625_v54 = vld [vmem:[%s3246_s17 + $0xa4] ss:$0 sps:$4 sm:$0x11]  }
  0x48   : > { %1733 = vrot.lane.b32.xlu1 %v1632_v56, %s3209_s26  ;;  %v642_v56 = vrot.slane %v640_v51, 1  ;;  %v784_v13 = vsel %vm772_vm0, %v782_v32, %v783_v2  ;;  %v3561_v51 = vld [vmem:[%s3246_s17 + $0x98] ss:$0 sps:$4 sm:$0x11]   ;;  %v2666_v40 = vld [vmem:[%s3246_s17 + $0x30] sm:$0xe] }
  0x49   : > { %1717 = vrot.lane.b32.xlu0 %v1536_v3, %s3209_s26  ;;  %v631_v47 = vsel %vm499_vm1, %v626_v36, %v630_v33  ;;  %v1802_v3 = vsel %vm772_vm0, %v1800_v45, %v1801_v46  ;;  %v2621_v33 = vld [vmem:[%s3246_s17 + $0x30] sm:$0xf]  ;;  %v1136_v36 = vshll.u32 %v2801_v24, 16  ;;  %v1134_v44 = vshrl.u32 %v2801_v24, 16  ;;  %v3597_v32 = vld [vmem:[%s3246_s17 + $0xa0] sm:$0xf] }
  0x4a   : > { %v643_v39 = vsel %vm499_vm1, %v638_v4, %v642_v56  ;;  %v1038_v46 = vshrl.u32 %v2793_v28, 16  ;;  %v1153_v60 = vshll.u32 %v3561_v51, 16  ;;  %v1316_v59 = vrot.slane %v3551_v42, 1  ;;  %v3951_v26 = vld [vmem:[%s3246_s17 + $0x4c] sm:$0xf] }
  0x4b   : > { %v1138_v45 = vrot.slane %v1136_v36, 1  ;;  %v3603_v36 = vld [vmem:[%s3246_s17 + $0x40] sm:$0xf] }
  0x4c   : > { %1735 = vrot.lane.b32.xlu1 %v1644_v15, %s3209_s26  ;;  %v779_v15 = vrot.slane %v2777_v61, 1  ;;  %v1047_v61 = vrot.slane %v1045_v52, 1 }
  0x4d   : > { %1719 = vrot.lane.b32.xlu0 %v1548_v21, %s3209_s26  ;;  %v807_v21 = vrot.slane %v3485_v37, 1  ;;  %v2802_v37 = vcombine.low %v2637_v29, %v3537_v12  ;;  %v1139_v11 = vor.u32 %v1138_v45, %v1134_v44  ;;  %v3593_v29 = vld [vmem:[%s3246_s17 + $0x34] sm:$0xf] }
  0x4e   : > { %v781_v27 = vsel %vm772_vm0, %v779_v15, %v780_v10 }
  0x4f   : > { %v808_v5 = vsel %vm772_vm0, %v806_v63, %v807_v21  ;;  %v1148_v43 = vshll.u32 %v2802_v37, 16  ;;  %v1146_v55 = vshrl.u32 %v2802_v37, 16  ;;  %v2834_v63 = vcombine.low %v2674_v9, %v3537_v12  ;;  %v2685_v12 = vld [vmem:[%s3246_s17 + $0x3c] sm:$0xf]  ;;  %v201_v9 = vld [vmem:[%s3246_s17 + $0x90] sm:$0xf] }
  0x50   : > { %1861 = vrot.lane.b32.xlu1 %v1823_v35, %s3210_s27  ;;  %v3543_v35 = vld [vmem:[%s3246_s17 + $0x34] sm:$0xf]  ;;  %v1291_v21 = vrot.slane %v2825_v7, 1 }
  0x51   : > { %1845 = vrot.lane.b32.xlu0 %v1799_v17, %s3210_s27  ;;  %v1040_v17 = vshll.u32 %v2793_v28, 16  ;;  %v2794_v41 = vcombine.low %v2621_v33, %v3543_v35  ;;  %v1150_v56 = vrot.slane %v1148_v43, 1  ;;  %v2826_v2 = vcombine.low %v2666_v40, %v3543_v35  ;;  %v185_v40 = vld [vmem:[%s3246_s17 + $0x30] sm:$0xf] }
  0x52   : > { %v1319_v35 = vrot.slane %v3561_v51, 1 }
  0x53   : > { %v1042_v49 = vrot.slane %v1040_v17, 1  ;;  %v1050_v62 = vshrl.u32 %v2794_v41, 16  ;;  %v1151_v14 = vor.u32 %v1150_v56, %v1146_v55  ;;  %v1294_v43 = vrot.slane %v2826_v2, 1 }
  0x54   : > { %712 = vrot.lane.b32.xlu1 %v631_v47, %s3205_s20  ;;  %v1052_v47 = vshll.u32 %v2794_v41, 16 }
  0x55   : > { %696 = vrot.lane.b32.xlu0 %v535_v1, %s3205_s20  ;;  %v3565_v1 = vld [vmem:[%s3246_s17 + $0x38] ss:$0 sps:$4 sm:$0x11]   ;;  %v1043_v4 = vor.u32 %v1042_v49, %v1038_v46 }
  0x56   : > { %v1057_v6 = vshll.u32 %v3565_v1, 16  ;;  %v1295_v44 = vrot.slane %v3565_v1, 1  ;;  %v3616_v46 = vld [vmem:[%s3246_s17 + $0x98] ss:$0 sps:$4 sm:$0x11]  }
  0x57   : > { %v1048_v15 = vsel %vm499_vm1, %v1043_v4, %v1047_v61  ;;  %v2737_v1 = vld [vmem:[%s3246_s17 + $0x90] sm:$0xe] }
  0x58   : > { %1863 = vrot.lane.b32.xlu1 %v1826_v58, %s3210_s27  ;;  %v1143_v58 = vrot.slane %v1141_v48, 1  ;;  %v1059_v20 = vrot.slane %v1057_v6, 1  ;;  %v3620_v48 = vld [vmem:[%s3246_s17 + $0x38] ss:$0 sps:$4 sm:$0x11]   ;;  %v1665_v6 = vshll.u32 %v3625_v54, 16 }
  0x59   : > { %1847 = vrot.lane.b32.xlu0 %v1802_v3, %s3210_s27  ;;  %v1054_v3 = vrot.slane %v1052_v47, 1 }
  0x5a   : > { %v1144_v10 = vsel %vm499_vm1, %v1139_v11, %v1143_v58  ;;  %v1296_v11 = vsel %vm772_vm0, %v1294_v43, %v1295_v44  ;;  %v1653_v58 = vshll.u32 %v3616_v46, 16  ;;  %v1828_v44 = vrot.slane %v3616_v46, 1 }
  0x5b   : > { %v1055_v16 = vor.u32 %v1054_v3, %v1050_v62  ;;  %v3633_v62 = vld [vmem:[%s3246_s17 + $0x44] ss:$0 sps:$4 sm:$0x11]  }
  0x5c   : > { %714 = vrot.lane.b32.xlu1 %v643_v39, %s3205_s20  ;;  %v1155_v39 = vrot.slane %v1153_v60, 1  ;;  %v1557_v60 = vshll.u32 %v3620_v48, 16 }
  0x5d   : > { %698 = vrot.lane.b32.xlu0 %v547_v8, %s3205_s20  ;;  %v1315_v8 = vrot.slane %v2833_v57, 1  ;;  %v1060_v33 = vsel %vm499_vm1, %v1055_v16, %v1059_v20  ;;  %v3154_v16 = vld [vmem:[%s4567_s1 + $0x8] sm:$0x3f]   ;;  %v1569_v20 = vshll.u32 %v3633_v62, 16 }
  0x60   : > { %841 = vrot.lane.b32.xlu1 %v805_v25, %s3204_s19  ;;  %v2683_v25 = vld [vmem:[%s3246_s17 + $0x30] sm:$0xf] }
  0x61   : > { %825 = vrot.lane.b32.xlu0 %v781_v27, %s3204_s19  ;;  %v2701_v27 = vld [vmem:[%s3246_s17 + $0x9c] sm:$0xf]  ;;  %v2841_v17 = vcombine.low %v2683_v25, %v3593_v29 }
  0x62   : > { %v2850_v42 = vcombine.low %v2701_v27, %v3597_v32 }
  0x63   : > { %v1552_v47 = vshll.u32 %v2841_v17, 16  ;;  %v1550_v4 = vshrl.u32 %v2841_v17, 16 }
  0x64   : > { %843 = vrot.lane.b32.xlu1 %v808_v5, %s3204_s19  ;;  %v1318_v5 = vrot.slane %v2834_v63, 1  ;;  %v1660_v51 = vshll.u32 %v2850_v42, 16  ;;  %v1658_v61 = vshrl.u32 %v2850_v42, 16 }
  0x65   : > { %827 = vrot.lane.b32.xlu0 %v784_v13, %s3204_s19  ;;  %v2842_v13 = vcombine.low %v2685_v12, %v3603_v36  ;;  %v1554_v56 = vrot.slane %v1552_v47, 1  ;;  %v1667_v12 = vrot.slane %v1665_v6, 1  ;;  %v203_v47 = vld [vmem:[%s3246_s17 + $0x9c] sm:$0xf] }
  0x66   : > { %v1320_v49 = vsel %vm772_vm0, %v1318_v5, %v1319_v35  ;;  %v1662_v3 = vrot.slane %v1660_v51, 1  ;;  %v1571_v5 = vrot.slane %v1569_v20, 1  ;;  %v3681_v51 = vld [vmem:[%s3246_s17 + $0x40] sm:$0xf] }
  0x67   : > { %v1564_v52 = vshll.u32 %v2842_v13, 16  ;;  %v1562_v57 = vshrl.u32 %v2842_v13, 16  ;;  %v3710_v20 = vld [vmem:[%s3246_s17 + $0xa4] ss:$0 sps:$4 sm:$0x11]  }
  0x68   : > { %953 = vrot.lane.b32.xlu1 %v2801_v24, %s3203_s18  ;;  %v1292_v24 = vrot.slane %v3555_v19, 1 }
  0x69   : > { %937 = vrot.lane.b32.xlu0 %v2793_v28, %s3203_s18  ;;  %v1156_v28 = vsel %vm499_vm1, %v1151_v14, %v1155_v39  ;;  %v1566_v7 = vrot.slane %v1564_v52, 1  ;;  %v3640_v14 = vld [vmem:[%s3246_s17 + $0x94] sm:$0xf]  ;;  %v2881_v39 = vcombine.low %v2737_v1, %v3584_v22  ;;  %v2738_v52 = vld [vmem:[%s3246_s17 + $0x9c] sm:$0xe] }
  0x6a   : > { %v1293_v19 = vsel %vm772_vm0, %v1291_v21, %v1292_v24  ;;  %v1555_v21 = vor.u32 %v1554_v56, %v1550_v4  ;;  %v1559_v24 = vrot.slane %v1557_v60, 1 }
  0x6b   : > { %v1827_v35 = vrot.slane %v2881_v39, 1 }
  0x6c   : > { %955 = vrot.lane.b32.xlu1 %v2802_v37, %s3203_s18  ;;  %v2849_v37 = vcombine.low %v2699_v0, %v3584_v22  ;;  %v3654_v0 = vcombine.low %v201_v9, %v3640_v14  ;;  %v3211_v22 = vmov 65535   ;;  %v2882_v9 = vcombine.low %v2738_v52, %v3597_v32 }
  0x6d   : > { %939 = vrot.lane.b32.xlu0 %v2794_v41, %s3203_s18  ;;  %v1317_v41 = vsel %vm772_vm0, %v1315_v8, %v1316_v59  ;;  %v1655_v59 = vrot.slane %v1653_v58, 1  ;;  %v2193_v63 = vsel %vm2191_vm2, 4294967295, %v3211_v22  ;;  %v1804_v58 = vrot.slane %v3620_v48, 1 }
  0x6e   : > { %v1648_v45 = vshll.u32 %v2849_v37, 16  ;;  %v1646_v55 = vshrl.u32 %v2849_v37, 16  ;;  %4578 = vst [vmem:[#allocation4_spill] sm:$0xff] %v3654_v0  ;;  %v645_v4 = vshrl.u32 %v3654_v0, 16  ;;  %v1829_v39 = vsel %vm772_vm0, %v1827_v35, %v1828_v44  ;;  %v237_v44 = vld [vmem:[%s3246_s17 + $0x90] sm:$0xe] }
  0x70   : > { %1225 = vrot.lane.b32.xlu1 %v1144_v10, %s3206_s21  ;;  %v1650_v34 = vrot.slane %v1648_v45, 1  ;;  %v2729_v10 = vld [vmem:[%s3246_s17 + $0x30] sm:$0xe] }
  0x71   : > { %1209 = vrot.lane.b32.xlu0 %v1048_v15, %s3206_s21  ;;  %v3645_v15 = vld [vmem:[%s3246_s17 + $0x34] sm:$0xf]  ;;  %v2873_v27 = vcombine.low %v2729_v10, %v3593_v29  ;;  %v647_v29 = vshll.u32 %v3654_v0, 16 }
  0x72   : > { %v1651_v8 = vor.u32 %v1650_v34, %v1646_v55  ;;  %v3657_v25 = vcombine.low %v185_v40, %v3645_v15 }
  0x73   : > { %v1803_v34 = vrot.slane %v2873_v27, 1  ;;  %v649_v56 = vrot.slane %v647_v29, 1  ;;  %v1831_v27 = vrot.slane %v3625_v54, 1 }
  0x74   : > { %1227 = vrot.lane.b32.xlu1 %v1156_v28, %s3206_s21  ;;  %4579 = vst [vmem:[#allocation5_spill] sm:$0xff] %v3657_v25  ;;  %v2194_v28 = vsel %vm2192_vm3, %v2193_v63, 0  ;;  %v551_v45 = vshll.u32 %v3657_v25, 16 }
  0x75   : > { %1211 = vrot.lane.b32.xlu0 %v1060_v33, %s3206_s21  ;;  %v2196_v2 = vand.u32 %v3154_v16, %v2194_v28  ;;  %v1663_v33 = vor.u32 %v1662_v3, %v1658_v61  ;;  %v549_v3 = vshrl.u32 %v3657_v25, 16  ;;  %v650_v40 = vor.u32 %v649_v56, %v645_v4  ;;  %v238_v56 = vld [vmem:[%s3246_s17 + $0x9c] sm:$0xe] }
  0x76   : > { %v553_v6 = vrot.slane %v551_v45, 1  ;;  %v1805_v22 = vsel %vm772_vm0, %v1803_v34, %v1804_v58  ;;  %v1830_v28 = vrot.slane %v2882_v9, 1  ;;  %v229_v45 = vld [vmem:[%s3246_s17 + $0x30] sm:$0xe] }
  0x77   : > { %2993 = vmatprep.subr.bf16.mxu0 %v2196_v2  ;;  %3028 = vmatprep.subr.bf16.mxu1 %v2196_v2  ;;  %v1668_v55 = vsel %vm499_vm1, %v1663_v33, %v1667_v12  ;;  %v1807_v33 = vrot.slane %v3633_v62, 1  ;;  %v2779_v4 = vcombine.low %v229_v45, %v3645_v15 }
  0x78   : > { %1353 = vrot.lane.b32.xlu1 %v1317_v41, %s3207_s22  ;;  %v1656_v41 = vsel %vm499_vm1, %v1651_v8, %v1655_v59  ;;  %2994 = vmatpush3.bf16.msra.mxu0 %v2196_v2  ;;  %v554_v63 = vor.u32 %v553_v6, %v549_v3  ;;  %v230_v3 = vld [vmem:[%s3246_s17 + $0x3c] sm:$0xe] }
  0x79   : > { %1337 = vrot.lane.b32.xlu0 %v1293_v19, %s3207_s22  ;;  %v1560_v19 = vsel %vm499_vm1, %v1555_v21, %v1559_v24  ;;  %3030 = vmatpush3.bf16.msra.mxu1 %v2196_v2  ;;  %v3717_v21 = vld [vmem:[%s3246_s17 + $0x44] ss:$0 sps:$4 sm:$0x11]   ;;  %v2639_v6 = vld [vmem:[%s3246_s17 + $0x9c] sm:$0xf] }
  0x7a   : > { %v568_v54 = vshll.u32 %v3717_v21, 16 }
  0x7c   : > { %1355 = vrot.lane.b32.xlu1 %v1320_v49, %s3207_s22  ;;  %v187_v49 = vld [vmem:[%s3246_s17 + $0x3c] sm:$0xf]  ;;  %v570_v58 = vrot.slane %v568_v54, 1 }
  0x7d   : > { %1339 = vrot.lane.b32.xlu0 %v1296_v11, %s3207_s22  ;;  %v2730_v11 = vld [vmem:[%s3246_s17 + $0x3c] sm:$0xe] }
  0x7e   : > { %v2874_v10 = vcombine.low %v2730_v11, %v3603_v36  ;;  %v2787_v11 = vcombine.low %v237_v44, %v3640_v14  ;;  %v3792_v44 = vld [vmem:[%s3246_s17 + $0xa4] ss:$0 sps:$4 sm:$0x11]  }
  0x80   : > { %1465 = vrot.lane.b32.xlu1 %v2849_v37, %s3208_s23  ;;  %v1567_v37 = vor.u32 %v1566_v7, %v1562_v57  ;;  %v3700_v7 = vcombine.low %v187_v49, %v3681_v51  ;;  %v1806_v2 = vrot.slane %v2874_v10, 1  ;;  %v809_v9 = vrot.slane %v2787_v11, 1 }
  0x81   : > { %1449 = vrot.lane.b32.xlu0 %v2841_v17, %s3208_s23  ;;  %v3662_v17 = vld [vmem:[%s3246_s17 + $0x98] ss:$0 sps:$4 sm:$0x11]  }
  0x82   : > { %v1572_v46 = vsel %vm499_vm1, %v1567_v37, %v1571_v5  ;;  %v652_v60 = vshll.u32 %v3662_v17, 16  ;;  %4581 = vst [vmem:[#allocation7_spill] sm:$0xff] %v3700_v7  ;;  %v563_v36 = vshll.u32 %v3700_v7, 16  ;;  %v561_v29 = vshrl.u32 %v3700_v7, 16 }
  0x83   : > { %v810_v15 = vrot.slane %v3662_v17, 1 }
  0x84   : > { %1467 = vrot.lane.b32.xlu1 %v2850_v42, %s3208_s23  ;;  %v3668_v42 = vld [vmem:[%s3246_s17 + $0x38] ss:$0 sps:$4 sm:$0x11]   ;;  %v654_v16 = vrot.slane %v652_v60, 1 }
  0x85   : > { %1451 = vrot.lane.b32.xlu0 %v2842_v13, %s3208_s23  ;;  %v3677_v13 = vld [vmem:[%s3246_s17 + $0xa0] sm:$0xf]  ;;  %v556_v57 = vshll.u32 %v3668_v42, 16 }
  0x86   : > { %v3695_v61 = vcombine.low %v203_v47, %v3677_v13  ;;  %v655_v12 = vsel %vm499_vm1, %v650_v40, %v654_v16  ;;  %v1832_v47 = vsel %vm772_vm0, %v1830_v28, %v1831_v27  ;;  %v2788_v10 = vcombine.low %v238_v56, %v3677_v13  ;;  %v2641_v13 = vld [vmem:[%s3246_s17 + $0xa8] sm:$0xf]  ;;  %v3772_v28 = vld [vmem:[%s3246_s17 + $0xac] sm:$0xf] }
  0x87   : > { %v558_v32 = vrot.slane %v556_v57, 1  ;;  %v3751_v57 = vld [vmem:[%s3246_s17 + $0xa0] sm:$0xf]  ;;  %v785_v16 = vrot.slane %v2779_v4, 1  ;;  %v811_v27 = vsel %vm772_vm0, %v809_v9, %v810_v15  ;;  %v2804_v54 = vcombine.low %v2641_v13, %v3772_v28 }
  0x88   : > { %v3671_v43 = vpop.permute.xlu1 %949  ;;  %1737 = vrot.lane.b32.xlu1 %v1656_v41, %s3209_s26  ;;  %4580 = vst [vmem:[#allocation6_spill] sm:$0xff] %v3695_v61  ;;  %v659_v8 = vshll.u32 %v3695_v61, 16  ;;  %v657_v37 = vshrl.u32 %v3695_v61, 16  ;;  %v664_v41 = vshll.u32 %v3710_v20, 16  ;;  %v2803_v17 = vcombine.low %v2639_v6, %v3751_v57 }
  0x89   : > { %v3686_v1 = vpop.permute.xlu0 %933  ;;  %1721 = vrot.lane.b32.xlu0 %v1560_v19, %s3209_s26  ;;  %v559_v35 = vsel %vm499_vm1, %v554_v63, %v558_v32  ;;  %v565_v19 = vrot.slane %v563_v36, 1  ;;  %v2623_v63 = vld [vmem:[%s3246_s17 + $0x3c] sm:$0xf]  ;;  %v3764_v32 = vld [vmem:[%s3246_s17 + $0x40] sm:$0xf] }
  0x8a   : > { %v661_v5 = vrot.slane %v659_v8, 1  ;;  %v666_v52 = vrot.slane %v664_v41, 1  ;;  %v786_v8 = vrot.slane %v3668_v42, 1  ;;  %v812_v42 = vrot.slane %v2788_v10, 1 }
  0x8b   : > { %v566_v34 = vor.u32 %v565_v19, %v561_v29  ;;  %v1160_v19 = vshll.u32 %v2803_v17, 16  ;;  %v3814_v10 = vld [vmem:[%s3246_s17 + $0x50] ss:$0 sps:$4 sm:$0x11]  }
  0x8c   : > { %v3702_v48 = vpop.permute.xlu1 %837  ;;  %1739 = vrot.lane.b32.xlu1 %v1668_v55, %s3209_s26  ;;  %v662_v49 = vor.u32 %v661_v5, %v657_v37  ;;  %v787_v5 = vsel %vm772_vm0, %v785_v16, %v786_v8  ;;  %v2675_v16 = vld [vmem:[%s3246_s17 + $0x9c] sm:$0xe] }
  0x8d   : > { %1723 = vrot.lane.b32.xlu0 %v1572_v46, %s3209_s26  ;;  %v1808_v46 = vsel %vm772_vm0, %v1806_v2, %v1807_v33  ;;  %v571_v40 = vsel %vm499_vm1, %v566_v34, %v570_v58  ;;  %v2795_v2 = vcombine.low %v2623_v63, %v3764_v32  ;;  %v2625_v33 = vld [vmem:[%s3246_s17 + $0x48] sm:$0xf]  ;;  %v1158_v34 = vshrl.u32 %v2803_v17, 16  ;;  %v2667_v63 = vld [vmem:[%s3246_s17 + $0x3c] sm:$0xe] }
  0x8e   : > { %v3713_v59 = vpop.permute.xlu0 %821  ;;  %v667_v14 = vsel %vm499_vm1, %v662_v49, %v666_v52  ;;  %v3800_v52 = vld [vmem:[%s3246_s17 + $0x44] ss:$0 sps:$4 sm:$0x11]   ;;  %v1162_v58 = vrot.slane %v1160_v19, 1  ;;  %v2835_v19 = vcombine.low %v2675_v16, %v3751_v57  ;;  %v2668_v57 = vld [vmem:[%s3246_s17 + $0x48] sm:$0xe] }
  0x8f   : > { %v1062_v4 = vshrl.u32 %v2795_v2, 16  ;;  %v1069_v15 = vshll.u32 %v3800_v52, 16  ;;  %v1322_v16 = vrot.slane %v3792_v44, 1 }
  0x90   : > { %1865 = vrot.lane.b32.xlu1 %v1829_v39, %s3210_s27  ;;  %v1163_v8 = vor.u32 %v1162_v58, %v1158_v34 }
  0x91   : > { %v3721_v24 = vpop.permute.xlu1 %839  ;;  %1849 = vrot.lane.b32.xlu0 %v1805_v22, %s3210_s27  ;;  %v2780_v22 = vcombine.low %v230_v3, %v3681_v51  ;;  %v813_v51 = vrot.slane %v3710_v20, 1  ;;  %v1165_v3 = vshll.u32 %v3792_v44, 16 }
  0x93   : > { %v3733_v62 = vpop.permute.xlu0 %823  ;;  %v788_v41 = vrot.slane %v2780_v22, 1  ;;  %v814_v45 = vsel %vm772_vm0, %v812_v42, %v813_v51  ;;  %v1170_v22 = vshrl.u32 %v2804_v54, 16  ;;  %v1167_v13 = vrot.slane %v1165_v3, 1 }
  0x94   : > { %716 = vrot.lane.b32.xlu1 %v655_v12, %s3205_s20  ;;  %v3780_v12 = vld [vmem:[%s3246_s17 + $0x4c] sm:$0xf] }
  0x95   : > { %700 = vrot.lane.b32.xlu0 %v559_v35, %s3205_s20  ;;  %v789_v35 = vrot.slane %v3717_v21, 1  ;;  %v2796_v20 = vcombine.low %v2625_v33, %v3780_v12  ;;  %v1168_v34 = vsel %vm499_vm1, %v1163_v8, %v1167_v13  ;;  %v2687_v8 = vld [vmem:[%s3246_s17 + $0x48] sm:$0xf] }
  0x96   : > { %v3740_v55 = vpop.permute.xlu1 %694 }
  0x97   : > { %v3745_v60 = vpop.permute.xlu0 %692  ;;  %v790_v21 = vsel %vm772_vm0, %v788_v41, %v789_v35  ;;  %v1076_v56 = vshll.u32 %v2796_v20, 16  ;;  %v1074_v41 = vshrl.u32 %v2796_v20, 16 }
  0x98   : > { %1867 = vrot.lane.b32.xlu1 %v1832_v47, %s3210_s27  ;;  %v1064_v47 = vshll.u32 %v2795_v2, 16 }
  0x99   : > { %1851 = vrot.lane.b32.xlu0 %v1808_v46, %s3210_s27  ;;  %v1172_v46 = vshll.u32 %v2804_v54, 16  ;;  %v1078_v35 = vrot.slane %v1076_v56, 1 }
  0x9a   : > { %v3757_v39 = vpop.permute.xlu1 %710  ;;  %v1066_v6 = vrot.slane %v1064_v47, 1  ;;  %v2703_v47 = vld [vmem:[%s3246_s17 + $0xa8] sm:$0xf] }
  0x9b   : > { %v3766_v36 = vpop.permute.xlu0 %708  ;;  %v1174_v42 = vrot.slane %v1172_v46, 1  ;;  %v2676_v46 = vld [vmem:[%s3246_s17 + $0xa8] sm:$0xe] }
  0x9c   : > { %718 = vrot.lane.b32.xlu1 %v667_v14, %s3205_s20  ;;  %v3808_v14 = vld [vmem:[%s3246_s17 + $0xb0] ss:$0 sps:$4 sm:$0x11]  }
  0x9d   : > { %702 = vrot.lane.b32.xlu0 %v571_v40, %s3205_s20  ;;  %v1177_v51 = vshll.u32 %v3808_v14, 16  ;;  %v1175_v58 = vor.u32 %v1174_v42, %v1170_v22  ;;  %v3850_v22 = vld [vmem:[%s3246_s17 + $0x4c] sm:$0xf]  ;;  %v2705_v42 = vld [vmem:[%s3246_s17 + $0xb4] sm:$0xf] }
  0x9e   : > { %v3782_v37 = vpop.permute.xlu1 %951 }
  0x9f   : > { %v3786_v29 = vpop.permute.xlu0 %935 }
  0xa0   : > { %845 = vrot.lane.b32.xlu1 %v811_v27, %s3204_s19  ;;  %v1067_v27 = vor.u32 %v1066_v6, %v1062_v4  ;;  %v1179_v4 = vrot.slane %v1177_v51, 1  ;;  %v1079_v6 = vor.u32 %v1078_v35, %v1074_v41  ;;  %v3857_v51 = vld [vmem:[%s3246_s17 + $0xb8] sm:$0xf]  ;;  %v2689_v41 = vld [vmem:[%s3246_s17 + $0x54] sm:$0xf] }
  0xa1   : > { %829 = vrot.lane.b32.xlu0 %v787_v5, %s3204_s19  ;;  %v1071_v5 = vrot.slane %v1069_v15, 1 }
  0xa2   : > { %v3796_v49 = vpop.permute.xlu1 %1221  ;;  %v1180_v44 = vsel %vm499_vm1, %v1175_v58, %v1179_v4  ;;  %v1325_v4 = vrot.slane %v3808_v14, 1 }
  0xa3   : > { %v3802_v11 = vpop.permute.xlu0 %1205  ;;  %v1072_v3 = vsel %vm499_vm1, %v1067_v27, %v1071_v5  ;;  %v1298_v27 = vrot.slane %v3800_v52, 1  ;;  %v2828_v5 = vcombine.low %v2668_v57, %v3780_v12  ;;  %v3871_v52 = vld [vmem:[%s3246_s17 + $0x58] sm:$0xf] }
  0xa4   : > { %847 = vrot.lane.b32.xlu1 %v814_v45, %s3204_s19 }
  0xa5   : > { %831 = vrot.lane.b32.xlu0 %v790_v21, %s3204_s19  ;;  %v2827_v21 = vcombine.low %v2667_v63, %v3764_v32  ;;  %v2836_v63 = vcombine.low %v2676_v46, %v3772_v28  ;;  %v1300_v57 = vrot.slane %v2828_v5, 1  ;;  %v1879_v5 = vsel %vm1877_vm4, %v3283_v23, %v3745_v60 }
  0xa6   : > { %v3810_v9 = vpop.permute.xlu1 %1223 }
  0xa7   : > { %v3816_v40 = vpop.permute.xlu0 %1207  ;;  %v1297_v13 = vrot.slane %v2827_v21, 1  ;;  %v3879_v21 = vcombine.low %v2705_v42, %v3857_v51  ;;  %v1324_v58 = vrot.slane %v2836_v63, 1  ;;  %v3906_v42 = vld [vmem:[%s3246_s17 + $0xbc] ss:$0 sps:$4 sm:$0x11]  }
  0xa8   : > { %957 = vrot.lane.b32.xlu1 %v2803_v17, %s3203_s18  ;;  %v1081_v17 = vshll.u32 %v3814_v10, 16 }
  0xa9   : > { %941 = vrot.lane.b32.xlu0 %v2795_v2, %s3203_s18  ;;  %v3831_v2 = vld [vmem:[%s3246_s17 + $0xac] sm:$0xf] }
  0xaa   : > { %v3823_v33 = vpop.permute.xlu1 %1349  ;;  %v1083_v32 = vrot.slane %v1081_v17, 1 }
  0xab   : > { %v3827_v45 = vpop.permute.xlu0 %1333 }
  0xac   : > { %959 = vrot.lane.b32.xlu1 %v2804_v54, %s3203_s18  ;;  %v3843_v54 = vcombine.low %v2703_v47, %v3831_v2  ;;  %v1084_v17 = vsel %vm499_vm1, %v1079_v6, %v1083_v32  ;;  %v3874_v47 = vld [vmem:[%s3246_s17 + $0xb0] ss:$0 sps:$4 sm:$0x11]   ;;  %v3888_v6 = vcombine.low %v2689_v41, %v3871_v52 }
  0xad   : > { %943 = vrot.lane.b32.xlu0 %v2796_v20, %s3203_s18  ;;  %v1321_v20 = vrot.slane %v2835_v19, 1  ;;  %v3868_v19 = vcombine.low %v2687_v8, %v3850_v22  ;;  %v1677_v63 = vshll.u32 %v3874_v47, 16 }
  0xae   : > { %v3839_v56 = vpop.permute.xlu1 %1351  ;;  %v1672_v28 = vshll.u32 %v3843_v54, 16 }
  0xaf   : > { %v3845_v15 = vpop.permute.xlu0 %1335  ;;  %v1323_v46 = vsel %vm772_vm0, %v1321_v20, %v1322_v16  ;;  %v1576_v8 = vshll.u32 %v3868_v19, 16  ;;  %v1670_v20 = vshrl.u32 %v3843_v54, 16  ;;  %v1679_v61 = vrot.slane %v1677_v63, 1 }
  0xb0   : > { %1229 = vrot.lane.b32.xlu1 %v1168_v34, %s3206_s21  ;;  %v1299_v34 = vsel %vm772_vm0, %v1297_v13, %v1298_v27  ;;  %v1674_v16 = vrot.slane %v1672_v28, 1  ;;  %v3899_v13 = vld [vmem:[%s3246_s17 + $0x50] ss:$0 sps:$4 sm:$0x11]   ;;  %v1895_v27 = vsel %vm1877_vm4, %v3278_v18, %v3766_v36  ;;  %v1588_v18 = vshll.u32 %v3888_v6, 16 }
  0xb1   : > { %1213 = vrot.lane.b32.xlu0 %v1072_v3, %s3206_s21  ;;  %v1301_v3 = vrot.slane %v3814_v10, 1  ;;  %v1684_v10 = vshll.u32 %v3879_v21, 16  ;;  %v3917_v36 = vld [vmem:[%s3246_s17 + $0x5c] ss:$0 sps:$4 sm:$0x11]   ;;  %v1574_v25 = vshrl.u32 %v3868_v19, 16  ;;  %v1928_v23 = vsel %vm1910_vm5, %v1895_v27, %v3702_v48 }
  0xb2   : > { %v3863_v35 = vpop.permute.xlu1 %1461  ;;  %v1675_v7 = vor.u32 %v1674_v16, %v1670_v20  ;;  %v1578_v0 = vrot.slane %v1576_v8, 1  ;;  %v1586_v8 = vshrl.u32 %v3888_v6, 16  ;;  %v1590_v16 = vrot.slane %v1588_v18, 1 }
  0xb3   : > { %v3876_v12 = vpop.permute.xlu0 %1445  ;;  %v1302_v41 = vsel %vm772_vm0, %v1300_v57, %v1301_v3  ;;  %v1912_v57 = vsel %vm1910_vm5, %v1879_v5, %v3713_v59  ;;  %v1689_v3 = vshll.u32 %v3906_v42, 16  ;;  %v1593_v63 = vshll.u32 %v3917_v36, 16  ;;  %v3936_v59 = vld [vmem:[%s3246_s17 + $0xac] sm:$0xf] }
  0xb4   : > { %1231 = vrot.lane.b32.xlu1 %v1180_v44, %s3206_s21  ;;  %v1326_v44 = vsel %vm772_vm0, %v1324_v58, %v1325_v4  ;;  %v1682_v58 = vshrl.u32 %v3879_v21, 16  ;;  %v1686_v4 = vrot.slane %v1684_v10, 1  ;;  %v205_v10 = vld [vmem:[%s3246_s17 + $0xa8] sm:$0xf]  ;;  %v1961_v27 = vsel %vm1943_vm6, %v1928_v23, %v3671_v43 }
  0xb5   : > { %1215 = vrot.lane.b32.xlu0 %v1084_v17, %s3206_s21  ;;  %v2739_v17 = vld [vmem:[%s3246_s17 + $0xa8] sm:$0xe] }
  0xb6   : > { %v3890_v32 = vpop.permute.xlu1 %1463  ;;  %v2883_v48 = vcombine.low %v2739_v17, %v3831_v2  ;;  %v1994_v2 = vsel %vm1976_vm7, %v1961_v27, %v3796_v49  ;;  %v1591_v49 = vor.u32 %v1590_v16, %v1586_v8  ;;  %v4012_v16 = vld [vmem:[%s3246_s17 + $0xb8] sm:$0xf]  ;;  %v191_v27 = vld [vmem:[%s3246_s17 + $0x54] sm:$0xf] }
  0xb7   : > { %v3895_v14 = vpop.permute.xlu0 %1447 }
  0xb8   : > { %1357 = vrot.lane.b32.xlu1 %v1323_v46, %s3207_s22  ;;  %v2731_v46 = vld [vmem:[%s3246_s17 + $0x48] sm:$0xe] }
  0xb9   : > { %1341 = vrot.lane.b32.xlu0 %v1299_v34, %s3207_s22  ;;  %v1581_v34 = vshll.u32 %v3899_v13, 16  ;;  %v2875_v20 = vcombine.low %v2731_v46, %v3850_v22  ;;  %v1945_v22 = vsel %vm1943_vm6, %v1912_v57, %v3686_v1  ;;  %v1687_v46 = vor.u32 %v1686_v4, %v1682_v58 }
  0xba   : > { %v1734_v28 = vpop.permute.xlu1 %1733  ;;  %v1978_v43 = vsel %vm1976_vm7, %v1945_v22, %v3802_v11  ;;  %v1595_v11 = vrot.slane %v1593_v63, 1  ;;  %v1810_v57 = vrot.slane %v3899_v13, 1 }
  0xbb   : > { %v1718_v60 = vpop.permute.xlu0 %1717  ;;  %v1583_v18 = vrot.slane %v1581_v34, 1  ;;  %v2011_v1 = vsel %vm2009_vm8, %v1978_v43, %v3827_v45  ;;  %v3975_v45 = vcombine.low %v189_v30, %v3951_v26  ;;  %v1834_v30 = vrot.slane %v3874_v47, 1  ;;  %v2740_v43 = vld [vmem:[%s3246_s17 + $0xb4] sm:$0xe] }
  0xbc   : > { %1359 = vrot.lane.b32.xlu1 %v1326_v44, %s3207_s22  ;;  %v1680_v44 = vsel %vm499_vm1, %v1675_v7, %v1679_v61  ;;  %v2027_v61 = vsel %vm2009_vm8, %v1994_v2, %v3823_v33  ;;  %v1897_v33 = vsel %vm1877_vm4, %v3290_v31, %v3757_v39  ;;  %v1833_v31 = vrot.slane %v2883_v48, 1  ;;  %v3983_v39 = vld [vmem:[%s3246_s17 + $0xb0] ss:$0 sps:$4 sm:$0x11]  }
  0xbd   : > { %1343 = vrot.lane.b32.xlu0 %v1302_v41, %s3207_s22  ;;  %v1579_v41 = vor.u32 %v1578_v0, %v1574_v25  ;;  %v1691_v0 = vrot.slane %v1689_v3, 1  ;;  %v3960_v25 = vcombine.low %v205_v10, %v3936_v59  ;;  %v2060_v7 = vsel %vm2042_vm9, %v2027_v61, %v3863_v35  ;;  %v2732_v61 = vld [vmem:[%s3246_s17 + $0x54] sm:$0xe] }
  0xbe   : > { %v3940_v5 = vpop.permute.xlu1 %1735  ;;  %v2093_v23 = vsel %vm2075_vm10, %v2060_v7, %v1734_v28  ;;  %v1881_v35 = vsel %vm1877_vm4, %v3296_v38, %v3740_v55  ;;  %v1809_v38 = vrot.slane %v2875_v20, 1  ;;  %v3992_v28 = vld [vmem:[%s3246_s17 + $0x50] ss:$0 sps:$4 sm:$0x11]   ;;  %v575_v48 = vshll.u32 %v3975_v45, 16 }
  0xbf   : > { %v3947_v17 = vpop.permute.xlu0 %1719  ;;  %v671_v55 = vshll.u32 %v3960_v25, 16  ;;  %v1692_v47 = vsel %vm499_vm1, %v1687_v46, %v1691_v0  ;;  %v1914_v8 = vsel %vm1910_vm5, %v1881_v35, %v3733_v62  ;;  %v207_v20 = vld [vmem:[%s3246_s17 + $0xb4] sm:$0xf]  ;;  %v669_v62 = vshrl.u32 %v3960_v25, 16 }
  0xc0   : > { %1469 = vrot.lane.b32.xlu1 %v3843_v54, %s3208_s23  ;;  %v2044_v54 = vsel %vm2042_vm9, %v2011_v1, %v3876_v12  ;;  %v1947_v13 = vsel %vm1943_vm6, %v1914_v8, %v3786_v29  ;;  %v676_v10 = vshll.u32 %v3983_v39, 16  ;;  %v4041_v0 = vcombine.low %v207_v20, %v4012_v16 }
  0xc1   : > { %1453 = vrot.lane.b32.xlu0 %v3868_v19, %s3208_s23  ;;  %v2077_v19 = vsel %vm2075_vm10, %v2044_v54, %v1718_v60  ;;  %v1930_v60 = vsel %vm1910_vm5, %v1897_v33, %v3721_v24  ;;  %v1980_v2 = vsel %vm1976_vm7, %v1947_v13, %v3816_v40  ;;  %v673_v29 = vrot.slane %v671_v55, 1 }
  0xc2   : > { %v1862_v34 = vpop.permute.xlu1 %1861  ;;  %v1963_v3 = vsel %vm1943_vm6, %v1930_v60, %v3782_v37  ;;  %v573_v40 = vshrl.u32 %v3975_v45, 16  ;;  %v2884_v33 = vcombine.low %v2740_v43, %v3857_v51  ;;  %v683_v51 = vshll.u32 %v4041_v0, 16  ;;  %v240_v43 = vld [vmem:[%s3246_s17 + $0xb4] sm:$0xe] }
  0xc3   : > { %v1846_v58 = vpop.permute.xlu0 %1845  ;;  %v2126_v4 = vsel %vm2108_vm11, %v2093_v23, %v1862_v34  ;;  %v1996_v37 = vsel %vm1976_vm7, %v1963_v3, %v3810_v9  ;;  %v580_v9 = vshll.u32 %v3992_v28, 16  ;;  %v678_v23 = vrot.slane %v676_v10, 1  ;;  %v4062_v34 = vld [vmem:[%s3246_s17 + $0xbc] ss:$0 sps:$4 sm:$0x11]  }
  0xc4   : > { %1471 = vrot.lane.b32.xlu1 %v3879_v21, %s3208_s23  ;;  %v2110_v12 = vsel %vm2108_vm11, %v2077_v19, %v1846_v58  ;;  %3011 = vmatprep.mubr.msk.bf16.mxu1 %vm2158_vm12, %v2126_v4  ;;  %v1584_v21 = vsel %vm499_vm1, %v1579_v41, %v1583_v18  ;;  %v4024_v41 = vld [vmem:[%s3246_s17 + $0x58] sm:$0xf]  ;;  %v2029_v22 = vsel %vm2009_vm8, %v1996_v37, %v3839_v56  ;;  %v4069_v4 = vld [vmem:[%s3246_s17 + $0x5c] ss:$0 sps:$4 sm:$0x11]   ;;  %v688_v3 = vshll.u32 %v4062_v34, 16 }
  0xc5   : > { %1455 = vrot.lane.b32.xlu0 %v3888_v6, %s3208_s23  ;;  %2995 = vmatprep.mubr.msk.bf16.mxu0 %vm2158_vm12, %v2110_v12  ;;  %v1596_v6 = vsel %vm499_vm1, %v1591_v49, %v1595_v11  ;;  %v2013_v18 = vsel %vm2009_vm8, %v1980_v2, %v3845_v15  ;;  %v2062_v46 = vsel %vm2042_vm9, %v2029_v22, %v3890_v32  ;;  %v577_v15 = vrot.slane %v575_v48, 1  ;;  %v231_v37 = vld [vmem:[%s3246_s17 + $0x48] sm:$0xe] }
  0xc6   : > { %v4006_v24 = vpop.permute.xlu1 %712  ;;  %v2046_v56 = vsel %vm2042_vm9, %v2013_v18, %v3895_v14  ;;  %v4048_v32 = vcombine.low %v191_v27, %v4024_v41  ;;  %v2876_v14 = vcombine.low %v2732_v61, %v3871_v52  ;;  %v1811_v52 = vsel %vm772_vm0, %v1809_v38, %v1810_v57 }
  0xc7   : > { %v4018_v63 = vpop.permute.xlu0 %696  ;;  %v2079_v7 = vsel %vm2075_vm10, %v2046_v56, %v3947_v17  ;;  %v674_v17 = vor.u32 %v673_v29, %v669_v62  ;;  %v578_v19 = vor.u32 %v577_v15, %v573_v40  ;;  %v582_v58 = vrot.slane %v580_v9, 1  ;;  %v232_v40 = vld [vmem:[%s3246_s17 + $0x54] sm:$0xe] }
  0xc8   : > { %1741 = vrot.lane.b32.xlu1 %v1680_v44, %s3209_s26  ;;  %v2095_v44 = vsel %vm2075_vm10, %v2062_v46, %v3940_v5  ;;  %v1835_v5 = vsel %vm772_vm0, %v1833_v31, %v1834_v30  ;;  %v587_v12 = vshll.u32 %v4048_v32, 16  ;;  %v1836_v31 = vrot.slane %v2884_v33, 1  ;;  %v2643_v33 = vld [vmem:[%s3246_s17 + $0xb4] sm:$0xf] }
  0xc9   : > { %1725 = vrot.lane.b32.xlu0 %v1584_v21, %s3209_s26  ;;  %v1837_v30 = vrot.slane %v3906_v42, 1  ;;  %v1812_v60 = vrot.slane %v2876_v14, 1  ;;  %v1813_v21 = vrot.slane %v3917_v36, 1  ;;  %v679_v38 = vsel %vm499_vm1, %v674_v17, %v678_v23  ;;  %v239_v36 = vld [vmem:[%s3246_s17 + $0xa8] sm:$0xe] }
  0xca   : > { %v1864_v1 = vpop.permute.xlu1 %1863  ;;  %v685_v57 = vrot.slane %v683_v51, 1  ;;  %v585_v48 = vshrl.u32 %v4048_v32, 16  ;;  %v589_v20 = vrot.slane %v587_v12, 1  ;;  %v592_v42 = vshll.u32 %v4069_v4, 16  ;;  %v4114_v14 = vld [vmem:[%s3246_s17 + $0xb8] sm:$0xf] }
  0xcb   : > { %v2128_v49 = vsel %vm2108_vm11, %v2095_v44, %v1864_v1  ;;  %v1848_v11 = vpop.permute.xlu0 %1847  ;;  %v1838_v62 = vsel %vm772_vm0, %v1836_v31, %v1837_v30  ;;  %v690_v27 = vrot.slane %v688_v3, 1  ;;  %v2789_v2 = vcombine.low %v239_v36, %v3936_v59  ;;  %v2645_v12 = vld [vmem:[%s3246_s17 + $0xc0] sm:$0xf]  ;;  %v4134_v31 = vld [vmem:[%s3246_s17 + $0xc4] sm:$0xf] }
  0xcc   : > { %v2112_v54 = vsel %vm2108_vm11, %v2079_v7, %v1848_v11  ;;  %1743 = vrot.lane.b32.xlu1 %v1692_v47, %s3209_s26  ;;  %3012 = vmatmul.mubr.msk.bf16.vlgmr.msra.gmra.mrb[0].mxu1 %vm2158_vm12, %v2128_v49  ;;  %v681_v47 = vshrl.u32 %v4041_v0, 16  ;;  %v1814_v29 = vsel %vm772_vm0, %v1812_v60, %v1813_v21  ;;  %v590_v9 = vor.u32 %v589_v20, %v585_v48  ;;  %v2629_v60 = vld [vmem:[%s3246_s17 + $0x60] sm:$0xf]  ;;  %v4140_v21 = vld [vmem:[%s3246_s17 + $0x64] sm:$0xf] }
  0xcd   : > { %1727 = vrot.lane.b32.xlu0 %v1596_v6, %s3209_s26  ;;  %2996 = vmatmul.mubr.msk.bf16.vlgmr.msra.gmra.mrb[0].mxu0 %vm2158_vm12, %v2112_v54  ;;  %v583_v6 = vsel %vm499_vm1, %v578_v19, %v582_v58  ;;  %v594_v18 = vrot.slane %v592_v42, 1  ;;  %v2781_v46 = vcombine.low %v231_v37, %v3951_v26  ;;  %v815_v56 = vrot.slane %v2789_v2, 1 }
  0xce   : > { %v4065_v35 = vpop.permute.xlu1 %714  ;;  %v686_v10 = vor.u32 %v685_v57, %v681_v47  ;;  %v816_v44 = vrot.slane %v3983_v39, 1  ;;  %v2790_v1 = vcombine.low %v240_v43, %v4012_v16  ;;  %v792_v49 = vrot.slane %v3992_v28, 1  ;;  %v4120_v39 = vld [vmem:[%s3246_s17 + $0x58] sm:$0xf] }
  0xcf   : > { %v4072_v55 = vpop.permute.xlu0 %698  ;;  %v595_v26 = vsel %vm499_vm1, %v590_v9, %v594_v18  ;;  %v791_v7 = vrot.slane %v2781_v46, 1  ;;  %v2782_v11 = vcombine.low %v232_v40, %v4024_v41  ;;  %v819_v41 = vrot.slane %v4062_v34, 1  ;;  %v4144_v34 = vld [vmem:[%s3246_s17 + $0xbc] ss:$0 sps:$4 sm:$0x11]  }
  0xd0   : > { %1869 = vrot.lane.b32.xlu1 %v1835_v5, %s3210_s27  ;;  %v691_v59 = vsel %vm499_vm1, %v686_v10, %v690_v27  ;;  %v2627_v5 = vld [vmem:[%s3246_s17 + $0x54] sm:$0xf]  ;;  %v817_v28 = vsel %vm772_vm0, %v815_v56, %v816_v44  ;;  %v818_v16 = vrot.slane %v2790_v1, 1  ;;  %v2805_v17 = vcombine.low %v2643_v33, %v4114_v14  ;;  %v4150_v57 = vld [vmem:[%s3246_s17 + $0x5c] ss:$0 sps:$4 sm:$0x11]  }
  0xd1   : > { %1853 = vrot.lane.b32.xlu0 %v1811_v52, %s3210_s27  ;;  %v793_v51 = vsel %vm772_vm0, %v791_v7, %v792_v49  ;;  %v794_v52 = vrot.slane %v2782_v11, 1  ;;  %v795_v19 = vrot.slane %v4069_v4, 1  ;;  %v2797_v58 = vcombine.low %v2627_v5, %v4120_v39  ;;  %v4163_v27 = vld [vmem:[%s3246_s17 + $0xc8] ss:$0 sps:$4 sm:$0x11]  }
  0xd2   : > { %v4081_v8 = vpop.permute.xlu1 %841  ;;  %v2806_v4 = vcombine.low %v2645_v12, %v4134_v31  ;;  %v1184_v47 = vshll.u32 %v2805_v17, 16  ;;  %v2798_v48 = vcombine.low %v2629_v60, %v4140_v21  ;;  %v1182_v36 = vshrl.u32 %v2805_v17, 16  ;;  %v4168_v46 = vld [vmem:[%s3246_s17 + $0x68] ss:$0 sps:$4 sm:$0x11]  }
  0xd3   : > { %v4087_v13 = vpop.permute.xlu0 %825  ;;  %v1088_v20 = vshll.u32 %v2797_v58, 16  ;;  %v1189_v37 = vshll.u32 %v4144_v34, 16  ;;  %v1093_v10 = vshll.u32 %v4150_v57, 16  ;;  %v1086_v9 = vshrl.u32 %v2797_v58, 16 }
  0xd4   : > { %720 = vrot.lane.b32.xlu1 %v679_v38, %s3205_s20  ;;  %v820_v38 = vsel %vm772_vm0, %v818_v16, %v819_v41  ;;  %v1196_v2 = vshll.u32 %v2806_v4, 16  ;;  %v1100_v43 = vshll.u32 %v2798_v48, 16  ;;  %v1194_v56 = vshrl.u32 %v2806_v4, 16  ;;  %v2677_v16 = vld [vmem:[%s3246_s17 + $0xb4] sm:$0xe] }
  0xd5   : > { %704 = vrot.lane.b32.xlu0 %v583_v6, %s3205_s20  ;;  %v796_v6 = vsel %vm772_vm0, %v794_v52, %v795_v19  ;;  %v1090_v18 = vrot.slane %v1088_v20, 1  ;;  %v1095_v1 = vrot.slane %v1093_v10, 1  ;;  %v1201_v7 = vshll.u32 %v4163_v27, 16 }
  0xd6   : > { %v4094_v22 = vpop.permute.xlu1 %843  ;;  %v1098_v33 = vshrl.u32 %v2798_v48, 16  ;;  %v1102_v5 = vrot.slane %v1100_v43, 1  ;;  %v1328_v10 = vrot.slane %v4144_v34, 1  ;;  %v2709_v34 = vld [vmem:[%s3246_s17 + $0xcc] sm:$0xf] }
  0xd7   : > { %v4099_v61 = vpop.permute.xlu0 %827  ;;  %v1091_v11 = vor.u32 %v1090_v18, %v1086_v9  ;;  %v1203_v19 = vrot.slane %v1201_v7, 1  ;;  %v4205_v9 = vld [vmem:[%s3246_s17 + $0x64] sm:$0xf]  ;;  %v4219_v7 = vld [vmem:[%s3246_s17 + $0xd0] sm:$0xf] }
  0xd8   : > { %1871 = vrot.lane.b32.xlu1 %v1838_v62, %s3210_s27  ;;  %v1186_v62 = vrot.slane %v1184_v47, 1 }
  0xd9   : > { %1855 = vrot.lane.b32.xlu0 %v1814_v29, %s3210_s27  ;;  %v1096_v60 = vsel %vm499_vm1, %v1091_v11, %v1095_v1 }
  0xda   : > { %v4107_v15 = vpop.permute.xlu1 %953  ;;  %v1187_v44 = vor.u32 %v1186_v62, %v1182_v36  ;;  %v2707_v36 = vld [vmem:[%s3246_s17 + $0xc0] sm:$0xf] }
  0xdb   : > { %v4116_v54 = vpop.permute.xlu0 %937 }
  0xdc   : > { %722 = vrot.lane.b32.xlu1 %v691_v59, %s3205_s20  ;;  %v1191_v59 = vrot.slane %v1189_v37, 1  ;;  %v4197_v37 = vld [vmem:[%s3246_s17 + $0xc4] sm:$0xf] }
  0xdd   : > { %706 = vrot.lane.b32.xlu0 %v595_v26, %s3205_s20  ;;  %v1198_v26 = vrot.slane %v1196_v2, 1  ;;  %v2691_v2 = vld [vmem:[%s3246_s17 + $0x60] sm:$0xf] }
  0xde   : > { %v4127_v23 = vpop.permute.xlu1 %955 }
  0xdf   : > { %v4136_v30 = vpop.permute.xlu0 %939  ;;  %v1199_v52 = vor.u32 %v1198_v26, %v1194_v56  ;;  %v1304_v56 = vrot.slane %v4150_v57, 1  ;;  %v2853_v26 = vcombine.low %v2707_v36, %v4197_v37 }
  0xe0   : > { %849 = vrot.lane.b32.xlu1 %v817_v28, %s3204_s19  ;;  %v1105_v28 = vshll.u32 %v4168_v46, 16 }
  0xe1   : > { %833 = vrot.lane.b32.xlu0 %v793_v51, %s3204_s19  ;;  %v1192_v51 = vsel %vm499_vm1, %v1187_v44, %v1191_v59 }
  0xe2   : > { %v4152_v3 = vpop.permute.xlu1 %1225  ;;  %v1107_v47 = vrot.slane %v1105_v28, 1 }
  0xe3   : > { %v4156_v42 = vpop.permute.xlu0 %1209 }
  0xe4   : > { %851 = vrot.lane.b32.xlu1 %v820_v38, %s3204_s19  ;;  %v1103_v38 = vor.u32 %v1102_v5, %v1098_v33 }
  0xe5   : > { %835 = vrot.lane.b32.xlu0 %v796_v6, %s3204_s19 }
  0xe6   : > { %v4165_v29 = vpop.permute.xlu1 %1227  ;;  %v1108_v43 = vsel %vm499_vm1, %v1103_v38, %v1107_v47  ;;  %v4247_v47 = vld [vmem:[%s3246_s17 + $0xd4] ss:$0 sps:$4 sm:$0x11]  }
  0xe7   : > { %v4170_v40 = vpop.permute.xlu0 %1211 }
  0xe8   : > { %961 = vrot.lane.b32.xlu1 %v2805_v17, %s3203_s18  ;;  %v2669_v17 = vld [vmem:[%s3246_s17 + $0x54] sm:$0xe] }
  0xe9   : > { %945 = vrot.lane.b32.xlu0 %v2797_v58, %s3203_s18  ;;  %v2837_v58 = vcombine.low %v2677_v16, %v4114_v14  ;;  %v2829_v6 = vcombine.low %v2669_v17, %v4120_v39  ;;  %v1204_v14 = vsel %vm499_vm1, %v1199_v52, %v1203_v19  ;;  %v1307_v16 = vrot.slane %v4168_v46, 1  ;;  %v4229_v17 = vld [vmem:[%s3246_s17 + $0xc8] ss:$0 sps:$4 sm:$0x11]   ;;  %v2693_v19 = vld [vmem:[%s3246_s17 + $0x6c] sm:$0xf] }
  0xea   : > { %v4175_v49 = vpop.permute.xlu1 %1353  ;;  %v4234_v52 = vcombine.low %v2709_v34, %v4219_v7  ;;  %v1701_v36 = vshll.u32 %v4229_v17, 16 }
  0xeb   : > { %v4179_v41 = vpop.permute.xlu0 %1337  ;;  %v1327_v62 = vrot.slane %v2837_v58, 1  ;;  %v1303_v59 = vrot.slane %v2829_v6, 1  ;;  %v4238_v58 = vld [vmem:[%s3246_s17 + $0x70] sm:$0xf] }
  0xec   : > { %963 = vrot.lane.b32.xlu1 %v2806_v4, %s3203_s18  ;;  %v2678_v4 = vld [vmem:[%s3246_s17 + $0xc0] sm:$0xe] }
  0xed   : > { %947 = vrot.lane.b32.xlu0 %v2798_v48, %s3203_s18  ;;  %v2670_v48 = vld [vmem:[%s3246_s17 + $0x60] sm:$0xe]  ;;  %v2838_v39 = vcombine.low %v2678_v4, %v4134_v31  ;;  %v2845_v31 = vcombine.low %v2691_v2, %v4205_v9  ;;  %v1329_v57 = vsel %vm772_vm0, %v1327_v62, %v1328_v10  ;;  %v1305_v5 = vsel %vm772_vm0, %v1303_v59, %v1304_v56 }
  0xee   : > { %v4186_v12 = vpop.permute.xlu1 %1355  ;;  %v2830_v44 = vcombine.low %v2670_v48, %v4140_v21  ;;  %v1331_v21 = vrot.slane %v4163_v27, 1  ;;  %v4242_v27 = vld [vmem:[%s3246_s17 + $0x68] ss:$0 sps:$4 sm:$0x11]   ;;  %v4251_v48 = vcombine.low %v2693_v19, %v4238_v58  ;;  %v1694_v62 = vshrl.u32 %v2853_v26, 16 }
  0xef   : > { %v4191_v20 = vpop.permute.xlu0 %1339  ;;  %v1330_v11 = vrot.slane %v2838_v39, 1  ;;  %v1600_v38 = vshll.u32 %v2845_v31, 16  ;;  %v1708_v39 = vshll.u32 %v4234_v52, 16  ;;  %v1899_v2 = vsel %vm1877_vm4, %v3431_v50, %v4006_v24  ;;  %v4269_v50 = vld [vmem:[%s3246_s17 + $0x74] ss:$0 sps:$4 sm:$0x11]  }
  0xf0   : > { %1233 = vrot.lane.b32.xlu1 %v1192_v51, %s3206_s21  ;;  %v1306_v28 = vrot.slane %v2830_v44, 1  ;;  %v1605_v56 = vshll.u32 %v4242_v27, 16  ;;  %v1883_v44 = vsel %vm1877_vm4, %v3434_v53, %v4018_v63  ;;  %v1932_v34 = vsel %vm1910_vm5, %v1899_v2, %v4081_v8 }
  0xf1   : > { %1217 = vrot.lane.b32.xlu0 %v1096_v60, %s3206_s21  ;;  %v1696_v60 = vshll.u32 %v2853_v26, 16  ;;  %v1332_v46 = vsel %vm772_vm0, %v1330_v11, %v1331_v21  ;;  %v1602_v59 = vrot.slane %v1600_v38, 1  ;;  %v1713_v11 = vshll.u32 %v4247_v47, 16 }
  0xf2   : > { %v4207_v18 = vpop.permute.xlu1 %1465  ;;  %v1308_v4 = vsel %vm772_vm0, %v1306_v28, %v1307_v16  ;;  %v1916_v24 = vsel %vm1910_vm5, %v1883_v44, %v4087_v13  ;;  %v1965_v21 = vsel %vm1943_vm6, %v1932_v34, %v4107_v15  ;;  %v1703_v53 = vrot.slane %v1701_v36, 1 }
  0xf3   : > { %v4212_v1 = vpop.permute.xlu0 %1449  ;;  %v1698_v10 = vrot.slane %v1696_v60, 1  ;;  %v1612_v63 = vshll.u32 %v4251_v48, 16  ;;  %v1949_v8 = vsel %vm1943_vm6, %v1916_v24, %v4116_v54  ;;  %v1998_v28 = vsel %vm1976_vm7, %v1965_v21, %v4152_v3 }
  0xf4   : > { %1235 = vrot.lane.b32.xlu1 %v1204_v14, %s3206_s21  ;;  %v1710_v60 = vrot.slane %v1708_v39, 1  ;;  %v1982_v13 = vsel %vm1976_vm7, %v1949_v8, %v4156_v42  ;;  %v2031_v15 = vsel %vm2009_vm8, %v1998_v28, %v4175_v49  ;;  %v1617_v36 = vshll.u32 %v4269_v50, 16  ;;  %v2741_v42 = vld [vmem:[%s3246_s17 + $0xc0] sm:$0xe] }
  0xf5   : > { %1219 = vrot.lane.b32.xlu0 %v1108_v43, %s3206_s21  ;;  %v1598_v43 = vshrl.u32 %v2845_v31, 16  ;;  %v1699_v19 = vor.u32 %v1698_v10, %v1694_v62  ;;  %v2015_v54 = vsel %vm2009_vm8, %v1982_v13, %v4179_v41  ;;  %v2064_v3 = vsel %vm2042_vm9, %v2031_v15, %v4207_v18 }
  0xf6   : > { %v4224_v33 = vpop.permute.xlu1 %1467  ;;  %v2048_v49 = vsel %vm2042_vm9, %v2015_v54, %v4212_v1  ;;  %v1610_v10 = vshrl.u32 %v4251_v48, 16  ;;  %v1614_v39 = vrot.slane %v1612_v63, 1  ;;  %v1840_v28 = vrot.slane %v4229_v17, 1 }
  0xf7   : > { %v4231_v51 = vpop.permute.xlu0 %1451  ;;  %v1603_v38 = vor.u32 %v1602_v59, %v1598_v43  ;;  %v2733_v59 = vld [vmem:[%s3246_s17 + $0x60] sm:$0xe] }
  0xf8   : > { %1361 = vrot.lane.b32.xlu1 %v1329_v57, %s3207_s22  ;;  %v1706_v57 = vshrl.u32 %v4234_v52, 16  ;;  %v2877_v21 = vcombine.low %v2733_v59, %v4205_v9 }
  0xf9   : > { %1345 = vrot.lane.b32.xlu0 %v1305_v5, %s3207_s22 }
  0xfa   : > { %v1738_v6 = vpop.permute.xlu1 %1737  ;;  %v1711_v43 = vor.u32 %v1710_v60, %v1706_v57 }
  0xfb   : > { %v1722_v14 = vpop.permute.xlu0 %1721 }
  0xfc   : > { %1363 = vrot.lane.b32.xlu1 %v1332_v46, %s3207_s22  ;;  %v1607_v46 = vrot.slane %v1605_v56, 1  ;;  %v2081_v41 = vsel %vm2075_vm10, %v2048_v49, %v1722_v14  ;;  %v4582_v56 = vld [vmem:[#allocation2_spill] sm:$0xff]  ;;  %v4583_v14 = vld [vmem:[#allocation3_spill] sm:$0xff] }
  0xfd   : > { %1347 = vrot.lane.b32.xlu0 %v1308_v4, %s3207_s22  ;;  %v1715_v4 = vrot.slane %v1713_v11, 1  ;;  %v1901_v44 = vsel %vm1877_vm4, %v4582_v56, %v4065_v35  ;;  %v1885_v34 = vsel %vm1877_vm4, %v4583_v14, %v4072_v55  ;;  %v1619_v11 = vrot.slane %v1617_v36, 1 }
  0xfe   : > { %v4275_v5 = vpop.permute.xlu1 %1739  ;;  %v1934_v57 = vsel %vm1910_vm5, %v1901_v44, %v4094_v22  ;;  %v1608_v35 = vsel %vm499_vm1, %v1603_v38, %v1607_v46  ;;  %v1615_v55 = vor.u32 %v1614_v39, %v1610_v10  ;;  %v2742_v22 = vld [vmem:[%s3246_s17 + $0xcc] sm:$0xe]  ;;  %v1815_v38 = vrot.slane %v2877_v21, 1  ;;  %v4585_v21 = vld [vmem:[#allocation5_spill] sm:$0xff] }
  0xff   : > { %v4282_v16 = vpop.permute.xlu0 %1723  ;;  %v2886_v17 = vcombine.low %v2742_v22, %v4219_v7 }
 0x100   : > { %1473 = vrot.lane.b32.xlu1 %v2853_v26, %s3208_s23  ;;  %v2097_v26 = vsel %vm2075_vm10, %v2064_v3, %v1738_v6  ;;  %v2885_v6 = vcombine.low %v2741_v42, %v4197_v37  ;;  %v1967_v37 = vsel %vm1943_vm6, %v1934_v57, %v4127_v23 }
 0x101   : > { %1457 = vrot.lane.b32.xlu0 %v2845_v31, %s3208_s23  ;;  %v1704_v31 = vsel %vm499_vm1, %v1699_v19, %v1703_v53  ;;  %v2734_v53 = vld [vmem:[%s3246_s17 + $0x6c] sm:$0xe]  ;;  %v2000_v63 = vsel %vm1976_vm7, %v1967_v37, %v4165_v29  ;;  %v4584_v37 = vld [vmem:[#allocation4_spill] sm:$0xff] }
 0x102   : > { %v1866_v62 = vpop.permute.xlu1 %1865  ;;  %v2033_v9 = vsel %vm2009_vm8, %v2000_v63, %v4186_v12  ;;  %v1839_v19 = vrot.slane %v2885_v6, 1 }
 0x103   : > { %v2130_v2 = vsel %vm2108_vm11, %v2097_v26, %v1866_v62  ;;  %v1850_v18 = vpop.permute.xlu0 %1849  ;;  %v2066_v60 = vsel %vm2042_vm9, %v2033_v9, %v4224_v33 }
 0x104   : > { %v2114_v1 = vsel %vm2108_vm11, %v2081_v41, %v1850_v18  ;;  %1475 = vrot.lane.b32.xlu1 %v4234_v52, %s3208_s23  ;;  %3015 = vmatprep.mubr.msk.bf16.mxu1 %vm2158_vm12, %v2130_v2  ;;  %v1918_v52 = vsel %vm1910_vm5, %v1885_v34, %v4099_v61  ;;  %v1716_v61 = vsel %vm499_vm1, %v1711_v43, %v1715_v4  ;;  %v1819_v4 = vrot.slane %v4269_v50, 1 }
 0x105   : > { %1459 = vrot.lane.b32.xlu0 %v4251_v48, %s3208_s23  ;;  %2999 = vmatprep.mubr.msk.bf16.mxu0 %vm2158_vm12, %v2114_v1  ;;  %v1951_v48 = vsel %vm1943_vm6, %v1918_v52, %v4136_v30  ;;  %v1816_v30 = vrot.slane %v4242_v27, 1  ;;  %v2099_v13 = vsel %vm2075_vm10, %v2066_v60, %v4275_v5  ;;  %v1620_v27 = vsel %vm499_vm1, %v1615_v55, %v1619_v11 }
 0x106   : > { %v4325_v24 = vpop.permute.xlu1 %716  ;;  %v1984_v23 = vsel %vm1976_vm7, %v1951_v48, %v4170_v40  ;;  %v2878_v40 = vcombine.low %v2734_v53, %v4238_v58  ;;  %v1842_v58 = vrot.slane %v2886_v17, 1  ;;  %v1843_v5 = vrot.slane %v4247_v47, 1 }
 0x107   : > { %v4334_v8 = vpop.permute.xlu0 %700  ;;  %v2017_v29 = vsel %vm2009_vm8, %v1984_v23, %v4191_v20  ;;  %v1903_v55 = vsel %vm1877_vm4, %v4584_v37, %v4325_v24 }
 0x108   : > { %1745 = vrot.lane.b32.xlu1 %v1704_v31, %s3209_s26  ;;  %v2050_v12 = vsel %vm2042_vm9, %v2017_v29, %v4231_v51  ;;  %v1841_v51 = vsel %vm772_vm0, %v1839_v19, %v1840_v28  ;;  %v1818_v3 = vrot.slane %v2878_v40, 1  ;;  %v1844_v42 = vsel %vm772_vm0, %v1842_v58, %v1843_v5 }
 0x109   : > { %1729 = vrot.lane.b32.xlu0 %v1608_v35, %s3209_s26  ;;  %v2083_v20 = vsel %vm2075_vm10, %v2050_v12, %v4282_v16  ;;  %v1817_v16 = vsel %vm772_vm0, %v1815_v38, %v1816_v30  ;;  %v1887_v22 = vsel %vm1877_vm4, %v4585_v21, %v4334_v8 }
 0x10a   : > { %v1868_v15 = vpop.permute.xlu1 %1867  ;;  %v1820_v26 = vsel %vm772_vm0, %v1818_v3, %v1819_v4 }
 0x10b   : > { %v2132_v33 = vsel %vm2108_vm11, %v2099_v13, %v1868_v15  ;;  %v1852_v46 = vpop.permute.xlu0 %1851  ;;  %v4586_v15 = vld [vmem:[#allocation6_spill] sm:$0xff] }
 0x10c   : > { %v2116_v7 = vsel %vm2108_vm11, %v2083_v20, %v1852_v46  ;;  %1747 = vrot.lane.b32.xlu1 %v1716_v61, %s3209_s26  ;;  %3016 = vmatmul.mubr.msk.bf16.gmra.mrb[4].mxu1 %vm2158_vm12, %v2132_v33  ;;  %v4587_v20 = vld [vmem:[#allocation7_spill] sm:$0xff] }
 0x10d   : > { %1731 = vrot.lane.b32.xlu0 %v1620_v27, %s3209_s26  ;;  %3000 = vmatmul.mubr.msk.bf16.gmra.mrb[4].mxu0 %vm2158_vm12, %v2116_v7 }
 0x10e   : > { %v719_v54 = vpop.permute.xlu1 %718 }
 0x10f   : > { %v703_v36 = vpop.permute.xlu0 %702  ;;  %v1905_v27 = vsel %vm1877_vm4, %v4586_v15, %v719_v54 }
 0x110   : > { %1873 = vrot.lane.b32.xlu1 %v1841_v51, %s3210_s27  ;;  %v1889_v33 = vsel %vm1877_vm4, %v4587_v20, %v703_v36 }
 0x111   : > { %1857 = vrot.lane.b32.xlu0 %v1817_v16, %s3210_s27 }
 0x112   : > { %v846_v49 = vpop.permute.xlu1 %845 }
 0x113   : > { %v830_v62 = vpop.permute.xlu0 %829  ;;  %v1936_v53 = vsel %vm1910_vm5, %v1903_v55, %v846_v49 }
 0x114   : > { %1875 = vrot.lane.b32.xlu1 %v1844_v42, %s3210_s27  ;;  %v1920_v48 = vsel %vm1910_vm5, %v1887_v22, %v830_v62 }
 0x115   : > { %1859 = vrot.lane.b32.xlu0 %v1820_v26, %s3210_s27 }
 0x116   : > { %v848_v47 = vpop.permute.xlu1 %847 }
 0x117   : > { %v832_v10 = vpop.permute.xlu0 %831  ;;  %v1938_v46 = vsel %vm1910_vm5, %v1905_v27, %v848_v47 }
 0x118   : > { %v1922_v7 = vsel %vm1910_vm5, %v1889_v33, %v832_v10 }
 0x11a   : > { %v958_v39 = vpop.permute.xlu1 %957 }
 0x11b   : > { %v942_v41 = vpop.permute.xlu0 %941  ;;  %v1969_v63 = vsel %vm1943_vm6, %v1936_v53, %v958_v39 }
 0x11c   : > { %v1953_v28 = vsel %vm1943_vm6, %v1920_v48, %v942_v41 }
 0x11e   : > { %v960_v50 = vpop.permute.xlu1 %959 }
 0x11f   : > { %v944_v2 = vpop.permute.xlu0 %943  ;;  %v1971_v51 = vsel %vm1943_vm6, %v1938_v46, %v960_v50 }
 0x120   : > { %v1955_v5 = vsel %vm1943_vm6, %v1922_v7, %v944_v2 }
 0x122   : > { %v1230_v18 = vpop.permute.xlu1 %1229 }
 0x123   : > { %v1214_v31 = vpop.permute.xlu0 %1213  ;;  %v2002_v23 = vsel %vm1976_vm7, %v1969_v63, %v1230_v18 }
 0x124   : > { %v1986_v19 = vsel %vm1976_vm7, %v1953_v28, %v1214_v31 }
 0x126   : > { %v1232_v43 = vpop.permute.xlu1 %1231 }
 0x127   : > { %v1216_v59 = vpop.permute.xlu0 %1215  ;;  %v2004_v54 = vsel %vm1976_vm7, %v1971_v51, %v1232_v43 }
 0x128   : > { %v1988_v3 = vsel %vm1976_vm7, %v1955_v5, %v1216_v59 }
 0x12a   : > { %v1358_v56 = vpop.permute.xlu1 %1357 }
 0x12b   : > { %v1342_v44 = vpop.permute.xlu0 %1341  ;;  %v2035_v24 = vsel %vm2009_vm8, %v2002_v23, %v1358_v56 }
 0x12c   : > { %v2019_v30 = vsel %vm2009_vm8, %v1986_v19, %v1342_v44 }
 0x12e   : > { %v1360_v1 = vpop.permute.xlu1 %1359 }
 0x12f   : > { %v1344_v6 = vpop.permute.xlu0 %1343  ;;  %v2037_v4 = vsel %vm2009_vm8, %v2004_v54, %v1360_v1 }
 0x130   : > { %v2021_v36 = vsel %vm2009_vm8, %v1988_v3, %v1344_v6 }
 0x132   : > { %v1470_v14 = vpop.permute.xlu1 %1469 }
 0x133   : > { %v1454_v34 = vpop.permute.xlu0 %1453  ;;  %v2068_v8 = vsel %vm2042_vm9, %v2035_v24, %v1470_v14 }
 0x134   : > { %v2052_v29 = vsel %vm2042_vm9, %v2019_v30, %v1454_v34 }
 0x136   : > { %v1472_v57 = vpop.permute.xlu1 %1471 }
 0x137   : > { %v1456_v35 = vpop.permute.xlu0 %1455  ;;  %v2070_v42 = vsel %vm2042_vm9, %v2037_v4, %v1472_v57 }
 0x138   : > { %v2054_v49 = vsel %vm2042_vm9, %v2021_v36, %v1456_v35 }
 0x13a   : > { %v1742_v11 = vpop.permute.xlu1 %1741 }
 0x13b   : > { %v1726_v52 = vpop.permute.xlu0 %1725  ;;  %v2101_v60 = vsel %vm2075_vm10, %v2068_v8, %v1742_v11 }
 0x13c   : > { %v2085_v40 = vsel %vm2075_vm10, %v2052_v29, %v1726_v52 }
 0x13e   : > { %v1744_v61 = vpop.permute.xlu1 %1743 }
 0x13f   : > { %v1728_v9 = vpop.permute.xlu0 %1727  ;;  %v2103_v26 = vsel %vm2075_vm10, %v2070_v42, %v1744_v61 }
 0x140   : > { %v2087_v47 = vsel %vm2075_vm10, %v2054_v49, %v1728_v9 }
 0x142   : > { %v1870_v17 = vpop.permute.xlu1 %1869 }
 0x143   : > { %v2134_v12 = vsel %vm2108_vm11, %v2101_v60, %v1870_v17  ;;  %v1854_v13 = vpop.permute.xlu0 %1853 }
 0x144   : > { %v2118_v38 = vsel %vm2108_vm11, %v2085_v40, %v1854_v13  ;;  %3019 = vmatprep.mubr.msk.bf16.mxu1 %vm2158_vm12, %v2134_v12 }
 0x145   : > { %3003 = vmatprep.mubr.msk.bf16.mxu0 %vm2158_vm12, %v2118_v38 }
 0x146   : > { %v721_v58 = vpop.permute.xlu1 %720 }
 0x147   : > { %v705_v16 = vpop.permute.xlu0 %704  ;;  %v1907_v28 = vsel %vm1877_vm4, %v3960_v25, %v721_v58 }
 0x148   : > { %v1891_v23 = vsel %vm1877_vm4, %v3975_v45, %v705_v16 }
 0x14a   : > { %v1872_v62 = vpop.permute.xlu1 %1871 }
 0x14b   : > { %v2136_v10 = vsel %vm2108_vm11, %v2103_v26, %v1872_v62  ;;  %v1856_v39 = vpop.permute.xlu0 %1855 }
 0x14c   : > { %v2120_v41 = vsel %vm2108_vm11, %v2087_v47, %v1856_v39  ;;  %3020 = vmatmul.mubr.msk.bf16.gmra.mrb[8].mxu1 %vm2158_vm12, %v2136_v10  ;;  %v4459_v39 = vld [vmem:[%s4568_s2] ss:$0 sm:$0xff] }
 0x14d   : > { %3004 = vmatmul.mubr.msk.bf16.gmra.mrb[8].mxu0 %vm2158_vm12, %v2120_v41 }
 0x14e   : > { %v723_v50 = vpop.permute.xlu1 %722 }
 0x14f   : > { %v707_v2 = vpop.permute.xlu0 %706  ;;  %v1909_v17 = vsel %vm1877_vm4, %v4041_v0, %v723_v50 }
 0x150   : > { %v1893_v45 = vsel %vm1877_vm4, %v4048_v32, %v707_v2 }
 0x152   : > { %v850_v18 = vpop.permute.xlu1 %849 }
 0x153   : > { %v834_v31 = vpop.permute.xlu0 %833  ;;  %v1940_v9 = vsel %vm1910_vm5, %v1907_v28, %v850_v18 }
 0x154   : > { %v1924_v19 = vsel %vm1910_vm5, %v1891_v23, %v834_v31 }
 0x156   : > { %v852_v43 = vpop.permute.xlu1 %851 }
 0x157   : > { %v836_v59 = vpop.permute.xlu0 %835  ;;  %v1942_v12 = vsel %vm1910_vm5, %v1909_v17, %v852_v43 }
 0x158   : > { %v1926_v27 = vsel %vm1910_vm5, %v1893_v45, %v836_v59 }
 0x15a   : > { %v962_v56 = vpop.permute.xlu1 %961 }
 0x15b   : > { %v946_v44 = vpop.permute.xlu0 %945  ;;  %v1973_v24 = vsel %vm1943_vm6, %v1940_v9, %v962_v56 }
 0x15c   : > { %v1957_v8 = vsel %vm1943_vm6, %v1924_v19, %v946_v44 }
 0x15e   : > { %v964_v1 = vpop.permute.xlu1 %963 }
 0x15f   : > { %v948_v6 = vpop.permute.xlu0 %947  ;;  %v1975_v38 = vsel %vm1943_vm6, %v1942_v12, %v964_v1 }
 0x160   : > { %v1959_v46 = vsel %vm1943_vm6, %v1926_v27, %v948_v6 }
 0x162   : > { %v1234_v14 = vpop.permute.xlu1 %1233 }
 0x163   : > { %v1218_v34 = vpop.permute.xlu0 %1217  ;;  %v2006_v29 = vsel %vm1976_vm7, %v1973_v24, %v1234_v14 }
 0x164   : > { %v1990_v25 = vsel %vm1976_vm7, %v1957_v8, %v1218_v34 }
 0x166   : > { %v1236_v57 = vpop.permute.xlu1 %1235 }
 0x167   : > { %v1220_v35 = vpop.permute.xlu0 %1219  ;;  %v2008_v7 = vsel %vm1976_vm7, %v1975_v38, %v1236_v57 }
 0x168   : > { %v1992_v5 = vsel %vm1976_vm7, %v1959_v46, %v1220_v35 }
 0x16a   : > { %v1362_v11 = vpop.permute.xlu1 %1361 }
 0x16b   : > { %v1346_v52 = vpop.permute.xlu0 %1345  ;;  %v2039_v40 = vsel %vm2009_vm8, %v2006_v29, %v1362_v11 }
 0x16c   : > { %v2023_v13 = vsel %vm2009_vm8, %v1990_v25, %v1346_v52 }
 0x16e   : > { %v1364_v37 = vpop.permute.xlu1 %1363 }
 0x16f   : > { %v1348_v55 = vpop.permute.xlu0 %1347  ;;  %v2041_v54 = vsel %vm2009_vm8, %v2008_v7, %v1364_v37 }
 0x170   : > { %v2025_v3 = vsel %vm2009_vm8, %v1992_v5, %v1348_v55 }
 0x172   : > { %v1474_v21 = vpop.permute.xlu1 %1473 }
 0x173   : > { %v1458_v22 = vpop.permute.xlu0 %1457  ;;  %v2072_v15 = vsel %vm2042_vm9, %v2039_v40, %v1474_v21 }
 0x174   : > { %v2056_v20 = vsel %vm2042_vm9, %v2023_v13, %v1458_v22 }
 0x176   : > { %v1476_v53 = vpop.permute.xlu1 %1475 }
 0x177   : > { %v1460_v48 = vpop.permute.xlu0 %1459  ;;  %v2074_v4 = vsel %vm2042_vm9, %v2041_v54, %v1476_v53 }
 0x178   : > { %v2058_v36 = vsel %vm2042_vm9, %v2025_v3, %v1460_v48 }
 0x17a   : > { %v1746_v63 = vpop.permute.xlu1 %1745 }
 0x17b   : > { %v1730_v61 = vpop.permute.xlu0 %1729  ;;  %v2105_v0 = vsel %vm2075_vm10, %v2072_v15, %v1746_v63 }
 0x17c   : > { %v2089_v32 = vsel %vm2075_vm10, %v2056_v20, %v1730_v61 }
 0x17e   : > { %v1748_v30 = vpop.permute.xlu1 %1747 }
 0x17f   : > { %v1732_v60 = vpop.permute.xlu0 %1731  ;;  %v2107_v42 = vsel %vm2075_vm10, %v2074_v4, %v1748_v30 }
 0x180   : > { %v2091_v26 = vsel %vm2075_vm10, %v2058_v36, %v1732_v60 }
 0x182   : > { %v1874_v33 = vpop.permute.xlu1 %1873 }
 0x183   : > { %v2138_v51 = vsel %vm2108_vm11, %v2105_v0, %v1874_v33  ;;  %v1858_v58 = vpop.permute.xlu0 %1857 }
 0x184   : > { %v2122_v16 = vsel %vm2108_vm11, %v2089_v32, %v1858_v58  ;;  %3023 = vmatprep.mubr.msk.bf16.mxu1 %vm2158_vm12, %v2138_v51 }
 0x185   : > { %3007 = vmatprep.mubr.msk.bf16.mxu0 %vm2158_vm12, %v2122_v16 }
 0x186   : > { %v1876_v49 = vpop.permute.xlu1 %1875 }
 0x187   : > { %v2140_v62 = vsel %vm2108_vm11, %v2107_v42, %v1876_v49  ;;  %v1860_v47 = vpop.permute.xlu0 %1859 }
 0x188   : > { %v2124_v10 = vsel %vm2108_vm11, %v2091_v26, %v1860_v47  ;;  %3024 = vmatmul.mubr.msk.bf16.gmra.mrb[12].mxu1 %vm2158_vm12, %v2140_v62 }
 0x189   : > { %3008 = vmatmul.mubr.msk.bf16.gmra.mrb[12].mxu0 %vm2158_vm12, %v2124_v10 }
 0x19f   : > { %v3013_v41 = vpop.f32.mrb[0].mxu1 }
 0x1a0   : > { %v2997_v50 = vpop.f32.mrb[0].mxu0  ;;  %v2305_v2 = vadd.f32 %v3013_v41, %v4459_v39  ;;  %v2296_v18 = vpop.f32.mrb[1].mxu1 }
 0x1a1   : > { %v2241_v31 = vadd.f32 %v2997_v50, %v4459_v39  ;;  %v2232_v43 = vpop.f32.mrb[1].mxu0  ;;  %v2297_v59 = vadd.f32 %v4459_v39, %v2296_v18  ;;  %v3014_v56 = vpop.f32.mrb[2].mxu1 }
 0x1a2   : > { %v2377_v44 = vmax.f32 %v2305_v2, 0.0  ;;  %v2233_v1 = vadd.f32 %v4459_v39, %v2232_v43  ;;  %v2998_v6 = vpop.f32.mrb[2].mxu0  ;;  %v2308_v14 = vadd.f32 %v3014_v56, %v4459_v39  ;;  %v2299_v34 = vpop.f32.mrb[3].mxu1 }
 0x1a3   : > { %v2361_v57 = vmax.f32 %v2241_v31, 0.0  ;;  %v2375_v35 = vmax.f32 %v2297_v59, 0.0  ;;  %v2244_v11 = vadd.f32 %v2998_v6, %v4459_v39  ;;  %v2235_v52 = vpop.f32.mrb[3].mxu0  ;;  %v2300_v37 = vadd.f32 %v4459_v39, %v2299_v34 }
 0x1a4   : > { %v2959_v55 = vpack.c.bf16 %v2377_v44, %v2377_v44  ;;  %v2359_v21 = vmax.f32 %v2233_v1, 0.0  ;;  %v2378_v22 = vmax.f32 %v2308_v14, 0.0  ;;  %v2236_v53 = vadd.f32 %v4459_v39, %v2235_v52 }
 0x1a5   : > { %v2943_v48 = vpack.c.bf16 %v2361_v57, %v2361_v57  ;;  %v2957_v63 = vpack.c.bf16 %v2375_v35, %v2375_v35  ;;  %v2362_v61 = vmax.f32 %v2244_v11, 0.0  ;;  %v2376_v28 = vmax.f32 %v2300_v37, 0.0 }
 0x1a6   : > { %2538 = vst.msk [vmem:[%s4470_s8 + $0x48] sm:$0xf] %vm2519_vm13, %v2959_v55  ;;  %v2941_v23 = vpack.c.bf16 %v2359_v21, %v2359_v21  ;;  %v2960_v9 = vpack.c.bf16 %v2378_v22, %v2378_v22  ;;  %v2360_v19 = vmax.f32 %v2236_v53, 0.0 }
 0x1a7   : > { %2522 = vst.msk [vmem:[%s4470_s8 + $0x8] sm:$0xf] %vm2519_vm13, %v2943_v48  ;;  %2536 = vst.msk [vmem:[%s4470_s8 + $0x40] sm:$0xf] %vm2519_vm13, %v2957_v63  ;;  %v2944_v24 = vpack.c.bf16 %v2362_v61, %v2362_v61  ;;  %v2958_v30 = vpack.c.bf16 %v2376_v28, %v2376_v28 }
 0x1a8   : > { %2520 = vst.msk [vmem:[%s4470_s8] sm:$0xf] %vm2519_vm13, %v2941_v23  ;;  %2539 = vst.msk [vmem:[%s4470_s8 + $0x4c] sm:$0xf] %vm2519_vm13, %v2960_v9  ;;  %v2942_v8 = vpack.c.bf16 %v2360_v19, %v2360_v19 }
 0x1a9   : > { %2523 = vst.msk [vmem:[%s4470_s8 + $0xc] sm:$0xf] %vm2519_vm13, %v2944_v24  ;;  %2537 = vst.msk [vmem:[%s4470_s8 + $0x44] sm:$0xf] %vm2519_vm13, %v2958_v30 }
 0x1aa   : > { %2521 = vst.msk [vmem:[%s4470_s8 + $0x4] sm:$0xf] %vm2519_vm13, %v2942_v8 }
 0x1df   : > { %v3017_v29 = vpop.f32.mrb[4].mxu1 }
 0x1e0   : > { %v3001_v60 = vpop.f32.mrb[4].mxu0  ;;  %v2321_v17 = vadd.f32 %v3017_v29, %v4459_v39  ;;  %v2312_v25 = vpop.f32.mrb[5].mxu1 }
 0x1e1   : > { %v2257_v40 = vadd.f32 %v3001_v60, %v4459_v39  ;;  %v2248_v45 = vpop.f32.mrb[5].mxu0  ;;  %v2313_v12 = vadd.f32 %v4459_v39, %v2312_v25  ;;  %v3018_v13 = vpop.f32.mrb[6].mxu1 }
 0x1e2   : > { %v2381_v15 = vmax.f32 %v2321_v17, 0.0  ;;  %v2249_v27 = vadd.f32 %v4459_v39, %v2248_v45  ;;  %v3002_v38 = vpop.f32.mrb[6].mxu0  ;;  %v2324_v20 = vadd.f32 %v3018_v13, %v4459_v39  ;;  %v2315_v0 = vpop.f32.mrb[7].mxu1 }
 0x1e3   : > { %v2365_v33 = vmax.f32 %v2257_v40, 0.0  ;;  %v2379_v46 = vmax.f32 %v2313_v12, 0.0  ;;  %v2260_v7 = vadd.f32 %v3002_v38, %v4459_v39  ;;  %v2251_v32 = vpop.f32.mrb[7].mxu0  ;;  %v2316_v51 = vadd.f32 %v4459_v39, %v2315_v0 }
 0x1e4   : > { %v2963_v58 = vpack.c.bf16 %v2381_v15, %v2381_v15  ;;  %v2363_v5 = vmax.f32 %v2249_v27, 0.0  ;;  %v2382_v54 = vmax.f32 %v2324_v20, 0.0  ;;  %v2252_v16 = vadd.f32 %v4459_v39, %v2251_v32 }
 0x1e5   : > { %v2947_v3 = vpack.c.bf16 %v2365_v33, %v2365_v33  ;;  %v2961_v4 = vpack.c.bf16 %v2379_v46, %v2379_v46  ;;  %v2366_v36 = vmax.f32 %v2260_v7, 0.0  ;;  %v2380_v42 = vmax.f32 %v2316_v51, 0.0 }
 0x1e6   : > { %2542 = vst.msk [vmem:[%s4470_s8 + $0x58] sm:$0xf] %vm2519_vm13, %v2963_v58  ;;  %v2945_v49 = vpack.c.bf16 %v2363_v5, %v2363_v5  ;;  %v2964_v26 = vpack.c.bf16 %v2382_v54, %v2382_v54  ;;  %v2364_v62 = vmax.f32 %v2252_v16, 0.0 }
 0x1e7   : > { %2526 = vst.msk [vmem:[%s4470_s8 + $0x18] sm:$0xf] %vm2519_vm13, %v2947_v3  ;;  %2540 = vst.msk [vmem:[%s4470_s8 + $0x50] sm:$0xf] %vm2519_vm13, %v2961_v4  ;;  %v2948_v47 = vpack.c.bf16 %v2366_v36, %v2366_v36  ;;  %v2962_v10 = vpack.c.bf16 %v2380_v42, %v2380_v42 }
 0x1e8   : > { %2524 = vst.msk [vmem:[%s4470_s8 + $0x10] sm:$0xf] %vm2519_vm13, %v2945_v49  ;;  %2543 = vst.msk [vmem:[%s4470_s8 + $0x5c] sm:$0xf] %vm2519_vm13, %v2964_v26  ;;  %v2946_v41 = vpack.c.bf16 %v2364_v62, %v2364_v62 }
 0x1e9   : > { %2527 = vst.msk [vmem:[%s4470_s8 + $0x1c] sm:$0xf] %vm2519_vm13, %v2948_v47  ;;  %2541 = vst.msk [vmem:[%s4470_s8 + $0x54] sm:$0xf] %vm2519_vm13, %v2962_v10 }
 0x1ea   : > { %2525 = vst.msk [vmem:[%s4470_s8 + $0x14] sm:$0xf] %vm2519_vm13, %v2946_v41 }
 0x21f   : > { %v3021_v50 = vpop.f32.mrb[8].mxu1 }
 0x220   : > { %v3005_v2 = vpop.f32.mrb[8].mxu0  ;;  %v2337_v18 = vadd.f32 %v3021_v50, %v4459_v39  ;;  %v2328_v31 = vpop.f32.mrb[9].mxu1 }
 0x221   : > { %v2273_v43 = vadd.f32 %v3005_v2, %v4459_v39  ;;  %v2264_v59 = vpop.f32.mrb[9].mxu0  ;;  %v2329_v56 = vadd.f32 %v4459_v39, %v2328_v31  ;;  %v3022_v44 = vpop.f32.mrb[10].mxu1 }
 0x222   : > { %v2385_v1 = vmax.f32 %v2337_v18, 0.0  ;;  %v2265_v6 = vadd.f32 %v4459_v39, %v2264_v59  ;;  %v3006_v14 = vpop.f32.mrb[10].mxu0  ;;  %v2340_v34 = vadd.f32 %v3022_v44, %v4459_v39  ;;  %v2331_v57 = vpop.f32.mrb[11].mxu1 }
 0x223   : > { %v2369_v35 = vmax.f32 %v2273_v43, 0.0  ;;  %v2383_v11 = vmax.f32 %v2329_v56, 0.0  ;;  %v2276_v52 = vadd.f32 %v3006_v14, %v4459_v39  ;;  %v2267_v37 = vpop.f32.mrb[11].mxu0  ;;  %v2332_v55 = vadd.f32 %v4459_v39, %v2331_v57 }
 0x224   : > { %v2967_v21 = vpack.c.bf16 %v2385_v1, %v2385_v1  ;;  %v2367_v22 = vmax.f32 %v2265_v6, 0.0  ;;  %v2386_v53 = vmax.f32 %v2340_v34, 0.0  ;;  %v2268_v48 = vadd.f32 %v4459_v39, %v2267_v37 }
 0x225   : > { %v2951_v63 = vpack.c.bf16 %v2369_v35, %v2369_v35  ;;  %v2965_v61 = vpack.c.bf16 %v2383_v11, %v2383_v11  ;;  %v2370_v28 = vmax.f32 %v2276_v52, 0.0  ;;  %v2384_v23 = vmax.f32 %v2332_v55, 0.0 }
 0x226   : > { %2546 = vst.msk [vmem:[%s4470_s8 + $0x68] sm:$0xf] %vm2519_vm13, %v2967_v21  ;;  %v2949_v9 = vpack.c.bf16 %v2367_v22, %v2367_v22  ;;  %v2968_v19 = vpack.c.bf16 %v2386_v53, %v2386_v53  ;;  %v2368_v24 = vmax.f32 %v2268_v48, 0.0 }
 0x227   : > { %2530 = vst.msk [vmem:[%s4470_s8 + $0x28] sm:$0xf] %vm2519_vm13, %v2951_v63  ;;  %2544 = vst.msk [vmem:[%s4470_s8 + $0x60] sm:$0xf] %vm2519_vm13, %v2965_v61  ;;  %v2952_v30 = vpack.c.bf16 %v2370_v28, %v2370_v28  ;;  %v2966_v8 = vpack.c.bf16 %v2384_v23, %v2384_v23 }
 0x228   : > { %2528 = vst.msk [vmem:[%s4470_s8 + $0x20] sm:$0xf] %vm2519_vm13, %v2949_v9  ;;  %2547 = vst.msk [vmem:[%s4470_s8 + $0x6c] sm:$0xf] %vm2519_vm13, %v2968_v19  ;;  %v2950_v29 = vpack.c.bf16 %v2368_v24, %v2368_v24 }
 0x229   : > { %2531 = vst.msk [vmem:[%s4470_s8 + $0x2c] sm:$0xf] %vm2519_vm13, %v2952_v30  ;;  %2545 = vst.msk [vmem:[%s4470_s8 + $0x64] sm:$0xf] %vm2519_vm13, %v2966_v8 }
 0x22a   : > { %2529 = vst.msk [vmem:[%s4470_s8 + $0x24] sm:$0xf] %vm2519_vm13, %v2950_v29 }
 0x25b   : > { %v3025_v60 = vpop.f32.mrb[12].mxu1 }
 0x25c   : > { %v3009_v17 = vpop.f32.mrb[12].mxu0  ;;  %v2353_v25 = vadd.f32 %v3025_v60, %v4459_v39  ;;  %v2344_v40 = vpop.f32.mrb[13].mxu1 }
 0x25d   : > { %v2289_v45 = vadd.f32 %v3009_v17, %v4459_v39  ;;  %v2280_v12 = vpop.f32.mrb[13].mxu0  ;;  %v2345_v13 = vadd.f32 %v4459_v39, %v2344_v40  ;;  %v3026_v15 = vpop.f32.mrb[14].mxu1 }
 0x25e   : > { %v2389_v27 = vmax.f32 %v2353_v25, 0.0  ;;  %v2281_v38 = vadd.f32 %v4459_v39, %v2280_v12  ;;  %v3010_v20 = vpop.f32.mrb[14].mxu0  ;;  %v2356_v0 = vadd.f32 %v3026_v15, %v4459_v39  ;;  %v2347_v33 = vpop.f32.mrb[15].mxu1 }
 0x25f   : > { %v2373_v46 = vmax.f32 %v2289_v45, 0.0  ;;  %v2387_v7 = vmax.f32 %v2345_v13, 0.0  ;;  %v2292_v32 = vadd.f32 %v3010_v20, %v4459_v39  ;;  %v2283_v51 = vpop.f32.mrb[15].mxu0  ;;  %v2348_v58 = vadd.f32 %v4459_v39, %v2347_v33 }
 0x260   : > { %v2971_v5 = vpack.c.bf16 %v2389_v27, %v2389_v27  ;;  %v2371_v54 = vmax.f32 %v2281_v38, 0.0  ;;  %v2390_v16 = vmax.f32 %v2356_v0, 0.0  ;;  %v2284_v3 = vadd.f32 %v4459_v39, %v2283_v51 }
 0x261   : > { %v2955_v4 = vpack.c.bf16 %v2373_v46, %v2373_v46  ;;  %v2969_v36 = vpack.c.bf16 %v2387_v7, %v2387_v7  ;;  %v2374_v42 = vmax.f32 %v2292_v32, 0.0  ;;  %v2388_v49 = vmax.f32 %v2348_v58, 0.0 }
 0x262   : > { %2550 = vst.msk [vmem:[%s4470_s8 + $0x78] sm:$0xf] %vm2519_vm13, %v2971_v5  ;;  %v2953_v26 = vpack.c.bf16 %v2371_v54, %v2371_v54  ;;  %v2972_v62 = vpack.c.bf16 %v2390_v16, %v2390_v16  ;;  %v2372_v47 = vmax.f32 %v2284_v3, 0.0 }
 0x263   : > { %2534 = vst.msk [vmem:[%s4470_s8 + $0x38] sm:$0xf] %vm2519_vm13, %v2955_v4  ;;  %2548 = vst.msk [vmem:[%s4470_s8 + $0x70] sm:$0xf] %vm2519_vm13, %v2969_v36  ;;  %v2956_v10 = vpack.c.bf16 %v2374_v42, %v2374_v42  ;;  %v2970_v41 = vpack.c.bf16 %v2388_v49, %v2388_v49 }
 0x264   : > { %2532 = vst.msk [vmem:[%s4470_s8 + $0x30] sm:$0xf] %vm2519_vm13, %v2953_v26  ;;  %2551 = vst.msk [vmem:[%s4470_s8 + $0x7c] sm:$0xf] %vm2519_vm13, %v2972_v62  ;;  %v2954_v39 = vpack.c.bf16 %v2372_v47, %v2372_v47 }
 0x265   : > { %2535 = vst.msk [vmem:[%s4470_s8 + $0x3c] sm:$0xf] %vm2519_vm13, %v2956_v10  ;;  %2549 = vst.msk [vmem:[%s4470_s8 + $0x74] sm:$0xf] %vm2519_vm13, %v2970_v41 }
 0x266   : > { %2533 = vst.msk [vmem:[%s4470_s8 + $0x34] sm:$0xf] %vm2519_vm13, %v2954_v39 }
 0x267 PF: > { %s13_s12 = sadd.s32 1, %s3201_s12  }
 0x268   : > { %p10_p4 = scmp.ge.s32.totalorder %s13_s12, 6  }
 0x26a   :  { %12 = sbr.rel (!%p10_p4) target bundleno = 1 (0x1), region = 64 }

// kernel: vgg_perceptual_loss.13
= control target key start
LH: loop header
LB: loop body
LE: loop exit
PB: predicated region body
PF: predicated region fallthrough
CT: control target
= control target key end

     0   :  { %s4028_s12 = smov 0   ;;  %s5330_s0 = inlined_call_operand.vmem [shape: bf16[4,18,18,64], index: 0, kind: input, shape index: {}]   ;;  %s5331_s1 = inlined_call_operand.vmem [shape: bf16[576,64], index: 1, kind: input, shape index: {}]   ;;  %s5332_s2 = inlined_call_operand.vmem [shape: f32[1,64], index: 2, kind: input, shape index: {}]   ;;  %s5333_s3 = inlined_call_operand.vmem [shape: bf16[4,16,16,64], index: 3, kind: output, shape index: {}]  }
   0x1 LB: > { %s3043_s13 = sadd.s32 4294967295, %s4005_s12   ;;  %p3047_p0 = scmp.ge.s32.totalorder %s4005_s12, 1  ;;  %s4005_s12 = sphi %s4028_s12, %s13_s12  }
   0x2   : > { %p137_p1 = scmp.lt.s32.totalorder %s4005_s12, 5 }
   0x4   : > { %p138_p2 = pnand %p3047_p0, %p137_p1 }
   0x6   : > { %141 = sbr.rel (%p138_p2) target bundleno = 525 (0x20d), region = 32 }
   0xd   : > { %p161_p3 = scmp.lt.s32.totalorder %s3043_s13, 3  ;;  %v3834_v0 = vld [vmem:[%s5331_s1 + $0x40] sm:$0xff]   ;;  %v3839_v2 = vld [vmem:[%s5331_s1 + $0x48] sm:$0xff]   ;;  %v3845_v4 = vld [vmem:[%s5331_s1 + $0x50] sm:$0xff]   ;;  %s4007_s30 = smov 64   ;;  %vm840_vm1 = vcmask 1046528  }
   0xe   : > { %3727 = vmatprep.subr.bf16.mxu1 %v3834_v0  ;;  %v3835_v1 = vld [vmem:[%s5331_s1] sm:$0xff]   ;;  %3443 = vmatprep.subr.bf16.mxu0 %v3834_v0  ;;  %v3840_v3 = vld [vmem:[%s5331_s1 + $0x8] sm:$0xff]   ;;  %v3846_v10 = vld [vmem:[%s5331_s1 + $0x10] sm:$0xff]   ;;  %vm567_vm0 = vsmask.f32 7424  ;;  %vm1817_vm2 = vcmask 523264  }
   0xf   : > { %s5403_s13 = smov (!%p161_p3, %s3043_s13), 3  ;;  %3735 = vmatpush3.bf16.msra.mxu1 %v3835_v1  ;;  %3444 = vmatpush3.bf16.msra.mxu0 %v3835_v1  ;;  %v3847_v16 = vld [vmem:[%s5331_s1 + $0x58] sm:$0xff]   ;;  %v3852_v46 = vld [vmem:[%s5331_s1 + $0x60] sm:$0xff]   ;;  %vm2955_vm3 = vcmask 519168  }
  0x10   : > { %s3743_s20 = smul.u32 216, %s5403_s13  ;;  %3728 = vmatprep.subr.bf16.mxu1 %v3839_v2  ;;  %3445 = vmatprep.subr.bf16.mxu0 %v3839_v2  ;;  %v3850_v31 = vld [vmem:[%s5331_s1 + $0x18] sm:$0xff]  }
  0x12   : > { %s4057_s27 = scalar_lea.vmem %s5330_s0, %s3743_s20  ;;  %s3410_s20 = sshll.u32 %s5403_s13, 7 }
  0x13   : > { %v3075_v5 = vld [vmem:[%s4057_s27 + $0x9c] sm:$0xf]  ;;  %v3076_v6 = vld [vmem:[%s4057_s27 + $0xa0] sm:$0xf]  ;;  %v3051_v8 = vld [vmem:[%s4057_s27 + $0xc] sm:$0xf]  ;;  %3736 = vmatpush3.bf16.msra.mxu1 %v3840_v3  ;;  %3446 = vmatpush3.bf16.msra.mxu0 %v3840_v3  ;;  %s5200_s23 = scalar_lea.vmem %s5333_s3, %s3410_s20 }
  0x14   : > { %v4061_v7 = vcombine.low %v3075_v5, %v3076_v6  ;;  %v4065_v9 = vld [vmem:[%s4057_s27 + $0x10] sm:$0xf]  ;;  %v270_v13 = vld [vmem:[%s4057_s27 + $0x94] sm:$0xf]  ;;  %3729 = vmatprep.subr.bf16.mxu1 %v3845_v4  ;;  %3447 = vmatprep.subr.bf16.mxu0 %v3845_v4  ;;  %v245_v17 = vld [vmem:[%s4057_s27] sm:$0xf] }
  0x15   : > { %v4071_v11 = vcombine.low %v3051_v8, %v4065_v9  ;;  %v269_v12 = vld [vmem:[%s4057_s27 + $0x90] sm:$0xf]  ;;  %v3758_v15 = vld [vmem:[%s4057_s27 + $0x98] ss:$0 sps:$4 sm:$0x11]  }
  0x16   : > { %993 = vrot.lane.b32.xlu0 %v4061_v7, %s4007_s30  ;;  %v4077_v14 = vcombine.low %v269_v12, %v270_v13  ;;  %v246_v18 = vld [vmem:[%s4057_s27 + $0x4] sm:$0xf]  ;;  %v720_v21 = vshll.u32 %v3758_v15, 16  ;;  %v3760_v23 = vld [vmem:[%s4057_s27 + $0x8] ss:$0 sps:$4 sm:$0x11]  }
  0x17   : > { %969 = vrot.lane.b32.xlu1 %v4071_v11, %s4007_s30  ;;  %3737 = vmatpush3.bf16.msra.mxu1 %v3846_v10  ;;  %v4089_v22 = vcombine.low %v245_v17, %v246_v18  ;;  %v3077_v26 = vld [vmem:[%s4057_s27 + $0xa8] sm:$0xf]  ;;  %v576_v29 = vshll.u32 %v3760_v23, 16  ;;  %v271_v30 = vld [vmem:[%s4057_s27 + $0x9c] sm:$0xf]  ;;  %v3853_v17 = vld [vmem:[%s5331_s1 + $0x20] sm:$0xff]  }
  0x18   : > { %v713_v19 = vshrl.u32 %v4077_v14, 16  ;;  %v715_v20 = vshll.u32 %v4077_v14, 16  ;;  %3448 = vmatpush3.bf16.msra.mxu0 %v3846_v10  ;;  %3730 = vmatprep.subr.bf16.mxu1 %v3847_v16  ;;  %v722_v25 = vrot.slane %v720_v21, 1  ;;  %v3078_v33 = vld [vmem:[%s4057_s27 + $0xac] sm:$0xf] }
  0x19   : > { %3449 = vmatprep.subr.bf16.mxu0 %v3847_v16  ;;  %v569_v27 = vshrl.u32 %v4089_v22, 16  ;;  %v571_v28 = vshll.u32 %v4089_v22, 16  ;;  %v272_v34 = vld [vmem:[%s4057_s27 + $0xa0] sm:$0xf]  ;;  %v578_v36 = vrot.slane %v576_v29, 1  ;;  %v4110_v43 = vcombine.low %v3077_v26, %v3078_v33  ;;  %v3857_v26 = vld [vmem:[%s5331_s1 + $0x28] sm:$0xff]  }
  0x1a   : > { %v717_v24 = vrot.slane %v715_v20, 1  ;;  %v4102_v38 = vcombine.low %v271_v30, %v272_v34  ;;  %v3764_v39 = vld [vmem:[%s4057_s27 + $0xa4] ss:$0 sps:$4 sm:$0x11]   ;;  %v3053_v40 = vld [vmem:[%s4057_s27 + $0x18] sm:$0xf] }
  0x1b   : > { %v573_v35 = vrot.slane %v571_v28, 1  ;;  %3738 = vmatpush3.bf16.msra.mxu1 %v3850_v31  ;;  %v4107_v41 = vld [vmem:[%s4057_s27 + $0x1c] sm:$0xf]  ;;  %v247_v44 = vld [vmem:[%s4057_s27 + $0xc] sm:$0xf]  ;;  %v732_v49 = vshll.u32 %v3764_v39, 16 }
  0x1c   : > { %v718_v32 = vor.u32 %v717_v24, %v713_v19  ;;  %3450 = vmatpush3.bf16.msra.mxu0 %v3850_v31  ;;  %v248_v45 = vld [vmem:[%s4057_s27 + $0x10] sm:$0xf]  ;;  %v725_v47 = vshrl.u32 %v4102_v38, 16  ;;  %v727_v48 = vshll.u32 %v4102_v38, 16  ;;  %3731 = vmatprep.subr.bf16.mxu1 %v3852_v46  ;;  %v3079_v55 = vld [vmem:[%s4057_s27 + $0xb4] sm:$0xf]  ;;  %v4129_v57 = vcombine.low %v3053_v40, %v4107_v41 }
  0x1d   : > { %v574_v42 = vor.u32 %v573_v35, %v569_v27  ;;  %v4120_v51 = vcombine.low %v247_v44, %v248_v45  ;;  %v3768_v52 = vld [vmem:[%s4057_s27 + $0x14] ss:$0 sps:$4 sm:$0x11]   ;;  %3451 = vmatprep.subr.bf16.mxu0 %v3852_v46  ;;  %v734_v54 = vrot.slane %v732_v49, 1  ;;  %v3080_v56 = vld [vmem:[%s4057_s27 + $0xb8] sm:$0xf] }
  0x1e   : > { %v723_v37 = vsel %vm567_vm0, %v718_v32, %v722_v25  ;;  %v729_v53 = vrot.slane %v727_v48, 1  ;;  %v588_v60 = vshll.u32 %v3768_v52, 16  ;;  %v273_v61 = vld [vmem:[%s4057_s27 + $0xa8] sm:$0xf]  ;;  %v274_v63 = vld [vmem:[%s4057_s27 + $0xac] sm:$0xf]  ;;  %v4139_v5 = vcombine.low %v3079_v55, %v3080_v56 }
  0x1f   : > { %784 = vrot.lane.b32.xlu0 %v723_v37, %s4007_s30  ;;  %v579_v50 = vsel %vm567_vm0, %v574_v42, %v578_v36  ;;  %v581_v58 = vshrl.u32 %v4120_v51, 16  ;;  %v583_v59 = vshll.u32 %v4120_v51, 16  ;;  %v4135_v2 = vcombine.low %v273_v61, %v274_v63  ;;  %v3772_v3 = vld [vmem:[%s4057_s27 + $0xb0] ss:$0 sps:$4 sm:$0x11]   ;;  %v3854_v19 = vld [vmem:[%s5331_s1 + $0x68] sm:$0xff]   ;;  %3739 = vmatpush3.bf16.msra.mxu1 %v3853_v17 }
  0x20   : > { %760 = vrot.lane.b32.xlu1 %v579_v50, %s4007_s30  ;;  %v730_v62 = vor.u32 %v729_v53, %v725_v47  ;;  %v590_v1 = vrot.slane %v588_v60, 1  ;;  %v3055_v6 = vld [vmem:[%s4057_s27 + $0x24] sm:$0xf]  ;;  %v4143_v8 = vld [vmem:[%s4057_s27 + $0x28] sm:$0xf]  ;;  %v744_v15 = vshll.u32 %v3772_v3, 16  ;;  %3452 = vmatpush3.bf16.msra.mxu0 %v3853_v17 }
  0x21   : > { %v585_v0 = vrot.slane %v583_v59, 1  ;;  %v737_v12 = vshrl.u32 %v4135_v2, 16  ;;  %v739_v13 = vshll.u32 %v4135_v2, 16  ;;  %v249_v16 = vld [vmem:[%s4057_s27 + $0x18] sm:$0xf]  ;;  %v4166_v27 = vcombine.low %v3055_v6, %v4143_v8  ;;  %3732 = vmatprep.subr.bf16.mxu1 %v3854_v19  ;;  %3453 = vmatprep.subr.bf16.mxu0 %v3854_v19  ;;  %v3859_v33 = vld [vmem:[%s5331_s1 + $0x70] sm:$0xff]  }
  0x22   : > { %v735_v4 = vsel %vm567_vm0, %v730_v62, %v734_v54  ;;  %v250_v18 = vld [vmem:[%s4057_s27 + $0x1c] sm:$0xf]  ;;  %v746_v23 = vrot.slane %v744_v15, 1  ;;  %v3776_v25 = vld [vmem:[%s4057_s27 + $0x20] ss:$0 sps:$4 sm:$0x11]  }
  0x23   : > { %995 = vrot.lane.b32.xlu0 %v4110_v43, %s4007_s30  ;;  %v586_v10 = vor.u32 %v585_v0, %v581_v58  ;;  %v741_v21 = vrot.slane %v739_v13, 1  ;;  %v4159_v24 = vcombine.low %v249_v16, %v250_v18  ;;  %v600_v31 = vshll.u32 %v3776_v25, 16  ;;  %v3081_v32 = vld [vmem:[%s4057_s27 + $0xc0] sm:$0xf]  ;;  %v3082_v34 = vld [vmem:[%s4057_s27 + $0xc4] sm:$0xf]  ;;  %3740 = vmatpush3.bf16.msra.mxu1 %v3857_v26 }
  0x24   : > { %786 = vrot.lane.b32.xlu1 %v735_v4, %s4007_s30  ;;  %v275_v35 = vld [vmem:[%s4057_s27 + $0xb4] sm:$0xf]  ;;  %v276_v36 = vld [vmem:[%s4057_s27 + $0xb8] sm:$0xf]  ;;  %3454 = vmatpush3.bf16.msra.mxu0 %v3857_v26  ;;  %v3099_v44 = vld [vmem:[%s4057_s27 + $0xc] sm:$0xe]  ;;  %v4191_v48 = vcombine.low %v3081_v32, %v3082_v34 }
  0x25   : > { %v591_v20 = vsel %vm567_vm0, %v586_v10, %v590_v1  ;;  %v742_v28 = vor.u32 %v741_v21, %v737_v12  ;;  %v593_v29 = vshrl.u32 %v4159_v24, 16  ;;  %v595_v30 = vshll.u32 %v4159_v24, 16  ;;  %v3780_v45 = vld [vmem:[%s4057_s27 + $0xbc] ss:$0 sps:$4 sm:$0x11]   ;;  %3733 = vmatprep.subr.bf16.mxu1 %v3859_v33  ;;  %v3860_v46 = vld [vmem:[%s5331_s1 + $0x30] sm:$0xff]   ;;  %3455 = vmatprep.subr.bf16.mxu0 %v3859_v33 }
  0x26   : > { %v602_v40 = vrot.slane %v600_v31, 1  ;;  %v4181_v42 = vcombine.low %v275_v35, %v276_v36  ;;  %v3057_v52 = vld [vmem:[%s4057_s27 + $0x30] sm:$0xf]  ;;  %v4197_v53 = vld [vmem:[%s4057_s27 + $0x34] sm:$0xf]  ;;  %v756_v54 = vshll.u32 %v3780_v45, 16  ;;  %v3259_v62 = vcombine.low %v3099_v44, %v4065_v9 }
  0x27   : > { %971 = vrot.lane.b32.xlu0 %v4129_v57, %s4007_s30  ;;  %v747_v37 = vsel %vm567_vm0, %v742_v28, %v746_v23  ;;  %v597_v39 = vrot.slane %v595_v30, 1  ;;  %v251_v55 = vld [vmem:[%s4057_s27 + $0x24] sm:$0xf]  ;;  %v252_v56 = vld [vmem:[%s4057_s27 + $0x28] sm:$0xf]  ;;  %3741 = vmatpush3.bf16.msra.mxu1 %v3860_v46  ;;  %v4207_v0 = vcombine.low %v3057_v52, %v4197_v53  ;;  %v3861_v9 = vld [vmem:[%s5331_s1 + $0x78] sm:$0xff]  }
  0x28   : > { %762 = vrot.lane.b32.xlu1 %v591_v20, %s4007_s30  ;;  %v749_v49 = vshrl.u32 %v4181_v42, 16  ;;  %v751_v50 = vshll.u32 %v4181_v42, 16  ;;  %v4202_v60 = vcombine.low %v251_v55, %v252_v56  ;;  %v3784_v61 = vld [vmem:[%s4057_s27 + $0x2c] ss:$0 sps:$4 sm:$0x11]   ;;  %3456 = vmatpush3.bf16.msra.mxu0 %v3860_v46  ;;  %v758_v63 = vrot.slane %v756_v54, 1 }
  0x29   : > { %v598_v47 = vor.u32 %v597_v39, %v593_v29  ;;  %v3115_v1 = vld [vmem:[%s4057_s27 + $0x18] sm:$0xf]  ;;  %v612_v10 = vshll.u32 %v3784_v61, 16  ;;  %v3116_v12 = vld [vmem:[%s4057_s27 + $0x1c] sm:$0xf]  ;;  %3734 = vmatprep.subr.bf16.mxu1 %v3861_v9  ;;  %3457 = vmatprep.subr.bf16.mxu0 %v3861_v9  ;;  %v1289_v28 = vrot.slane %v3259_v62, 1 }
  0x2a   : > { %v753_v59 = vrot.slane %v751_v50, 1  ;;  %v605_v4 = vshrl.u32 %v4202_v60, 16  ;;  %v607_v6 = vshll.u32 %v4202_v60, 16  ;;  %v4219_v13 = vcombine.low %v3115_v1, %v3116_v12  ;;  %v3786_v15 = vld [vmem:[%s4057_s27 + $0x20] ss:$0 sps:$4 sm:$0x11]  }
  0x2b   : > { %997 = vrot.lane.b32.xlu0 %v4139_v5, %s4007_s30  ;;  %v603_v58 = vsel %vm567_vm0, %v598_v47, %v602_v40  ;;  %v614_v18 = vrot.slane %v612_v10, 1  ;;  %v1505_v21 = vshll.u32 %v3786_v15, 16  ;;  %v3787_v23 = vld [vmem:[%s4057_s27 + $0x14] ss:$0 sps:$4 sm:$0x11]   ;;  %v3864_v34 = vld [vmem:[%s5331_s1 + $0x38] sm:$0xff]  }
  0x2c   : > { %788 = vrot.lane.b32.xlu1 %v747_v37, %s4007_s30  ;;  %v754_v3 = vor.u32 %v753_v59, %v749_v49  ;;  %v609_v17 = vrot.slane %v607_v6, 1  ;;  %v1498_v19 = vshrl.u32 %v4219_v13, 16  ;;  %v1500_v20 = vshll.u32 %v4219_v13, 16  ;;  %v3100_v25 = vld [vmem:[%s4057_s27 + $0x18] sm:$0xe]  ;;  %3742 = vmatpush3.bf16.msra.mxu1 %v3864_v34  ;;  %v3867_v45 = vld [vmem:[%s5331_s1 + $0xc0] sm:$0xff]  }
  0x2d   : > { %v1507_v30 = vrot.slane %v1505_v21, 1  ;;  %v1290_v31 = vrot.slane %v3787_v23, 1  ;;  %v3059_v32 = vld [vmem:[%s4057_s27 + $0x3c] sm:$0xf]  ;;  %v253_v33 = vld [vmem:[%s4057_s27 + $0x30] sm:$0xf]  ;;  %3458 = vmatpush3.bf16.msra.mxu0 %v3864_v34  ;;  %v3260_v46 = vcombine.low %v3100_v25, %v4107_v41  ;;  %3555 = vmatprep.subr.bf16.mxu1 %v3867_v45 }
  0x2e   : > { %v759_v16 = vsel %vm567_vm0, %v754_v3, %v758_v63  ;;  %v610_v26 = vor.u32 %v609_v17, %v605_v4  ;;  %v1502_v29 = vrot.slane %v1500_v20, 1  ;;  %v254_v36 = vld [vmem:[%s4057_s27 + $0x34] sm:$0xf]  ;;  %v3117_v37 = vld [vmem:[%s4057_s27 + $0x24] sm:$0xf] }
  0x2f   : > { %973 = vrot.lane.b32.xlu0 %v4166_v27, %s4007_s30  ;;  %v4239_v40 = vld [vmem:[%s4057_s27 + $0x40] sm:$0xf]  ;;  %v3791_v44 = vld [vmem:[%s4057_s27 + $0x38] ss:$0 sps:$4 sm:$0x11]   ;;  %v4247_v47 = vcombine.low %v253_v33, %v254_v36  ;;  %v1291_v52 = vsel %vm840_vm1, %v1289_v28, %v1290_v31  ;;  %v1292_v15 = vrot.slane %v3260_v46, 1 }
  0x30   : > { %764 = vrot.lane.b32.xlu1 %v603_v58, %s4007_s30  ;;  %v615_v35 = vsel %vm567_vm0, %v610_v26, %v614_v18  ;;  %v1503_v39 = vor.u32 %v1502_v29, %v1498_v19  ;;  %v3118_v49 = vld [vmem:[%s4057_s27 + $0x28] sm:$0xf]  ;;  %v624_v54 = vshll.u32 %v3791_v44, 16  ;;  %v3793_v56 = vld [vmem:[%s4057_s27 + $0x2c] ss:$0 sps:$4 sm:$0x11]   ;;  %v4257_v58 = vcombine.low %v3059_v32, %v4239_v40 }
  0x31   : > { %v4252_v55 = vcombine.low %v3117_v37, %v3118_v49  ;;  %v617_v41 = vshrl.u32 %v4247_v47, 16  ;;  %v619_v59 = vshll.u32 %v4247_v47, 16  ;;  %v3794_v61 = vld [vmem:[%s4057_s27 + $0x20] ss:$0 sps:$4 sm:$0x11]   ;;  %v1517_v1 = vshll.u32 %v3793_v56, 16 }
  0x32   : > { %v1508_v50 = vsel %vm567_vm0, %v1503_v39, %v1507_v30  ;;  %v3101_v3 = vld [vmem:[%s4057_s27 + $0x24] sm:$0xe]  ;;  %v626_v6 = vrot.slane %v624_v54, 1  ;;  %v3061_v17 = vld [vmem:[%s4057_s27 + $0x48] sm:$0xf] }
  0x33   : > { %999 = vrot.lane.b32.xlu0 %v4191_v48, %s4007_s30  ;;  %v1510_v62 = vshrl.u32 %v4252_v55, 16  ;;  %v1512_v63 = vshll.u32 %v4252_v55, 16  ;;  %v621_v4 = vrot.slane %v619_v59, 1  ;;  %v4269_v10 = vld [vmem:[%s5331_s1 + $0x100] sm:$0xff]   ;;  %v1519_v9 = vrot.slane %v1517_v1, 1 }
  0x34   : > { %790 = vrot.lane.b32.xlu1 %v759_v16, %s4007_s30  ;;  %v1293_v16 = vrot.slane %v3794_v61, 1  ;;  %v255_v18 = vld [vmem:[%s4057_s27 + $0x3c] sm:$0xf]  ;;  %v4276_v20 = vld [vmem:[%s4057_s27 + $0x4c] sm:$0xf]  ;;  %3687 = vmatprep.subr.bf16.mxu0 %v4269_v10  ;;  %v3261_v29 = vcombine.low %v3101_v3, %v4143_v8 }
  0x35   : > { %v1514_v12 = vrot.slane %v1512_v63, 1  ;;  %v622_v19 = vor.u32 %v621_v4, %v617_v41  ;;  %v256_v21 = vld [vmem:[%s4057_s27 + $0x40] sm:$0xf]  ;;  %v3798_v26 = vld [vmem:[%s4057_s27 + $0x44] ss:$0 sps:$4 sm:$0x11]   ;;  %v4295_v37 = vcombine.low %v3061_v17, %v4276_v20 }
  0x36   : > { %v4280_v25 = vcombine.low %v255_v18, %v256_v21  ;;  %v3119_v28 = vld [vmem:[%s4057_s27 + $0x30] sm:$0xf]  ;;  %v3120_v31 = vld [vmem:[%s4057_s27 + $0x34] sm:$0xf]  ;;  %v1294_v36 = vsel %vm840_vm1, %v1292_v15, %v1293_v16  ;;  %v636_v8 = vshll.u32 %v3798_v26, 16  ;;  %v1295_v56 = vrot.slane %v3261_v29, 1 }
  0x37   : > { %975 = vrot.lane.b32.xlu0 %v4207_v0, %s4007_s30  ;;  %v1515_v23 = vor.u32 %v1514_v12, %v1510_v62  ;;  %v627_v30 = vsel %vm567_vm0, %v622_v19, %v626_v6  ;;  %v4297_v39 = vcombine.low %v3119_v28, %v3120_v31  ;;  %v3801_v44 = vld [vmem:[%s4057_s27 + $0x2c] ss:$0 sps:$4 sm:$0x11]   ;;  %v3102_v45 = vld [vmem:[%s4057_s27 + $0x30] sm:$0xe] }
  0x38   : > { %766 = vrot.lane.b32.xlu1 %v615_v35, %s4007_s30  ;;  %v629_v33 = vshrl.u32 %v4280_v25, 16  ;;  %v631_v34 = vshll.u32 %v4280_v25, 16  ;;  %v3800_v35 = vld [vmem:[%s4057_s27 + $0x38] ss:$0 sps:$4 sm:$0x11]   ;;  %v1296_v62 = vrot.slane %v3801_v44, 1 }
  0x39   : > { %v1520_v32 = vsel %vm567_vm0, %v1515_v23, %v1519_v9  ;;  %v1529_v49 = vshll.u32 %v3800_v35, 16  ;;  %v1524_v54 = vshll.u32 %v4297_v39, 16  ;;  %v257_v41 = vld [vmem:[%s4057_s27 + $0x48] sm:$0xf]  ;;  %v258_v63 = vld [vmem:[%s4057_s27 + $0x4c] sm:$0xf]  ;;  %v3262_v9 = vcombine.low %v3102_v45, %v4197_v53 }
  0x3a   : > { %v633_v46 = vrot.slane %v631_v34, 1  ;;  %v3063_v3 = vld [vmem:[%s4057_s27 + $0x54] sm:$0xf]  ;;  %v4309_v4 = vcombine.low %v257_v41, %v258_v63  ;;  %v3805_v6 = vld [vmem:[%s4057_s27 + $0x50] ss:$0 sps:$4 sm:$0x11]   ;;  %v1297_v28 = vsel %vm840_vm1, %v1295_v56, %v1296_v62 }
  0x3b   : > { %1689 = vrot.lane.b32.xlu0 %v1508_v50, %s4007_s30  ;;  %v638_v50 = vrot.slane %v636_v8, 1  ;;  %v1531_v61 = vrot.slane %v1529_v49, 1  ;;  %v1526_v1 = vrot.slane %v1524_v54, 1  ;;  %v3121_v12 = vld [vmem:[%s4057_s27 + $0x3c] sm:$0xf]  ;;  %v648_v23 = vshll.u32 %v3805_v6, 16 }
  0x3c   : > { %1337 = vrot.lane.b32.xlu1 %v1291_v52, %s4007_s30  ;;  %v1522_v52 = vshrl.u32 %v4297_v39, 16  ;;  %v634_v59 = vor.u32 %v633_v46, %v629_v33  ;;  %v4316_v16 = vld [vmem:[%s4057_s27 + $0x58] sm:$0xf]  ;;  %v3122_v17 = vld [vmem:[%s4057_s27 + $0x40] sm:$0xf]  ;;  %v641_v19 = vshrl.u32 %v4309_v4, 16 }
  0x3d   : > { %v643_v21 = vshll.u32 %v4309_v4, 16  ;;  %v3807_v26 = vld [vmem:[%s4057_s27 + $0x44] ss:$0 sps:$4 sm:$0x11]   ;;  %v4324_v53 = vcombine.low %v3121_v12, %v3122_v17  ;;  %v650_v31 = vrot.slane %v648_v23, 1  ;;  %v4331_v35 = vcombine.low %v3063_v3, %v4316_v16 }
  0x3e   : > { %v639_v15 = vsel %vm567_vm0, %v634_v59, %v638_v50  ;;  %v1527_v18 = vor.u32 %v1526_v1, %v1522_v52  ;;  %v3808_v33 = vld [vmem:[%s4057_s27 + $0x38] ss:$0 sps:$4 sm:$0x11]   ;;  %v3103_v34 = vld [vmem:[%s4057_s27 + $0x3c] sm:$0xe]  ;;  %v1298_v45 = vrot.slane %v3262_v9, 1 }
  0x3f   : > { %977 = vrot.lane.b32.xlu0 %v4257_v58, %s4007_s30  ;;  %5357 = vst [vmem:[#allocation2_spill] sm:$0xff] %v4324_v53  ;;  %5358 = vst [vmem:[#allocation3_spill] sm:$0xff] %v4331_v35  ;;  %v1536_v8 = vshll.u32 %v4324_v53, 16  ;;  %v259_v46 = vld [vmem:[%s4057_s27 + $0x54] sm:$0xf]  ;;  %v3263_v54 = vcombine.low %v3103_v34, %v4239_v40  ;;  %v1299_v41 = vrot.slane %v3808_v33, 1 }
  0x40   : > { %768 = vrot.lane.b32.xlu1 %v627_v30, %s4007_s30  ;;  %v1532_v29 = vsel %vm567_vm0, %v1527_v18, %v1531_v61  ;;  %v645_v30 = vrot.slane %v643_v21, 1  ;;  %v260_v52 = vld [vmem:[%s4057_s27 + $0x58] sm:$0xf]  ;;  %v3065_v59 = vld [vmem:[%s4057_s27 + $0x60] sm:$0xf] }
  0x41   : > { %v1538_v49 = vrot.slane %v1536_v8, 1  ;;  %v4342_v61 = vld [vmem:[%s4057_s27 + $0x64] sm:$0xf]  ;;  %v4344_v62 = vcombine.low %v259_v46, %v260_v52  ;;  %v3812_v63 = vld [vmem:[%s4057_s27 + $0x5c] ss:$0 sps:$4 sm:$0x11]   ;;  %v1300_v21 = vsel %vm840_vm1, %v1298_v45, %v1299_v41 }
  0x42   : > { %v646_v44 = vor.u32 %v645_v30, %v641_v19  ;;  %v3123_v3 = vld [vmem:[%s4057_s27 + $0x48] sm:$0xf]  ;;  %v3124_v6 = vld [vmem:[%s4057_s27 + $0x4c] sm:$0xf]  ;;  %v660_v9 = vshll.u32 %v3812_v63, 16  ;;  %v4363_v30 = vcombine.low %v3065_v59, %v4342_v61 }
  0x43   : > { %1691 = vrot.lane.b32.xlu0 %v1520_v32, %s4007_s30  ;;  %v1541_v32 = vshll.u32 %v3807_v26, 16  ;;  %5359 = vst [vmem:[#allocation4_spill] sm:$0xff] %v4344_v62  ;;  %v653_v40 = vshrl.u32 %v4344_v62, 16  ;;  %v655_v12 = vshll.u32 %v4344_v62, 16  ;;  %v4355_v17 = vcombine.low %v3123_v3, %v3124_v6  ;;  %v262_v8 = vld [vmem:[%s4057_s27 + $0x64] sm:$0xf] }
  0x44   : > { %1339 = vrot.lane.b32.xlu1 %v1294_v36, %s4007_s30  ;;  %v1534_v36 = vshrl.u32 %v4324_v53, 16  ;;  %v651_v56 = vsel %vm567_vm0, %v646_v44, %v650_v31  ;;  %v3814_v18 = vld [vmem:[%s4057_s27 + $0x50] ss:$0 sps:$4 sm:$0x11]   ;;  %v662_v26 = vrot.slane %v660_v9, 1  ;;  %5361 = vst [vmem:[#allocation6_spill] sm:$0xff] %v4363_v30 }
  0x45   : > { %v1543_v50 = vrot.slane %v1541_v32, 1  ;;  %5360 = vst [vmem:[#allocation5_spill] sm:$0xff] %v4355_v17  ;;  %v3815_v19 = vld [vmem:[%s4057_s27 + $0x44] ss:$0 sps:$4 sm:$0x11]   ;;  %v657_v23 = vrot.slane %v655_v12, 1 }
  0x46   : > { %v1539_v1 = vor.u32 %v1538_v49, %v1534_v36  ;;  %v1546_v31 = vshrl.u32 %v4355_v17, 16  ;;  %v1548_v32 = vshll.u32 %v4355_v17, 16  ;;  %v1553_v33 = vshll.u32 %v3814_v18, 16  ;;  %v261_v36 = vld [vmem:[%s4057_s27 + $0x60] sm:$0xf] }
  0x47   : > { %979 = vrot.lane.b32.xlu0 %v4295_v37, %s4007_s30  ;;  %v658_v34 = vor.u32 %v657_v23, %v653_v40  ;;  %v1302_v46 = vrot.slane %v3815_v19, 1  ;;  %v4370_v49 = vcombine.low %v261_v36, %v262_v8  ;;  %v4377_v41 = vld [vmem:[%s4057_s27 + $0x70] sm:$0xf]  ;;  %v3125_v59 = vld [vmem:[%s4057_s27 + $0x54] sm:$0xf] }
  0x48   : > { %770 = vrot.lane.b32.xlu1 %v639_v15, %s4007_s30  ;;  %v1544_v15 = vsel %vm567_vm0, %v1539_v1, %v1543_v50  ;;  %v1550_v44 = vrot.slane %v1548_v32, 1  ;;  %v1555_v45 = vrot.slane %v1553_v33, 1  ;;  %v3819_v50 = vld [vmem:[%s4057_s27 + $0x68] ss:$0 sps:$4 sm:$0x11]  }
  0x49   : > { %5362 = vst [vmem:[#allocation7_spill] sm:$0xff] %v4370_v49  ;;  %v3126_v63 = vld [vmem:[%s4057_s27 + $0x58] sm:$0xf]  ;;  %v665_v3 = vshrl.u32 %v4370_v49, 16  ;;  %v667_v6 = vshll.u32 %v4370_v49, 16  ;;  %v672_v40 = vshll.u32 %v3819_v50, 16 }
  0x4a   : > { %v1551_v1 = vor.u32 %v1550_v44, %v1546_v31  ;;  %v4385_v12 = vcombine.low %v3125_v59, %v3126_v63  ;;  %v3822_v19 = vld [vmem:[%s4057_s27 + $0x50] ss:$0 sps:$4 sm:$0x11]   ;;  %v3105_v33 = vld [vmem:[%s4057_s27 + $0x54] sm:$0xe] }
  0x4b   : > { %1693 = vrot.lane.b32.xlu0 %v1532_v29, %s4007_s30  ;;  %v3104_v29 = vld [vmem:[%s4057_s27 + $0x48] sm:$0xe]  ;;  %v669_v18 = vrot.slane %v667_v6, 1  ;;  %v263_v8 = vld [vmem:[%s4057_s27 + $0x6c] sm:$0xf] }
  0x4c   : > { %1341 = vrot.lane.b32.xlu1 %v1297_v28, %s4007_s30  ;;  %v1301_v28 = vrot.slane %v3263_v54, 1  ;;  %v3264_v52 = vcombine.low %v3104_v29, %v4276_v20  ;;  %v663_v54 = vsel %vm567_vm0, %v658_v34, %v662_v26  ;;  %5363 = vst [vmem:[#allocation8_spill] sm:$0xff] %v4385_v12  ;;  %v3821_v20 = vld [vmem:[%s4057_s27 + $0x5c] ss:$0 sps:$4 sm:$0x11]   ;;  %v1556_v9 = vsel %vm567_vm0, %v1551_v1, %v1555_v45 }
  0x4d   : > { %v1558_v23 = vshrl.u32 %v4385_v12, 16  ;;  %v1560_v26 = vshll.u32 %v4385_v12, 16  ;;  %v1565_v29 = vshll.u32 %v3821_v20, 16  ;;  %v670_v32 = vor.u32 %v669_v18, %v665_v3  ;;  %v264_v44 = vld [vmem:[%s4057_s27 + $0x70] sm:$0xf] }
  0x4e   : > { %v1305_v45 = vrot.slane %v3822_v19, 1  ;;  %v3826_v50 = vld [vmem:[%s4057_s27 + $0x74] ss:$0 sps:$4 sm:$0x11]   ;;  %v3069_v59 = vld [vmem:[%s4057_s27 + $0x78] sm:$0xf]  ;;  %v3265_v18 = vcombine.low %v3105_v33, %v4316_v16 }
  0x4f   : > { %981 = vrot.lane.b32.xlu0 %v4331_v35, %s4007_s30  ;;  %v1562_v34 = vrot.slane %v1560_v26, 1  ;;  %v1567_v36 = vrot.slane %v1565_v29, 1  ;;  %v4408_v63 = vld [vmem:[%s4057_s27 + $0x7c] sm:$0xf]  ;;  %v3127_v1 = vld [vmem:[%s4057_s27 + $0x60] sm:$0xf] }
  0x50   : > { %772 = vrot.lane.b32.xlu1 %v651_v56, %s4007_s30  ;;  %v3067_v56 = vld [vmem:[%s4057_s27 + $0x6c] sm:$0xf]  ;;  %v4428_v16 = vcombine.low %v3069_v59, %v4408_v63  ;;  %v307_v12 = vld [vmem:[%s4057_s27 + $0xa8] sm:$0xe] }
  0x51   : > { %v4396_v31 = vcombine.low %v3067_v56, %v4377_v41  ;;  %v1563_v56 = vor.u32 %v1562_v34, %v1558_v23  ;;  %v3829_v34 = vld [vmem:[%s4057_s27 + $0x5c] ss:$0 sps:$4 sm:$0x11]   ;;  %v3129_v59 = vld [vmem:[%s4057_s27 + $0x6c] sm:$0xf] }
  0x52   : > { %v3945_v17 = vld [vmem:[%s4057_s27 + $0xac] sm:$0xf] }
  0x53   : > { %1695 = vrot.lane.b32.xlu0 %v1544_v15, %s4007_s30  ;;  %v1303_v15 = vsel %vm840_vm1, %v1301_v28, %v1302_v46  ;;  %v1304_v28 = vrot.slane %v3264_v52, 1  ;;  %v4402_v46 = vcombine.low %v263_v8, %v264_v44  ;;  %v3128_v52 = vld [vmem:[%s4057_s27 + $0x64] sm:$0xf]  ;;  %v265_v8 = vld [vmem:[%s4057_s27 + $0x78] sm:$0xf] }
  0x54   : > { %1343 = vrot.lane.b32.xlu1 %v1300_v21, %s4007_s30  ;;  %v674_v21 = vrot.slane %v672_v40, 1  ;;  %v684_v40 = vshll.u32 %v3826_v50, 16  ;;  %v4416_v20 = vcombine.low %v3127_v1, %v3128_v52  ;;  %v266_v50 = vld [vmem:[%s4057_s27 + $0x7c] sm:$0xf] }
  0x55   : > { %5364 = vst [vmem:[#allocation9_spill] sm:$0xff] %v4402_v46  ;;  %v677_v3 = vshrl.u32 %v4402_v46, 16  ;;  %v679_v6 = vshll.u32 %v4402_v46, 16  ;;  %v1306_v26 = vsel %vm840_vm1, %v1304_v28, %v1305_v45  ;;  %v1307_v45 = vrot.slane %v3265_v18, 1  ;;  %v4448_v18 = vld [vmem:[%s4057_s27 + $0x88] sm:$0xf] }
  0x56   : > { %5365 = vst [vmem:[#allocation10_spill] sm:$0xff] %v4416_v20  ;;  %v1572_v23 = vshll.u32 %v4416_v20, 16  ;;  %v686_v29 = vrot.slane %v684_v40, 1  ;;  %v3833_v1 = vld [vmem:[%s4057_s27 + $0x80] ss:$0 sps:$4 sm:$0x11]  }
  0x57   : > { %983 = vrot.lane.b32.xlu0 %v4363_v30, %s4007_s30  ;;  %v681_v19 = vrot.slane %v679_v6, 1  ;;  %v4436_v6 = vcombine.low %v265_v8, %v266_v50  ;;  %v3071_v40 = vld [vmem:[%s4057_s27 + $0x84] sm:$0xf]  ;;  %v3838_v50 = vld [vmem:[%s4057_s27 + $0x68] ss:$0 sps:$4 sm:$0x11]  }
  0x58   : > { %774 = vrot.lane.b32.xlu1 %v663_v54, %s4007_s30  ;;  %v675_v54 = vsel %vm567_vm0, %v670_v32, %v674_v21  ;;  %v1570_v21 = vshrl.u32 %v4416_v20, 16  ;;  %v4591_v30 = vld [vmem:[%s4057_s27 + $0xac] sm:$0xf] }
  0x59   : > { %v682_v33 = vor.u32 %v681_v19, %v677_v3  ;;  %5366 = vst [vmem:[#allocation11_spill] sm:$0xff] %v4436_v6  ;;  %v3130_v3 = vld [vmem:[%s4057_s27 + $0x70] sm:$0xf]  ;;  %v3837_v19 = vld [vmem:[%s4057_s27 + $0x74] ss:$0 sps:$4 sm:$0x11]  }
  0x5b   : > { %1697 = vrot.lane.b32.xlu0 %v1556_v9, %s4007_s30  ;;  %v1568_v9 = vsel %vm567_vm0, %v1563_v56, %v1567_v36  ;;  %v1574_v36 = vrot.slane %v1572_v23, 1  ;;  %v1308_v56 = vrot.slane %v3829_v34, 1  ;;  %v687_v52 = vsel %vm567_vm0, %v682_v33, %v686_v29 }
  0x5c   : > { %1345 = vrot.lane.b32.xlu1 %v1303_v15, %s4007_s30  ;;  %v3828_v15 = vld [vmem:[%s4057_s27 + $0x68] ss:$0 sps:$4 sm:$0x11]   ;;  %v689_v23 = vshrl.u32 %v4436_v6, 16  ;;  %v1589_v34 = vshll.u32 %v3837_v19, 16 }
  0x5d   : > { %v1577_v32 = vshll.u32 %v3828_v15, 16  ;;  %v1575_v28 = vor.u32 %v1574_v36, %v1570_v21  ;;  %v4443_v15 = vcombine.low %v3129_v59, %v3130_v3  ;;  %v1309_v36 = vsel %vm840_vm1, %v1307_v45, %v1308_v56  ;;  %v268_v59 = vld [vmem:[%s4057_s27 + $0x88] sm:$0xf]  ;;  %v3107_v3 = vld [vmem:[%s4057_s27 + $0x6c] sm:$0xe] }
  0x5f   : > { %985 = vrot.lane.b32.xlu0 %v4396_v31, %s4007_s30  ;;  %v1579_v44 = vrot.slane %v1577_v32, 1  ;;  %5367 = vst [vmem:[#allocation12_spill] sm:$0xff] %v4443_v15  ;;  %v1582_v29 = vshrl.u32 %v4443_v15, 16  ;;  %v1584_v32 = vshll.u32 %v4443_v15, 16  ;;  %v3131_v15 = vld [vmem:[%s4057_s27 + $0x78] sm:$0xf] }
  0x60   : > { %776 = vrot.lane.b32.xlu1 %v675_v54, %s4007_s30  ;;  %v3106_v54 = vld [vmem:[%s4057_s27 + $0x60] sm:$0xe] }
  0x61   : > { %v1580_v21 = vsel %vm567_vm0, %v1575_v28, %v1579_v44  ;;  %v3266_v33 = vcombine.low %v3106_v54, %v4342_v61  ;;  %v4460_v28 = vcombine.low %v3071_v40, %v4448_v18  ;;  %v1591_v54 = vrot.slane %v1589_v34, 1 }
  0x63   : > { %1699 = vrot.lane.b32.xlu0 %v1568_v9, %s4007_s30  ;;  %v696_v9 = vshll.u32 %v3833_v1, 16  ;;  %v1586_v1 = vrot.slane %v1584_v32, 1  ;;  %v1310_v40 = vrot.slane %v3266_v33, 1  ;;  %v4472_v32 = vld [vmem:[%s4057_s27 + $0x94] sm:$0xf] }
  0x64   : > { %1347 = vrot.lane.b32.xlu1 %v1306_v26, %s4007_s30  ;;  %v691_v26 = vshll.u32 %v4436_v6, 16  ;;  %v3132_v6 = vld [vmem:[%s4057_s27 + $0x7c] sm:$0xf] }
  0x65   : > { %v698_v44 = vrot.slane %v696_v9, 1  ;;  %v1587_v45 = vor.u32 %v1586_v1, %v1582_v29  ;;  %v3844_v9 = vld [vmem:[%s4057_s27 + $0x8c] ss:$0 sps:$4 sm:$0x11]   ;;  %v3108_v1 = vld [vmem:[%s4057_s27 + $0x78] sm:$0xe] }
  0x66   : > { %v693_v8 = vrot.slane %v691_v26, 1  ;;  %v3073_v26 = vld [vmem:[%s4057_s27 + $0x90] sm:$0xf]  ;;  %v708_v34 = vshll.u32 %v3844_v9, 16 }
  0x67   : > { %987 = vrot.lane.b32.xlu0 %v4428_v16, %s4007_s30  ;;  %v1592_v33 = vsel %vm567_vm0, %v1587_v45, %v1591_v54 }
  0x68   : > { %778 = vrot.lane.b32.xlu1 %v687_v52, %s4007_s30  ;;  %v267_v52 = vld [vmem:[%s4057_s27 + $0x84] sm:$0xf]  ;;  %v694_v61 = vor.u32 %v693_v8, %v689_v23  ;;  %v3267_v8 = vcombine.low %v3107_v3, %v4377_v41  ;;  %v4492_v41 = vld [vmem:[%s4057_s27 + $0x74] ss:$0 sps:$4 sm:$0x11]  }
  0x69   : > { %v4466_v56 = vcombine.low %v267_v52, %v268_v59  ;;  %v710_v59 = vrot.slane %v708_v34, 1 }
  0x6a   : > { %v699_v19 = vsel %vm567_vm0, %v694_v61, %v698_v44  ;;  %v4483_v44 = vcombine.low %v3131_v15, %v3132_v6  ;;  %v4496_v6 = vcombine.low %v3073_v26, %v4472_v32  ;;  %v1313_v45 = vrot.slane %v3267_v8, 1 }
  0x6b   : > { %1701 = vrot.lane.b32.xlu0 %v1580_v21, %s4007_s30  ;;  %5368 = vst [vmem:[#allocation13_spill] sm:$0xff] %v4466_v56  ;;  %v1311_v21 = vrot.slane %v3838_v50, 1  ;;  %v701_v23 = vshrl.u32 %v4466_v56, 16  ;;  %v703_v29 = vshll.u32 %v4466_v56, 16 }
  0x6c   : > { %1349 = vrot.lane.b32.xlu1 %v1309_v36, %s4007_s30  ;;  %v1052_v36 = vshll.u32 %v4071_v11, 16  ;;  %5369 = vst [vmem:[#allocation14_spill] sm:$0xff] %v4483_v44  ;;  %v3849_v50 = vld [vmem:[%s4057_s27 + $0x80] ss:$0 sps:$4 sm:$0x11]   ;;  %v1594_v56 = vshrl.u32 %v4483_v44, 16 }
  0x6d   : > { %v705_v52 = vrot.slane %v703_v29, 1  ;;  %v1312_v61 = vsel %vm840_vm1, %v1310_v40, %v1311_v21  ;;  %v1596_v9 = vshll.u32 %v4483_v44, 16  ;;  %v1601_v20 = vshll.u32 %v3849_v50, 16  ;;  %v3133_v40 = vld [vmem:[%s4057_s27 + $0x84] sm:$0xf] }
  0x6e   : > { %v3268_v21 = vcombine.low %v3108_v1, %v4408_v63  ;;  %v3109_v50 = vld [vmem:[%s4057_s27 + $0x84] sm:$0xe]  ;;  %v4511_v8 = vrot.slane %v1052_v36, 1  ;;  %v4515_v63 = vld [vmem:[%s4057_s27 + $0x80] ss:$0 sps:$4 sm:$0x11]  }
  0x6f   : > { %989 = vrot.lane.b32.xlu0 %v4460_v28, %s4007_s30  ;;  %v706_v15 = vor.u32 %v705_v52, %v701_v23  ;;  %v1598_v3 = vrot.slane %v1596_v9, 1  ;;  %v1603_v54 = vrot.slane %v1601_v20, 1  ;;  %v3856_v23 = vld [vmem:[%s4057_s27 + $0x8c] ss:$0 sps:$4 sm:$0x11]  }
  0x70   : > { %780 = vrot.lane.b32.xlu1 %v699_v19, %s4007_s30  ;;  %v1314_v19 = vrot.slane %v4492_v41, 1 }
  0x71   : > { %v711_v29 = vsel %vm567_vm0, %v706_v15, %v710_v59  ;;  %v1599_v34 = vor.u32 %v1598_v3, %v1594_v56  ;;  %v1613_v59 = vshll.u32 %v3856_v23, 16  ;;  %v1316_v15 = vrot.slane %v3268_v21, 1  ;;  %v3934_v21 = vld [vmem:[%s4057_s27 + $0x8] ss:$0 sps:$4 sm:$0x11]  }
  0x72   : > { %v1315_v36 = vsel %vm840_vm1, %v1313_v45, %v1314_v19  ;;  %v1317_v3 = vrot.slane %v4515_v63, 1  ;;  %v3863_v19 = vld [vmem:[%s4057_s27 + $0x98] ss:$0 sps:$4 sm:$0x11]  }
  0x73   : > { %1703 = vrot.lane.b32.xlu0 %v1592_v33, %s4007_s30  ;;  %v3134_v33 = vld [vmem:[%s4057_s27 + $0x88] sm:$0xf]  ;;  %v1604_v52 = vsel %vm567_vm0, %v1599_v34, %v1603_v54  ;;  %v3135_v34 = vld [vmem:[%s4057_s27 + $0x90] sm:$0xf]  ;;  %v1625_v26 = vshll.u32 %v3863_v19, 16 }
  0x74   : > { %1351 = vrot.lane.b32.xlu1 %v1312_v61, %s4007_s30  ;;  %v4508_v20 = vcombine.low %v3133_v40, %v3134_v33  ;;  %v3933_v61 = vld [vmem:[%s4057_s27 + $0x98] ss:$0 sps:$4 sm:$0x11]   ;;  %v1615_v40 = vrot.slane %v1613_v59, 1  ;;  %v3136_v33 = vld [vmem:[%s4057_s27 + $0x94] sm:$0xf] }
  0x75   : > { %v878_v9 = vrot.slane %v3933_v61, 1  ;;  %v4528_v45 = vcombine.low %v3135_v34, %v3136_v33  ;;  %v842_v61 = vrot.slane %v3934_v21, 1  ;;  %v3110_v59 = vld [vmem:[%s4057_s27 + $0x90] sm:$0xe] }
  0x76   : > { %5370 = vst [vmem:[#allocation15_spill] sm:$0xff] %v4508_v20  ;;  %v1606_v56 = vshrl.u32 %v4508_v20, 16  ;;  %v1608_v1 = vshll.u32 %v4508_v20, 16  ;;  %v4541_v34 = vld [vmem:[%s4057_s27 + $0x8c] ss:$0 sps:$4 sm:$0x11]  }
  0x77   : > { %991 = vrot.lane.b32.xlu0 %v4496_v6, %s4007_s30  ;;  %5371 = vst [vmem:[#allocation16_spill] sm:$0xff] %v4528_v45  ;;  %v1320_v19 = vrot.slane %v4541_v34, 1 }
  0x78   : > { %782 = vrot.lane.b32.xlu1 %v711_v29, %s4007_s30  ;;  %v1610_v54 = vrot.slane %v1608_v1, 1  ;;  %v3269_v29 = vcombine.low %v3109_v50, %v4448_v18  ;;  %v305_v1 = vld [vmem:[%s4057_s27 + $0x90] sm:$0xe]  ;;  %v1618_v50 = vshrl.u32 %v4528_v45, 16 }
  0x7a   : > { %v1611_v23 = vor.u32 %v1610_v54, %v1606_v56  ;;  %v3935_v56 = vld [vmem:[%s4057_s27 + $0x94] sm:$0xf]  ;;  %v1319_v33 = vrot.slane %v3269_v29, 1 }
  0x7b   : > { %1705 = vrot.lane.b32.xlu0 %v1604_v52, %s4007_s30  ;;  %v1318_v52 = vsel %vm840_vm1, %v1316_v15, %v1317_v3  ;;  %v3223_v54 = vcombine.low %v305_v1, %v3935_v56  ;;  %v3111_v15 = vld [vmem:[%s4057_s27 + $0x9c] sm:$0xe]  ;;  %v3270_v56 = vcombine.low %v3110_v59, %v4472_v32 }
  0x7c   : > { %1353 = vrot.lane.b32.xlu1 %v1315_v36, %s4007_s30  ;;  %v1616_v18 = vsel %vm567_vm0, %v1611_v23, %v1615_v40  ;;  %v1620_v36 = vshll.u32 %v4528_v45, 16  ;;  %v1627_v40 = vrot.slane %v1625_v26, 1  ;;  %v293_v23 = vld [vmem:[%s4057_s27] sm:$0xe]  ;;  %v3936_v45 = vld [vmem:[%s4057_s27 + $0x4] sm:$0xf]  ;;  %v1321_v44 = vsel %vm840_vm1, %v1319_v33, %v1320_v19 }
  0x7d   : > { %v877_v21 = vrot.slane %v3223_v54, 1  ;;  %v3137_v1 = vld [vmem:[%s4057_s27 + $0x9c] sm:$0xf]  ;;  %v1322_v19 = vrot.slane %v3270_v56, 1 }
  0x7e   : > { %v1622_v3 = vrot.slane %v1620_v36, 1  ;;  %v4553_v36 = vld [vmem:[%s4057_s27 + $0xa0] sm:$0xf] }
  0x7f   : > { %1707 = vrot.lane.b32.xlu0 %v1616_v18, %s4007_s30  ;;  %v3211_v18 = vcombine.low %v293_v23, %v3936_v45  ;;  %v879_v29 = vsel %vm840_vm1, %v877_v21, %v878_v9  ;;  %v4558_v46 = vcombine.low %v3137_v1, %v4553_v36  ;;  %v4561_v45 = vld [vmem:[%s4057_s27 + $0xa4] ss:$0 sps:$4 sm:$0x11]   ;;  %v3938_v9 = vld [vmem:[%s4057_s27 + $0xa0] sm:$0xf] }
  0x80   : > { %1355 = vrot.lane.b32.xlu1 %v1318_v52, %s4007_s30  ;;  %v1623_v20 = vor.u32 %v1622_v3, %v1618_v50  ;;  %v3937_v50 = vld [vmem:[%s4057_s27 + $0xa4] ss:$0 sps:$4 sm:$0x11]   ;;  %v3271_v59 = vcombine.low %v3111_v15, %v3938_v9  ;;  %v1637_v21 = vshll.u32 %v4561_v45, 16  ;;  %v3112_v1 = vld [vmem:[%s4057_s27 + $0xa8] sm:$0xe] }
  0x81   : > { %v841_v52 = vrot.slane %v3211_v18, 1  ;;  %5372 = vst [vmem:[#allocation17_spill] sm:$0xff] %v4558_v46  ;;  %v881_v32 = vrot.slane %v3937_v50, 1  ;;  %v1632_v23 = vshll.u32 %v4558_v46, 16  ;;  %v306_v18 = vld [vmem:[%s4057_s27 + $0x9c] sm:$0xe] }
  0x82   : > { %v1628_v54 = vsel %vm567_vm0, %v1623_v20, %v1627_v40  ;;  %v1630_v40 = vshrl.u32 %v4558_v46, 16  ;;  %v4573_v15 = vld [vmem:[%s4057_s27 + $0x98] ss:$0 sps:$4 sm:$0x11]   ;;  %v294_v50 = vld [vmem:[%s4057_s27 + $0xc] sm:$0xe] }
  0x83   : > { %1709 = vrot.lane.b32.xlu0 %v1628_v54, %s4007_s30  ;;  %v1323_v54 = vrot.slane %v4573_v15, 1  ;;  %v3940_v9 = vld [vmem:[%s4057_s27 + $0x14] ss:$0 sps:$4 sm:$0x11]  }
  0x84   : > { %1357 = vrot.lane.b32.xlu1 %v1321_v44, %s4007_s30  ;;  %v843_v44 = vsel %vm840_vm1, %v841_v52, %v842_v61  ;;  %v1634_v61 = vrot.slane %v1632_v23, 1  ;;  %v3939_v52 = vld [vmem:[%s4057_s27 + $0xa0] sm:$0xf]  ;;  %v1325_v23 = vrot.slane %v3271_v59, 1 }
  0x85   : > { %v4599_v59 = vld [vmem:[%s4057_s27 + $0xb0] ss:$0 sps:$4 sm:$0x11]  }
  0x86   : > { %v1635_v56 = vor.u32 %v1634_v61, %v1630_v40  ;;  %5374 = vst [vmem:[#allocation19_spill] sm:$0xff] %v4599_v59  ;;  %v4602_v61 = vld [vmem:[%s4057_s27 + $0xb0] ss:$0 sps:$4 sm:$0x11]  }
  0x88   : > { %v994_v26 = vpop.permute.xlu0 %993 }
  0x89   : > { %v970_v33 = vpop.permute.xlu1 %969  ;;  %v1916_v20 = vsel %vm1817_vm2, %v879_v29, %v994_v26  ;;  %v1639_v29 = vrot.slane %v1637_v21, 1  ;;  %v3224_v26 = vcombine.low %v306_v18, %v3939_v52  ;;  %v3873_v21 = vld [vmem:[%s5331_s1 + $0xc8] sm:$0xff]   ;;  %v1324_v18 = vsel %vm840_vm1, %v1322_v19, %v1323_v54  ;;  %v3941_v52 = vld [vmem:[%s4057_s27 + $0x10] sm:$0xf] }
  0x8a   : > { %2440 = vmatprep.mubr.bf16.mxu1 %v1916_v20  ;;  %v1868_v3 = vsel %vm1817_vm2, %v843_v44, %v970_v33  ;;  %v845_v33 = vrot.slane %v3940_v9, 1  ;;  %v3869_v20 = vld [vmem:[%s5331_s1 + $0x80] sm:$0xff]   ;;  %v3212_v46 = vcombine.low %v294_v50, %v3941_v52  ;;  %1359 = vrot.lane.b32.xlu1 %v1324_v18, %s4007_s30  ;;  %v3943_v19 = vld [vmem:[%s4057_s27 + $0xac] sm:$0xf] }
  0x8b   : > { %2344 = vmatprep.mubr.bf16.mxu0 %v1868_v3  ;;  %v880_v44 = vrot.slane %v3224_v26, 1  ;;  %v3139_v3 = vld [vmem:[%s4057_s27 + $0xa8] sm:$0xf]  ;;  %v1640_v9 = vsel %vm567_vm0, %v1635_v56, %v1639_v29  ;;  %v3272_v54 = vcombine.low %v3112_v1, %v3943_v19  ;;  %v4615_v52 = vld [vmem:[%s4057_s27 + $0xa4] ss:$0 sps:$4 sm:$0x11]  }
  0x8c   : > { %v4596_v40 = vcombine.low %v3139_v3, %v4591_v30  ;;  %1711 = vrot.lane.b32.xlu0 %v1640_v9, %s4007_s30  ;;  %v3874_v56 = vld [vmem:[%s5331_s1 + $0x88] sm:$0xff]   ;;  %v4618_v26 = vld [vmem:[%s4057_s27 + $0x20] ss:$0 sps:$4 sm:$0x11]   ;;  %v844_v19 = vrot.slane %v3212_v46, 1  ;;  %v1326_v35 = vrot.slane %v4615_v52, 1 }
  0x8d   : > { %v882_v9 = vsel %vm840_vm1, %v880_v44, %v881_v32  ;;  %v295_v1 = vld [vmem:[%s4057_s27 + $0x18] sm:$0xe]  ;;  %v4632_v62 = vrot.slane %v3272_v54, 1 }
  0x8e   : > { %5373 = vst [vmem:[#allocation18_spill] sm:$0xff] %v4596_v40  ;;  %v1642_v3 = vshrl.u32 %v4596_v40, 16  ;;  %v1644_v18 = vshll.u32 %v4596_v40, 16  ;;  %v846_v54 = vsel %vm840_vm1, %v844_v19, %v845_v33 }
  0x90   : > { %v1646_v40 = vrot.slane %v1644_v18, 1  ;;  %v3879_v18 = vld [vmem:[%s5331_s1 + $0x90] sm:$0xff]  }
  0x91   : > { %v785_v50 = vpop.permute.xlu0 %784 }
  0x92   : > { %v1855_v29 = vsel %vm1817_vm2, %v4077_v14, %v785_v50  ;;  %v3877_v14 = vld [vmem:[%s5331_s1 + $0xd0] sm:$0xff]   ;;  %v1649_v50 = vshll.u32 %v4599_v59, 16  ;;  %v761_v49 = vpop.permute.xlu1 %760  ;;  %v1647_v53 = vor.u32 %v1646_v40, %v1642_v3  ;;  %v3882_v40 = vld [vmem:[%s5331_s1 + $0xd8] sm:$0xff]  }
  0x93   : > { %2441 = vmatmul.mubr.bf16.vlgmr.msra.gmra.mrb[0].mxu1 %v1855_v29  ;;  %v3225_v29 = vcombine.low %v307_v12, %v3945_v17  ;;  %v1819_v32 = vsel %vm1817_vm2, %v4089_v22, %v761_v49  ;;  %v1327_v17 = vsel %vm840_vm1, %v1325_v23, %v1326_v35  ;;  %v3946_v12 = vld [vmem:[%s4057_s27 + $0x1c] sm:$0xf]  ;;  %v3141_v22 = vld [vmem:[%s4057_s27 + $0xb4] sm:$0xf]  ;;  %v4642_v49 = vld [vmem:[%s4057_s27 + $0xb8] sm:$0xf] }
  0x94   : > { %3556 = vmatpush3.bf16.msra.mxu1 %v3869_v20  ;;  %v1651_v46 = vrot.slane %v1649_v50, 1  ;;  %2345 = vmatmul.mubr.bf16.vlgmr.msra.gmra.mrb[0].mxu0 %v1819_v32  ;;  %v3213_v59 = vcombine.low %v295_v1, %v3946_v12  ;;  %v4653_v35 = vcombine.low %v3141_v22, %v4642_v49  ;;  %v4656_v23 = vld [vmem:[%s4057_s27 + $0xbc] ss:$0 sps:$4 sm:$0x11]   ;;  %v4659_v1 = vld [vmem:[%s4057_s27 + $0xb4] sm:$0xe] }
  0x95   : > { %v996_v44 = vpop.permute.xlu0 %995  ;;  %3557 = vmatprep.subr.bf16.mxu1 %v3873_v21  ;;  %v3901_v21 = vld [vmem:[%s5331_s1 + $0x108] sm:$0xff]   ;;  %3688 = vmatpush3.bf16.msra.mxu0 %v4269_v10  ;;  %v883_v3 = vrot.slane %v3225_v29, 1  ;;  %5376 = vst [vmem:[#allocation21_spill] sm:$0xff] %v4656_v23  ;;  %v1661_v29 = vshll.u32 %v4656_v23, 16  ;;  %v3883_v32 = vld [vmem:[%s5331_s1 + $0x98] sm:$0xff]  }
  0x96   : > { %v1920_v20 = vsel %vm1817_vm2, %v882_v9, %v996_v44  ;;  %5375 = vst [vmem:[#allocation20_spill] sm:$0xff] %v4653_v35  ;;  %v1652_v9 = vsel %vm567_vm0, %v1647_v53, %v1651_v46  ;;  %1361 = vrot.lane.b32.xlu1 %v1327_v17, %s4007_s30  ;;  %v787_v10 = vpop.permute.xlu1 %786  ;;  %v1654_v19 = vshrl.u32 %v4653_v35, 16  ;;  %v1656_v50 = vshll.u32 %v4653_v35, 16  ;;  %v4679_v46 = vld [vmem:[%s4057_s27 + $0xb0] ss:$0 sps:$4 sm:$0x11]   ;;  %3689 = vmatprep.subr.bf16.mxu0 %v3901_v21 }
  0x97   : > { %2448 = vmatprep.mubr.bf16.mxu1 %v1920_v20  ;;  %1713 = vrot.lane.b32.xlu0 %v1652_v9, %s4007_s30  ;;  %v847_v44 = vrot.slane %v3213_v59, 1  ;;  %v5377_v20 = vrot.slane %v4602_v61, 1  ;;  %v1663_v22 = vrot.slane %v1661_v29, 1  ;;  %v4689_v59 = vld [vmem:[%s4057_s27 + $0xc0] sm:$0xe]  ;;  %v1329_v9 = vrot.slane %v4679_v46, 1 }
  0x98   : > { %3558 = vmatpush3.bf16.msra.mxu1 %v3874_v56  ;;  %v4670_v56 = vld [vmem:[%s5331_s1 + $0x110] sm:$0xff]   ;;  %v1658_v12 = vrot.slane %v1656_v50, 1  ;;  %v296_v61 = vld [vmem:[%s4057_s27 + $0x24] sm:$0xe]  ;;  %v3143_v23 = vld [vmem:[%s4057_s27 + $0xc0] sm:$0xf] }
  0x99   : > { %v972_v33 = vpop.permute.xlu0 %971  ;;  %3559 = vmatprep.subr.bf16.mxu1 %v3877_v14  ;;  %v1858_v14 = vsel %vm1817_vm2, %v4102_v38, %v787_v10  ;;  %v885_v17 = vsel %vm840_vm1, %v883_v3, %v5377_v20  ;;  %v3886_v38 = vld [vmem:[%s5331_s1 + $0xe0] sm:$0xff]   ;;  %v3947_v10 = vld [vmem:[%s4057_s27 + $0xb8] sm:$0xf]  ;;  %3690 = vmatpush3.bf16.msra.mxu0 %v3901_v21 }
  0x9a   : > { %v1872_v53 = vsel %vm1817_vm2, %v846_v54, %v972_v33  ;;  %v308_v54 = vld [vmem:[%s4057_s27 + $0xb4] sm:$0xe]  ;;  %v3949_v3 = vld [vmem:[%s4057_s27 + $0xb8] sm:$0xf]  ;;  %v763_v35 = vpop.permute.xlu1 %762  ;;  %v1659_v29 = vor.u32 %v1658_v12, %v1654_v19  ;;  %3691 = vmatprep.subr.bf16.mxu0 %v4670_v56  ;;  %v4711_v19 = vld [vmem:[%s4057_s27 + $0xc4] sm:$0xf] }
  0x9b   : > { %2352 = vmatprep.mubr.bf16.mxu0 %v1872_v53  ;;  %2449 = vmatmul.mubr.bf16.gmra.mrb[4].mxu1 %v1858_v14  ;;  %v3226_v33 = vcombine.low %v308_v54, %v3947_v10  ;;  %v3948_v53 = vld [vmem:[%s4057_s27 + $0xbc] ss:$0 sps:$4 sm:$0x11]   ;;  %v3273_v20 = vcombine.low %v4659_v1, %v3949_v3  ;;  %v5378_v10 = vrot.slane %v4618_v26, 1  ;;  %v3888_v1 = vld [vmem:[%s5331_s1 + $0xa0] sm:$0xff]   ;;  %v4719_v12 = vcombine.low %v3143_v23, %v4711_v19 }
  0x9c   : > { %3560 = vmatpush3.bf16.msra.mxu1 %v3879_v18  ;;  %v887_v14 = vrot.slane %v3948_v53, 1  ;;  %v1822_v18 = vsel %vm1817_vm2, %v4120_v51, %v763_v35  ;;  %v3914_v51 = vld [vmem:[%s5331_s1 + $0x118] sm:$0xff]   ;;  %v1664_v26 = vsel %vm567_vm0, %v1659_v29, %v1663_v22  ;;  %v4722_v53 = vld [vmem:[%s4057_s27 + $0xc8] ss:$0 sps:$4 sm:$0x11]  }
  0x9d   : > { %v998_v50 = vpop.permute.xlu0 %997  ;;  %3561 = vmatprep.subr.bf16.mxu1 %v3882_v40  ;;  %v849_v21 = vsel %vm840_vm1, %v847_v44, %v5378_v10  ;;  %v1330_v40 = vsel %vm840_vm1, %v4632_v62, %v1329_v9  ;;  %2353 = vmatmul.mubr.bf16.gmra.mrb[4].mxu0 %v1822_v18  ;;  %v886_v35 = vrot.slane %v3226_v33, 1  ;;  %v3951_v62 = vld [vmem:[%s4057_s27 + $0xc4] sm:$0xf]  ;;  %v3891_v22 = vld [vmem:[%s5331_s1 + $0xe8] sm:$0xff]   ;;  %v1666_v23 = vshrl.u32 %v4719_v12, 16 }
  0x9e   : > { %v1924_v54 = vsel %vm1817_vm2, %v885_v17, %v998_v50  ;;  %v3950_v17 = vld [vmem:[%s4057_s27 + $0x28] sm:$0xf]  ;;  %1715 = vrot.lane.b32.xlu0 %v1664_v26, %s4007_s30  ;;  %v3274_v9 = vcombine.low %v4689_v59, %v3951_v62  ;;  %v789_v3 = vpop.permute.xlu1 %788  ;;  %1363 = vrot.lane.b32.xlu1 %v1330_v40, %s4007_s30  ;;  %v1668_v33 = vshll.u32 %v4719_v12, 16  ;;  %v3952_v29 = vld [vmem:[%s4057_s27 + $0x2c] ss:$0 sps:$4 sm:$0x11]  }
  0x9f   : > { %2456 = vmatprep.mubr.bf16.mxu1 %v1924_v54  ;;  %v3214_v44 = vcombine.low %v296_v61, %v3950_v17  ;;  %v1861_v59 = vsel %vm1817_vm2, %v4135_v2, %v789_v3  ;;  %v851_v18 = vrot.slane %v3952_v29, 1  ;;  %v1331_v54 = vrot.slane %v3273_v20, 1  ;;  %3692 = vmatpush3.bf16.msra.mxu0 %v4670_v56  ;;  %v4747_v17 = vld [vmem:[%s4057_s27 + $0xbc] ss:$0 sps:$4 sm:$0x11]  }
  0xa0   : > { %3562 = vmatpush3.bf16.msra.mxu1 %v3883_v32  ;;  %v1673_v32 = vshll.u32 %v4722_v53, 16  ;;  %v888_v10 = vsel %vm840_vm1, %v886_v35, %v887_v14  ;;  %v1670_v40 = vrot.slane %v1668_v33, 1  ;;  %v3145_v20 = vld [vmem:[%s4057_s27 + $0xcc] sm:$0xf]  ;;  %v4751_v56 = vld [vmem:[%s4057_s27 + $0xd0] sm:$0xf]  ;;  %3693 = vmatprep.subr.bf16.mxu0 %v3914_v51 }
  0xa1   : > { %v974_v50 = vpop.permute.xlu0 %973  ;;  %3563 = vmatprep.subr.bf16.mxu1 %v3886_v38  ;;  %v3892_v38 = vld [vmem:[%s5331_s1 + $0xa8] sm:$0xff]   ;;  %v850_v2 = vrot.slane %v3214_v44, 1  ;;  %v1332_v35 = vrot.slane %v4747_v17, 1  ;;  %v4756_v44 = vcombine.low %v3145_v20, %v4751_v56  ;;  %v4759_v33 = vld [vmem:[%s4057_s27 + $0xd4] ss:$0 sps:$4 sm:$0x11]  }
  0xa2   : > { %v1876_v61 = vsel %vm1817_vm2, %v849_v21, %v974_v50  ;;  %v3895_v21 = vld [vmem:[%s5331_s1 + $0xf0] sm:$0xff]   ;;  %v1675_v26 = vrot.slane %v1673_v32, 1  ;;  %v765_v62 = vpop.permute.xlu1 %764  ;;  %v1671_v14 = vor.u32 %v1670_v40, %v1666_v23  ;;  %v4766_v29 = vld [vmem:[%s4057_s27 + $0xc8] ss:$0 sps:$4 sm:$0x11]   ;;  %v1334_v20 = vrot.slane %v3274_v9, 1 }
  0xa3   : > { %2360 = vmatprep.mubr.bf16.mxu0 %v1876_v61  ;;  %2457 = vmatmul.mubr.bf16.gmra.mrb[8].mxu1 %v1861_v59  ;;  %v297_v50 = vld [vmem:[%s4057_s27 + $0x30] sm:$0xe]  ;;  %5379 = vst [vmem:[#allocation22_spill] sm:$0xff] %v4756_v44  ;;  %v3953_v61 = vld [vmem:[%s4057_s27 + $0x14] ss:$0 sps:$4 sm:$0x11]  }
  0xa4   : > { %3564 = vmatpush3.bf16.msra.mxu1 %v3888_v1  ;;  %v1825_v1 = vsel %vm1817_vm2, %v4159_v24, %v765_v62  ;;  %v1057_v59 = vshll.u32 %v3953_v61, 16  ;;  %3694 = vmatpush3.bf16.msra.mxu0 %v3914_v51  ;;  %v3897_v23 = vld [vmem:[%s5331_s1 + $0xb0] sm:$0xff]   ;;  %v1676_v40 = vsel %vm567_vm0, %v1671_v14, %v1675_v26  ;;  %v1333_v24 = vsel %vm840_vm1, %v1331_v54, %v1332_v35  ;;  %v3900_v9 = vld [vmem:[%s5331_s1 + $0xf8] sm:$0xff]  }
  0xa5   : > { %v1000_v3 = vpop.permute.xlu0 %999  ;;  %3565 = vmatprep.subr.bf16.mxu1 %v3891_v22  ;;  %2361 = vmatmul.mubr.bf16.gmra.mrb[8].mxu0 %v1825_v1  ;;  %v852_v22 = vsel %vm840_vm1, %v850_v2, %v851_v18  ;;  %v1680_v51 = vshll.u32 %v4756_v44, 16  ;;  %v1685_v62 = vshll.u32 %v4759_v33, 16  ;;  %v1335_v18 = vrot.slane %v4766_v29, 1 }
  0xa6   : > { %v1928_v32 = vsel %vm1817_vm2, %v888_v10, %v1000_v3  ;;  %1717 = vrot.lane.b32.xlu0 %v1676_v40, %s4007_s30  ;;  %v1678_v10 = vshrl.u32 %v4756_v44, 16  ;;  %v1196_v2 = vshll.u32 %v4061_v7, 16  ;;  %v791_v3 = vpop.permute.xlu1 %790  ;;  %1365 = vrot.lane.b32.xlu1 %v1333_v24, %s4007_s30  ;;  %v1208_v61 = vshll.u32 %v4110_v43, 16 }
  0xa7   : > { %2464 = vmatprep.mubr.bf16.mxu1 %v1928_v32  ;;  %v1864_v14 = vsel %vm1817_vm2, %v4181_v42, %v791_v3  ;;  %v1682_v35 = vrot.slane %v1680_v51, 1  ;;  %v1687_v32 = vrot.slane %v1685_v62, 1  ;;  %v1059_v44 = vrot.slane %v1057_v59, 1  ;;  %v3902_v42 = vld [vmem:[%s5331_s1 + $0xb8] sm:$0xff]  }
  0xa8   : > { %3566 = vmatpush3.bf16.msra.mxu1 %v3892_v38  ;;  %v3954_v38 = vld [vmem:[%s4057_s27 + $0x34] sm:$0xf]  ;;  %v1336_v24 = vsel %vm840_vm1, %v1334_v20, %v1335_v18  ;;  %v1148_v51 = vshll.u32 %v4396_v31, 16  ;;  %v1160_v59 = vshll.u32 %v4428_v16, 16  ;;  %v4806_v18 = vrot.slane %v1196_v2, 1 }
  0xa9   : > { %v976_v1 = vpop.permute.xlu0 %975  ;;  %3567 = vmatprep.subr.bf16.mxu1 %v3895_v21  ;;  %v3215_v54 = vcombine.low %v297_v50, %v3954_v38  ;;  %v5380_v21 = vshrl.u32 %v4071_v11, 16  ;;  %v1064_v50 = vshll.u32 %v4129_v57, 16  ;;  %v3955_v11 = vld [vmem:[%s4057_s27 + $0x38] ss:$0 sps:$4 sm:$0x11]   ;;  %v4809_v38 = vrot.slane %v1208_v61, 1 }
  0xaa   : > { %v1880_v26 = vsel %vm1817_vm2, %v852_v22, %v976_v1  ;;  %v1683_v22 = vor.u32 %v1682_v35, %v1678_v10  ;;  %v767_v62 = vpop.permute.xlu1 %766  ;;  %v854_v1 = vrot.slane %v3955_v11, 1  ;;  %1367 = vrot.lane.b32.xlu1 %v1336_v24, %s4007_s30  ;;  %v298_v10 = vld [vmem:[%s4057_s27 + $0x3c] sm:$0xe]  ;;  %v3956_v2 = vld [vmem:[%s4057_s27 + $0x20] ss:$0 sps:$4 sm:$0x11]  }
  0xab   : > { %2368 = vmatprep.mubr.bf16.mxu0 %v1880_v26  ;;  %2465 = vmatmul.mubr.bf16.gmra.mrb[12].mxu1 %v1864_v14  ;;  %v1055_v40 = vor.u32 %v4511_v8, %v5380_v21  ;;  %v853_v3 = vrot.slane %v3215_v54, 1  ;;  %v1194_v8 = vshrl.u32 %v4061_v7, 16  ;;  %v1062_v14 = vshrl.u32 %v4129_v57, 16 }
  0xac   : > { %3568 = vmatpush3.bf16.msra.mxu1 %v3897_v23  ;;  %v1828_v23 = vsel %vm1817_vm2, %v4202_v60, %v767_v62  ;;  %v1688_v20 = vsel %vm567_vm0, %v1683_v22, %v1687_v32  ;;  %v1066_v35 = vrot.slane %v1064_v50, 1  ;;  %v1069_v32 = vshll.u32 %v3956_v2, 16  ;;  %v3957_v62 = vld [vmem:[%s4057_s27 + $0x40] sm:$0xf] }
  0xad   : > { %3569 = vmatprep.subr.bf16.mxu1 %v3900_v9  ;;  %v1206_v9 = vshrl.u32 %v4110_v43, 16  ;;  %2369 = vmatmul.mubr.bf16.gmra.mrb[12].mxu0 %v1828_v23  ;;  %v1690_v54 = vpop.permute.xlu0 %1689  ;;  %v1060_v26 = vsel %vm567_vm0, %v1055_v40, %v1059_v44  ;;  %v1146_v21 = vshrl.u32 %v4396_v31, 16  ;;  %v1150_v61 = vrot.slane %v1148_v51, 1 }
  0xae   : > { %1719 = vrot.lane.b32.xlu0 %v1688_v20, %s4007_s30  ;;  %v1995_v60 = vsel %vm1817_vm2, %v4219_v13, %v1690_v54  ;;  %v1338_v24 = vpop.permute.xlu1 %1337  ;;  %v855_v22 = vsel %vm840_vm1, %v853_v3, %v854_v1  ;;  %v3216_v44 = vcombine.low %v298_v10, %v3957_v62  ;;  %v1076_v40 = vshll.u32 %v4166_v27, 16 }
  0xaf   : > { %2505 = vmatprep.mubr.bf16.mxu1 %v1995_v60  ;;  %v1158_v57 = vshrl.u32 %v4428_v16, 16  ;;  %v1162_v50 = vrot.slane %v1160_v59, 1  ;;  %v1218_v13 = vshrl.u32 %v4139_v5, 16  ;;  %v1220_v11 = vshll.u32 %v4139_v5, 16 }
  0xb0   : > { %3570 = vmatpush3.bf16.msra.mxu1 %v3902_v42  ;;  %v1932_v42 = vsel %vm1817_vm2, %v1060_v26, %v1338_v24  ;;  %v1074_v31 = vshrl.u32 %v4166_v27, 16  ;;  %v1172_v51 = vshll.u32 %v4460_v28, 16  ;;  %v1184_v3 = vshll.u32 %v4496_v6, 16  ;;  %v3958_v59 = vld [vmem:[%s4057_s27 + $0x44] ss:$0 sps:$4 sm:$0x11]  }
  0xb1   : > { %v978_v23 = vpop.permute.xlu0 %977  ;;  %v1067_v20 = vor.u32 %v1066_v35, %v1062_v14  ;;  %v1071_v10 = vrot.slane %v1069_v32, 1  ;;  %v856_v16 = vrot.slane %v3216_v44, 1  ;;  %v857_v54 = vrot.slane %v3958_v59, 1  ;;  %v299_v44 = vld [vmem:[%s4057_s27 + $0x48] sm:$0xe] }
  0xb2   : > { %v1884_v1 = vsel %vm1817_vm2, %v855_v22, %v978_v23  ;;  %v1151_v26 = vor.u32 %v1150_v61, %v1146_v21  ;;  %v1153_v60 = vshll.u32 %v4492_v41, 16  ;;  %v1078_v27 = vrot.slane %v1076_v40, 1  ;;  %v769_v24 = vpop.permute.xlu1 %768  ;;  %v3959_v40 = vld [vmem:[%s4057_s27 + $0x2c] ss:$0 sps:$4 sm:$0x11]  }
  0xb3   : > { %2506 = vmatmul.mubr.bf16.vlgmr.msra.gmra.mrb[16].mxu1 %v1932_v42  ;;  %2376 = vmatprep.mubr.bf16.mxu0 %v1884_v1  ;;  %v1088_v2 = vshll.u32 %v4207_v0, 16  ;;  %v1163_v62 = vor.u32 %v1162_v50, %v1158_v57  ;;  %v1165_v42 = vshll.u32 %v4515_v63, 16  ;;  %v1170_v22 = vshrl.u32 %v4460_v28, 16  ;;  %v3960_v59 = vld [vmem:[%s4057_s27 + $0x4c] sm:$0xf] }
  0xb4   : > { %v1174_v14 = vrot.slane %v1172_v51, 1  ;;  %v1831_v35 = vsel %vm1817_vm2, %v4247_v47, %v769_v24  ;;  %v1155_v21 = vrot.slane %v1153_v60, 1  ;;  %v1072_v61 = vsel %vm567_vm0, %v1067_v20, %v1071_v10  ;;  %v300_v24 = vld [vmem:[%s4057_s27 + $0x54] sm:$0xe] }
  0xb5   : > { %v1692_v32 = vpop.permute.xlu0 %1691  ;;  %2377 = vmatmul.mubr.bf16.gmra.mrb[16].mxu0 %v1831_v35  ;;  %v1081_v57 = vshll.u32 %v3959_v40, 16  ;;  %v1167_v63 = vrot.slane %v1165_v42, 1  ;;  %v1182_v28 = vshrl.u32 %v4496_v6, 16  ;;  %v1186_v50 = vrot.slane %v1184_v3, 1 }
  0xb6   : > { %v1998_v41 = vsel %vm1817_vm2, %v4252_v55, %v1692_v32  ;;  %v858_v47 = vsel %vm840_vm1, %v856_v16, %v857_v54  ;;  %v4844_v51 = vsel %vm567_vm0, %v1151_v26, %v1155_v21  ;;  %v4846_v23 = vrot.slane %v1220_v11, 1  ;;  %v1340_v55 = vpop.permute.xlu1 %1339 }
  0xb7   : > { %2513 = vmatprep.mubr.bf16.mxu1 %v1998_v41  ;;  %v1086_v1 = vshrl.u32 %v4207_v0, 16  ;;  %v3217_v20 = vcombine.low %v299_v44, %v3960_v59  ;;  %v4851_v10 = vsel %vm567_vm0, %v1163_v62, %v1167_v63  ;;  %v1090_v60 = vrot.slane %v1088_v2, 1  ;;  %v3961_v2 = vld [vmem:[%s4057_s27 + $0x50] ss:$0 sps:$4 sm:$0x11]  }
  0xb8   : > { %v1936_v3 = vsel %vm1817_vm2, %v1072_v61, %v1340_v55  ;;  %v1175_v16 = vor.u32 %v1174_v14, %v1170_v22  ;;  %v1177_v54 = vshll.u32 %v4541_v34, 16  ;;  %v1100_v11 = vshll.u32 %v4257_v58, 16  ;;  %v3962_v22 = vld [vmem:[%s4057_s27 + $0x58] sm:$0xf] }
  0xb9   : > { %v980_v6 = vpop.permute.xlu0 %979  ;;  %v1079_v26 = vor.u32 %v1078_v27, %v1074_v31  ;;  %v1083_v42 = vrot.slane %v1081_v57, 1  ;;  %v1230_v62 = vshrl.u32 %v4191_v48, 16  ;;  %v860_v35 = vrot.slane %v3961_v2, 1  ;;  %v3963_v14 = vld [vmem:[%s4057_s27 + $0x38] ss:$0 sps:$4 sm:$0x11]  }
  0xba   : > { %v1888_v0 = vsel %vm1817_vm2, %v858_v47, %v980_v6  ;;  %v1179_v32 = vrot.slane %v1177_v54, 1  ;;  %v1187_v44 = vor.u32 %v1186_v50, %v1182_v28  ;;  %v771_v21 = vpop.permute.xlu1 %770  ;;  %v859_v41 = vrot.slane %v3217_v20, 1  ;;  %v3964_v20 = vld [vmem:[%s4057_s27 + $0x5c] ss:$0 sps:$4 sm:$0x11]  }
  0xbb   : > { %2514 = vmatmul.mubr.bf16.gmra.mrb[20].mxu1 %v1936_v3  ;;  %2384 = vmatprep.mubr.bf16.mxu0 %v1888_v0  ;;  %v3218_v34 = vcombine.low %v300_v24, %v3962_v22  ;;  %v1093_v61 = vshll.u32 %v3963_v14, 16  ;;  %v1189_v40 = vshll.u32 %v4573_v15, 16  ;;  %v1232_v63 = vshll.u32 %v4191_v48, 16 }
  0xbc   : > { %v1098_v31 = vshrl.u32 %v4257_v58, 16  ;;  %v1834_v27 = vsel %vm1817_vm2, %v4280_v25, %v771_v21  ;;  %v4868_v57 = vsel %vm567_vm0, %v1175_v16, %v1179_v32  ;;  %v1102_v28 = vrot.slane %v1100_v11, 1  ;;  %v3175_v32 = vld [vmem:[%s4057_s27 + $0xa8] sm:$0xe]  ;;  %v3966_v21 = vld [vmem:[%s4057_s27 + $0x64] sm:$0xf] }
  0xbd   : > { %2385 = vmatmul.mubr.bf16.gmra.mrb[20].mxu0 %v1834_v27  ;;  %v1694_v50 = vpop.permute.xlu0 %1693  ;;  %v1084_v47 = vsel %vm567_vm0, %v1079_v26, %v1083_v42  ;;  %v1091_v55 = vor.u32 %v1090_v60, %v1086_v1  ;;  %v1191_v59 = vrot.slane %v1189_v40, 1  ;;  %v863_v58 = vrot.slane %v3964_v20, 1  ;;  %v4880_v60 = vld [vmem:[%s4057_s27 + $0x60] sm:$0xe] }
  0xbe   : > { %v2001_v15 = vsel %vm1817_vm2, %v4297_v39, %v1694_v50  ;;  %v1199_v25 = vor.u32 %v4806_v18, %v1194_v8  ;;  %v1201_v6 = vshll.u32 %v4615_v52, 16  ;;  %v1342_v3 = vpop.permute.xlu1 %1341  ;;  %v861_v24 = vsel %vm840_vm1, %v859_v41, %v860_v35  ;;  %v3174_v18 = vld [vmem:[%s4057_s27 + $0x9c] sm:$0xe]  ;;  %v3965_v26 = vld [vmem:[%s4057_s27 + $0x44] ss:$0 sps:$4 sm:$0x11]  }
  0xbf   : > { %2521 = vmatprep.mubr.bf16.mxu1 %v2001_v15  ;;  %v862_v16 = vrot.slane %v3218_v34, 1  ;;  %v1095_v1 = vrot.slane %v1093_v61, 1  ;;  %v4883_v39 = vsel %vm567_vm0, %v1187_v44, %v1191_v59  ;;  %v1234_v54 = vrot.slane %v1232_v63, 1  ;;  %v3176_v61 = vld [vmem:[%s4057_s27 + $0xb4] sm:$0xe] }
  0xc0   : > { %v1112_v7 = vshll.u32 %v4295_v37, 16  ;;  %v1940_v8 = vsel %vm1817_vm2, %v1084_v47, %v1342_v3  ;;  %v1203_v52 = vrot.slane %v1201_v6, 1  ;;  %v4888_v0 = vor.u32 %v1102_v28, %v1098_v31  ;;  %v5382_v47 = vld [vmem:[#allocation2_spill] sm:$0xff] }
  0xc1   : > { %v982_v11 = vpop.permute.xlu0 %981  ;;  %v1105_v42 = vshll.u32 %v3965_v26, 16  ;;  %v1211_v2 = vor.u32 %v4809_v38, %v1206_v9  ;;  %v1213_v35 = vshll.u32 %v4679_v46, 16  ;;  %v3219_v41 = vcombine.low %v4880_v60, %v3966_v21  ;;  %v3177_v15 = vld [vmem:[%s4057_s27 + $0xc0] sm:$0xe] }
  0xc2   : > { %v1892_v44 = vsel %vm1817_vm2, %v861_v24, %v982_v11  ;;  %v4900_v22 = vsel %vm567_vm0, %v1199_v25, %v1203_v52  ;;  %v1223_v34 = vor.u32 %v4846_v23, %v1218_v13  ;;  %v773_v14 = vpop.permute.xlu1 %772  ;;  %v864_v43 = vsel %vm840_vm1, %v862_v16, %v863_v58  ;;  %v5383_v58 = vld [vmem:[#allocation21_spill] sm:$0xff] }
  0xc3   : > { %2522 = vmatmul.mubr.bf16.gmra.mrb[24].mxu1 %v1940_v8  ;;  %2392 = vmatprep.mubr.bf16.mxu0 %v1892_v44  ;;  %v1096_v9 = vsel %vm567_vm0, %v1091_v55, %v1095_v1  ;;  %v1215_v46 = vrot.slane %v1213_v35, 1  ;;  %v3318_v38 = vcombine.low %v3174_v18, %v4553_v36  ;;  %v1837_v40 = vsel %vm1817_vm2, %v4309_v4, %v773_v14  ;;  %v5381_v36 = vld [vmem:[#allocation19_spill] sm:$0xff]  ;;  %v5384_v44 = vld [vmem:[#allocation4_spill] sm:$0xff] }
  0xc4   : > { %v1803_v63 = vrot.slane %v4561_v45, 1  ;;  %v1225_v5 = vshll.u32 %v4747_v17, 16  ;;  %v3319_v13 = vcombine.low %v3175_v32, %v4591_v30  ;;  %v1107_v31 = vrot.slane %v1105_v42, 1  ;;  %v3178_v17 = vld [vmem:[%s4057_s27 + $0xcc] sm:$0xe] }
  0xc5   : > { %2393 = vmatmul.mubr.bf16.gmra.mrb[24].mxu0 %v1837_v40  ;;  %v1696_v23 = vpop.permute.xlu0 %1695  ;;  %v4915_v27 = vsel %vm567_vm0, %v1211_v2, %v1215_v46  ;;  %v1802_v28 = vrot.slane %v3318_v38, 1  ;;  %v1806_v50 = vrot.slane %v5381_v36, 1  ;;  %v3320_v45 = vcombine.low %v3176_v61, %v4642_v49  ;;  %v3968_v14 = vld [vmem:[%s4057_s27 + $0x50] ss:$0 sps:$4 sm:$0x11]   ;;  %v5385_v38 = vld [vmem:[#allocation5_spill] sm:$0xff] }
  0xc6   : > { %v2004_v55 = vsel %vm1817_vm2, %v5382_v47, %v1696_v23  ;;  %v1227_v59 = vrot.slane %v1225_v5, 1  ;;  %v1805_v4 = vrot.slane %v3319_v13, 1  ;;  %v1344_v20 = vpop.permute.xlu1 %1343  ;;  %v1809_v25 = vrot.slane %v5383_v58, 1  ;;  %v3969_v40 = vld [vmem:[%s4057_s27 + $0x70] sm:$0xf]  ;;  %v5386_v5 = vld [vmem:[#allocation3_spill] sm:$0xff] }
  0xc7   : > { %2529 = vmatprep.mubr.bf16.mxu1 %v2004_v55  ;;  %v4924_v30 = vsel %vm840_vm1, %v1802_v28, %v1803_v63  ;;  %v1235_v6 = vor.u32 %v1234_v54, %v1230_v62  ;;  %v1237_v3 = vshll.u32 %v4766_v29, 16  ;;  %v1944_v24 = vsel %vm1817_vm2, %v1096_v9, %v1344_v20  ;;  %v3967_v62 = vld [vmem:[%s4057_s27 + $0x68] ss:$0 sps:$4 sm:$0x11]  }
  0xc8   : > { %v4932_v16 = vsel %vm567_vm0, %v1223_v34, %v1227_v59  ;;  %v4935_v49 = vsel %vm840_vm1, %v1805_v4, %v1806_v50  ;;  %v1808_v1 = vrot.slane %v3320_v45, 1  ;;  %v3321_v52 = vcombine.low %v3177_v15, %v4711_v19  ;;  %v302_v34 = vld [vmem:[%s4057_s27 + $0x6c] sm:$0xe]  ;;  %v3970_v55 = vld [vmem:[%s4057_s27 + $0x74] ss:$0 sps:$4 sm:$0x11]  }
  0xc9   : > { %v984_v60 = vpop.permute.xlu0 %983  ;;  %v1239_v8 = vrot.slane %v1237_v3, 1  ;;  %v1812_v18 = vrot.slane %v4722_v53, 1  ;;  %v3322_v48 = vcombine.low %v3178_v17, %v4751_v56  ;;  %v866_v54 = vrot.slane %v3967_v62, 1  ;;  %v5387_v4 = vld [vmem:[#allocation7_spill] sm:$0xff]  ;;  %v303_v15 = vld [vmem:[%s4057_s27 + $0x78] sm:$0xe] }
  0xca   : > { %v1896_v29 = vsel %vm1817_vm2, %v864_v43, %v984_v60  ;;  %v4943_v11 = vsel %vm840_vm1, %v1808_v1, %v1809_v25  ;;  %v1815_v26 = vrot.slane %v4759_v33, 1  ;;  %v775_v42 = vpop.permute.xlu1 %774  ;;  %v865_v2 = vrot.slane %v3219_v41, 1 }
  0xcb   : > { %2530 = vmatmul.mubr.bf16.gmra.mrb[28].mxu1 %v1944_v24  ;;  %2400 = vmatprep.mubr.bf16.mxu0 %v1896_v29  ;;  %v4947_v19 = vsel %vm567_vm0, %v1235_v6, %v1239_v8  ;;  %v1811_v53 = vrot.slane %v3321_v52, 1  ;;  %v1814_v35 = vrot.slane %v3322_v48, 1  ;;  %v1110_v56 = vshrl.u32 %v4295_v37, 16  ;;  %v3971_v6 = vld [vmem:[%s4057_s27 + $0x5c] ss:$0 sps:$4 sm:$0x11]  }
  0xcc   : > { %v1114_v32 = vrot.slane %v1112_v7, 1  ;;  %v1840_v21 = vsel %vm1817_vm2, %v5384_v44, %v775_v42  ;;  %v1108_v41 = vsel %vm567_vm0, %v4888_v0, %v1107_v31  ;;  %v1117_v43 = vshll.u32 %v3968_v14, 16  ;;  %v5388_v24 = vld [vmem:[#allocation8_spill] sm:$0xff]  ;;  %v3972_v52 = vld [vmem:[%s4057_s27 + $0x7c] sm:$0xf]  ;;  %v5389_v29 = vld [vmem:[#allocation6_spill] sm:$0xff] }
  0xcd   : > { %2401 = vmatmul.mubr.bf16.gmra.mrb[28].mxu0 %v1840_v21  ;;  %v1698_v33 = vpop.permute.xlu0 %1697  ;;  %v4959_v9 = vsel %vm840_vm1, %v1811_v53, %v1812_v18  ;;  %v4962_v46 = vsel %vm840_vm1, %v1814_v35, %v1815_v26  ;;  %v867_v61 = vsel %vm840_vm1, %v865_v2, %v866_v54  ;;  %v3220_v63 = vcombine.low %v302_v34, %v3969_v40  ;;  %v5390_v44 = vld [vmem:[#allocation9_spill] sm:$0xff]  ;;  %v304_v34 = vld [vmem:[%s4057_s27 + $0x84] sm:$0xe] }
  0xce   : > { %v2007_v37 = vsel %vm1817_vm2, %v5385_v38, %v1698_v33  ;;  %v1346_v7 = vpop.permute.xlu1 %1345  ;;  %v1124_v13 = vshll.u32 %v5386_v5, 16  ;;  %v1115_v31 = vor.u32 %v1114_v32, %v1110_v56  ;;  %v1119_v28 = vrot.slane %v1117_v43, 1  ;;  %v3973_v56 = vld [vmem:[%s4057_s27 + $0x80] ss:$0 sps:$4 sm:$0x11]  }
  0xcf   : > { %2537 = vmatprep.mubr.bf16.mxu1 %v2007_v37  ;;  %v1948_v0 = vsel %vm1817_vm2, %v1108_v41, %v1346_v7  ;;  %v868_v47 = vrot.slane %v3220_v63, 1  ;;  %v869_v59 = vrot.slane %v3970_v55, 1  ;;  %v1122_v17 = vshrl.u32 %v5386_v5, 16  ;;  %v3974_v38 = vld [vmem:[%s4057_s27 + $0x68] ss:$0 sps:$4 sm:$0x11]  }
  0xd0   : > { %v1126_v20 = vrot.slane %v1124_v13, 1  ;;  %v1120_v25 = vsel %vm567_vm0, %v1115_v31, %v1119_v28  ;;  %v1129_v3 = vshll.u32 %v3971_v6, 16  ;;  %v3221_v18 = vcombine.low %v303_v15, %v3972_v52  ;;  %v5391_v7 = vld [vmem:[#allocation10_spill] sm:$0xff]  ;;  %v5393_v6 = vld [vmem:[#allocation12_spill] sm:$0xff] }
  0xd1   : > { %v986_v23 = vpop.permute.xlu0 %985  ;;  %v870_v8 = vsel %vm840_vm1, %v868_v47, %v869_v59  ;;  %v1136_v62 = vshll.u32 %v5389_v29, 16  ;;  %v872_v32 = vrot.slane %v3973_v56, 1  ;;  %v1134_v33 = vshrl.u32 %v5389_v29, 16  ;;  %v3976_v59 = vld [vmem:[%s4057_s27 + $0x8c] ss:$0 sps:$4 sm:$0x11]  }
  0xd2   : > { %v1900_v36 = vsel %vm1817_vm2, %v867_v61, %v986_v23  ;;  %v777_v50 = vpop.permute.xlu1 %776  ;;  %v1127_v26 = vor.u32 %v1126_v20, %v1122_v17  ;;  %v1131_v42 = vrot.slane %v1129_v3, 1  ;;  %v871_v35 = vrot.slane %v3221_v18, 1  ;;  %v3163_v23 = vld [vmem:[%s4057_s27 + $0x18] sm:$0xe]  ;;  %v5392_v17 = vld [vmem:[#allocation11_spill] sm:$0xff] }
  0xd3   : > { %2538 = vmatmul.mubr.bf16.gmra.mrb[32].mxu1 %v1948_v0  ;;  %2408 = vmatprep.mubr.bf16.mxu0 %v1900_v36  ;;  %v1843_v45 = vsel %vm1817_vm2, %v5387_v4, %v777_v50  ;;  %v1138_v41 = vrot.slane %v1136_v62, 1  ;;  %v1141_v37 = vshll.u32 %v3974_v38, 16  ;;  %v3975_v0 = vld [vmem:[%s4057_s27 + $0x88] sm:$0xf]  ;;  %v875_v4 = vrot.slane %v3976_v59, 1 }
  0xd4   : > { %v1132_v43 = vsel %vm567_vm0, %v1127_v26, %v1131_v42  ;;  %v873_v63 = vsel %vm840_vm1, %v871_v35, %v872_v32  ;;  %v3222_v5 = vcombine.low %v304_v34, %v3975_v0  ;;  %v3164_v18 = vld [vmem:[%s4057_s27 + $0x24] sm:$0xe]  ;;  %v3165_v29 = vld [vmem:[%s4057_s27 + $0x30] sm:$0xe]  ;;  %v3979_v26 = vld [vmem:[%s4057_s27 + $0x28] sm:$0xf] }
  0xd5   : > { %2409 = vmatmul.mubr.bf16.gmra.mrb[32].mxu0 %v1843_v45  ;;  %v1700_v58 = vpop.permute.xlu0 %1699  ;;  %v1139_v28 = vor.u32 %v1138_v41, %v1134_v33  ;;  %v1143_v36 = vrot.slane %v1141_v37, 1  ;;  %v3977_v45 = vld [vmem:[%s4057_s27 + $0x1c] sm:$0xf]  ;;  %v3308_v42 = vcombine.low %v3164_v18, %v3979_v26  ;;  %v3980_v35 = vld [vmem:[%s4057_s27 + $0x34] sm:$0xf]  ;;  %v5395_v41 = vld [vmem:[#allocation14_spill] sm:$0xff] }
  0xd6   : > { %v2010_v1 = vsel %vm1817_vm2, %v5388_v24, %v1700_v58  ;;  %v1348_v60 = vpop.permute.xlu1 %1347  ;;  %v874_v55 = vrot.slane %v3222_v5, 1  ;;  %v3307_v15 = vcombine.low %v3163_v23, %v3977_v45  ;;  %v3309_v56 = vcombine.low %v3165_v29, %v3980_v35  ;;  %v5394_v32 = vld [vmem:[#allocation13_spill] sm:$0xff]  ;;  %v3981_v34 = vld [vmem:[%s4057_s27 + $0x2c] ss:$0 sps:$4 sm:$0x11]  }
  0xd7   : > { %2545 = vmatprep.mubr.bf16.mxu1 %v2010_v1  ;;  %v1952_v48 = vsel %vm1817_vm2, %v1120_v25, %v1348_v60  ;;  %v1144_v25 = vsel %vm567_vm0, %v1139_v28, %v1143_v36  ;;  %v1773_v33 = vrot.slane %v3981_v34, 1  ;;  %v3167_v0 = vld [vmem:[%s4057_s27 + $0x48] sm:$0xe]  ;;  %v3983_v23 = vld [vmem:[%s4057_s27 + $0x40] sm:$0xf] }
  0xd8   : > { %v876_v1 = vsel %vm840_vm1, %v874_v55, %v875_v4  ;;  %v1769_v60 = vrot.slane %v3307_v15, 1  ;;  %v1775_v37 = vrot.slane %v3309_v56, 1  ;;  %v5396_v36 = vld [vmem:[#allocation15_spill] sm:$0xff]  ;;  %v3985_v45 = vld [vmem:[%s4057_s27 + $0x44] ss:$0 sps:$4 sm:$0x11]  }
  0xd9   : > { %v988_v54 = vpop.permute.xlu0 %987  ;;  %v3984_v55 = vld [vmem:[%s4057_s27 + $0x4c] sm:$0xf]  ;;  %v1779_v15 = vrot.slane %v3985_v45, 1  ;;  %v3989_v26 = vld [vmem:[%s4057_s27 + $0x5c] ss:$0 sps:$4 sm:$0x11]  }
  0xda   : > { %v1904_v2 = vsel %vm1817_vm2, %v870_v8, %v988_v54  ;;  %v779_v53 = vpop.permute.xlu1 %778  ;;  %v3978_v8 = vld [vmem:[%s4057_s27 + $0x20] ss:$0 sps:$4 sm:$0x11]   ;;  %v3311_v59 = vcombine.low %v3167_v0, %v3984_v55  ;;  %v3170_v56 = vld [vmem:[%s4057_s27 + $0x6c] sm:$0xe] }
  0xdb   : > { %2546 = vmatmul.mubr.bf16.gmra.mrb[36].mxu1 %v1952_v48  ;;  %2416 = vmatprep.mubr.bf16.mxu0 %v1904_v2  ;;  %v1846_v21 = vsel %vm1817_vm2, %v5390_v44, %v779_v53  ;;  %v1770_v52 = vrot.slane %v3978_v8, 1 }
  0xdd   : > { %2417 = vmatmul.mubr.bf16.gmra.mrb[36].mxu0 %v1846_v21  ;;  %v1702_v14 = vpop.permute.xlu0 %1701  ;;  %v1771_v53 = vsel %vm840_vm1, %v1769_v60, %v1770_v52  ;;  %v3987_v60 = vld [vmem:[%s4057_s27 + $0x58] sm:$0xf] }
  0xde   : > { %v2013_v61 = vsel %vm1817_vm2, %v5391_v7, %v1702_v14  ;;  %v1350_v40 = vpop.permute.xlu1 %1349  ;;  %v3982_v7 = vld [vmem:[%s4057_s27 + $0x38] ss:$0 sps:$4 sm:$0x11]  }
  0xdf   : > { %2553 = vmatprep.mubr.bf16.mxu1 %v2013_v61  ;;  %v1956_v13 = vsel %vm1817_vm2, %v1132_v43, %v1350_v40  ;;  %v1772_v43 = vrot.slane %v3308_v42, 1  ;;  %v1776_v61 = vrot.slane %v3982_v7, 1  ;;  %v3166_v40 = vld [vmem:[%s4057_s27 + $0x3c] sm:$0xe]  ;;  %v1785_v42 = vrot.slane %v3989_v26, 1 }
  0xe1   : > { %v990_v31 = vpop.permute.xlu0 %989  ;;  %v1774_v5 = vsel %vm840_vm1, %v1772_v43, %v1773_v33  ;;  %v3991_v33 = vld [vmem:[%s4057_s27 + $0x70] sm:$0xf] }
  0xe2   : > { %v1908_v50 = vsel %vm1817_vm2, %v873_v63, %v990_v31  ;;  %v781_v47 = vpop.permute.xlu1 %780  ;;  %v3310_v31 = vcombine.low %v3166_v40, %v3983_v23  ;;  %v3993_v40 = vld [vmem:[%s4057_s27 + $0x74] ss:$0 sps:$4 sm:$0x11]   ;;  %v3172_v23 = vld [vmem:[%s4057_s27 + $0x84] sm:$0xe] }
  0xe3   : > { %2554 = vmatmul.mubr.bf16.gmra.mrb[40].mxu1 %v1956_v13  ;;  %2424 = vmatprep.mubr.bf16.mxu0 %v1908_v50  ;;  %v1849_v20 = vsel %vm1817_vm2, %v5392_v17, %v781_v47  ;;  %v1777_v47 = vsel %vm840_vm1, %v1775_v37, %v1776_v61  ;;  %v1781_v17 = vrot.slane %v3311_v59, 1 }
  0xe4   : > { %v1778_v4 = vrot.slane %v3310_v31, 1 }
  0xe5   : > { %2425 = vmatmul.mubr.bf16.gmra.mrb[40].mxu0 %v1849_v20  ;;  %v1704_v58 = vpop.permute.xlu0 %1703  ;;  %v3986_v20 = vld [vmem:[%s4057_s27 + $0x50] ss:$0 sps:$4 sm:$0x11]  }
  0xe6   : > { %v2016_v3 = vsel %vm1817_vm2, %v5393_v6, %v1704_v58  ;;  %v1352_v24 = vpop.permute.xlu1 %1351  ;;  %v1782_v58 = vrot.slane %v3986_v20, 1  ;;  %v3997_v20 = vld [vmem:[%s4057_s27 + $0x8c] ss:$0 sps:$4 sm:$0x11]  }
  0xe7   : > { %2561 = vmatprep.mubr.bf16.mxu1 %v2016_v3  ;;  %v1960_v48 = vsel %vm1817_vm2, %v1144_v25, %v1352_v24  ;;  %v3168_v25 = vld [vmem:[%s4057_s27 + $0x54] sm:$0xe]  ;;  %v3169_v3 = vld [vmem:[%s4057_s27 + $0x60] sm:$0xe] }
  0xe8   : > { %v5397_v24 = vld [vmem:[#allocation16_spill] sm:$0xff]  ;;  %v3312_v8 = vcombine.low %v3168_v25, %v3987_v60  ;;  %v1783_v18 = vsel %vm840_vm1, %v1781_v17, %v1782_v58  ;;  %v1797_v58 = vrot.slane %v3997_v20, 1 }
  0xe9   : > { %v992_v62 = vpop.permute.xlu0 %991 }
  0xea   : > { %v1912_v54 = vsel %vm1817_vm2, %v876_v1, %v992_v62  ;;  %v783_v2 = vpop.permute.xlu1 %782 }
  0xeb   : > { %2562 = vmatmul.mubr.bf16.gmra.mrb[44].mxu1 %v1960_v48  ;;  %2432 = vmatprep.mubr.bf16.mxu0 %v1912_v54  ;;  %v1852_v44 = vsel %vm1817_vm2, %v5394_v32, %v783_v2  ;;  %v3988_v48 = vld [vmem:[%s4057_s27 + $0x64] sm:$0xf]  ;;  %v1784_v54 = vrot.slane %v3312_v8, 1 }
  0xec   : > { %v3313_v29 = vcombine.low %v3169_v3, %v3988_v48  ;;  %v3998_v3 = vld [vmem:[%s4057_s27 + $0x98] ss:$0 sps:$4 sm:$0x11]  }
  0xed   : > { %2433 = vmatmul.mubr.bf16.gmra.mrb[44].mxu0 %v1852_v44  ;;  %v1706_v21 = vpop.permute.xlu0 %1705  ;;  %v3171_v44 = vld [vmem:[%s4057_s27 + $0x78] sm:$0xe] }
  0xee   : > { %v2019_v14 = vsel %vm1817_vm2, %v5395_v41, %v1706_v21  ;;  %3695 = vmatprep.mubr.msk.bf16.mxu0 %vm1817_vm2, %v1771_v53  ;;  %v1354_v38 = vpop.permute.xlu1 %1353  ;;  %v1787_v2 = vrot.slane %v3313_v29, 1  ;;  %v3990_v53 = vld [vmem:[%s4057_s27 + $0x68] ss:$0 sps:$4 sm:$0x11]   ;;  %v5398_v21 = vld [vmem:[#allocation17_spill] sm:$0xff]  ;;  %v3314_v41 = vcombine.low %v3170_v56, %v3991_v33 }
  0xef   : > { %2569 = vmatprep.mubr.bf16.mxu1 %v2019_v14  ;;  %v1964_v63 = vsel %vm1817_vm2, %v4844_v51, %v1354_v38  ;;  %v1788_v35 = vrot.slane %v3990_v53, 1  ;;  %v3992_v38 = vld [vmem:[%s4057_s27 + $0x7c] sm:$0xf] }
  0xf0   : > { %v3315_v37 = vcombine.low %v3171_v44, %v3992_v38  ;;  %v1790_v61 = vrot.slane %v3314_v41, 1 }
  0xf1   : > { %v1708_v13 = vpop.permute.xlu0 %1707  ;;  %v1789_v43 = vsel %vm840_vm1, %v1787_v2, %v1788_v35 }
  0xf2   : > { %v1356_v28 = vpop.permute.xlu1 %1355  ;;  %v2022_v50 = vsel %vm1817_vm2, %v5396_v36, %v1708_v13  ;;  %v1793_v0 = vrot.slane %v3315_v37, 1  ;;  %v5399_v36 = vld [vmem:[#allocation18_spill] sm:$0xff] }
  0xf3   : > { %2570 = vmatmul.mubr.bf16.gmra.mrb[48].mxu1 %v1964_v63  ;;  %v1968_v51 = vsel %vm1817_vm2, %v4851_v10, %v1356_v28  ;;  %v1780_v10 = vsel %vm840_vm1, %v1778_v4, %v1779_v15  ;;  %v1791_v63 = vrot.slane %v3993_v40, 1  ;;  %v3173_v28 = vld [vmem:[%s4057_s27 + $0x90] sm:$0xe]  ;;  %v3996_v4 = vld [vmem:[%s4057_s27 + $0x94] sm:$0xf] }
  0xf4   : > { %2577 = vmatprep.mubr.bf16.mxu1 %v2022_v50  ;;  %v3317_v45 = vcombine.low %v3173_v28, %v3996_v4 }
  0xf5   : > { %3696 = vmatmul.mubr.msk.bf16.vlgmr.msra.gmra.mrb[48].mxu0 %vm1817_vm2, %v1774_v5  ;;  %v1710_v6 = vpop.permute.xlu0 %1709  ;;  %v3994_v5 = vld [vmem:[%s4057_s27 + $0x80] ss:$0 sps:$4 sm:$0x11]  }
  0xf6   : > { %3699 = vmatprep.mubr.msk.bf16.mxu0 %vm1817_vm2, %v1777_v47  ;;  %v2025_v1 = vsel %vm1817_vm2, %v5397_v24, %v1710_v6  ;;  %v1358_v52 = vpop.permute.xlu1 %1357  ;;  %v1794_v13 = vrot.slane %v3994_v5, 1  ;;  %v1792_v47 = vsel %vm840_vm1, %v1790_v61, %v1791_v63  ;;  %v1799_v6 = vrot.slane %v3317_v45, 1 }
  0xf7   : > { %v1972_v62 = vsel %vm1817_vm2, %v4868_v57, %v1358_v52  ;;  %v1786_v57 = vsel %vm840_vm1, %v1784_v54, %v1785_v42  ;;  %v1800_v24 = vrot.slane %v3998_v3, 1 }
  0xf9   : > { %v1801_v52 = vsel %vm840_vm1, %v1799_v6, %v1800_v24 }
  0xfb   : > { %2578 = vmatmul.mubr.bf16.gmra.mrb[52].mxu1 %v1968_v51  ;;  %v1795_v51 = vsel %vm840_vm1, %v1793_v0, %v1794_v13 }
  0xfc   : > { %2585 = vmatprep.mubr.bf16.mxu1 %v2025_v1  ;;  %v1360_v14 = vpop.permute.xlu1 %1359  ;;  %v5400_v1 = vld [vmem:[#allocation20_spill] sm:$0xff] }
  0xfd   : > { %3700 = vmatmul.mubr.msk.bf16.gmra.mrb[52].mxu0 %vm1817_vm2, %v1780_v10  ;;  %v1976_v7 = vsel %vm1817_vm2, %v4883_v39, %v1360_v14  ;;  %v3995_v39 = vld [vmem:[%s4057_s27 + $0x88] sm:$0xf] }
  0xfe   : > { %3703 = vmatprep.mubr.msk.bf16.mxu0 %vm1817_vm2, %v1783_v18  ;;  %v1712_v32 = vpop.permute.xlu0 %1711  ;;  %v3316_v55 = vcombine.low %v3172_v23, %v3995_v39 }
  0xff   : > { %v2028_v34 = vsel %vm1817_vm2, %v5398_v21, %v1712_v32 }
 0x100   : > { %v1796_v17 = vrot.slane %v3316_v55, 1 }
 0x102   : > { %v1798_v60 = vsel %vm840_vm1, %v1796_v17, %v1797_v58 }
 0x103   : > { %2586 = vmatmul.mubr.bf16.gmra.mrb[56].mxu1 %v1972_v62 }
 0x104   : > { %2593 = vmatprep.mubr.bf16.mxu1 %v2028_v34 }
 0x105   : > { %3704 = vmatmul.mubr.msk.bf16.gmra.mrb[56].mxu0 %vm1817_vm2, %v1786_v57 }
 0x106   : > { %3707 = vmatprep.mubr.msk.bf16.mxu0 %vm1817_vm2, %v1789_v43 }
 0x108   : > { %v1362_v59 = vpop.permute.xlu1 %1361 }
 0x109   : > { %v1714_v31 = vpop.permute.xlu0 %1713  ;;  %v1980_v15 = vsel %vm1817_vm2, %v4900_v22, %v1362_v59 }
 0x10a   : > { %v2031_v50 = vsel %vm1817_vm2, %v5399_v36, %v1714_v31 }
 0x10b   : > { %2594 = vmatmul.mubr.bf16.gmra.mrb[60].mxu1 %v1976_v7 }
 0x10c   : > { %2601 = vmatprep.mubr.bf16.mxu1 %v2031_v50 }
 0x10d   : > { %3708 = vmatmul.mubr.msk.bf16.gmra.mrb[60].mxu0 %vm1817_vm2, %v1792_v47 }
 0x10e   : > { %3711 = vmatprep.mubr.msk.bf16.mxu0 %vm1817_vm2, %v1795_v51 }
 0x110   : > { %v1716_v25 = vpop.permute.xlu0 %1715  ;;  %v1364_v8 = vpop.permute.xlu1 %1363 }
 0x111   : > { %v2034_v10 = vsel %vm1817_vm2, %v5400_v1, %v1716_v25  ;;  %v1984_v22 = vsel %vm1817_vm2, %v4915_v27, %v1364_v8  ;;  %v5401_v27 = vld [vmem:[#allocation22_spill] sm:$0xff] }
 0x112   : > { %v5125_v1 = vld [vmem:[%s5332_s2] ss:$0 sm:$0xff] }
 0x113   : > { %2602 = vmatmul.mubr.bf16.gmra.mrb[64].mxu1 %v1980_v15 }
 0x114   : > { %2609 = vmatprep.mubr.bf16.mxu1 %v2034_v10 }
 0x115   : > { %3712 = vmatmul.mubr.msk.bf16.gmra.mrb[64].mxu0 %vm1817_vm2, %v1798_v60 }
 0x116   : > { %3715 = vmatprep.mubr.msk.bf16.mxu0 %vm1817_vm2, %v1801_v52 }
 0x118   : > { %v1718_v18 = vpop.permute.xlu0 %1717  ;;  %v1366_v29 = vpop.permute.xlu1 %1365 }
 0x119   : > { %v2037_v48 = vsel %vm1817_vm2, %v4719_v12, %v1718_v18  ;;  %v1988_v62 = vsel %vm1817_vm2, %v4932_v16, %v1366_v29 }
 0x11b   : > { %2610 = vmatmul.mubr.bf16.gmra.mrb[68].mxu1 %v1984_v22 }
 0x11c   : > { %2617 = vmatprep.mubr.bf16.mxu1 %v2037_v48  ;;  %v1368_v42 = vpop.permute.xlu1 %1367 }
 0x11d   : > { %3716 = vmatmul.mubr.msk.bf16.gmra.mrb[68].mxu0 %vm1817_vm2, %v4924_v30  ;;  %v1992_v12 = vsel %vm1817_vm2, %v4947_v19, %v1368_v42 }
 0x11e   : > { %3719 = vmatprep.mubr.msk.bf16.mxu0 %vm1817_vm2, %v4935_v49 }
 0x120   : > { %v1720_v54 = vpop.permute.xlu0 %1719 }
 0x121   : > { %v2040_v26 = vsel %vm1817_vm2, %v5401_v27, %v1720_v54 }
 0x123   : > { %2618 = vmatmul.mubr.bf16.gmra.mrb[72].mxu1 %v1988_v62 }
 0x124   : > { %2625 = vmatprep.mubr.bf16.mxu1 %v2040_v26 }
 0x125   : > { %3720 = vmatmul.mubr.msk.bf16.gmra.mrb[72].mxu0 %vm1817_vm2, %v4943_v11 }
 0x126   : > { %3723 = vmatprep.mubr.msk.bf16.mxu0 %vm1817_vm2, %v4959_v9 }
 0x12b   : > { %2626 = vmatmul.mubr.bf16.gmra.mrb[76].mxu1 %v1992_v12 }
 0x12d   : > { %3724 = vmatmul.mubr.msk.bf16.gmra.mrb[76].mxu0 %vm1817_vm2, %v4962_v46 }
 0x166   : > { %v3531_v30 = vpop.f32.mrb[0].mxu1 }
 0x167   : > { %v3532_v16 = vpop.f32.mrb[1].mxu1  ;;  %v3459_v53 = vpop.f32.mrb[0].mxu0 }
 0x168   : > { %v5106_v49 = vadd.f32 %v3532_v16, %v3531_v30  ;;  %v3534_v2 = vpop.f32.mrb[2].mxu1  ;;  %v3460_v56 = vpop.f32.mrb[1].mxu0 }
 0x169   : > { %v3535_v35 = vpop.f32.mrb[3].mxu1  ;;  %v3461_v11 = vadd.f32 %v3460_v56, %v3459_v53  ;;  %v3462_v44 = vpop.f32.mrb[2].mxu0 }
 0x16a   : > { %v5108_v32 = vadd.f32 %v3535_v35, %v3534_v2  ;;  %v3463_v19 = vpop.f32.mrb[3].mxu0 }
 0x16b   : > { %v3464_v21 = vadd.f32 %v3463_v19, %v3462_v44  ;;  %v2347_v60 = vadd.f32 %v3461_v11, %v5125_v1 }
 0x16d   : > { %v2350_v18 = vadd.f32 %v3464_v21, %v5125_v1 }
 0x16e   : > { %v3537_v34 = vpop.f32.mrb[4].mxu1 }
 0x16f   : > { %v3538_v9 = vpop.f32.mrb[5].mxu1 }
 0x170   : > { %v5110_v57 = vadd.f32 %v3538_v9, %v3537_v34  ;;  %v3540_v33 = vpop.f32.mrb[6].mxu1  ;;  %v3465_v41 = vpop.f32.mrb[4].mxu0 }
 0x171   : > { %v3541_v46 = vpop.f32.mrb[7].mxu1  ;;  %v3466_v43 = vpop.f32.mrb[5].mxu0 }
 0x172   : > { %v5112_v14 = vadd.f32 %v3541_v46, %v3540_v33  ;;  %v3467_v38 = vadd.f32 %v3466_v43, %v3465_v41  ;;  %v3468_v37 = vpop.f32.mrb[6].mxu0 }
 0x173   : > { %v3469_v7 = vpop.f32.mrb[7].mxu0 }
 0x174   : > { %v3470_v61 = vadd.f32 %v3469_v7, %v3468_v37  ;;  %v2355_v53 = vadd.f32 %v3467_v38, %v5125_v1 }
 0x176   : > { %v3543_v40 = vpop.f32.mrb[8].mxu1  ;;  %v2358_v44 = vadd.f32 %v3470_v61, %v5125_v1 }
 0x177   : > { %v3544_v63 = vpop.f32.mrb[9].mxu1 }
 0x178   : > { %v5114_v0 = vadd.f32 %v3544_v63, %v3543_v40  ;;  %v3546_v5 = vpop.f32.mrb[10].mxu1  ;;  %v3471_v23 = vpop.f32.mrb[8].mxu0 }
 0x179   : > { %v3547_v13 = vpop.f32.mrb[11].mxu1  ;;  %v3472_v28 = vpop.f32.mrb[9].mxu0 }
 0x17a   : > { %v5116_v31 = vadd.f32 %v3547_v13, %v3546_v5  ;;  %v3473_v36 = vadd.f32 %v3472_v28, %v3471_v23  ;;  %v3474_v50 = vpop.f32.mrb[10].mxu0 }
 0x17b   : > { %v3475_v47 = vpop.f32.mrb[11].mxu0 }
 0x17c   : > { %v3476_v39 = vadd.f32 %v3475_v47, %v3474_v50  ;;  %v2363_v38 = vadd.f32 %v3473_v36, %v5125_v1 }
 0x17e   : > { %v3549_v55 = vpop.f32.mrb[12].mxu1  ;;  %v2366_v61 = vadd.f32 %v3476_v39, %v5125_v1 }
 0x17f   : > { %v3550_v59 = vpop.f32.mrb[13].mxu1 }
 0x180   : > { %v5118_v51 = vadd.f32 %v3550_v59, %v3549_v55  ;;  %v3552_v4 = vpop.f32.mrb[14].mxu1  ;;  %v3477_v15 = vpop.f32.mrb[12].mxu0 }
 0x181   : > { %v3553_v45 = vpop.f32.mrb[15].mxu1  ;;  %v3478_v20 = vpop.f32.mrb[13].mxu0 }
 0x182   : > { %v5120_v17 = vadd.f32 %v3553_v45, %v3552_v4  ;;  %v3479_v58 = vadd.f32 %v3478_v20, %v3477_v15  ;;  %v3480_v25 = vpop.f32.mrb[14].mxu0 }
 0x183   : > { %v3481_v6 = vpop.f32.mrb[15].mxu0 }
 0x184   : > { %v3482_v3 = vadd.f32 %v3481_v6, %v3480_v25  ;;  %v2371_v36 = vadd.f32 %v3479_v58, %v5125_v1 }
 0x186   : > { %v3571_v24 = vpop.f32.mrb[16].mxu1  ;;  %v2374_v39 = vadd.f32 %v3482_v3, %v5125_v1 }
 0x187   : > { %v3572_v10 = vpop.f32.mrb[17].mxu1 }
 0x188   : > { %v3573_v8 = vadd.f32 %v3572_v10, %v3571_v24  ;;  %v3574_v52 = vpop.f32.mrb[18].mxu1  ;;  %v3483_v62 = vpop.f32.mrb[16].mxu0 }
 0x189   : > { %v3575_v22 = vpop.f32.mrb[19].mxu1  ;;  %v3484_v54 = vpop.f32.mrb[17].mxu0 }
 0x18a   : > { %v3576_v48 = vadd.f32 %v3575_v22, %v3574_v52  ;;  %v5129_v29 = vadd.f32 %v3573_v8, %v2347_v60  ;;  %v3485_v26 = vadd.f32 %v3484_v54, %v3483_v62  ;;  %v3486_v42 = vpop.f32.mrb[18].mxu0 }
 0x18b   : > { %v3487_v12 = vpop.f32.mrb[19].mxu0 }
 0x18c   : > { %v5131_v27 = vadd.f32 %v3576_v48, %v2350_v18  ;;  %v3488_v30 = vadd.f32 %v3487_v12, %v3486_v42  ;;  %v2379_v58 = vadd.f32 %v3485_v26, %v5125_v1 }
 0x18e   : > { %v3577_v16 = vpop.f32.mrb[20].mxu1  ;;  %v2382_v3 = vadd.f32 %v3488_v30, %v5125_v1 }
 0x18f   : > { %v3578_v2 = vpop.f32.mrb[21].mxu1 }
 0x190   : > { %v3579_v35 = vadd.f32 %v3578_v2, %v3577_v16  ;;  %v3580_v56 = vpop.f32.mrb[22].mxu1  ;;  %v3489_v19 = vpop.f32.mrb[20].mxu0 }
 0x191   : > { %v3581_v11 = vpop.f32.mrb[23].mxu1  ;;  %v3490_v9 = vpop.f32.mrb[21].mxu0 }
 0x192   : > { %v3582_v21 = vadd.f32 %v3581_v11, %v3580_v56  ;;  %v5135_v34 = vadd.f32 %v3579_v35, %v2355_v53  ;;  %v3491_v33 = vadd.f32 %v3490_v9, %v3489_v19  ;;  %v3492_v46 = vpop.f32.mrb[22].mxu0 }
 0x193   : > { %v3493_v43 = vpop.f32.mrb[23].mxu0 }
 0x194   : > { %v5137_v41 = vadd.f32 %v3582_v21, %v2358_v44  ;;  %v3494_v37 = vadd.f32 %v3493_v43, %v3492_v46  ;;  %v2387_v26 = vadd.f32 %v3491_v33, %v5125_v1 }
 0x196   : > { %v3583_v7 = vpop.f32.mrb[24].mxu1  ;;  %v2390_v30 = vadd.f32 %v3494_v37, %v5125_v1 }
 0x197   : > { %v3584_v40 = vpop.f32.mrb[25].mxu1 }
 0x198   : > { %v3585_v63 = vadd.f32 %v3584_v40, %v3583_v7  ;;  %v3586_v5 = vpop.f32.mrb[26].mxu1  ;;  %v3495_v23 = vpop.f32.mrb[24].mxu0 }
 0x199   : > { %v3587_v13 = vpop.f32.mrb[27].mxu1  ;;  %v3496_v47 = vpop.f32.mrb[25].mxu0 }
 0x19a   : > { %v3588_v28 = vadd.f32 %v3587_v13, %v3586_v5  ;;  %v5141_v50 = vadd.f32 %v3585_v63, %v2363_v38  ;;  %v3497_v55 = vadd.f32 %v3496_v47, %v3495_v23  ;;  %v3498_v59 = vpop.f32.mrb[26].mxu0 }
 0x19b   : > { %v3499_v45 = vpop.f32.mrb[27].mxu0 }
 0x19c   : > { %v5143_v4 = vadd.f32 %v3588_v28, %v2366_v61  ;;  %v3500_v15 = vadd.f32 %v3499_v45, %v3498_v59 }
 0x19e   : > { %v3589_v20 = vpop.f32.mrb[28].mxu1 }
 0x19f   : > { %v3590_v25 = vpop.f32.mrb[29].mxu1 }
 0x1a0   : > { %v3591_v6 = vadd.f32 %v3590_v25, %v3589_v20  ;;  %v3592_v24 = vpop.f32.mrb[30].mxu1  ;;  %v3501_v60 = vpop.f32.mrb[28].mxu0 }
 0x1a1   : > { %v3593_v10 = vpop.f32.mrb[31].mxu1  ;;  %v3502_v22 = vpop.f32.mrb[29].mxu0 }
 0x1a2   : > { %v3594_v8 = vadd.f32 %v3593_v10, %v3592_v24  ;;  %v5147_v52 = vadd.f32 %v3591_v6, %v2371_v36  ;;  %v3503_v18 = vadd.f32 %v3502_v22, %v3501_v60  ;;  %v3504_v48 = vpop.f32.mrb[30].mxu0  ;;  %v2395_v24 = vadd.f32 %v3497_v55, %v5125_v1 }
 0x1a3   : > { %v3505_v54 = vpop.f32.mrb[31].mxu0  ;;  %v2398_v60 = vadd.f32 %v3500_v15, %v5125_v1 }
 0x1a4   : > { %v5149_v62 = vadd.f32 %v3594_v8, %v2374_v39  ;;  %v3506_v42 = vadd.f32 %v3505_v54, %v3504_v48 }
 0x1a6   : > { %v3595_v12 = vpop.f32.mrb[32].mxu1 }
 0x1a7   : > { %v3596_v16 = vpop.f32.mrb[33].mxu1 }
 0x1a8   : > { %v3597_v2 = vadd.f32 %v3596_v16, %v3595_v12  ;;  %v3598_v53 = vpop.f32.mrb[34].mxu1  ;;  %v3507_v56 = vpop.f32.mrb[32].mxu0 }
 0x1a9   : > { %v3599_v35 = vpop.f32.mrb[35].mxu1  ;;  %v3508_v19 = vpop.f32.mrb[33].mxu0 }
 0x1aa   : > { %v3600_v11 = vadd.f32 %v3599_v35, %v3598_v53  ;;  %v5153_v44 = vadd.f32 %v3597_v2, %v2379_v58  ;;  %v3509_v21 = vadd.f32 %v3508_v19, %v3507_v56  ;;  %v3510_v9 = vpop.f32.mrb[34].mxu0  ;;  %v2406_v19 = vadd.f32 %v3506_v42, %v5125_v1 }
 0x1ab   : > { %v3511_v43 = vpop.f32.mrb[35].mxu0 }
 0x1ac   : > { %v5155_v46 = vadd.f32 %v3600_v11, %v2382_v3  ;;  %v3512_v7 = vadd.f32 %v3511_v43, %v3510_v9  ;;  %v2403_v3 = vadd.f32 %v3503_v18, %v5125_v1 }
 0x1ae   : > { %v3601_v40 = vpop.f32.mrb[36].mxu1 }
 0x1af   : > { %v3602_v38 = vpop.f32.mrb[37].mxu1 }
 0x1b0   : > { %v3603_v63 = vadd.f32 %v3602_v38, %v3601_v40  ;;  %v3604_v5 = vpop.f32.mrb[38].mxu1  ;;  %v3513_v61 = vpop.f32.mrb[36].mxu0 }
 0x1b1   : > { %v3605_v13 = vpop.f32.mrb[39].mxu1  ;;  %v3514_v47 = vpop.f32.mrb[37].mxu0 }
 0x1b2   : > { %v3606_v23 = vadd.f32 %v3605_v13, %v3604_v5  ;;  %v5159_v28 = vadd.f32 %v3603_v63, %v2387_v26  ;;  %v5161_v59 = vadd.f32 %v3514_v47, %v3513_v61  ;;  %v3516_v45 = vpop.f32.mrb[38].mxu0 }
 0x1b3   : > { %v3517_v25 = vpop.f32.mrb[39].mxu0 }
 0x1b4   : > { %v5163_v20 = vadd.f32 %v3606_v23, %v2390_v30  ;;  %v5165_v36 = vadd.f32 %v3517_v25, %v3516_v45  ;;  %v2411_v23 = vadd.f32 %v3509_v21, %v5125_v1  ;;  %v2414_v25 = vadd.f32 %v3512_v7, %v5125_v1 }
 0x1b6   : > { %v3607_v6 = vpop.f32.mrb[40].mxu1 }
 0x1b7   : > { %v3608_v33 = vpop.f32.mrb[41].mxu1 }
 0x1b8   : > { %v3609_v10 = vadd.f32 %v3608_v33, %v3607_v6  ;;  %v3610_v39 = vpop.f32.mrb[42].mxu1  ;;  %v3519_v8 = vpop.f32.mrb[40].mxu0 }
 0x1b9   : > { %v3611_v37 = vpop.f32.mrb[43].mxu1  ;;  %v3520_v54 = vpop.f32.mrb[41].mxu0 }
 0x1ba   : > { %v3612_v22 = vadd.f32 %v3611_v37, %v3610_v39  ;;  %v5169_v48 = vadd.f32 %v3609_v10, %v2395_v24  ;;  %v5171_v12 = vadd.f32 %v3520_v54, %v3519_v8  ;;  %v3522_v16 = vpop.f32.mrb[42].mxu0 }
 0x1bb   : > { %v3523_v2 = vpop.f32.mrb[43].mxu0 }
 0x1bc   : > { %v5173_v58 = vadd.f32 %v3612_v22, %v2398_v60  ;;  %v5175_v53 = vadd.f32 %v3523_v2, %v3522_v16 }
 0x1be   : > { %v3613_v35 = vpop.f32.mrb[44].mxu1 }
 0x1bf   : > { %v3614_v55 = vpop.f32.mrb[45].mxu1 }
 0x1c0   : > { %v3615_v56 = vadd.f32 %v3614_v55, %v3613_v35  ;;  %v3616_v11 = vpop.f32.mrb[46].mxu1  ;;  %v3525_v9 = vpop.f32.mrb[44].mxu0 }
 0x1c1   : > { %v3617_v15 = vpop.f32.mrb[47].mxu1  ;;  %v3526_v38 = vpop.f32.mrb[45].mxu0 }
 0x1c2   : > { %v3618_v43 = vadd.f32 %v3617_v15, %v3616_v11  ;;  %v5179_v40 = vadd.f32 %v3615_v56, %v2403_v3  ;;  %v5181_v26 = vadd.f32 %v3526_v38, %v3525_v9  ;;  %v3528_v63 = vpop.f32.mrb[46].mxu0 }
 0x1c3   : > { %v3529_v13 = vpop.f32.mrb[47].mxu0 }
 0x1c4   : > { %v5183_v5 = vadd.f32 %v3618_v43, %v2406_v19  ;;  %v5185_v30 = vadd.f32 %v3529_v13, %v3528_v63 }
 0x1c6   : > { %v3619_v18 = vpop.f32.mrb[48].mxu1 }
 0x1c7   : > { %v3620_v61 = vpop.f32.mrb[49].mxu1 }
 0x1c8   : > { %v3621_v47 = vadd.f32 %v3620_v61, %v3619_v18  ;;  %v3622_v42 = vpop.f32.mrb[50].mxu1  ;;  %v3697_v6 = vpop.f32.mrb[48].mxu0 }
 0x1c9   : > { %v3623_v45 = vpop.f32.mrb[51].mxu1  ;;  %v2677_v10 = vadd.f32 %v3697_v6, %v5135_v34  ;;  %v2668_v39 = vpop.f32.mrb[49].mxu0 }
 0x1ca   : > { %v3624_v33 = vadd.f32 %v3623_v45, %v3622_v42  ;;  %v5189_v24 = vadd.f32 %v3621_v47, %v2411_v23  ;;  %v2669_v37 = vadd.f32 %v2668_v39, %v5129_v29  ;;  %v3698_v60 = vpop.f32.mrb[50].mxu0 }
 0x1cb   : > { %v2797_v22 = vmax.f32 %v2677_v10, 0.0  ;;  %v2680_v21 = vadd.f32 %v3698_v60, %v5137_v41  ;;  %v2671_v54 = vpop.f32.mrb[51].mxu0  ;;  %v2419_v41 = vadd.f32 %v5161_v59, %v5125_v1 }
 0x1cc   : > { %v5194_v8 = vadd.f32 %v3624_v33, %v2414_v25  ;;  %v2795_v7 = vmax.f32 %v2669_v37, 0.0  ;;  %v2672_v34 = vadd.f32 %v2671_v54, %v5131_v27  ;;  %v2422_v27 = vadd.f32 %v5165_v36, %v5125_v1 }
 0x1cd   : > { %v3413_v29 = vpack.c.bf16 %v2797_v22, %v2797_v22  ;;  %v2798_v2 = vmax.f32 %v2680_v21, 0.0 }
 0x1ce   : > { %v3625_v16 = vpop.f32.mrb[52].mxu1  ;;  %v3411_v55 = vpack.c.bf16 %v2795_v7, %v2795_v7  ;;  %v2796_v3 = vmax.f32 %v2672_v34, 0.0 }
 0x1cf   : > { %v3626_v35 = vpop.f32.mrb[53].mxu1  ;;  %2958 = vst.msk [vmem:[%s5200_s23 + $0x8] sm:$0xf] %vm2955_vm3, %v3413_v29  ;;  %v3414_v15 = vpack.c.bf16 %v2798_v2, %v2798_v2 }
 0x1d0   : > { %v3627_v56 = vadd.f32 %v3626_v35, %v3625_v16  ;;  %v3628_v11 = vpop.f32.mrb[54].mxu1  ;;  %2956 = vst.msk [vmem:[%s5200_s23] sm:$0xf] %vm2955_vm3, %v3411_v55  ;;  %v3412_v9 = vpack.c.bf16 %v2796_v3, %v2796_v3  ;;  %v3701_v43 = vpop.f32.mrb[52].mxu0 }
 0x1d1   : > { %v3629_v19 = vpop.f32.mrb[55].mxu1  ;;  %2959 = vst.msk [vmem:[%s5200_s23 + $0xc] sm:$0xf] %vm2955_vm3, %v3414_v15  ;;  %v2693_v59 = vadd.f32 %v3701_v43, %v5147_v52  ;;  %v2684_v13 = vpop.f32.mrb[53].mxu0 }
 0x1d2   : > { %v3630_v38 = vadd.f32 %v3629_v19, %v3628_v11  ;;  %v5211_v63 = vadd.f32 %v3627_v56, %v2419_v41  ;;  %2957 = vst.msk [vmem:[%s5200_s23 + $0x4] sm:$0xf] %vm2955_vm3, %v3412_v9  ;;  %v2685_v18 = vadd.f32 %v2684_v13, %v5141_v50  ;;  %v3702_v61 = vpop.f32.mrb[54].mxu0  ;;  %v2427_v50 = vadd.f32 %v5171_v12, %v5125_v1 }
 0x1d3   : > { %v2801_v36 = vmax.f32 %v2693_v59, 0.0  ;;  %v2696_v47 = vadd.f32 %v3702_v61, %v5149_v62  ;;  %v2687_v42 = vpop.f32.mrb[55].mxu0 }
 0x1d4   : > { %v5219_v23 = vadd.f32 %v3630_v38, %v2422_v27  ;;  %v2799_v45 = vmax.f32 %v2685_v18, 0.0  ;;  %v2688_v25 = vadd.f32 %v2687_v42, %v5143_v4  ;;  %v2430_v4 = vadd.f32 %v5175_v53, %v5125_v1 }
 0x1d5   : > { %v3417_v33 = vpack.c.bf16 %v2801_v36, %v2801_v36  ;;  %v2802_v52 = vmax.f32 %v2696_v47, 0.0 }
 0x1d6   : > { %v3631_v6 = vpop.f32.mrb[56].mxu1  ;;  %v3415_v39 = vpack.c.bf16 %v2799_v45, %v2799_v45  ;;  %v2800_v37 = vmax.f32 %v2688_v25, 0.0 }
 0x1d7   : > { %v3632_v10 = vpop.f32.mrb[57].mxu1  ;;  %2962 = vst.msk [vmem:[%s5200_s23 + $0x18] sm:$0xf] %vm2955_vm3, %v3417_v33  ;;  %v3418_v62 = vpack.c.bf16 %v2802_v52, %v2802_v52 }
 0x1d8   : > { %v3633_v60 = vadd.f32 %v3632_v10, %v3631_v6  ;;  %v3634_v22 = vpop.f32.mrb[58].mxu1  ;;  %2960 = vst.msk [vmem:[%s5200_s23 + $0x10] sm:$0xf] %vm2955_vm3, %v3415_v39  ;;  %v3416_v54 = vpack.c.bf16 %v2800_v37, %v2800_v37  ;;  %v3705_v7 = vpop.f32.mrb[56].mxu0 }
 0x1d9   : > { %v3635_v21 = vpop.f32.mrb[59].mxu1  ;;  %2963 = vst.msk [vmem:[%s5200_s23 + $0x1c] sm:$0xf] %vm2955_vm3, %v3418_v62  ;;  %v2709_v12 = vadd.f32 %v3705_v7, %v5159_v28  ;;  %v2700_v29 = vpop.f32.mrb[57].mxu0 }
 0x1da   : > { %v3636_v34 = vadd.f32 %v3635_v21, %v3634_v22  ;;  %v5231_v16 = vadd.f32 %v3633_v60, %v2427_v50  ;;  %2961 = vst.msk [vmem:[%s5200_s23 + $0x14] sm:$0xf] %vm2955_vm3, %v3416_v54  ;;  %v2701_v2 = vadd.f32 %v2700_v29, %v5153_v44  ;;  %v3706_v35 = vpop.f32.mrb[58].mxu0  ;;  %v2435_v44 = vadd.f32 %v5181_v26, %v5125_v1 }
 0x1db   : > { %v2805_v53 = vmax.f32 %v2709_v12, 0.0  ;;  %v2712_v55 = vadd.f32 %v3706_v35, %v5163_v20  ;;  %v2703_v3 = vpop.f32.mrb[59].mxu0  ;;  %v2443_v22 = vadd.f32 %v5106_v49, %v5125_v1 }
 0x1dc   : > { %v5239_v41 = vadd.f32 %v3636_v34, %v2430_v4  ;;  %v2803_v56 = vmax.f32 %v2701_v2, 0.0  ;;  %v2704_v11 = vadd.f32 %v2703_v3, %v5155_v46  ;;  %v2438_v46 = vadd.f32 %v5185_v30, %v5125_v1 }
 0x1dd   : > { %v3421_v19 = vpack.c.bf16 %v2805_v53, %v2805_v53  ;;  %v2806_v28 = vmax.f32 %v2712_v55, 0.0 }
 0x1de   : > { %v3637_v15 = vpop.f32.mrb[60].mxu1  ;;  %v3419_v9 = vpack.c.bf16 %v2803_v56, %v2803_v56  ;;  %v2804_v43 = vmax.f32 %v2704_v11, 0.0 }
 0x1df   : > { %v3638_v27 = vpop.f32.mrb[61].mxu1  ;;  %2966 = vst.msk [vmem:[%s5200_s23 + $0x28] sm:$0xf] %vm2955_vm3, %v3421_v19  ;;  %v3422_v20 = vpack.c.bf16 %v2806_v28, %v2806_v28 }
 0x1e0   : > { %v3639_v38 = vadd.f32 %v3638_v27, %v3637_v15  ;;  %v3640_v59 = vpop.f32.mrb[62].mxu1  ;;  %2964 = vst.msk [vmem:[%s5200_s23 + $0x20] sm:$0xf] %vm2955_vm3, %v3419_v9  ;;  %v3420_v18 = vpack.c.bf16 %v2804_v43, %v2804_v43  ;;  %v3709_v61 = vpop.f32.mrb[60].mxu0 }
 0x1e1   : > { %v3641_v13 = vpop.f32.mrb[63].mxu1  ;;  %2967 = vst.msk [vmem:[%s5200_s23 + $0x2c] sm:$0xf] %vm2955_vm3, %v3422_v20  ;;  %v2725_v26 = vadd.f32 %v3709_v61, %v5179_v40  ;;  %v2716_v42 = vpop.f32.mrb[61].mxu0 }
 0x1e2   : > { %v3642_v36 = vadd.f32 %v3641_v13, %v3640_v59  ;;  %v2596_v47 = vadd.f32 %v3639_v38, %v2435_v44  ;;  %2965 = vst.msk [vmem:[%s5200_s23 + $0x24] sm:$0xf] %vm2955_vm3, %v3420_v18  ;;  %v2717_v45 = vadd.f32 %v2716_v42, %v5169_v48  ;;  %v3710_v25 = vpop.f32.mrb[62].mxu0 }
 0x1e3   : > { %v2809_v33 = vmax.f32 %v2725_v26, 0.0  ;;  %v2728_v30 = vadd.f32 %v3710_v25, %v5183_v5  ;;  %v2719_v52 = vpop.f32.mrb[63].mxu0 }
 0x1e4   : > { %v2599_v6 = vadd.f32 %v3642_v36, %v2438_v46  ;;  %v2807_v10 = vmax.f32 %v2717_v45, 0.0  ;;  %v2720_v50 = vadd.f32 %v2719_v52, %v5173_v58  ;;  %v2446_v58 = vadd.f32 %v5108_v32, %v5125_v1 }
 0x1e5   : > { %v3425_v37 = vpack.c.bf16 %v2809_v33, %v2809_v33  ;;  %v2810_v60 = vmax.f32 %v2728_v30, 0.0 }
 0x1e6   : > { %v3643_v39 = vpop.f32.mrb[64].mxu1  ;;  %v3423_v48 = vpack.c.bf16 %v2807_v10, %v2807_v10  ;;  %v2808_v62 = vmax.f32 %v2720_v50, 0.0 }
 0x1e7   : > { %v3644_v40 = vpop.f32.mrb[65].mxu1  ;;  %2970 = vst.msk [vmem:[%s5200_s23 + $0x38] sm:$0xf] %vm2955_vm3, %v3425_v37  ;;  %v3426_v5 = vpack.c.bf16 %v2810_v60, %v2810_v60 }
 0x1e8   : > { %v3645_v21 = vadd.f32 %v3644_v40, %v3643_v39  ;;  %v3646_v4 = vpop.f32.mrb[66].mxu1  ;;  %2968 = vst.msk [vmem:[%s5200_s23 + $0x30] sm:$0xf] %vm2955_vm3, %v3423_v48  ;;  %v3424_v7 = vpack.c.bf16 %v2808_v62, %v2808_v62  ;;  %v3713_v34 = vpop.f32.mrb[64].mxu0  ;;  %v2459_v39 = vadd.f32 %v5114_v0, %v5125_v1 }
 0x1e9   : > { %v3647_v54 = vpop.f32.mrb[67].mxu1  ;;  %2971 = vst.msk [vmem:[%s5200_s23 + $0x3c] sm:$0xf] %vm2955_vm3, %v3426_v5  ;;  %v2741_v49 = vadd.f32 %v3713_v34, %v5211_v63  ;;  %v2732_v2 = vpop.f32.mrb[65].mxu0 }
 0x1ea   : > { %v3648_v12 = vadd.f32 %v3647_v54, %v3646_v4  ;;  %v5267_v29 = vadd.f32 %v3645_v21, %v2443_v22  ;;  %2969 = vst.msk [vmem:[%s5200_s23 + $0x34] sm:$0xf] %vm2955_vm3, %v3424_v7  ;;  %v2733_v35 = vadd.f32 %v2732_v2, %v5189_v24  ;;  %v3714_v53 = vpop.f32.mrb[66].mxu0  ;;  %v2451_v24 = vadd.f32 %v5110_v57, %v5125_v1 }
 0x1eb   : > { %v2813_v32 = vmax.f32 %v2741_v49, 0.0  ;;  %v2744_v3 = vadd.f32 %v3714_v53, %v5219_v23  ;;  %v2735_v56 = vpop.f32.mrb[67].mxu0 }
 0x1ec   : > { %v5275_v55 = vadd.f32 %v3648_v12, %v2446_v58  ;;  %v2811_v11 = vmax.f32 %v2733_v35, 0.0  ;;  %v2736_v15 = vadd.f32 %v2735_v56, %v5194_v8  ;;  %v2454_v8 = vadd.f32 %v5112_v14, %v5125_v1 }
 0x1ed   : > { %v3429_v28 = vpack.c.bf16 %v2813_v32, %v2813_v32  ;;  %v2814_v63 = vmax.f32 %v2744_v3, 0.0  ;;  %v2467_v56 = vadd.f32 %v5118_v51, %v5125_v1 }
 0x1ee   : > { %v3649_v19 = vpop.f32.mrb[68].mxu1  ;;  %v3427_v44 = vpack.c.bf16 %v2811_v11, %v2811_v11  ;;  %v2812_v9 = vmax.f32 %v2736_v15, 0.0 }
 0x1ef   : > { %v3650_v27 = vpop.f32.mrb[69].mxu1  ;;  %2974 = vst.msk [vmem:[%s5200_s23 + $0x48] sm:$0xf] %vm2955_vm3, %v3429_v28  ;;  %v3430_v23 = vpack.c.bf16 %v2814_v63, %v2814_v63 }
 0x1f0   : > { %v3651_v43 = vadd.f32 %v3650_v27, %v3649_v19  ;;  %v3652_v38 = vpop.f32.mrb[70].mxu1  ;;  %2972 = vst.msk [vmem:[%s5200_s23 + $0x40] sm:$0xf] %vm2955_vm3, %v3427_v44  ;;  %v3428_v20 = vpack.c.bf16 %v2812_v9, %v2812_v9  ;;  %v3717_v13 = vpop.f32.mrb[68].mxu0 }
 0x1f1   : > { %v3653_v59 = vpop.f32.mrb[71].mxu1  ;;  %2975 = vst.msk [vmem:[%s5200_s23 + $0x4c] sm:$0xf] %vm2955_vm3, %v3430_v23  ;;  %v2757_v57 = vadd.f32 %v3717_v13, %v2596_v47  ;;  %v2748_v61 = vpop.f32.mrb[69].mxu0 }
 0x1f2   : > { %v3654_v46 = vadd.f32 %v3653_v59, %v3652_v38  ;;  %v2612_v18 = vadd.f32 %v3651_v43, %v2451_v24  ;;  %2973 = vst.msk [vmem:[%s5200_s23 + $0x44] sm:$0xf] %vm2955_vm3, %v3428_v20  ;;  %v2749_v36 = vadd.f32 %v2748_v61, %v5231_v16  ;;  %v3718_v26 = vpop.f32.mrb[70].mxu0 }
 0x1f3   : > { %v2817_v45 = vmax.f32 %v2757_v57, 0.0  ;;  %v2760_v25 = vadd.f32 %v3718_v26, %v2599_v6  ;;  %v2751_v14 = vpop.f32.mrb[71].mxu0 }
 0x1f4   : > { %v2615_v42 = vadd.f32 %v3654_v46, %v2454_v8  ;;  %v2815_v33 = vmax.f32 %v2749_v36, 0.0  ;;  %v2752_v30 = vadd.f32 %v2751_v14, %v5239_v41  ;;  %v2462_v41 = vadd.f32 %v5116_v31, %v5125_v1 }
 0x1f5   : > { %v3433_v10 = vpack.c.bf16 %v2817_v45, %v2817_v45  ;;  %v2818_v50 = vmax.f32 %v2760_v25, 0.0 }
 0x1f6   : > { %v3655_v52 = vpop.f32.mrb[72].mxu1  ;;  %v3431_v37 = vpack.c.bf16 %v2815_v33, %v2815_v33  ;;  %v2816_v16 = vmax.f32 %v2752_v30, 0.0 }
 0x1f7   : > { %v3656_v47 = vpop.f32.mrb[73].mxu1  ;;  %2978 = vst.msk [vmem:[%s5200_s23 + $0x58] sm:$0xf] %vm2955_vm3, %v3433_v10  ;;  %v3434_v6 = vpack.c.bf16 %v2818_v50, %v2818_v50 }
 0x1f8   : > { %v3657_v60 = vadd.f32 %v3656_v47, %v3655_v52  ;;  %v3658_v40 = vpop.f32.mrb[74].mxu1  ;;  %2976 = vst.msk [vmem:[%s5200_s23 + $0x50] sm:$0xf] %vm2955_vm3, %v3431_v37  ;;  %v3432_v48 = vpack.c.bf16 %v2816_v16, %v2816_v16  ;;  %v3721_v62 = vpop.f32.mrb[72].mxu0 }
 0x1f9   : > { %v3659_v22 = vpop.f32.mrb[75].mxu1  ;;  %2979 = vst.msk [vmem:[%s5200_s23 + $0x5c] sm:$0xf] %vm2955_vm3, %v3434_v6  ;;  %v2773_v0 = vadd.f32 %v3721_v62, %v2612_v18  ;;  %v2764_v5 = vpop.f32.mrb[73].mxu0 }
 0x1fa   : > { %v3660_v21 = vadd.f32 %v3659_v22, %v3658_v40  ;;  %v2620_v4 = vadd.f32 %v3657_v60, %v2459_v39  ;;  %2977 = vst.msk [vmem:[%s5200_s23 + $0x54] sm:$0xf] %vm2955_vm3, %v3432_v48  ;;  %v2765_v54 = vadd.f32 %v2764_v5, %v5267_v29  ;;  %v3722_v58 = vpop.f32.mrb[74].mxu0 }
 0x1fb   : > { %v2821_v34 = vmax.f32 %v2773_v0, 0.0  ;;  %v2776_v12 = vadd.f32 %v3722_v58, %v2615_v42  ;;  %v2767_v31 = vpop.f32.mrb[75].mxu0 }
 0x1fc   : > { %v2623_v7 = vadd.f32 %v3660_v21, %v2462_v41  ;;  %v2819_v49 = vmax.f32 %v2765_v54, 0.0  ;;  %v2768_v2 = vadd.f32 %v2767_v31, %v5275_v55  ;;  %v2470_v55 = vadd.f32 %v5120_v17, %v5125_v1 }
 0x1fd   : > { %v3437_v53 = vpack.c.bf16 %v2821_v34, %v2821_v34  ;;  %v2822_v32 = vmax.f32 %v2776_v12, 0.0 }
 0x1fe   : > { %v3661_v35 = vpop.f32.mrb[76].mxu1  ;;  %v3435_v29 = vpack.c.bf16 %v2819_v49, %v2819_v49  ;;  %v2820_v11 = vmax.f32 %v2768_v2, 0.0 }
 0x1ff   : > { %v3662_v3 = vpop.f32.mrb[77].mxu1  ;;  %2982 = vst.msk [vmem:[%s5200_s23 + $0x68] sm:$0xf] %vm2955_vm3, %v3437_v53  ;;  %v3438_v28 = vpack.c.bf16 %v2822_v32, %v2822_v32 }
 0x200   : > { %v3663_v15 = vadd.f32 %v3662_v3, %v3661_v35  ;;  %v3664_v19 = vpop.f32.mrb[78].mxu1  ;;  %2980 = vst.msk [vmem:[%s5200_s23 + $0x60] sm:$0xf] %vm2955_vm3, %v3435_v29  ;;  %v3436_v27 = vpack.c.bf16 %v2820_v11, %v2820_v11  ;;  %v3725_v44 = vpop.f32.mrb[76].mxu0 }
 0x201   : > { %v3665_v63 = vpop.f32.mrb[79].mxu1  ;;  %2983 = vst.msk [vmem:[%s5200_s23 + $0x6c] sm:$0xf] %vm2955_vm3, %v3438_v28  ;;  %v2780_v51 = vpop.f32.mrb[77].mxu0 }
 0x202   : > { %v2628_v24 = vadd.f32 %v3663_v15, %v2467_v56  ;;  %v3666_v9 = vadd.f32 %v3665_v63, %v3664_v19  ;;  %2981 = vst.msk [vmem:[%s5200_s23 + $0x64] sm:$0xf] %vm2955_vm3, %v3436_v27  ;;  %v2781_v38 = vadd.f32 %v2780_v51, %v2620_v4  ;;  %v3726_v59 = vpop.f32.mrb[78].mxu0 }
 0x203   : > { %v2783_v17 = vpop.f32.mrb[79].mxu0 }
 0x204   : > { %v2789_v43 = vadd.f32 %v3725_v44, %v2628_v24  ;;  %v2631_v23 = vadd.f32 %v3666_v9, %v2470_v55  ;;  %v2823_v8 = vmax.f32 %v2781_v38, 0.0  ;;  %v2784_v13 = vadd.f32 %v2783_v17, %v2623_v7 }
 0x206   : > { %v2825_v1 = vmax.f32 %v2789_v43, 0.0  ;;  %v2792_v20 = vadd.f32 %v3726_v59, %v2631_v23  ;;  %v3439_v18 = vpack.c.bf16 %v2823_v8, %v2823_v8  ;;  %v2824_v61 = vmax.f32 %v2784_v13, 0.0 }
 0x208   : > { %v3441_v46 = vpack.c.bf16 %v2825_v1, %v2825_v1  ;;  %v2826_v57 = vmax.f32 %v2792_v20, 0.0  ;;  %2984 = vst.msk [vmem:[%s5200_s23 + $0x70] sm:$0xf] %vm2955_vm3, %v3439_v18  ;;  %v3440_v26 = vpack.c.bf16 %v2824_v61, %v2824_v61 }
 0x20a   : > { %2986 = vst.msk [vmem:[%s5200_s23 + $0x78] sm:$0xf] %vm2955_vm3, %v3441_v46  ;;  %v3442_v36 = vpack.c.bf16 %v2826_v57, %v2826_v57  ;;  %2985 = vst.msk [vmem:[%s5200_s23 + $0x74] sm:$0xf] %vm2955_vm3, %v3440_v26 }
 0x20c   : > { %2987 = vst.msk [vmem:[%s5200_s23 + $0x7c] sm:$0xf] %vm2955_vm3, %v3442_v36 }
 0x20d PF: > { %s13_s12 = sadd.s32 1, %s4005_s12  }
 0x20e   : > { %p10_p4 = scmp.ge.s32.totalorder %s13_s12, 6  }
 0x210   :  { %12 = sbr.rel (!%p10_p4) target bundleno = 1 (0x1), region = 64 }

// kernel: vgg_perceptual_loss.16
= control target key start
LH: loop header
LB: loop body
LE: loop exit
PB: predicated region body
PF: predicated region fallthrough
CT: control target
= control target key end

     0   :  { %s1970_s12 = smov 0   ;;  %s2529_s0 = inlined_call_operand.vmem [shape: bf16[4,10,10,64], index: 0, kind: input, shape index: {}]   ;;  %s2530_s1 = inlined_call_operand.vmem [shape: bf16[576,128], index: 1, kind: input, shape index: {}]   ;;  %s2531_s2 = inlined_call_operand.vmem [shape: f32[1,128], index: 2, kind: input, shape index: {}]   ;;  %s2532_s3 = inlined_call_operand.vmem [shape: bf16[4,8,8,128], index: 3, kind: output, shape index: {}]  }
   0x1 LB: > { %s1512_s13 = sadd.s32 4294967295, %s1947_s12   ;;  %p1516_p0 = scmp.ge.s32.totalorder %s1947_s12, 1  ;;  %s1947_s12 = sphi %s1970_s12, %s13_s12  }
   0x2   : > { %p137_p1 = scmp.lt.s32.totalorder %s1947_s12, 5 }
   0x4   : > { %p138_p2 = pnand %p1516_p0, %p137_p1 }
   0x6   : > { %141 = sbr.rel (%p138_p2) target bundleno = 431 (0x1af), region = 32 }
   0xd   : > { %p161_p3 = scmp.lt.s32.totalorder %s1512_s13, 3  ;;  %v1893_v0 = vld [vmem:[%s2530_s1 + $0xc0] sm:$0xff]   ;;  %v1897_v4 = vld [vmem:[%s2530_s1 + $0xc8] sm:$0xff]   ;;  %s1949_s30 = smov 64   ;;  %v1901_v34 = vld [vmem:[%s2530_s1 + $0xd0] sm:$0xff]   ;;  %vm775_vm0 = vcmask 523264  }
   0xe   : > { %v1894_v1 = vld [vmem:[%s2530_s1 + $0x80] sm:$0xff]   ;;  %1767 = vmatprep.subr.bf16.mxu1 %v1893_v0  ;;  %v1898_v5 = vld [vmem:[%s2530_s1 + $0x88] sm:$0xff]   ;;  %v1902_v44 = vld [vmem:[%s2530_s1 + $0x90] sm:$0xff]  }
   0xf   : > { %s2553_s13 = smov (!%p161_p3, %s1512_s13), 3  ;;  %v1895_v2 = vld [vmem:[%s2530_s1 + $0x40] sm:$0xff]   ;;  %1768 = vmatpush3.bf16.msra.mxu1 %v1894_v1  ;;  %v1899_v27 = vld [vmem:[%s2530_s1 + $0x48] sm:$0xff]   ;;  %v1903_v49 = vld [vmem:[%s2530_s1 + $0x50] sm:$0xff]  }
  0x10   : > { %s1839_s20 = smul.u32 80, %s2553_s13  ;;  %v1896_v3 = vld [vmem:[%s2530_s1] sm:$0xff]   ;;  %1727 = vmatprep.subr.bf16.mxu0 %v1895_v2  ;;  %1769 = vmatprep.subr.bf16.mxu1 %v1897_v4  ;;  %v1900_v29 = vld [vmem:[%s2530_s1 + $0x8] sm:$0xff]   ;;  %v1904_v55 = vld [vmem:[%s2530_s1 + $0x10] sm:$0xff]  }
  0x11   : > { %1728 = vmatpush3.bf16.msra.mxu0 %v1896_v3  ;;  %v1905_v3 = vld [vmem:[%s2530_s1 + $0xd8] sm:$0xff]  }
  0x12   : > { %s1999_s27 = scalar_lea.vmem %s2529_s0, %s1839_s20  ;;  %1729 = vmatprep.subr.bf16.mxu0 %v1899_v27  ;;  %s1695_s20 = sshll.u32 %s2553_s13, 5 }
  0x13   : > { %v1523_v6 = vld [vmem:[%s1999_s27 + $0x20] sm:$0xf]  ;;  %v2006_v7 = vld [vmem:[%s1999_s27 + $0x24] sm:$0x1]  ;;  %v1520_v8 = vld [vmem:[%s1999_s27 + $0x8] sm:$0xf]  ;;  %1770 = vmatpush3.bf16.msra.mxu1 %v1898_v5  ;;  %s170_s23 = scalar_lea.vmem %s2532_s3, %s1695_s20 }
  0x14   : > { %v1587_v9 = vcombine.low %v1523_v6, %v1523_v6  ;;  %v2010_v10 = vcombine.low %v1523_v6, %v2006_v7  ;;  %v1528_v11 = vld [vmem:[%s1999_s27 + $0xc] sm:$0x1]  ;;  %v1584_v12 = vcombine.low %v1520_v8, %v1520_v8  ;;  %v1529_v13 = vld [vmem:[%s1999_s27 + $0x14] sm:$0x1]  ;;  %v1537_v14 = vld [vmem:[%s1999_s27 + $0x10] sm:$0xe]  ;;  %1771 = vmatprep.subr.bf16.mxu1 %v1901_v34 }
  0x15   : > { %v2015_v15 = vcombine.low %v1520_v8, %v1528_v11  ;;  %v1601_v16 = vcombine.low %v1537_v14, %v1529_v13  ;;  %v1521_v17 = vld [vmem:[%s1999_s27 + $0x10] sm:$0xf]  ;;  %v2022_v19 = vld [vmem:[%s1999_s27 + $0x14] sm:$0x1]  ;;  %v2029_v22 = vld [vmem:[%s1999_s27 + $0x18] sm:$0xf]  ;;  %1730 = vmatpush3.bf16.msra.mxu0 %v1900_v29 }
  0x16   : > { %v2019_v18 = vld [vmem:[%s1999_s27 + $0x10] sm:$0xf]  ;;  %493 = vrot.lane.b32.xlu1 %v1587_v9, %s1949_s30  ;;  %487 = vrot.lane.b32.xlu0 %v1584_v12, %s1949_s30  ;;  %v1585_v20 = vcombine.low %v1521_v17, %v1521_v17  ;;  %v2026_v21 = vcombine.low %v1521_v17, %v1529_v13  ;;  %v2034_v25 = vld [vmem:[%s1999_s27 + $0x18] sm:$0xf] }
  0x17   : > { %v608_v23 = vrot.slane %v1601_v16, 1  ;;  %v1608_v24 = vcombine.low %v2019_v18, %v2022_v19  ;;  %v2037_v26 = vld [vmem:[%s1999_s27 + $0x1c] sm:$0x1]  ;;  %v1536_v28 = vld [vmem:[%s1999_s27 + $0x8] sm:$0xe]  ;;  %v1586_v35 = vcombine.low %v2034_v25, %v2034_v25  ;;  %1772 = vmatpush3.bf16.msra.mxu1 %v1902_v44  ;;  %1731 = vmatprep.subr.bf16.mxu0 %v1903_v49 }
  0x18   : > { %v1609_v32 = vcombine.low %v2029_v22, %v2037_v26  ;;  %v2049_v33 = vld [vmem:[%s1999_s27 + $0x8] sm:$0xf]  ;;  %v1600_v36 = vcombine.low %v1536_v28, %v1528_v11  ;;  %v2059_v37 = vld [vmem:[%s1999_s27 + $0xc] sm:$0x1]  ;;  %v2062_v38 = vld [vmem:[%s1999_s27] sm:$0xf]  ;;  %1773 = vmatprep.subr.bf16.mxu1 %v1905_v3 }
  0x19   : > { %v672_v30 = vshrl.u32 %v1608_v24, 16  ;;  %v674_v31 = vshll.u32 %v1608_v24, 16  ;;  %v1569_v42 = vcombine.low %v2049_v33, %v2059_v37  ;;  %v2067_v43 = vld [vmem:[%s1999_s27 + $0x4] sm:$0x1]  ;;  %v2075_v47 = vld [vmem:[%s1999_s27 + $0x28] sm:$0xf]  ;;  %1732 = vmatpush3.bf16.msra.mxu0 %v1904_v55 }
  0x1a   : > { %617 = vrot.lane.b32.xlu1 %v608_v23, %s1949_s30  ;;  %489 = vrot.lane.b32.xlu0 %v1585_v20, %s1949_s30  ;;  %v679_v40 = vshrl.u32 %v1609_v32, 16  ;;  %v681_v41 = vshll.u32 %v1609_v32, 16  ;;  %v607_v45 = vrot.slane %v1600_v36, 1  ;;  %v1568_v46 = vcombine.low %v2062_v38, %v2067_v43  ;;  %v1555_v48 = vld [vmem:[%s1999_s27 + $0x2c] sm:$0x1]  ;;  %v1906_v28 = vld [vmem:[%s2530_s1 + $0x98] sm:$0xff]  }
  0x1b   : > { %v676_v39 = vrot.slane %v674_v31, 1  ;;  %v367_v52 = vshrl.u32 %v1569_v42, 16  ;;  %v369_v53 = vshll.u32 %v1569_v42, 16  ;;  %v1563_v54 = vld [vmem:[%s1999_s27 + $0x28] sm:$0xe]  ;;  %v1611_v58 = vcombine.low %v2075_v47, %v1555_v48  ;;  %1774 = vmatpush3.bf16.msra.mxu1 %v1906_v28 }
  0x1c   : > { %v683_v51 = vrot.slane %v681_v41, 1  ;;  %v360_v56 = vshrl.u32 %v1568_v46, 16  ;;  %v362_v57 = vshll.u32 %v1568_v46, 16  ;;  %v1619_v59 = vcombine.low %v1563_v54, %v1555_v48  ;;  %v2088_v60 = vld [vmem:[%s1999_s27 + $0x20] sm:$0xf] }
  0x1d   : > { %v677_v50 = vor.u32 %v676_v39, %v672_v30  ;;  %v1554_v61 = vld [vmem:[%s1999_s27 + $0x24] sm:$0x1]  ;;  %v371_v63 = vrot.slane %v369_v53, 1  ;;  %v1562_v0 = vld [vmem:[%s1999_s27 + $0x20] sm:$0xe]  ;;  %v693_v5 = vshrl.u32 %v1611_v58, 16 }
  0x1e   : > { %491 = vrot.lane.b32.xlu0 %v1586_v35, %s1949_s30  ;;  %v684_v62 = vor.u32 %v683_v51, %v679_v40  ;;  %v1610_v1 = vcombine.low %v2088_v60, %v1554_v61  ;;  %v2095_v2 = vld [vmem:[%s1999_s27 + $0x18] sm:$0xf]  ;;  %v364_v4 = vrot.slane %v362_v57, 1  ;;  %v695_v6 = vshll.u32 %v1611_v58, 16  ;;  %v2101_v8 = vld [vmem:[%s1999_s27 + $0x1c] sm:$0x1] }
  0x1f   : > { %727 = vrot.lane.b32.xlu1 %v677_v50, %s1949_s30  ;;  %v372_v9 = vor.u32 %v371_v63, %v367_v52  ;;  %v2103_v11 = vrot.slane %v1619_v59, 1  ;;  %v1618_v13 = vcombine.low %v1562_v0, %v1554_v61  ;;  %v2106_v14 = vld [vmem:[%s1999_s27 + $0x10] sm:$0xf]  ;;  %v2109_v16 = vld [vmem:[%s1999_s27 + $0x14] sm:$0x1]  ;;  %v1571_v23 = vcombine.low %v2095_v2, %v2101_v8  ;;  %v1907_v39 = vld [vmem:[%s2530_s1 + $0x58] sm:$0xff]  }
  0x20   : > { %v688_v12 = vshll.u32 %v1610_v1, 16  ;;  %v365_v17 = vor.u32 %v364_v4, %v360_v56  ;;  %v686_v20 = vshrl.u32 %v1610_v1, 16  ;;  %v1570_v24 = vcombine.low %v2106_v14, %v2109_v16  ;;  %v1530_v27 = vld [vmem:[%s1999_s27 + $0x1c] sm:$0x1]  ;;  %v1539_v35 = vld [vmem:[%s1999_s27 + $0x20] sm:$0xe]  ;;  %1733 = vmatprep.subr.bf16.mxu0 %v1907_v39 }
  0x21   : > { %2536 = vst [vmem:[#allocation2_spill] sm:$0xff] %v2103_v11  ;;  %v697_v29 = vrot.slane %v695_v6, 1  ;;  %v2121_v31 = vrot.slane %v1618_v13, 1  ;;  %v2124_v32 = vcombine.low %v2034_v25, %v1530_v27  ;;  %v383_v34 = vshll.u32 %v1571_v23, 16  ;;  %v1538_v36 = vld [vmem:[%s1999_s27 + $0x18] sm:$0xe] }
  0x22   : > { %615 = vrot.lane.b32.xlu0 %v607_v45, %s1949_s30  ;;  %v690_v30 = vrot.slane %v688_v12, 1  ;;  %v381_v41 = vshrl.u32 %v1571_v23, 16  ;;  %v376_v42 = vshll.u32 %v1570_v24, 16  ;;  %v2134_v44 = vld [vmem:[%s1999_s27 + $0x38] sm:$0xf]  ;;  %v374_v48 = vshrl.u32 %v1570_v24, 16 }
  0x23   : > { %729 = vrot.lane.b32.xlu1 %v684_v62, %s1949_s30  ;;  %v2137_v25 = vld [vmem:[%s1999_s27 + $0x3c] sm:$0x1]  ;;  %v385_v46 = vrot.slane %v383_v34, 1  ;;  %v2141_v49 = vld [vmem:[%s1999_s27 + $0x30] sm:$0xf]  ;;  %v698_v51 = vor.u32 %v697_v29, %v693_v5  ;;  %v1603_v53 = vcombine.low %v1539_v35, %v2006_v7  ;;  %v1602_v54 = vcombine.low %v1538_v36, %v1530_v27  ;;  %v1910_v59 = vld [vmem:[%s2530_s1 + $0xe0] sm:$0xff]  }
  0x24   : > { %v691_v45 = vor.u32 %v690_v30, %v686_v20  ;;  %v2144_v50 = vld [vmem:[%s1999_s27 + $0x34] sm:$0x1]  ;;  %v378_v52 = vrot.slane %v376_v42, 1  ;;  %v2149_v55 = vld [vmem:[%s1999_s27 + $0x28] sm:$0xf]  ;;  %v1909_v57 = vld [vmem:[%s2530_s1 + $0x18] sm:$0xff]   ;;  %v2159_v58 = vcombine.low %v2134_v44, %v2137_v25  ;;  %1775 = vmatprep.subr.bf16.mxu1 %v1910_v59 }
  0x25   : > { %v2152_v56 = vld [vmem:[%s1999_s27 + $0x2c] sm:$0x1]  ;;  %v2166_v7 = vcombine.low %v2141_v49, %v2144_v50  ;;  %v2173_v62 = vld [vmem:[%s1999_s27 + $0x20] sm:$0xf]  ;;  %v2176_v63 = vld [vmem:[%s1999_s27 + $0x24] sm:$0x1]  ;;  %1734 = vmatpush3.bf16.msra.mxu0 %v1909_v57  ;;  %v386_v6 = vor.u32 %v385_v46, %v381_v41 }
  0x26   : > { %415 = vrot.lane.b32.xlu0 %v365_v17, %s1949_s30  ;;  %v2170_v61 = vcombine.low %v2149_v55, %v2152_v56  ;;  %v1911_v0 = vld [vmem:[%s2530_s1 + $0xa0] sm:$0xff]   ;;  %v379_v1 = vor.u32 %v378_v52, %v374_v48  ;;  %v2183_v3 = vld [vmem:[%s1999_s27 + $0x30] sm:$0xf]  ;;  %v1533_v4 = vld [vmem:[%s1999_s27 + $0x34] sm:$0x1]  ;;  %v609_v12 = vrot.slane %v1602_v54, 1  ;;  %v2203_v27 = vcombine.low %v2173_v62, %v2176_v63 }
  0x27   : > { %417 = vrot.lane.b32.xlu1 %v372_v9, %s1949_s30  ;;  %v1912_v5 = vld [vmem:[%s2530_s1 + $0x60] sm:$0xff]   ;;  %v610_v9 = vrot.slane %v1603_v53, 1  ;;  %v2191_v13 = vld [vmem:[%s1999_s27 + $0x28] sm:$0xf]  ;;  %v2194_v17 = vcombine.low %v2183_v3, %v1533_v4  ;;  %1776 = vmatpush3.bf16.msra.mxu1 %v1911_v0  ;;  %v709_v24 = vshll.u32 %v2159_v58, 16  ;;  %v702_v30 = vshll.u32 %v2166_v7, 16 }
  0x28   : > { %v1913_v20 = vld [vmem:[%s2530_s1 + $0x20] sm:$0xff]   ;;  %v1541_v28 = vld [vmem:[%s1999_s27 + $0x30] sm:$0xe]  ;;  %v1532_v29 = vld [vmem:[%s1999_s27 + $0x2c] sm:$0x1]  ;;  %1735 = vmatprep.subr.bf16.mxu0 %v1912_v5  ;;  %v397_v34 = vshll.u32 %v2170_v61, 16 }
  0x29   : > { %v1540_v35 = vld [vmem:[%s1999_s27 + $0x28] sm:$0xe]  ;;  %v2211_v36 = vcombine.low %v2191_v13, %v1532_v29  ;;  %1736 = vmatpush3.bf16.msra.mxu0 %v1913_v20  ;;  %v700_v41 = vshrl.u32 %v2166_v7, 16  ;;  %v1559_v42 = vld [vmem:[%s1999_s27 + $0x4c] sm:$0x1]  ;;  %v390_v59 = vshll.u32 %v2203_v27, 16 }
  0x2a   : > { %731 = vrot.lane.b32.xlu0 %v691_v45, %s1949_s30  ;;  %v2214_v39 = vld [vmem:[%s1999_s27 + $0x48] sm:$0xf]  ;;  %v2229_v53 = vld [vmem:[%s1999_s27 + $0x40] sm:$0xf]  ;;  %v1558_v54 = vld [vmem:[%s1999_s27 + $0x44] sm:$0x1]  ;;  %v1604_v7 = vcombine.low %v1540_v35, %v1532_v29  ;;  %v1589_v29 = vcombine.low %v2183_v3, %v2183_v3  ;;  %v1588_v35 = vcombine.low %v2191_v13, %v2191_v13 }
  0x2b   : > { %733 = vrot.lane.b32.xlu1 %v698_v51, %s1949_s30  ;;  %v1567_v45 = vld [vmem:[%s1999_s27 + $0x48] sm:$0xe]  ;;  %v1605_v51 = vcombine.low %v1541_v28, %v1533_v4  ;;  %v2226_v52 = vcombine.low %v2214_v39, %v1559_v42  ;;  %v2238_v5 = vcombine.low %v2229_v53, %v1558_v54  ;;  %v704_v20 = vrot.slane %v702_v30, 1  ;;  %v2244_v40 = vld [vmem:[%s1999_s27 + $0x40] sm:$0xf] }
  0x2c   : > { %v1914_v46 = vld [vmem:[%s2530_s1 + $0xe8] sm:$0xff]   ;;  %v1623_v0 = vcombine.low %v1567_v45, %v1559_v42  ;;  %v399_v28 = vrot.slane %v397_v34, 1  ;;  %v2254_v45 = vld [vmem:[%s1999_s27 + $0x38] sm:$0xf]  ;;  %v2287_v23 = vld [vmem:[%s1999_s27 + $0x30] sm:$0xf] }
  0x2d   : > { %v1915_v57 = vld [vmem:[%s2530_s1 + $0xa8] sm:$0xff]   ;;  %1777 = vmatprep.subr.bf16.mxu1 %v1914_v46  ;;  %v612_v3 = vrot.slane %v1605_v51, 1  ;;  %v723_v34 = vshll.u32 %v2226_v52, 16  ;;  %v2268_v46 = vld [vmem:[%s1999_s27 + $0x44] sm:$0x1]  ;;  %v714_v51 = vshrl.u32 %v2238_v5, 16 }
  0x2e   : > { %419 = vrot.lane.b32.xlu0 %v379_v1, %s1949_s30  ;;  %v1566_v1 = vld [vmem:[%s1999_s27 + $0x40] sm:$0xe]  ;;  %v1916_v4 = vld [vmem:[%s2530_s1 + $0x68] sm:$0xff]   ;;  %1778 = vmatpush3.bf16.msra.mxu1 %v1915_v57  ;;  %v2251_v42 = vrot.slane %v1623_v0, 1  ;;  %v611_v57 = vrot.slane %v1604_v7, 1  ;;  %v716_v0 = vshll.u32 %v2238_v5, 16 }
  0x2f   : > { %421 = vrot.lane.b32.xlu1 %v386_v6, %s1949_s30  ;;  %v711_v6 = vrot.slane %v709_v24, 1  ;;  %v1622_v48 = vcombine.low %v1566_v1, %v1558_v54  ;;  %v2257_v24 = vld [vmem:[%s1999_s27 + $0x3c] sm:$0x1]  ;;  %1737 = vmatprep.subr.bf16.mxu0 %v1916_v4  ;;  %v1920_v30 = vld [vmem:[%s2530_s1 + $0x28] sm:$0xff]   ;;  %v392_v54 = vrot.slane %v390_v59, 1  ;;  %v2273_v1 = vcombine.low %v2244_v40, %v2268_v46 }
  0x30   : > { %2537 = vst [vmem:[#allocation3_spill] sm:$0xff] %v2251_v42  ;;  %1738 = vmatpush3.bf16.msra.mxu0 %v1920_v30  ;;  %v1575_v7 = vcombine.low %v2254_v45, %v2257_v24  ;;  %v705_v4 = vor.u32 %v704_v20, %v700_v41  ;;  %v2290_v30 = vld [vmem:[%s1999_s27 + $0x34] sm:$0x1]  ;;  %v2293_v11 = vld [vmem:[%s1999_s27 + $0x3c] sm:$0x1]  ;;  %v725_v59 = vrot.slane %v723_v34, 1 }
  0x31   : > { %v2265_v13 = vrot.slane %v1622_v48, 1  ;;  %v721_v48 = vshrl.u32 %v2226_v52, 16  ;;  %v2539_v52 = vshrl.u32 %v2159_v58, 16  ;;  %v1922_v41 = vld [vmem:[%s2530_s1 + $0xb0] sm:$0xff]   ;;  %v718_v20 = vrot.slane %v716_v0, 1 }
  0x32   : > { %619 = vrot.lane.b32.xlu0 %v609_v12, %s1949_s30  ;;  %v388_v12 = vshrl.u32 %v2203_v27, 16  ;;  %v1526_v27 = vld [vmem:[%s1999_s27 + $0x38] sm:$0xf]  ;;  %v1574_v34 = vcombine.low %v2287_v23, %v2290_v30 }
  0x33   : > { %621 = vrot.lane.b32.xlu1 %v610_v9, %s1949_s30  ;;  %2538 = vst [vmem:[#allocation4_spill] sm:$0xff] %v2265_v13  ;;  %v1921_v9 = vld [vmem:[%s2530_s1 + $0xf0] sm:$0xff]   ;;  %v712_v5 = vor.u32 %v711_v6, %v2539_v52  ;;  %v2299_v42 = vcombine.low %v1526_v27, %v2293_v11  ;;  %v411_v13 = vshll.u32 %v1575_v7, 16  ;;  %v2540_v6 = vshrl.u32 %v2170_v61, 16  ;;  %v2314_v0 = vld [vmem:[%s1999_s27 + $0x18] sm:$0xe] }
  0x34   : > { %1779 = vmatprep.subr.bf16.mxu1 %v1921_v9  ;;  %v409_v9 = vshrl.u32 %v1575_v7, 16  ;;  %v393_v58 = vor.u32 %v392_v54, %v388_v12  ;;  %v1579_v7 = vcombine.low %v2314_v0, %v2101_v8  ;;  %v404_v12 = vshll.u32 %v1574_v34, 16  ;;  %v1924_v61 = vld [vmem:[%s2530_s1 + $0x30] sm:$0xff]  }
  0x35   : > { %1780 = vmatpush3.bf16.msra.mxu1 %v1922_v41  ;;  %v2325_v54 = vld [vmem:[%s1999_s27 + $0x10] sm:$0xe]  ;;  %v1591_v52 = vcombine.low %v2244_v40, %v2244_v40  ;;  %v262_v41 = vld [vmem:[%s1999_s27 + $0x8] sm:$0xe]  ;;  %v1925_v40 = vld [vmem:[%s2530_s1 + $0xf8] sm:$0xff]  }
  0x36   : > { %495 = vrot.lane.b32.xlu0 %v1588_v35, %s1949_s30  ;;  %v1923_v35 = vld [vmem:[%s2530_s1 + $0x70] sm:$0xff]   ;;  %1781 = vmatprep.subr.bf16.mxu1 %v1925_v40 }
  0x37   : > { %497 = vrot.lane.b32.xlu1 %v1589_v29, %s1949_s30  ;;  %1739 = vmatprep.subr.bf16.mxu0 %v1923_v35  ;;  %v400_v29 = vor.u32 %v399_v28, %v2540_v6  ;;  %v1590_v28 = vcombine.low %v1526_v27, %v1526_v27  ;;  %v402_v27 = vshrl.u32 %v1574_v34, 16  ;;  %v1542_v6 = vld [vmem:[%s1999_s27 + $0x38] sm:$0xe]  ;;  %v2360_v34 = vld [vmem:[%s1999_s27 + $0x28] sm:$0xe] }
  0x38   : > { %1740 = vmatpush3.bf16.msra.mxu0 %v1924_v61  ;;  %v406_v61 = vrot.slane %v404_v12, 1  ;;  %v2363_v12 = vld [vmem:[%s1999_s27 + $0x20] sm:$0xe] }
  0x3a   : > { %735 = vrot.lane.b32.xlu0 %v705_v4, %s1949_s30  ;;  %v2328_v4 = vld [vmem:[%s1999_s27] sm:$0xe] }
  0x3b   : > { %737 = vrot.lane.b32.xlu1 %v712_v5, %s1949_s30  ;;  %v1576_v35 = vcombine.low %v2328_v4, %v2067_v43  ;;  %v726_v5 = vor.u32 %v725_v59, %v721_v48  ;;  %v1927_v43 = vld [vmem:[%s2530_s1 + $0x78] sm:$0xff]  }
  0x3c   : > { %v1928_v48 = vld [vmem:[%s2530_s1 + $0x38] sm:$0xff]   ;;  %1741 = vmatprep.subr.bf16.mxu0 %v1927_v43 }
  0x3d   : > { %1742 = vmatpush3.bf16.msra.mxu0 %v1928_v48  ;;  %v2377_v4 = vld [vmem:[%s1999_s27 + $0x38] sm:$0xe] }
  0x3e   : > { %423 = vrot.lane.b32.xlu0 %v393_v58, %s1949_s30  ;;  %v413_v58 = vrot.slane %v411_v13, 1  ;;  %v407_v13 = vor.u32 %v406_v61, %v402_v27  ;;  %v1560_v27 = vld [vmem:[%s1999_s27 + $0x10] sm:$0xe] }
  0x3f   : > { %425 = vrot.lane.b32.xlu1 %v400_v29, %s1949_s30  ;;  %v719_v29 = vor.u32 %v718_v20, %v714_v51  ;;  %v1606_v51 = vcombine.low %v1542_v6, %v2293_v11  ;;  %v1561_v6 = vld [vmem:[%s1999_s27 + $0x18] sm:$0xe]  ;;  %v1564_v61 = vld [vmem:[%s1999_s27 + $0x30] sm:$0xe] }
  0x40   : > { %v414_v59 = vor.u32 %v413_v58, %v409_v9  ;;  %v2372_v9 = vld [vmem:[%s2530_s1 + $0x100] sm:$0xff]   ;;  %v1617_v40 = vcombine.low %v1561_v6, %v2037_v26  ;;  %v530_v26 = vshll.u32 %v2015_v15, 16  ;;  %v528_v6 = vshrl.u32 %v2015_v15, 16 }
  0x41   : > { %1815 = vmatprep.subr.bf16.mxu0 %v2372_v9 }
  0x42   : > { %623 = vrot.lane.b32.xlu0 %v611_v57, %s1949_s30  ;;  %v1577_v57 = vcombine.low %v262_v41, %v2059_v37  ;;  %v1926_v37 = vld [vmem:[%s2530_s1 + $0xb8] sm:$0xff]  }
  0x43   : > { %625 = vrot.lane.b32.xlu1 %v612_v3, %s1949_s30  ;;  %v1543_v3 = vld [vmem:[%s1999_s27 + $0x40] sm:$0xe]  ;;  %1782 = vmatpush3.bf16.msra.mxu1 %v1926_v37  ;;  %v1620_v37 = vcombine.low %v1564_v61, %v2144_v50  ;;  %v537_v50 = vshll.u32 %v2026_v21, 16  ;;  %v535_v61 = vshrl.u32 %v2026_v21, 16 }
  0x44   : > { %v1607_v20 = vcombine.low %v1543_v3, %v2268_v46  ;;  %v613_v46 = vrot.slane %v1606_v51, 1  ;;  %1831 = vmatprep.subr.bf16.mxu1 %v2372_v9  ;;  %v1565_v3 = vld [vmem:[%s1999_s27 + $0x38] sm:$0xe]  ;;  %v2400_v51 = vrot.slane %v1617_v40, 1 }
  0x45   : > { %v1621_v43 = vcombine.low %v1565_v3, %v2137_v25  ;;  %v2402_v48 = vrot.slane %v1620_v37, 1  ;;  %v539_v40 = vrot.slane %v537_v50, 1 }
  0x46   : > { %499 = vrot.lane.b32.xlu0 %v1590_v28, %s1949_s30  ;;  %v1580_v28 = vcombine.low %v2363_v12, %v2176_v63  ;;  %v565_v63 = vshll.u32 %v2194_v17, 16 }
  0x47   : > { %501 = vrot.lane.b32.xlu1 %v1591_v52, %s1949_s30  ;;  %v2380_v52 = vld [vmem:[%s1999_s27 + $0x30] sm:$0xe] }
  0x4a   : > { %739 = vrot.lane.b32.xlu0 %v719_v29, %s1949_s30  ;;  %v1616_v29 = vcombine.low %v1560_v27, %v2022_v19  ;;  %v456_v27 = vrot.slane %v1577_v57, 1 }
  0x4b   : > { %741 = vrot.lane.b32.xlu1 %v726_v5, %s1949_s30  ;;  %v614_v5 = vrot.slane %v1607_v20, 1  ;;  %v2541_v20 = vcombine.low %v2325_v54, %v2109_v16 }
  0x4d   : > { %v457_v19 = vrot.slane %v2541_v20, 1 }
  0x4e   : > { %427 = vrot.lane.b32.xlu0 %v407_v13, %s1949_s30  ;;  %v2398_v13 = vrot.slane %v1616_v29, 1  ;;  %v532_v29 = vrot.slane %v530_v26, 1  ;;  %v540_v26 = vor.u32 %v539_v40, %v535_v61 }
  0x4f   : > { %429 = vrot.lane.b32.xlu1 %v414_v59, %s1949_s30  ;;  %v2404_v59 = vrot.slane %v1621_v43, 1  ;;  %v458_v43 = vrot.slane %v1579_v7, 1 }
  0x50   : > { %v533_v11 = vor.u32 %v532_v29, %v528_v6  ;;  %v551_v6 = vshll.u32 %v2010_v10, 16 }
  0x52   : > { %627 = vrot.lane.b32.xlu0 %v613_v46, %s1949_s30 }
  0x53   : > { %629 = vrot.lane.b32.xlu1 %v614_v5, %s1949_s30  ;;  %v455_v5 = vrot.slane %v1576_v35, 1 }
  0x88   : > { %v494_v46 = vpop.permute.xlu1 %493  ;;  %v488_v25 = vpop.permute.xlu0 %487 }
  0x89   : > { %v802_v35 = vsel %vm775_vm0, %v455_v5, %v488_v25  ;;  %v811_v21 = vsel %vm775_vm0, %v458_v43, %v494_v46 }
  0x8c   : > { %v618_v3 = vpop.permute.xlu1 %617  ;;  %v490_v37 = vpop.permute.xlu0 %489 }
  0x8d   : > { %v805_v57 = vsel %vm775_vm0, %v456_v27, %v490_v37  ;;  %v829_v7 = vsel %vm775_vm0, %v540_v26, %v618_v3  ;;  %v544_v27 = vshll.u32 %v2124_v32, 16  ;;  %v542_v3 = vshrl.u32 %v2124_v32, 16 }
  0x8e   : > { %v1626_v41 = vcombine.low %v802_v35, %v805_v57  ;;  %v553_v37 = vrot.slane %v551_v6, 1  ;;  %v1935_v35 = vld [vmem:[%s2530_s1 + $0x110] sm:$0xff]   ;;  %v563_v6 = vshrl.u32 %v2194_v17, 16  ;;  %v2543_v17 = vcombine.low %v2380_v52, %v2290_v30 }
  0x8f   : > { %v546_v40 = vrot.slane %v544_v27, 1  ;;  %v556_v27 = vshrl.u32 %v2211_v36, 16 }
  0x90   : > { %v492_v15 = vpop.permute.xlu0 %491  ;;  %1246 = vmatprep.mubr.bf16.mxu0 %v1626_v41 }
  0x91   : > { %v728_v50 = vpop.permute.xlu1 %727  ;;  %v808_v58 = vsel %vm775_vm0, %v457_v19, %v492_v15  ;;  %v547_v15 = vor.u32 %v546_v40, %v542_v3 }
  0x92   : > { %v1631_v8 = vcombine.low %v808_v58, %v811_v21  ;;  %v850_v25 = vsel %vm775_vm0, %v2019_v18, %v728_v50  ;;  %v1932_v18 = vld [vmem:[%s2530_s1 + $0x108] sm:$0xff]  }
  0x94   : > { %v616_v0 = vpop.permute.xlu0 %615 }
  0x95   : > { %v730_v16 = vpop.permute.xlu1 %729  ;;  %v826_v54 = vsel %vm775_vm0, %v533_v11, %v616_v0 }
  0x96   : > { %v1627_v20 = vcombine.low %v826_v54, %v829_v7  ;;  %v853_v41 = vsel %vm775_vm0, %v2029_v22, %v730_v16  ;;  %v2542_v7 = vcombine.low %v2360_v34, %v2152_v56 }
  0x97   : > { %v1628_v46 = vcombine.low %v850_v25, %v853_v41  ;;  %v558_v25 = vshll.u32 %v2211_v36, 16 }
  0x98   : > { %v416_v5 = vpop.permute.xlu0 %415  ;;  %v460_v16 = vrot.slane %v2542_v7, 1 }
  0x99   : > { %1311 = vmatprep.mubr.bf16.mxu1 %v1628_v46  ;;  %v418_v19 = vpop.permute.xlu1 %417  ;;  %v778_v58 = vsel %vm775_vm0, %v2062_v38, %v416_v5 }
  0x9a   : > { %v781_v11 = vsel %vm775_vm0, %v2049_v33, %v418_v19  ;;  %1312 = vmatmul.mubr.bf16.vlgmr.msra.gmra.mrb[0].mxu1 %v1627_v20  ;;  %v549_v33 = vshrl.u32 %v2010_v10, 16  ;;  %v560_v19 = vrot.slane %v558_v25, 1 }
  0x9b   : > { %v1625_v22 = vcombine.low %v778_v58, %v781_v11  ;;  %1835 = vmatpush3.bf16.msra.mxu1 %v2372_v9  ;;  %v567_v11 = vrot.slane %v565_v63, 1 }
  0x9c   : > { %v732_v29 = vpop.permute.xlu0 %731  ;;  %1832 = vmatprep.subr.bf16.mxu1 %v1932_v18  ;;  %v554_v21 = vor.u32 %v553_v37, %v549_v33  ;;  %v461_v37 = vrot.slane %v2543_v17, 1 }
  0x9d   : > { %v734_v61 = vpop.permute.xlu1 %733  ;;  %1247 = vmatmul.mubr.bf16.vlgmr.msra.gmra.mrb[0].mxu0 %v1625_v22  ;;  %v856_v38 = vsel %vm775_vm0, %v2088_v60, %v732_v29  ;;  %v568_v3 = vor.u32 %v567_v11, %v563_v6 }
  0x9e   : > { %v859_v43 = vsel %vm775_vm0, %v2075_v47, %v734_v61  ;;  %1254 = vmatprep.mubr.bf16.mxu0 %v1631_v8  ;;  %1816 = vmatpush3.bf16.msra.mxu0 %v2372_v9  ;;  %v1936_v9 = vld [vmem:[%s2530_s1 + $0x118] sm:$0xff]  }
  0x9f   : > { %v1633_v57 = vcombine.low %v856_v38, %v859_v43  ;;  %1817 = vmatprep.subr.bf16.mxu0 %v1932_v18  ;;  %1836 = vmatpush3.bf16.msra.mxu1 %v1932_v18  ;;  %v561_v38 = vor.u32 %v560_v19, %v556_v27 }
  0xa0   : > { %v420_v60 = vpop.permute.xlu0 %419  ;;  %1833 = vmatprep.subr.bf16.mxu1 %v1935_v35 }
  0xa1   : > { %v422_v32 = vpop.permute.xlu1 %421  ;;  %1319 = vmatprep.mubr.bf16.mxu1 %v1633_v57  ;;  %v784_v10 = vsel %vm775_vm0, %v2106_v14, %v420_v60  ;;  %v459_v14 = vrot.slane %v1580_v28, 1 }
  0xa2   : > { %v787_v47 = vsel %vm775_vm0, %v2095_v2, %v422_v32  ;;  %1818 = vmatpush3.bf16.msra.mxu0 %v1932_v18 }
  0xa3   : > { %v1630_v26 = vcombine.low %v784_v10, %v787_v47  ;;  %1819 = vmatprep.subr.bf16.mxu0 %v1935_v35  ;;  %1837 = vmatpush3.bf16.msra.mxu1 %v1935_v35 }
  0xa4   : > { %v620_v50 = vpop.permute.xlu0 %619  ;;  %1834 = vmatprep.subr.bf16.mxu1 %v1936_v9 }
  0xa5   : > { %v622_v8 = vpop.permute.xlu1 %621  ;;  %1255 = vmatmul.mubr.bf16.gmra.mrb[4].mxu0 %v1630_v26  ;;  %v832_v0 = vsel %vm775_vm0, %v547_v15, %v620_v50  ;;  %v579_v15 = vshll.u32 %v2273_v1, 16  ;;  %v577_v50 = vshrl.u32 %v2273_v1, 16 }
  0xa6   : > { %v835_v2 = vsel %vm775_vm0, %v554_v21, %v622_v8  ;;  %1820 = vmatpush3.bf16.msra.mxu0 %v1935_v35 }
  0xa7   : > { %v1632_v54 = vcombine.low %v832_v0, %v835_v2  ;;  %1821 = vmatprep.subr.bf16.mxu0 %v1936_v9  ;;  %1838 = vmatpush3.bf16.msra.mxu1 %v1936_v9  ;;  %v581_v8 = vrot.slane %v579_v15, 1 }
  0xa8   : > { %v496_v20 = vpop.permute.xlu0 %495 }
  0xa9   : > { %v498_v41 = vpop.permute.xlu1 %497  ;;  %1320 = vmatmul.mubr.bf16.gmra.mrb[4].mxu1 %v1632_v54  ;;  %v814_v46 = vsel %vm775_vm0, %v459_v14, %v496_v20  ;;  %v582_v54 = vor.u32 %v581_v8, %v577_v50 }
  0xaa   : > { %v817_v12 = vsel %vm775_vm0, %v460_v16, %v498_v41  ;;  %1822 = vmatpush3.bf16.msra.mxu0 %v1936_v9  ;;  %v2545_v41 = vcombine.low %v2398_v13, %v2400_v51 }
  0xab   : > { %v1636_v28 = vcombine.low %v814_v46, %v817_v12  ;;  %v2549_v12 = vld [vmem:[#allocation4_spill] sm:$0xff] }
  0xac   : > { %v736_v5 = vpop.permute.xlu0 %735 }
  0xad   : > { %v738_v56 = vpop.permute.xlu1 %737  ;;  %1262 = vmatprep.mubr.bf16.mxu0 %v1636_v28  ;;  %v862_v34 = vsel %vm775_vm0, %v2141_v49, %v736_v5  ;;  %v2550_v28 = vld [vmem:[#allocation3_spill] sm:$0xff] }
  0xae   : > { %v865_v58 = vsel %vm775_vm0, %v2134_v44, %v738_v56  ;;  %v2551_v5 = vcombine.low %v2549_v12, %v2550_v28 }
  0xaf   : > { %v1638_v18 = vcombine.low %v862_v34, %v865_v58 }
  0xb0   : > { %v424_v22 = vpop.permute.xlu0 %423 }
  0xb1   : > { %v426_v29 = vpop.permute.xlu1 %425  ;;  %1327 = vmatprep.mubr.bf16.mxu1 %v1638_v18  ;;  %v790_v61 = vsel %vm775_vm0, %v2173_v62, %v424_v22  ;;  %v2544_v62 = vcombine.low %v2377_v4, %v2257_v24  ;;  %v570_v4 = vshrl.u32 %v2299_v42, 16 }
  0xb2   : > { %v793_v49 = vsel %vm775_vm0, %v2149_v55, %v426_v29  ;;  %v572_v55 = vshll.u32 %v2299_v42, 16 }
  0xb3   : > { %v1635_v36 = vcombine.low %v790_v61, %v793_v49  ;;  %v462_v35 = vrot.slane %v2544_v62, 1 }
  0xb4   : > { %v624_v40 = vpop.permute.xlu0 %623  ;;  %v574_v9 = vrot.slane %v572_v55, 1 }
  0xb5   : > { %v626_v33 = vpop.permute.xlu1 %625  ;;  %1263 = vmatmul.mubr.bf16.gmra.mrb[8].mxu0 %v1635_v36  ;;  %v838_v44 = vsel %vm775_vm0, %v561_v38, %v624_v40 }
  0xb6   : > { %v841_v43 = vsel %vm775_vm0, %v568_v3, %v626_v33  ;;  %v575_v16 = vor.u32 %v574_v9, %v570_v4 }
  0xb7   : > { %v1637_v57 = vcombine.low %v838_v44, %v841_v43 }
  0xb8   : > { %v500_v60 = vpop.permute.xlu0 %499 }
  0xb9   : > { %v502_v32 = vpop.permute.xlu1 %501  ;;  %1328 = vmatmul.mubr.bf16.gmra.mrb[8].mxu1 %v1637_v57  ;;  %v820_v10 = vsel %vm775_vm0, %v461_v37, %v500_v60 }
  0xba   : > { %v823_v47 = vsel %vm775_vm0, %v462_v35, %v502_v32 }
  0xbb   : > { %v1641_v30 = vcombine.low %v820_v10, %v823_v47 }
  0xbc   : > { %v740_v52 = vpop.permute.xlu0 %739 }
  0xbd   : > { %v742_v21 = vpop.permute.xlu1 %741  ;;  %1270 = vmatprep.mubr.bf16.mxu0 %v1641_v30  ;;  %v868_v24 = vsel %vm775_vm0, %v2229_v53, %v740_v52 }
  0xbe   : > { %v871_v26 = vsel %vm775_vm0, %v2214_v39, %v742_v21 }
  0xbf   : > { %v1643_v0 = vcombine.low %v868_v24, %v871_v26 }
  0xc0   : > { %v428_v14 = vpop.permute.xlu0 %427 }
  0xc1   : > { %v430_v2 = vpop.permute.xlu1 %429  ;;  %1335 = vmatprep.mubr.bf16.mxu1 %v1643_v0  ;;  %v796_v7 = vsel %vm775_vm0, %v2287_v23, %v428_v14  ;;  %v2546_v23 = vcombine.low %v2402_v48, %v2404_v59  ;;  %v1624_v48 = vld [vmem:[%s2531_s2] ss:$0 sm:$0xff] }
  0xc2   : > { %v799_v53 = vsel %vm775_vm0, %v2254_v45, %v430_v2  ;;  %v2547_v45 = vld [vmem:[#allocation2_spill] sm:$0xff] }
  0xc3   : > { %v1640_v42 = vcombine.low %v796_v7, %v799_v53  ;;  %v2548_v63 = vcombine.low %v2121_v31, %v2547_v45 }
  0xc4   : > { %v628_v20 = vpop.permute.xlu0 %627 }
  0xc5   : > { %v630_v25 = vpop.permute.xlu1 %629  ;;  %1271 = vmatmul.mubr.bf16.gmra.mrb[12].mxu0 %v1640_v42  ;;  %v844_v39 = vsel %vm775_vm0, %v575_v16, %v628_v20 }
  0xc6   : > { %v847_v1 = vsel %vm775_vm0, %v582_v54, %v630_v25  ;;  %1823 = vmatprep.mubr.msk.bf16.mxu0 %vm775_vm0, %v2545_v41 }
  0xc7   : > { %v1642_v46 = vcombine.low %v844_v39, %v847_v1 }
  0xc9   : > { %1336 = vmatmul.mubr.bf16.gmra.mrb[12].mxu1 %v1642_v46 }
  0xca   : > { %1827 = vmatprep.mubr.msk.bf16.mxu1 %vm775_vm0, %v2546_v23 }
  0xcd   : > { %1824 = vmatmul.mubr.msk.bf16.vlgmr.msra.gmra.mrb[16].mxu0 %vm775_vm0, %v2548_v63 }
  0xd1   : > { %1828 = vmatmul.mubr.msk.bf16.vlgmr.msra.gmra.mrb[16].mxu1 %vm775_vm0, %v2551_v5 }
 0x16d   : > { %v1783_v13 = vpop.f32.mrb[0].mxu1 }
 0x16e   : > { %v1784_v51 = vpop.f32.mrb[1].mxu1 }
 0x16f   : > { %v1785_v56 = vadd.f32 %v1784_v51, %v1783_v13  ;;  %v1786_v34 = vpop.f32.mrb[2].mxu1 }
 0x170   : > { %v1743_v27 = vpop.f32.mrb[0].mxu0  ;;  %v1787_v19 = vpop.f32.mrb[3].mxu1 }
 0x171   : > { %v1788_v58 = vadd.f32 %v1787_v19, %v1786_v34  ;;  %v1744_v59 = vpop.f32.mrb[1].mxu0 }
 0x172   : > { %v1745_v31 = vadd.f32 %v1744_v59, %v1743_v27  ;;  %v1746_v6 = vpop.f32.mrb[2].mxu0 }
 0x173   : > { %v1747_v11 = vpop.f32.mrb[3].mxu0 }
 0x174   : > { %v1249_v18 = vadd.f32 %v1745_v31, %v1624_v48  ;;  %v1748_v22 = vadd.f32 %v1747_v11, %v1746_v6 }
 0x176   : > { %v1252_v29 = vadd.f32 %v1748_v22, %v1624_v48  ;;  %v1314_v61 = vadd.f32 %v1785_v56, %v1249_v18 }
 0x178   : > { %v1749_v38 = vpop.f32.mrb[4].mxu0  ;;  %v1317_v49 = vadd.f32 %v1788_v58, %v1252_v29 }
 0x179   : > { %v1750_v3 = vpop.f32.mrb[5].mxu0 }
 0x17a   : > { %v1751_v36 = vadd.f32 %v1750_v3, %v1749_v38  ;;  %v1752_v40 = vpop.f32.mrb[6].mxu0 }
 0x17b   : > { %v1753_v33 = vpop.f32.mrb[7].mxu0 }
 0x17c   : > { %v1754_v44 = vadd.f32 %v1753_v33, %v1752_v40  ;;  %v1789_v17 = vpop.f32.mrb[4].mxu1  ;;  %v1257_v43 = vadd.f32 %v1751_v36, %v1624_v48 }
 0x17d   : > { %v1790_v37 = vpop.f32.mrb[5].mxu1 }
 0x17e   : > { %v1791_v62 = vadd.f32 %v1790_v37, %v1789_v17  ;;  %v1792_v35 = vpop.f32.mrb[6].mxu1  ;;  %v1260_v60 = vadd.f32 %v1754_v44, %v1624_v48 }
 0x17f   : > { %v1793_v57 = vpop.f32.mrb[7].mxu1 }
 0x180   : > { %v1794_v55 = vadd.f32 %v1793_v57, %v1792_v35  ;;  %v1322_v32 = vadd.f32 %v1791_v62, %v1257_v43 }
 0x182   : > { %v1325_v10 = vadd.f32 %v1794_v55, %v1260_v60 }
 0x188   : > { %v1755_v15 = vpop.f32.mrb[8].mxu0 }
 0x189   : > { %v1756_v47 = vpop.f32.mrb[9].mxu0 }
 0x18a   : > { %v1757_v30 = vadd.f32 %v1756_v47, %v1755_v15  ;;  %v1758_v52 = vpop.f32.mrb[10].mxu0 }
 0x18b   : > { %v1759_v21 = vpop.f32.mrb[11].mxu0 }
 0x18c   : > { %v1760_v24 = vadd.f32 %v1759_v21, %v1758_v52  ;;  %v1795_v4 = vpop.f32.mrb[8].mxu1  ;;  %v1265_v26 = vadd.f32 %v1757_v30, %v1624_v48 }
 0x18d   : > { %v1796_v9 = vpop.f32.mrb[9].mxu1 }
 0x18e   : > { %v1797_v50 = vadd.f32 %v1796_v9, %v1795_v4  ;;  %v1798_v8 = vpop.f32.mrb[10].mxu1  ;;  %v1268_v14 = vadd.f32 %v1760_v24, %v1624_v48 }
 0x18f   : > { %v1799_v0 = vpop.f32.mrb[11].mxu1 }
 0x190   : > { %v1800_v2 = vadd.f32 %v1799_v0, %v1798_v8  ;;  %v1330_v7 = vadd.f32 %v1797_v50, %v1265_v26 }
 0x192   : > { %v1333_v16 = vadd.f32 %v1800_v2, %v1268_v14 }
 0x198   : > { %v1761_v53 = vpop.f32.mrb[12].mxu0 }
 0x199   : > { %v1762_v54 = vpop.f32.mrb[13].mxu0 }
 0x19a   : > { %v1763_v42 = vadd.f32 %v1762_v54, %v1761_v53  ;;  %v1764_v20 = vpop.f32.mrb[14].mxu0 }
 0x19b   : > { %v1765_v25 = vpop.f32.mrb[15].mxu0 }
 0x19c   : > { %v1766_v39 = vadd.f32 %v1765_v25, %v1764_v20  ;;  %v1801_v1 = vpop.f32.mrb[12].mxu1  ;;  %v1273_v46 = vadd.f32 %v1763_v42, %v1624_v48 }
 0x19d   : > { %v1802_v41 = vpop.f32.mrb[13].mxu1 }
 0x19e   : > { %v1803_v23 = vadd.f32 %v1802_v41, %v1801_v1  ;;  %v1804_v45 = vpop.f32.mrb[14].mxu1  ;;  %v1276_v12 = vadd.f32 %v1766_v39, %v1624_v48 }
 0x19f   : > { %v1805_v63 = vpop.f32.mrb[15].mxu1 }
 0x1a0   : > { %v1806_v28 = vadd.f32 %v1805_v63, %v1804_v45  ;;  %v1825_v5 = vpop.f32.mrb[16].mxu0  ;;  %v1338_v13 = vadd.f32 %v1803_v23, %v1273_v46 }
 0x1a1   : > { %v1387_v51 = vadd.f32 %v1825_v5, %v1322_v32  ;;  %v1378_v56 = vpop.f32.mrb[17].mxu0 }
 0x1a2   : > { %v1379_v34 = vadd.f32 %v1378_v56, %v1314_v61  ;;  %v1826_v27 = vpop.f32.mrb[18].mxu0  ;;  %v1341_v19 = vadd.f32 %v1806_v28, %v1276_v12 }
 0x1a3   : > { %v1390_v58 = vadd.f32 %v1826_v27, %v1325_v10  ;;  %v1381_v59 = vpop.f32.mrb[19].mxu0  ;;  %v1411_v11 = vmax.f32 %v1387_v51, 0.0 }
 0x1a4   : > { %v1382_v31 = vadd.f32 %v1381_v59, %v1317_v49  ;;  %v1829_v6 = vpop.f32.mrb[16].mxu1  ;;  %v1409_v38 = vmax.f32 %v1379_v34, 0.0 }
 0x1a5   : > { %v1412_v18 = vmax.f32 %v1390_v58, 0.0  ;;  %v1403_v22 = vadd.f32 %v1829_v6, %v1338_v13  ;;  %v1394_v29 = vpop.f32.mrb[17].mxu1 }
 0x1a6   : > { %v1410_v48 = vmax.f32 %v1382_v31, 0.0  ;;  %v1395_v3 = vadd.f32 %v1394_v29, %v1330_v7  ;;  %v1830_v36 = vpop.f32.mrb[18].mxu1 }
 0x1a7   : > { %v1712_v61 = vpack.c.bf16 %v1412_v18, %v1411_v11  ;;  %v1406_v40 = vadd.f32 %v1830_v36, %v1341_v19  ;;  %v1397_v33 = vpop.f32.mrb[19].mxu1  ;;  %v1415_v49 = vmax.f32 %v1403_v22, 0.0 }
 0x1a8   : > { %v1707_v44 = vpack.c.bf16 %v1410_v48, %v1409_v38  ;;  %v1398_v17 = vadd.f32 %v1397_v33, %v1333_v16  ;;  %v1413_v43 = vmax.f32 %v1395_v3, 0.0 }
 0x1a9   : > { %1724 = vst [vmem:[%s170_s23 + $0x8] sm:$0xff] %v1712_v61   ;;  %v1416_v37 = vmax.f32 %v1406_v40, 0.0 }
 0x1aa   : > { %1708 = vst [vmem:[%s170_s23] sm:$0xff] %v1707_v44   ;;  %v1414_v62 = vmax.f32 %v1398_v17, 0.0 }
 0x1ab   : > { %v1722_v35 = vpack.c.bf16 %v1416_v37, %v1415_v49 }
 0x1ac   : > { %v1717_v57 = vpack.c.bf16 %v1414_v62, %v1413_v43 }
 0x1ad   : > { %1726 = vst [vmem:[%s170_s23 + $0x18] sm:$0xff] %v1722_v35  }
 0x1ae   : > { %1725 = vst [vmem:[%s170_s23 + $0x10] sm:$0xff] %v1717_v57  }
 0x1af PF: > { %s13_s12 = sadd.s32 1, %s1947_s12  }
 0x1b0   : > { %p10_p4 = scmp.ge.s32.totalorder %s13_s12, 6  }
 0x1b2   :  { %12 = sbr.rel (!%p10_p4) target bundleno = 1 (0x1), region = 64 }

// kernel: vgg_perceptual_loss.14
= control target key start
LH: loop header
LB: loop body
LE: loop exit
PB: predicated region body
PF: predicated region fallthrough
CT: control target
= control target key end

     0   :  { %7 = vsyncpa [#allocation3], 0  ;;  %s724_s9 = smov 0   ;;  %s828_s0 = inlined_call_operand.vmem [shape: bf16[4,16,16,64], index: 0, kind: input, shape index: {}, may-alias: {0,1}]   ;;  %s829_s1 = inlined_call_operand.vmem [shape: bf16[4,16,16,64], index: 1, kind: input, shape index: {}, may-alias: {0,1}]   ;;  %s830_s2 = inlined_call_operand.hbm [shape: f32[1,1], index: 2, kind: output, shape index: {}]  }
   0x1 LB: > { %s730_s10 = sadd.s32 4294967295, %s705_s9   ;;  %p492_p0 = scmp.ge.s32.totalorder %s705_s9, 1  ;;  %s705_s9 = sphi %s724_s9, %s13_s9  }
   0x2   : > { %p122_p1 = scmp.lt.s32.totalorder %s705_s9, 3 }
   0x4   : > { %p123_p2 = pnand %p492_p0, %p122_p1 }
   0x5   : > { %s150_s11 = sadd.s32 (!%p123_p2), 2, %s730_s10  ;;  %p145_p3 = scmp.lt.s32.totalorder (!%p123_p2), %s730_s10, 3  ;;  %vm356_vm0 = vcmask (!%p123_p2), 523264  }
   0x6   : > { %126 = sbr.rel (%p123_p2) target bundleno = 301 (0x12d), region = 28  ;;  %p151_p4 = scmp.lt.s32.totalorder (!%p123_p2), %s150_s11, 3 }
   0x7   : > { %p670_p5 = scmp.eq.s32.totalorder (!%p123_p2), %s730_s10, 0  ;;  %s707_s21 = smov (!%p123_p2), 0.0  }
   0x8   : > { %p671_p6 = scmp.eq.s32.totalorder (!%p123_p2), %s730_s10, 1  ;;  %s683_s27 = scalar_lea.hbm (!%p123_p2), %s830_s2, 16 }
   0x9   : > { %p684_p7 = scmp.ne.s32.totalorder (!%p123_p2), %s830_s2, %s683_s27  ;;  %p689_p10 = scmp.lt.u32.totalorder (!%p123_p2), %s683_s27, %s830_s2 }
   0xb   : > { %p685_p8 = pnand (!%p123_p2), %p684_p7, %p671_p6 }
   0xd   : > { %s146_s12 = scalar_select %p145_p3, %s730_s10, 3 }
   0xe   : > { %s832_s11 = smov (!%p151_p4, %s150_s11), 3  ;;  %665 = sst [smem:[#allocation2]] (%p670_p5), %s707_s21 }
   0xf   : > { %s502_s13 = sshll.u32 %s146_s12, 7  ;;  %s503_s14 = sshll.u32 %s832_s11, 7 }
  0x10   : > { %s740_s17 = scalar_lea.vmem %s828_s0, %s502_s13  ;;  %s745_s20 = scalar_lea.vmem %s829_s1, %s503_s14 }
  0x11   : > { %v505_v0 = vld [vmem:[%s740_s17] sm:$0xff]   ;;  %v632_v1 = vld [vmem:[%s740_s17 + $0x8] sm:$0xff]   ;;  %v633_v7 = vld [vmem:[%s740_s17 + $0x10] sm:$0xff]   ;;  %s323_s22 = sld [smem:[#allocation2]]  ;;  %p686_p9 = pneg %p685_p8 }
  0x12   : > { %v569_v2 = vld [vmem:[%s745_s20] sm:$0xff]   ;;  %v647_v3 = vld [vmem:[%s745_s20 + $0x8] sm:$0xff]   ;;  %v506_v4 = vunpack.c.l.bf16 %v505_v0  ;;  %v507_v5 = vunpack.c.h.bf16 %v505_v0  ;;  %v510_v6 = vunpack.c.l.bf16 %v632_v1  ;;  %v648_v11 = vld [vmem:[%s745_s20 + $0x10] sm:$0xff]   ;;  %v511_v12 = vunpack.c.h.bf16 %v632_v1 }
  0x13   : > { %v570_v8 = vunpack.c.l.bf16 %v569_v2  ;;  %v571_v9 = vunpack.c.h.bf16 %v569_v2  ;;  %v574_v10 = vunpack.c.l.bf16 %v647_v3  ;;  %v575_v13 = vunpack.c.h.bf16 %v647_v3  ;;  %v634_v15 = vld [vmem:[%s740_s17 + $0x18] sm:$0xff]   ;;  %v635_v26 = vld [vmem:[%s740_s17 + $0x20] sm:$0xff]   ;;  %v636_v39 = vld [vmem:[%s740_s17 + $0x28] sm:$0xff]   ;;  %p691_p11 = pnand %p689_p10, %p686_p9 }
  0x14   : > { %v514_v14 = vunpack.c.l.bf16 %v633_v7  ;;  %v578_v16 = vunpack.c.l.bf16 %v648_v11  ;;  %v649_v17 = vld [vmem:[%s745_s20 + $0x18] sm:$0xff]   ;;  %v515_v21 = vunpack.c.h.bf16 %v633_v7  ;;  %v579_v22 = vunpack.c.h.bf16 %v648_v11  ;;  %v650_v27 = vld [vmem:[%s745_s20 + $0x20] sm:$0xff]   ;;  %v651_v45 = vld [vmem:[%s745_s20 + $0x28] sm:$0xff]  }
  0x15   : > { %v291_v18 = vsub.f32 %v506_v4, %v570_v8  ;;  %v292_v19 = vsub.f32 %v507_v5, %v571_v9  ;;  %v293_v20 = vsub.f32 %v510_v6, %v574_v10  ;;  %v294_v23 = vsub.f32 %v511_v12, %v575_v13  ;;  %v637_v53 = vld [vmem:[%s740_s17 + $0x30] sm:$0xff]   ;;  %v638_v3 = vld [vmem:[%s740_s17 + $0x38] sm:$0xff]  }
  0x16   : > { %v518_v24 = vunpack.c.l.bf16 %v634_v15  ;;  %v582_v25 = vunpack.c.l.bf16 %v649_v17  ;;  %v295_v28 = vsub.f32 %v514_v14, %v578_v16  ;;  %v519_v32 = vunpack.c.h.bf16 %v634_v15  ;;  %v652_v59 = vld [vmem:[%s745_s20 + $0x30] sm:$0xff]   ;;  %v653_v9 = vld [vmem:[%s745_s20 + $0x38] sm:$0xff]  }
  0x17   : > { %v324_v29 = vmul.f32 %v291_v18, %v291_v18  ;;  %v325_v30 = vmul.f32 %v292_v19, %v292_v19  ;;  %v326_v31 = vmul.f32 %v293_v20, %v293_v20  ;;  %v583_v33 = vunpack.c.h.bf16 %v649_v17  ;;  %v639_v17 = vld [vmem:[%s740_s17 + $0x40] sm:$0xff]  }
  0x18   : > { %v296_v34 = vsub.f32 %v515_v21, %v579_v22  ;;  %v327_v35 = vmul.f32 %v294_v23, %v294_v23  ;;  %v522_v36 = vunpack.c.l.bf16 %v635_v26  ;;  %v586_v37 = vunpack.c.l.bf16 %v650_v27  ;;  %v654_v23 = vld [vmem:[%s745_s20 + $0x40] sm:$0xff]  }
  0x19   : > { %v297_v38 = vsub.f32 %v518_v24, %v582_v25  ;;  %v328_v40 = vmul.f32 %v295_v28, %v295_v28  ;;  %v357_v41 = vsel %vm356_vm0, %v324_v29, 0.0  ;;  %v358_v42 = vsel %vm356_vm0, %v325_v30, 0.0 }
  0x1a   : > { %v360_v43 = vsel %vm356_vm0, %v326_v31, 0.0  ;;  %v523_v44 = vunpack.c.h.bf16 %v635_v26  ;;  %v359_v46 = vadd.f32 %v358_v42, %v357_v41  ;;  %v587_v47 = vunpack.c.h.bf16 %v650_v27  ;;  %v640_v31 = vld [vmem:[%s740_s17 + $0x48] sm:$0xff]  }
  0x1b   : > { %v298_v48 = vsub.f32 %v519_v32, %v583_v33  ;;  %v329_v49 = vmul.f32 %v296_v34, %v296_v34  ;;  %v362_v50 = vsel %vm356_vm0, %v327_v35, 0.0  ;;  %v526_v51 = vunpack.c.l.bf16 %v636_v39 }
  0x1c   : > { %v361_v52 = vadd.f32 %v360_v43, %v359_v46  ;;  %v590_v54 = vunpack.c.l.bf16 %v651_v45  ;;  %v299_v55 = vsub.f32 %v522_v36, %v586_v37  ;;  %v330_v56 = vmul.f32 %v297_v38, %v297_v38  ;;  %v655_v37 = vld [vmem:[%s745_s20 + $0x48] sm:$0xff]  }
  0x1d   : > { %v364_v57 = vsel %vm356_vm0, %v328_v40, 0.0  ;;  %v527_v58 = vunpack.c.h.bf16 %v636_v39  ;;  %v591_v61 = vunpack.c.h.bf16 %v651_v45  ;;  %v300_v62 = vsub.f32 %v523_v44, %v587_v47  ;;  %v641_v45 = vld [vmem:[%s740_s17 + $0x50] sm:$0xff]  }
  0x1e   : > { %v363_v60 = vadd.f32 %v362_v50, %v361_v52  ;;  %v331_v63 = vmul.f32 %v298_v48, %v298_v48  ;;  %v366_v0 = vsel %vm356_vm0, %v329_v49, 0.0  ;;  %v530_v1 = vunpack.c.l.bf16 %v637_v53 }
  0x1f   : > { %v594_v4 = vunpack.c.l.bf16 %v652_v59  ;;  %v301_v5 = vsub.f32 %v526_v51, %v590_v54  ;;  %v332_v6 = vmul.f32 %v299_v55, %v299_v55  ;;  %v368_v7 = vsel %vm356_vm0, %v330_v56, 0.0  ;;  %v656_v51 = vld [vmem:[%s745_s20 + $0x50] sm:$0xff]  }
  0x20   : > { %v365_v2 = vadd.f32 %v364_v57, %v363_v60  ;;  %v531_v8 = vunpack.c.h.bf16 %v637_v53  ;;  %v595_v11 = vunpack.c.h.bf16 %v652_v59  ;;  %v302_v12 = vsub.f32 %v527_v58, %v591_v61  ;;  %v642_v59 = vld [vmem:[%s740_s17 + $0x58] sm:$0xff]  }
  0x21   : > { %v333_v13 = vmul.f32 %v300_v62, %v300_v62  ;;  %v370_v14 = vsel %vm356_vm0, %v331_v63, 0.0  ;;  %v534_v15 = vunpack.c.l.bf16 %v638_v3  ;;  %v598_v18 = vunpack.c.l.bf16 %v653_v9 }
  0x22   : > { %v367_v10 = vadd.f32 %v366_v0, %v365_v2  ;;  %v303_v19 = vsub.f32 %v530_v1, %v594_v4  ;;  %v334_v20 = vmul.f32 %v301_v5, %v301_v5  ;;  %v372_v21 = vsel %vm356_vm0, %v332_v6, 0.0  ;;  %v657_v1 = vld [vmem:[%s745_s20 + $0x58] sm:$0xff]  }
  0x23   : > { %v535_v22 = vunpack.c.h.bf16 %v638_v3  ;;  %v599_v25 = vunpack.c.h.bf16 %v653_v9  ;;  %v304_v26 = vsub.f32 %v531_v8, %v595_v11  ;;  %v335_v27 = vmul.f32 %v302_v12, %v302_v12  ;;  %v643_v9 = vld [vmem:[%s740_s17 + $0x60] sm:$0xff]  }
  0x24   : > { %v369_v16 = vadd.f32 %v368_v7, %v367_v10  ;;  %v374_v28 = vsel %vm356_vm0, %v333_v13, 0.0  ;;  %v538_v29 = vunpack.c.l.bf16 %v639_v17  ;;  %v602_v32 = vunpack.c.l.bf16 %v654_v23 }
  0x25   : > { %v305_v33 = vsub.f32 %v534_v15, %v598_v18  ;;  %v336_v34 = vmul.f32 %v303_v19, %v303_v19  ;;  %v376_v35 = vsel %vm356_vm0, %v334_v20, 0.0  ;;  %v539_v36 = vunpack.c.h.bf16 %v639_v17  ;;  %v658_v15 = vld [vmem:[%s745_s20 + $0x60] sm:$0xff]  }
  0x26   : > { %v371_v24 = vadd.f32 %v370_v14, %v369_v16  ;;  %v603_v39 = vunpack.c.h.bf16 %v654_v23  ;;  %v306_v40 = vsub.f32 %v535_v22, %v599_v25  ;;  %v337_v41 = vmul.f32 %v304_v26, %v304_v26  ;;  %v644_v23 = vld [vmem:[%s740_s17 + $0x68] sm:$0xff]  }
  0x27   : > { %v378_v42 = vsel %vm356_vm0, %v335_v27, 0.0  ;;  %v542_v43 = vunpack.c.l.bf16 %v640_v31  ;;  %v606_v46 = vunpack.c.l.bf16 %v655_v37  ;;  %v307_v47 = vsub.f32 %v538_v29, %v602_v32  ;;  %v659_v29 = vld [vmem:[%s745_s20 + $0x68] sm:$0xff]  }
  0x28   : > { %v373_v30 = vadd.f32 %v372_v21, %v371_v24  ;;  %v338_v48 = vmul.f32 %v305_v33, %v305_v33  ;;  %v380_v49 = vsel %vm356_vm0, %v336_v34, 0.0  ;;  %v543_v50 = vunpack.c.h.bf16 %v640_v31 }
  0x29   : > { %v607_v53 = vunpack.c.h.bf16 %v655_v37  ;;  %v308_v54 = vsub.f32 %v539_v36, %v603_v39  ;;  %v339_v55 = vmul.f32 %v306_v40, %v306_v40  ;;  %v382_v56 = vsel %vm356_vm0, %v337_v41, 0.0  ;;  %v645_v37 = vld [vmem:[%s740_s17 + $0x70] sm:$0xff]  }
  0x2a   : > { %v375_v38 = vadd.f32 %v374_v28, %v373_v30  ;;  %v546_v57 = vunpack.c.l.bf16 %v641_v45  ;;  %v610_v60 = vunpack.c.l.bf16 %v656_v51  ;;  %v309_v61 = vsub.f32 %v542_v43, %v606_v46  ;;  %v660_v43 = vld [vmem:[%s745_s20 + $0x70] sm:$0xff]  }
  0x2b   : > { %v340_v62 = vmul.f32 %v307_v47, %v307_v47  ;;  %v384_v63 = vsel %vm356_vm0, %v338_v48, 0.0  ;;  %v547_v0 = vunpack.c.h.bf16 %v641_v45  ;;  %v611_v3 = vunpack.c.h.bf16 %v656_v51  ;;  %v646_v51 = vld [vmem:[%s740_s17 + $0x78] sm:$0xff]  }
  0x2c   : > { %v377_v44 = vadd.f32 %v376_v35, %v375_v38  ;;  %v310_v4 = vsub.f32 %v543_v50, %v607_v53  ;;  %v341_v5 = vmul.f32 %v308_v54, %v308_v54  ;;  %v386_v6 = vsel %vm356_vm0, %v339_v55, 0.0 }
  0x2d   : > { %v550_v7 = vunpack.c.l.bf16 %v642_v59  ;;  %v614_v10 = vunpack.c.l.bf16 %v657_v1  ;;  %v311_v11 = vsub.f32 %v546_v57, %v610_v60  ;;  %v342_v12 = vmul.f32 %v309_v61, %v309_v61  ;;  %v661_v57 = vld [vmem:[%s745_s20 + $0x78] sm:$0xff]  }
  0x2e   : > { %v379_v52 = vadd.f32 %v378_v42, %v377_v44  ;;  %v388_v13 = vsel %vm356_vm0, %v340_v62, 0.0  ;;  %v551_v14 = vunpack.c.h.bf16 %v642_v59  ;;  %v615_v17 = vunpack.c.h.bf16 %v657_v1 }
  0x2f   : > { %v312_v18 = vsub.f32 %v547_v0, %v611_v3  ;;  %v343_v19 = vmul.f32 %v310_v4, %v310_v4  ;;  %v390_v20 = vsel %vm356_vm0, %v341_v5, 0.0  ;;  %v554_v21 = vunpack.c.l.bf16 %v643_v9 }
  0x30   : > { %v381_v58 = vadd.f32 %v380_v49, %v379_v52  ;;  %v618_v24 = vunpack.c.l.bf16 %v658_v15  ;;  %v313_v25 = vsub.f32 %v550_v7, %v614_v10  ;;  %v344_v26 = vmul.f32 %v311_v11, %v311_v11 }
  0x31   : > { %v392_v27 = vsel %vm356_vm0, %v342_v12, 0.0  ;;  %v555_v28 = vunpack.c.h.bf16 %v643_v9  ;;  %v619_v31 = vunpack.c.h.bf16 %v658_v15  ;;  %v314_v32 = vsub.f32 %v551_v14, %v615_v17 }
  0x32   : > { %v383_v2 = vadd.f32 %v382_v56, %v381_v58  ;;  %v345_v33 = vmul.f32 %v312_v18, %v312_v18  ;;  %v394_v34 = vsel %vm356_vm0, %v343_v19, 0.0  ;;  %v558_v35 = vunpack.c.l.bf16 %v644_v23 }
  0x33   : > { %v622_v38 = vunpack.c.l.bf16 %v659_v29  ;;  %v315_v39 = vsub.f32 %v554_v21, %v618_v24  ;;  %v346_v40 = vmul.f32 %v313_v25, %v313_v25  ;;  %v396_v41 = vsel %vm356_vm0, %v344_v26, 0.0 }
  0x34   : > { %v385_v8 = vadd.f32 %v384_v63, %v383_v2  ;;  %v559_v42 = vunpack.c.h.bf16 %v644_v23  ;;  %v623_v45 = vunpack.c.h.bf16 %v659_v29  ;;  %v316_v46 = vsub.f32 %v555_v28, %v619_v31 }
  0x35   : > { %v347_v47 = vmul.f32 %v314_v32, %v314_v32  ;;  %v398_v48 = vsel %vm356_vm0, %v345_v33, 0.0  ;;  %v562_v49 = vunpack.c.l.bf16 %v645_v37  ;;  %v626_v52 = vunpack.c.l.bf16 %v660_v43 }
  0x36   : > { %v387_v16 = vadd.f32 %v386_v6, %v385_v8  ;;  %v317_v53 = vsub.f32 %v558_v35, %v622_v38  ;;  %v348_v54 = vmul.f32 %v315_v39, %v315_v39  ;;  %v400_v55 = vsel %vm356_vm0, %v346_v40, 0.0 }
  0x37   : > { %v563_v56 = vunpack.c.h.bf16 %v645_v37  ;;  %v627_v59 = vunpack.c.h.bf16 %v660_v43  ;;  %v318_v60 = vsub.f32 %v559_v42, %v623_v45  ;;  %v349_v61 = vmul.f32 %v316_v46, %v316_v46 }
  0x38   : > { %v389_v22 = vadd.f32 %v388_v13, %v387_v16  ;;  %v402_v62 = vsel %vm356_vm0, %v347_v47, 0.0  ;;  %v566_v63 = vunpack.c.l.bf16 %v646_v51  ;;  %v630_v1 = vunpack.c.l.bf16 %v661_v57 }
  0x39   : > { %v319_v2 = vsub.f32 %v562_v49, %v626_v52  ;;  %v350_v3 = vmul.f32 %v317_v53, %v317_v53  ;;  %v404_v4 = vsel %vm356_vm0, %v348_v54, 0.0  ;;  %v567_v5 = vunpack.c.h.bf16 %v646_v51 }
  0x3a   : > { %v391_v30 = vadd.f32 %v390_v20, %v389_v22  ;;  %v631_v7 = vunpack.c.h.bf16 %v661_v57  ;;  %v320_v8 = vsub.f32 %v563_v56, %v627_v59  ;;  %v351_v9 = vmul.f32 %v318_v60, %v318_v60 }
  0x3b   : > { %v406_v10 = vsel %vm356_vm0, %v349_v61, 0.0  ;;  %v321_v12 = vsub.f32 %v566_v63, %v630_v1  ;;  %v352_v13 = vmul.f32 %v319_v2, %v319_v2  ;;  %v408_v14 = vsel %vm356_vm0, %v350_v3, 0.0 }
  0x3c   : > { %v393_v36 = vadd.f32 %v392_v27, %v391_v30  ;;  %v322_v16 = vsub.f32 %v567_v5, %v631_v7  ;;  %v353_v17 = vmul.f32 %v320_v8, %v320_v8  ;;  %v410_v18 = vsel %vm356_vm0, %v351_v9, 0.0 }
  0x3d   : > { %v354_v20 = vmul.f32 %v321_v12, %v321_v12  ;;  %v412_v21 = vsel %vm356_vm0, %v352_v13, 0.0 }
  0x3e   : > { %v395_v44 = vadd.f32 %v394_v34, %v393_v36  ;;  %v355_v23 = vmul.f32 %v322_v16, %v322_v16  ;;  %v414_v24 = vsel %vm356_vm0, %v353_v17, 0.0 }
  0x3f   : > { %v416_v26 = vsel %vm356_vm0, %v354_v20, 0.0 }
  0x40   : > { %v397_v50 = vadd.f32 %v396_v41, %v395_v44  ;;  %v418_v28 = vsel %vm356_vm0, %v355_v23, 0.0 }
  0x42   : > { %v399_v58 = vadd.f32 %v398_v48, %v397_v50 }
  0x44   : > { %v401_v0 = vadd.f32 %v400_v55, %v399_v58 }
  0x46   : > { %v403_v6 = vadd.f32 %v402_v62, %v401_v0 }
  0x48   : > { %v405_v11 = vadd.f32 %v404_v4, %v403_v6 }
  0x4a   : > { %v407_v15 = vadd.f32 %v406_v10, %v405_v11 }
  0x4c   : > { %v409_v19 = vadd.f32 %v408_v14, %v407_v15 }
  0x4e   : > { %v411_v22 = vadd.f32 %v410_v18, %v409_v19 }
  0x50   : > { %v413_v25 = vadd.f32 %v412_v21, %v411_v22 }
  0x52   : > { %v415_v27 = vadd.f32 %v414_v24, %v413_v25 }
  0x54   : > { %v417_v29 = vadd.f32 %v416_v26, %v415_v27 }
  0x56   : > { %v419_v30 = vadd.f32 %v418_v28, %v417_v29 }
  0x58   : > { %420 = vadd.xlane.f32.xlu0 %v419_v30 }
  0xe5   : > { %v421_v31 = vpop.xlane.xlu0 %420 }
  0xe6   : > { %v422_v32 = vrot.slane %v421_v31, 4 }
  0xe8   : > { %v423_v33 = vadd.f32 %v422_v32, %v421_v31 }
  0xea   : > { %v424_v34 = vrot.slane %v423_v33, 2 }
  0xec   : > { %v425_v35 = vadd.f32 %v424_v34, %v423_v33 }
  0xee   : > { %v426_v36 = vrot.slane %v425_v35, 1 }
  0xf0   : > { %v427_v37 = vadd.f32 %v426_v36, %v425_v35 }
  0xf2   : > { %662 = vpush %v427_v37 }
 0x123   : > { %s663_s23 = spop %662 }
 0x124   : > { %s429_s24 = sadd.f32 %s663_s23, %s323_s22 }
 0x126   : > { %431 = sst [smem:[#allocation2]] %s429_s24 }
 0x127   : > { %694 = shalt.err (!%p691_p11)
}
 0x128   : > { %s708_s4 = smov [#allocation2]  }
 0x129   : > { %667 = dma.smem_to_hbm (%p671_p6), %s708_s4, 16, %s830_s2, [#allocation3]  }
 0x12a   : > { %700 = dma.done.wait (%p671_p6), [#allocation3], 16  }
 0x12b   : > { %702 = vsyncadd (%p671_p6), [#allocation3], 4294967280 }
 0x12c   : > { %445 = sfence }
 0x12d PF: > { %s13_s9 = sadd.s32 1, %s705_s9  }
 0x12e   : > { %p10_p12 = scmp.ge.s32.totalorder %s13_s9, 4  }
 0x130   :  { %12 = sbr.rel (!%p10_p12) target bundleno = 1 (0x1), region = 64 }
 0x137   :  { %451 = vsyncpa [#allocation3], 1 }
 0x138   :  { %453 = vsyncpa [#allocation3 + $0x1], 1 }

// kernel: vgg_perceptual_loss.18
= control target key start
LH: loop header
LB: loop body
LE: loop exit
PB: predicated region body
PF: predicated region fallthrough
CT: control target
= control target key end

     0   :  { %7 = vsyncpa [#allocation3], 0  ;;  %s403_s9 = smov 0   ;;  %s439_s0 = inlined_call_operand.vmem [shape: bf16[4,8,8,128], index: 0, kind: input, shape index: {}, may-alias: {0,1}]   ;;  %s440_s1 = inlined_call_operand.vmem [shape: bf16[4,8,8,128], index: 1, kind: input, shape index: {}, may-alias: {0,1}]   ;;  %s441_s2 = inlined_call_operand.hbm [shape: f32[1,1], index: 2, kind: output, shape index: {}]  }
   0x1 LB: > { %s409_s10 = sadd.s32 4294967295, %s384_s9   ;;  %p291_p0 = scmp.ge.s32.totalorder %s384_s9, 1  ;;  %s384_s9 = sphi %s403_s9, %s13_s9  }
   0x2   : > { %p122_p1 = scmp.lt.s32.totalorder %s384_s9, 3 }
   0x4   : > { %p123_p2 = pnand %p291_p0, %p122_p1 }
   0x5   : > { %p145_p3 = scmp.lt.s32.totalorder (!%p123_p2), %s409_s10, 3  ;;  %s150_s11 = sadd.s32 (!%p123_p2), 2, %s409_s10 }
   0x6   : > { %126 = sbr.rel (%p123_p2) target bundleno = 252 (0xfc), region = 28  ;;  %p151_p4 = scmp.lt.s32.totalorder (!%p123_p2), %s150_s11, 3 }
   0x7   : > { %p349_p5 = scmp.eq.s32.totalorder (!%p123_p2), %s409_s10, 0  ;;  %s386_s21 = smov (!%p123_p2), 0.0  }
   0x8   : > { %p350_p6 = scmp.eq.s32.totalorder (!%p123_p2), %s409_s10, 1  ;;  %s362_s27 = scalar_lea.hbm (!%p123_p2), %s441_s2, 16 }
   0x9   : > { %p363_p7 = scmp.ne.s32.totalorder (!%p123_p2), %s441_s2, %s362_s27  ;;  %p368_p10 = scmp.lt.u32.totalorder (!%p123_p2), %s362_s27, %s441_s2 }
   0xb   : > { %p364_p8 = pnand (!%p123_p2), %p363_p7, %p350_p6 }
   0xd   : > { %s146_s12 = scalar_select %p145_p3, %s409_s10, 3 }
   0xe   : > { %s443_s11 = smov (!%p151_p4, %s150_s11), 3  ;;  %344 = sst [smem:[#allocation2]] (%p349_p5), %s386_s21 }
   0xf   : > { %s301_s13 = sshll.u32 %s146_s12, 5  ;;  %s302_s17 = sshll.u32 %s443_s11, 5 }
  0x10   : > { %s149_s16 = scalar_lea.vmem %s439_s0, %s301_s13  ;;  %s155_s20 = scalar_lea.vmem %s440_s1, %s302_s17 }
  0x11   : > { %v304_v0 = vld [vmem:[%s149_s16] sm:$0xff]   ;;  %v335_v1 = vld [vmem:[%s149_s16 + $0x8] sm:$0xff]   ;;  %v336_v2 = vld [vmem:[%s149_s16 + $0x10] sm:$0xff]   ;;  %s203_s22 = sld [smem:[#allocation2]]  ;;  %p365_p9 = pneg %p364_p8 }
  0x12   : > { %v305_v3 = vunpack.c.l.bf16 %v304_v0  ;;  %v306_v4 = vunpack.c.h.bf16 %v304_v0  ;;  %v309_v5 = vunpack.c.l.bf16 %v335_v1  ;;  %v310_v6 = vunpack.c.h.bf16 %v335_v1  ;;  %v320_v7 = vld [vmem:[%s155_s20] sm:$0xff]   ;;  %v338_v8 = vld [vmem:[%s155_s20 + $0x8] sm:$0xff]   ;;  %v339_v10 = vld [vmem:[%s155_s20 + $0x10] sm:$0xff]  }
  0x13   : > { %v313_v9 = vunpack.c.l.bf16 %v336_v2  ;;  %v337_v11 = vld [vmem:[%s149_s16 + $0x18] sm:$0xff]   ;;  %v321_v12 = vunpack.c.l.bf16 %v320_v7  ;;  %v322_v13 = vunpack.c.h.bf16 %v320_v7  ;;  %v325_v14 = vunpack.c.l.bf16 %v338_v8  ;;  %p370_p11 = pnand %p368_p10, %p365_p9 }
  0x14   : > { %v326_v15 = vunpack.c.h.bf16 %v338_v8  ;;  %v340_v16 = vld [vmem:[%s155_s20 + $0x18] sm:$0xff]   ;;  %v314_v17 = vunpack.c.h.bf16 %v336_v2  ;;  %v329_v18 = vunpack.c.l.bf16 %v339_v10  ;;  %v330_v19 = vunpack.c.h.bf16 %v339_v10 }
  0x15   : > { %v195_v20 = vsub.f32 %v305_v3, %v321_v12  ;;  %v196_v21 = vsub.f32 %v306_v4, %v322_v13  ;;  %v197_v22 = vsub.f32 %v309_v5, %v325_v14  ;;  %v317_v24 = vunpack.c.l.bf16 %v337_v11 }
  0x16   : > { %v198_v23 = vsub.f32 %v310_v6, %v326_v15  ;;  %v333_v25 = vunpack.c.l.bf16 %v340_v16  ;;  %v199_v26 = vsub.f32 %v313_v9, %v329_v18  ;;  %v318_v30 = vunpack.c.h.bf16 %v337_v11 }
  0x17   : > { %v204_v27 = vmul.f32 %v195_v20, %v195_v20  ;;  %v205_v28 = vmul.f32 %v196_v21, %v196_v21  ;;  %v206_v29 = vmul.f32 %v197_v22, %v197_v22  ;;  %v334_v31 = vunpack.c.h.bf16 %v340_v16 }
  0x18   : > { %v200_v32 = vsub.f32 %v314_v17, %v330_v19  ;;  %v207_v33 = vmul.f32 %v198_v23, %v198_v23  ;;  %v201_v35 = vsub.f32 %v317_v24, %v333_v25  ;;  %v208_v36 = vmul.f32 %v199_v26, %v199_v26 }
  0x19   : > { %v212_v34 = vadd.f32 %v205_v28, %v204_v27  ;;  %v202_v38 = vsub.f32 %v318_v30, %v334_v31 }
  0x1a   : > { %v209_v39 = vmul.f32 %v200_v32, %v200_v32  ;;  %v210_v41 = vmul.f32 %v201_v35, %v201_v35 }
  0x1b   : > { %v213_v37 = vadd.f32 %v212_v34, %v206_v29  ;;  %v211_v43 = vmul.f32 %v202_v38, %v202_v38 }
  0x1d   : > { %v214_v40 = vadd.f32 %v213_v37, %v207_v33 }
  0x1f   : > { %v215_v42 = vadd.f32 %v214_v40, %v208_v36 }
  0x21   : > { %v216_v44 = vadd.f32 %v215_v42, %v209_v39 }
  0x23   : > { %v217_v45 = vadd.f32 %v216_v44, %v210_v41 }
  0x25   : > { %v218_v46 = vadd.f32 %v217_v45, %v211_v43 }
  0x27   : > { %219 = vadd.xlane.f32.xlu0 %v218_v46 }
  0xb4   : > { %v220_v47 = vpop.xlane.xlu0 %219 }
  0xb5   : > { %v221_v48 = vrot.slane %v220_v47, 4 }
  0xb7   : > { %v222_v49 = vadd.f32 %v221_v48, %v220_v47 }
  0xb9   : > { %v223_v50 = vrot.slane %v222_v49, 2 }
  0xbb   : > { %v224_v51 = vadd.f32 %v223_v50, %v222_v49 }
  0xbd   : > { %v225_v52 = vrot.slane %v224_v51, 1 }
  0xbf   : > { %v226_v53 = vadd.f32 %v225_v52, %v224_v51 }
  0xc1   : > { %341 = vpush %v226_v53 }
  0xf2   : > { %s342_s23 = spop %341 }
  0xf3   : > { %s228_s24 = sadd.f32 %s342_s23, %s203_s22 }
  0xf5   : > { %230 = sst [smem:[#allocation2]] %s228_s24 }
  0xf6   : > { %373 = shalt.err (!%p370_p11)
}
  0xf7   : > { %s387_s4 = smov [#allocation2]  }
  0xf8   : > { %346 = dma.smem_to_hbm (%p350_p6), %s387_s4, 16, %s441_s2, [#allocation3]  }
  0xf9   : > { %379 = dma.done.wait (%p350_p6), [#allocation3], 16  }
  0xfa   : > { %381 = vsyncadd (%p350_p6), [#allocation3], 4294967280 }
  0xfb   : > { %244 = sfence }
  0xfc PF: > { %s13_s9 = sadd.s32 1, %s384_s9  }
  0xfd   : > { %p10_p12 = scmp.ge.s32.totalorder %s13_s9, 4  }
  0xff   :  { %12 = sbr.rel (!%p10_p12) target bundleno = 1 (0x1), region = 64 }
 0x106   :  { %250 = vsyncpa [#allocation3], 1 }
 0x107   :  { %252 = vsyncpa [#allocation3 + $0x1], 1 }

// kernel: vgg_perceptual_loss.19
= control target key start
LH: loop header
LB: loop body
LE: loop exit
PB: predicated region body
PF: predicated region fallthrough
CT: control target
= control target key end

     0   :  { %s369_s6 = smov 0   ;;  %s371_s7 = smov 0   ;;  %s402_s0 = inlined_call_operand.vmem [shape: bf16[4,4,2,4,256], index: 0, kind: input, shape index: {}]   ;;  %s403_s1 = inlined_call_operand.vmem [shape: bf16[4,4,4,128], index: 1, kind: output, shape index: {}]  }
   0x1   :  { %s373_s8 = smov 0  }
   0x2 LB: > { %s23_s9 = sadd.s32 1, %s353_s7  ;;  %p298_p0 = scmp.ge.s32.totalorder %s357_s8, 1  ;;  %s357_s8 = sphi %s373_s8, %s11_s8   ;;  %s353_s7 = sphi %s371_s7, %s405_s7   ;;  %s349_s6 = sphi %s369_s6, %s404_s6  }
   0x3   : > { %p25_p1 = scmp.ge.s32.totalorder %s23_s9, 4  ;;  %p109_p2 = scmp.lt.s32.totalorder %s357_s8, 5 }
   0x5   : > { %s407_s9 = smov (%p25_p1, %s23_s9), 0  ;;  %p110_p3 = pnand %p298_p0, %p109_p2 }
   0x6   : > { %p139_p4 = scmp.lt.s32.totalorder (!%p110_p3), %s349_s6, 3 }
   0x7   : > { %113 = sbr.rel (%p110_p3) target bundleno = 30 (0x1e), region = 24 }
   0xe   : > { %s409_s6 = smov (!%p139_p4, %s349_s6), 3 }
   0xf   : > { %s309_s10 = sshll.u32 %s409_s6, 5  ;;  %s310_s14 = sshll.u32 %s409_s6, 3 }
  0x10   : > { %s147_s13 = scalar_lea.vmem %s402_s0, %s309_s10  ;;  %s157_s17 = scalar_lea.vmem %s403_s1, %s310_s14 }
  0x11   : > { %v159_v0 = vld [vmem:[%s147_s13] sm:$0xff]   ;;  %v160_v1 = vld [vmem:[%s147_s13 + $0x8] sm:$0xff]   ;;  %v161_v2 = vld [vmem:[%s147_s13 + $0x10] sm:$0xff]  }
  0x12   : > { %v163_v3 = vunpack.c.l.bf16 %v159_v0  ;;  %v172_v4 = vunpack.c.h.bf16 %v159_v0  ;;  %v164_v5 = vunpack.c.l.bf16 %v160_v1  ;;  %v173_v6 = vunpack.c.h.bf16 %v160_v1  ;;  %v162_v7 = vld [vmem:[%s147_s13 + $0x18] sm:$0xff]  }
  0x13   : > { %v165_v8 = vunpack.c.l.bf16 %v161_v2  ;;  %v174_v9 = vunpack.c.h.bf16 %v161_v2  ;;  %v166_v10 = vunpack.c.l.bf16 %v162_v7  ;;  %v175_v11 = vunpack.c.h.bf16 %v162_v7 }
  0x14   : > { %v176_v12 = vmax.f32 %v163_v3, %v172_v4  ;;  %v177_v13 = vmax.f32 %v164_v5, %v173_v6 }
  0x15   : > { %v178_v14 = vmax.f32 %v165_v8, %v174_v9  ;;  %v179_v15 = vmax.f32 %v166_v10, %v175_v11 }
  0x16   : > { %v184_v16 = vrot.slane %v176_v12, 4  ;;  %v185_v17 = vrot.slane %v177_v13, 4 }
  0x17   : > { %v186_v18 = vrot.slane %v178_v14, 4  ;;  %v187_v19 = vrot.slane %v179_v15, 4 }
  0x18   : > { %v192_v20 = vmax.f32 %v176_v12, %v184_v16  ;;  %v193_v21 = vmax.f32 %v177_v13, %v185_v17 }
  0x19   : > { %v194_v22 = vmax.f32 %v178_v14, %v186_v18  ;;  %v195_v23 = vmax.f32 %v179_v15, %v187_v19 }
  0x1a   : > { %v196_v24 = vpack.c.bf16 %v192_v20, %v192_v20  ;;  %v197_v25 = vpack.c.bf16 %v193_v21, %v193_v21 }
  0x1b   : > { %v198_v26 = vpack.c.bf16 %v194_v22, %v194_v22  ;;  %v199_v27 = vpack.c.bf16 %v195_v23, %v195_v23 }
  0x1c   : > { %200 = vst [vmem:[%s157_s17] sm:$0x3] %v196_v24  ;;  %201 = vst [vmem:[%s157_s17 + $0x2] sm:$0x3] %v197_v25 }
  0x1d   : > { %202 = vst [vmem:[%s157_s17 + $0x4] sm:$0x3] %v198_v26  ;;  %203 = vst [vmem:[%s157_s17 + $0x6] sm:$0x3] %v199_v27 }
  0x1e PF: > { %s11_s8 = sadd.s32 1, %s357_s8   ;;  %s404_s6 = smov %s353_s7 }
  0x1f   : > { %p8_p5 = scmp.ge.s32.totalorder %s11_s8, 6   ;;  %s405_s7 = smov %s407_s9 }
  0x21   :  { %10 = sbr.rel (!%p8_p5) target bundleno = 2 (0x2), region = 55 }

// kernel: vgg_perceptual_loss.17
= control target key start
LH: loop header
LB: loop body
LE: loop exit
PB: predicated region body
PF: predicated region fallthrough
CT: control target
= control target key end

     0   :  { %s2397_s12 = smov 0   ;;  %s2933_s0 = inlined_call_operand.vmem [shape: bf16[4,10,10,128], index: 0, kind: input, shape index: {}]   ;;  %s2934_s1 = inlined_call_operand.vmem [shape: bf16[1152,128], index: 1, kind: input, shape index: {}]   ;;  %s2935_s2 = inlined_call_operand.vmem [shape: f32[1,128], index: 2, kind: input, shape index: {}]   ;;  %s2936_s3 = inlined_call_operand.vmem [shape: bf16[4,8,8,128], index: 3, kind: output, shape index: {}]  }
   0x1 LB: > { %s1761_s13 = sadd.s32 4294967295, %s2375_s12   ;;  %p1765_p0 = scmp.ge.s32.totalorder %s2375_s12, 1  ;;  %s2375_s12 = sphi %s2397_s12, %s13_s12  }
   0x2   : > { %p137_p1 = scmp.lt.s32.totalorder %s2375_s12, 5 }
   0x4   : > { %p138_p2 = pnand %p1765_p0, %p137_p1 }
   0x5   : > { %v2237_v0 = vld [vmem:[%s2934_s1 + $0x40] sm:$0xff] (!%p138_p2)   ;;  %v2241_v4 = vld [vmem:[%s2934_s1 + $0x48] sm:$0xff] (!%p138_p2)   ;;  %v2245_v8 = vld [vmem:[%s2934_s1 + $0x50] sm:$0xff] (!%p138_p2)   ;;  %p161_p3 = scmp.lt.s32.totalorder (!%p138_p2), %s1761_s13, 3 }
   0x6   : > { %141 = sbr.rel (%p138_p2) target bundleno = 328 (0x148), region = 32  ;;  %v2238_v1 = vld [vmem:[%s2934_s1 + $0xc0] sm:$0xff] (!%p138_p2)   ;;  %2016 = vmatprep.subr.bf16.mxu0 (!%p138_p2), %v2237_v0  ;;  %v2242_v5 = vld [vmem:[%s2934_s1 + $0xc8] sm:$0xff] (!%p138_p2)   ;;  %v2246_v9 = vld [vmem:[%s2934_s1 + $0xd0] sm:$0xff] (!%p138_p2)  }
   0x7   : > { %v2239_v2 = vld [vmem:[%s2934_s1] sm:$0xff] (!%p138_p2)   ;;  %2056 = vmatprep.subr.bf16.mxu1 (!%p138_p2), %v2238_v1  ;;  %v2243_v6 = vld [vmem:[%s2934_s1 + $0x8] sm:$0xff] (!%p138_p2)   ;;  %v2247_v10 = vld [vmem:[%s2934_s1 + $0x10] sm:$0xff] (!%p138_p2)  }
   0x8   : > { %v2240_v3 = vld [vmem:[%s2934_s1 + $0x80] sm:$0xff] (!%p138_p2)   ;;  %2017 = vmatpush3.bf16.msra.mxu0 (!%p138_p2), %v2239_v2  ;;  %v2244_v7 = vld [vmem:[%s2934_s1 + $0x88] sm:$0xff] (!%p138_p2)   ;;  %v2248_v11 = vld [vmem:[%s2934_s1 + $0x90] sm:$0xff] (!%p138_p2)  }
   0x9   : > { %2057 = vmatpush3.bf16.msra.mxu1 (!%p138_p2), %v2240_v3  ;;  %2018 = vmatprep.subr.bf16.mxu0 (!%p138_p2), %v2241_v4  ;;  %v2249_v12 = vld [vmem:[%s2934_s1 + $0x58] sm:$0xff] (!%p138_p2)   ;;  %v2253_v16 = vld [vmem:[%s2934_s1 + $0x60] sm:$0xff] (!%p138_p2)   ;;  %v2257_v20 = vld [vmem:[%s2934_s1 + $0x68] sm:$0xff] (!%p138_p2)  }
   0xa   : > { %2058 = vmatprep.subr.bf16.mxu1 (!%p138_p2), %v2242_v5  ;;  %v2250_v13 = vld [vmem:[%s2934_s1 + $0xd8] sm:$0xff] (!%p138_p2)   ;;  %v2254_v17 = vld [vmem:[%s2934_s1 + $0xe0] sm:$0xff] (!%p138_p2)   ;;  %v2258_v21 = vld [vmem:[%s2934_s1 + $0xe8] sm:$0xff] (!%p138_p2)  }
   0xb   : > { %v2251_v14 = vld [vmem:[%s2934_s1 + $0x18] sm:$0xff] (!%p138_p2)   ;;  %v2255_v18 = vld [vmem:[%s2934_s1 + $0x20] sm:$0xff] (!%p138_p2)   ;;  %v2259_v22 = vld [vmem:[%s2934_s1 + $0x28] sm:$0xff] (!%p138_p2)  }
   0xc   : > { %2019 = vmatpush3.bf16.msra.mxu0 (!%p138_p2), %v2243_v6  ;;  %v2252_v15 = vld [vmem:[%s2934_s1 + $0x98] sm:$0xff] (!%p138_p2)   ;;  %v2256_v19 = vld [vmem:[%s2934_s1 + $0xa0] sm:$0xff] (!%p138_p2)   ;;  %v2260_v23 = vld [vmem:[%s2934_s1 + $0xa8] sm:$0xff] (!%p138_p2)  }
   0xd   : > { %2059 = vmatpush3.bf16.msra.mxu1 %v2244_v7  ;;  %2020 = vmatprep.subr.bf16.mxu0 %v2245_v8  ;;  %s2938_s13 = smov (!%p161_p3, %s1761_s13), 3  ;;  %v2261_v24 = vld [vmem:[%s2934_s1 + $0x70] sm:$0xff]   ;;  %v2265_v28 = vld [vmem:[%s2934_s1 + $0x78] sm:$0xff]   ;;  %v2279_v49 = vld [vmem:[%s2934_s1 + $0x140] sm:$0xff]  }
   0xe   : > { %2060 = vmatprep.subr.bf16.mxu1 %v2246_v9  ;;  %v2262_v25 = vld [vmem:[%s2934_s1 + $0xf0] sm:$0xff]   ;;  %s2228_s16 = smul.u32 80, %s2938_s13  ;;  %v2266_v29 = vld [vmem:[%s2934_s1 + $0xf8] sm:$0xff]   ;;  %v2280_v50 = vld [vmem:[%s2934_s1 + $0x1c0] sm:$0xff]  }
   0xf   : > { %v2263_v26 = vld [vmem:[%s2934_s1 + $0x30] sm:$0xff]   ;;  %v2267_v30 = vld [vmem:[%s2934_s1 + $0x38] sm:$0xff]   ;;  %v2281_v55 = vld [vmem:[%s2934_s1 + $0x100] sm:$0xff]  }
  0x10   : > { %2021 = vmatpush3.bf16.msra.mxu0 %v2247_v10  ;;  %v2264_v27 = vld [vmem:[%s2934_s1 + $0xb0] sm:$0xff]   ;;  %s2505_s27 = scalar_lea.vmem %s2933_s0, %s2228_s16  ;;  %v2268_v31 = vld [vmem:[%s2934_s1 + $0xb8] sm:$0xff]   ;;  %v2282_v56 = vld [vmem:[%s2934_s1 + $0x180] sm:$0xff]   ;;  %s1984_s16 = sshll.u32 %s2938_s13, 5 }
  0x11   : > { %2061 = vmatpush3.bf16.msra.mxu1 %v2248_v11  ;;  %2022 = vmatprep.subr.bf16.mxu0 %v2249_v12  ;;  %v317_v32 = vld [vmem:[%s2505_s27] sm:$0xf]  ;;  %v318_v33 = vld [vmem:[%s2505_s27 + $0x8] sm:$0xf]  ;;  %v325_v34 = vld [vmem:[%s2505_s27 + $0x4] sm:$0x1]  ;;  %s170_s19 = scalar_lea.vmem %s2936_s3, %s1984_s16 }
  0x12   : > { %2062 = vmatprep.subr.bf16.mxu1 %v2250_v13  ;;  %v326_v35 = vld [vmem:[%s2505_s27 + $0xc] sm:$0x1]  ;;  %v1817_v36 = vcombine.low %v317_v32, %v325_v34  ;;  %v2518_v37 = vld [vmem:[%s2505_s27 + $0x8] sm:$0xf]  ;;  %v2521_v38 = vld [vmem:[%s2505_s27 + $0x10] sm:$0xf]  ;;  %v1866_v57 = vcombine.low %v317_v32, %v318_v33 }
  0x13   : > { %v1818_v39 = vcombine.low %v318_v33, %v326_v35  ;;  %v1869_v40 = vcombine.low %v2518_v37, %v2521_v38  ;;  %v333_v43 = vld [vmem:[%s2505_s27] sm:$0xe]  ;;  %v334_v46 = vld [vmem:[%s2505_s27 + $0x8] sm:$0xe]  ;;  %v319_v2 = vld [vmem:[%s2505_s27 + $0x10] sm:$0xf] }
  0x14   : > { %2023 = vmatpush3.bf16.msra.mxu0 %v2251_v14  ;;  %v432_v41 = vshrl.u32 %v1817_v36, 16  ;;  %v434_v42 = vshll.u32 %v1817_v36, 16  ;;  %v1825_v52 = vcombine.low %v333_v43, %v325_v34  ;;  %v1826_v53 = vcombine.low %v334_v46, %v326_v35  ;;  %v2283_v61 = vld [vmem:[%s2934_s1 + $0x148] sm:$0xff]   ;;  %v320_v3 = vld [vmem:[%s2505_s27 + $0x18] sm:$0xf] }
  0x15   : > { %2063 = vmatpush3.bf16.msra.mxu1 %v2252_v15  ;;  %2024 = vmatprep.subr.bf16.mxu0 %v2253_v16  ;;  %v439_v44 = vshrl.u32 %v1818_v39, 16  ;;  %v441_v45 = vshll.u32 %v1818_v39, 16  ;;  %v2284_v63 = vld [vmem:[%s2934_s1 + $0x1c8] sm:$0xff]   ;;  %v327_v4 = vld [vmem:[%s2505_s27 + $0x14] sm:$0x1]  ;;  %v1875_v35 = vcombine.low %v319_v2, %v320_v3  ;;  %v2299_v36 = vld [vmem:[%s2934_s1 + $0x158] sm:$0xff]  }
  0x16   : > { %2064 = vmatprep.subr.bf16.mxu1 %v2254_v17  ;;  %1430 = vmatprep.mubr.bf16.mxu1 %v1869_v40  ;;  %v436_v47 = vrot.slane %v434_v42, 1  ;;  %v511_v58 = vrot.slane %v1825_v52, 1  ;;  %v512_v59 = vrot.slane %v1826_v53, 1  ;;  %v2285_v0 = vld [vmem:[%s2934_s1 + $0x108] sm:$0xff]   ;;  %v328_v5 = vld [vmem:[%s2505_s27 + $0x1c] sm:$0x1]  ;;  %v1819_v6 = vcombine.low %v319_v2, %v327_v4 }
  0x17   : > { %v443_v48 = vrot.slane %v441_v45, 1  ;;  %v2286_v1 = vld [vmem:[%s2934_s1 + $0x188] sm:$0xff]   ;;  %v2556_v7 = vld [vmem:[%s2505_s27 + $0x18] sm:$0xf]  ;;  %v2559_v8 = vld [vmem:[%s2505_s27 + $0x20] sm:$0xf]  ;;  %v1820_v9 = vcombine.low %v320_v3, %v328_v5 }
  0x18   : > { %2025 = vmatpush3.bf16.msra.mxu0 %v2255_v18  ;;  %v437_v51 = vor.u32 %v436_v47, %v432_v41  ;;  %v1868_v62 = vcombine.low %v511_v58, %v512_v59  ;;  %v1878_v10 = vcombine.low %v2556_v7, %v2559_v8  ;;  %v335_v11 = vld [vmem:[%s2505_s27 + $0x10] sm:$0xe]  ;;  %v2565_v12 = vld [vmem:[%s2505_s27 + $0xc] sm:$0x1]  ;;  %v446_v13 = vshrl.u32 %v1819_v6, 16  ;;  %v2301_v42 = vld [vmem:[%s2934_s1 + $0x118] sm:$0xff]  }
  0x19   : > { %2065 = vmatpush3.bf16.msra.mxu1 %v2256_v19  ;;  %2026 = vmatprep.subr.bf16.mxu0 %v2257_v20  ;;  %v444_v54 = vor.u32 %v443_v48, %v439_v44  ;;  %v448_v14 = vshll.u32 %v1819_v6, 16  ;;  %v336_v15 = vld [vmem:[%s2505_s27 + $0x18] sm:$0xe]  ;;  %v453_v16 = vshrl.u32 %v1820_v9, 16  ;;  %v455_v17 = vshll.u32 %v1820_v9, 16  ;;  %v2295_v20 = vld [vmem:[%s2934_s1 + $0x150] sm:$0xff]  }
  0x1a   : > { %2066 = vmatprep.subr.bf16.mxu1 %v2258_v21  ;;  %v1827_v18 = vcombine.low %v335_v11, %v327_v4  ;;  %v1828_v19 = vcombine.low %v336_v15, %v328_v5  ;;  %v2296_v21 = vld [vmem:[%s2934_s1 + $0x1d0] sm:$0xff]   ;;  %v2585_v32 = vcombine.low %v2518_v37, %v2565_v12  ;;  %v2300_v37 = vld [vmem:[%s2934_s1 + $0x1d8] sm:$0xff]   ;;  %v321_v44 = vld [vmem:[%s2505_s27 + $0x20] sm:$0xf] }
  0x1b   : > { %v1867_v60 = vcombine.low %v437_v51, %v444_v54  ;;  %v2302_v43 = vld [vmem:[%s2934_s1 + $0x198] sm:$0xff]   ;;  %v322_v45 = vld [vmem:[%s2505_s27 + $0x28] sm:$0xf]  ;;  %v329_v48 = vld [vmem:[%s2505_s27 + $0x24] sm:$0x1] }
  0x1c   : > { %2027 = vmatpush3.bf16.msra.mxu0 %v2259_v22  ;;  %v1778_v22 = vld [vmem:[%s2505_s27 + $0x14] sm:$0x1]  ;;  %v560_v41 = vshrl.u32 %v2585_v32, 16  ;;  %v2615_v53 = vld [vmem:[%s2505_s27 + $0x1c] sm:$0x1]  ;;  %v1821_v54 = vcombine.low %v321_v44, %v329_v48  ;;  %v2311_v5 = vld [vmem:[%s2934_s1 + $0x160] sm:$0xff]  }
  0x1d   : > { %2067 = vmatpush3.bf16.msra.mxu1 %v2260_v23  ;;  %2028 = vmatprep.subr.bf16.mxu0 %v2261_v24  ;;  %v450_v23 = vrot.slane %v448_v14, 1  ;;  %v2297_v24 = vld [vmem:[%s2934_s1 + $0x110] sm:$0xff]   ;;  %v2591_v39 = vcombine.low %v2521_v38, %v1778_v22  ;;  %v562_v38 = vshll.u32 %v2585_v32, 16  ;;  %v337_v59 = vld [vmem:[%s2505_s27 + $0x20] sm:$0xe]  ;;  %v2639_v9 = vcombine.low %v2556_v7, %v2615_v53 }
  0x1e   : > { %2068 = vmatprep.subr.bf16.mxu1 %v2262_v25  ;;  %1365 = vmatprep.mubr.bf16.mxu0 %v1867_v60  ;;  %v457_v25 = vrot.slane %v455_v17, 1  ;;  %v338_v60 = vld [vmem:[%s2505_s27 + $0x28] sm:$0xe]  ;;  %v1829_v3 = vcombine.low %v337_v59, %v329_v48  ;;  %v2312_v6 = vld [vmem:[%s2934_s1 + $0x1e0] sm:$0xff]   ;;  %v2758_v32 = vld [vmem:[%s2505_s27 + $0x1c] sm:$0x1] }
  0x1f   : > { %v567_v51 = vshrl.u32 %v2591_v39, 16  ;;  %v569_v52 = vshll.u32 %v2591_v39, 16  ;;  %v2313_v14 = vld [vmem:[%s2934_s1 + $0x120] sm:$0xff]  }
  0x20   : > { %2029 = vmatpush3.bf16.msra.mxu0 %v2263_v26  ;;  %v513_v26 = vrot.slane %v1827_v18, 1  ;;  %v458_v33 = vor.u32 %v457_v25, %v453_v16  ;;  %v2314_v15 = vld [vmem:[%s2934_s1 + $0x1a0] sm:$0xff]   ;;  %v2651_v18 = vrot.slane %v562_v38, 1  ;;  %v2685_v38 = vld [vmem:[%s2505_s27 + $0x34] sm:$0x1] }
  0x21   : > { %2069 = vmatpush3.bf16.msra.mxu1 %v2264_v27  ;;  %2030 = vmatprep.subr.bf16.mxu0 %v2265_v28  ;;  %v514_v27 = vrot.slane %v1828_v19, 1  ;;  %v2298_v28 = vld [vmem:[%s2934_s1 + $0x190] sm:$0xff]   ;;  %v1884_v19 = vcombine.low %v321_v44, %v322_v45  ;;  %v2663_v25 = vrot.slane %v569_v52, 1 }
  0x22   : > { %2070 = vmatprep.subr.bf16.mxu1 %v2266_v29  ;;  %v451_v29 = vor.u32 %v450_v23, %v446_v13  ;;  %v2658_v23 = vld [vmem:[%s2505_s27 + $0x2c] sm:$0x1] }
  0x23   : > { %v1877_v34 = vcombine.low %v513_v26, %v514_v27  ;;  %v2317_v26 = vld [vmem:[%s2934_s1 + $0x128] sm:$0xff]  }
  0x24   : > { %2031 = vmatpush3.bf16.msra.mxu0 %v2267_v30  ;;  %v1785_v30 = vld [vmem:[%s2505_s27 + $0x8] sm:$0xe]  ;;  %v1876_v40 = vcombine.low %v451_v29, %v458_v33  ;;  %v2673_v29 = vld [vmem:[%s2505_s27 + $0x30] sm:$0xf]  ;;  %v332_v33 = vld [vmem:[%s2505_s27 + $0x3c] sm:$0x1] }
  0x25   : > { %2071 = vmatpush3.bf16.msra.mxu1 %v2268_v31  ;;  %2096 = vmatprep.subr.bf16.mxu0 %v2279_v49  ;;  %v1786_v31 = vld [vmem:[%s2505_s27 + $0x10] sm:$0xe]  ;;  %v1841_v46 = vcombine.low %v1785_v30, %v2565_v12  ;;  %v330_v49 = vld [vmem:[%s2505_s27 + $0x2c] sm:$0x1]  ;;  %v515_v12 = vrot.slane %v1829_v3, 1 }
  0x26   : > { %2136 = vmatprep.subr.bf16.mxu1 %v2280_v50  ;;  %v1842_v47 = vcombine.low %v1786_v31, %v1778_v22  ;;  %v2610_v50 = vld [vmem:[%s2505_s27 + $0x28] sm:$0xf]  ;;  %v1830_v4 = vcombine.low %v338_v60, %v330_v49  ;;  %v576_v22 = vshll.u32 %v2639_v9, 16  ;;  %v324_v30 = vld [vmem:[%s2505_s27 + $0x38] sm:$0xf] }
  0x27   : > { %1366 = vmatmul.mubr.bf16.vlgmr.msra.gmra.mrb[0].mxu0 %v1866_v57  ;;  %v2621_v57 = vld [vmem:[%s2505_s27 + $0x24] sm:$0x1]  ;;  %v331_v31 = vld [vmem:[%s2505_s27 + $0x34] sm:$0x1]  ;;  %v2709_v3 = vld [vmem:[%s2505_s27 + $0x3c] sm:$0x1] }
  0x28   : > { %1431 = vmatmul.mubr.bf16.vlgmr.msra.gmra.mrb[0].mxu1 %v1868_v62  ;;  %2097 = vmatpush3.bf16.msra.mxu0 %v2281_v55  ;;  %v1822_v55 = vcombine.low %v322_v45, %v330_v49  ;;  %v462_v62 = vshll.u32 %v1821_v54, 16  ;;  %v2629_v2 = vrot.slane %v1842_v47, 1  ;;  %v516_v13 = vrot.slane %v1830_v4, 1  ;;  %v339_v45 = vld [vmem:[%s2505_s27 + $0x30] sm:$0xe] }
  0x29   : > { %2137 = vmatpush3.bf16.msra.mxu1 %v2282_v56  ;;  %2098 = vmatprep.subr.bf16.mxu0 %v2283_v61  ;;  %v2618_v56 = vld [vmem:[%s2505_s27 + $0x30] sm:$0xf]  ;;  %v460_v61 = vshrl.u32 %v1821_v54, 16  ;;  %v2649_v16 = vcombine.low %v2559_v8, %v2621_v57  ;;  %v1831_v54 = vcombine.low %v339_v45, %v331_v31  ;;  %v1788_v45 = vld [vmem:[%s2505_s27 + $0x20] sm:$0xe] }
  0x2a   : > { %2138 = vmatprep.subr.bf16.mxu1 %v2284_v63  ;;  %1438 = vmatprep.mubr.bf16.mxu1 %v1878_v10  ;;  %v1887_v58 = vcombine.low %v2610_v50, %v2618_v56  ;;  %v467_v63 = vshrl.u32 %v1822_v55, 16  ;;  %v464_v10 = vrot.slane %v462_v62, 1  ;;  %v2328_v62 = vld [vmem:[%s2934_s1 + $0x1f0] sm:$0xff]  }
  0x2b   : > { %1373 = vmatprep.mubr.bf16.mxu0 %v1876_v40  ;;  %v583_v27 = vshll.u32 %v2649_v16, 16  ;;  %v1776_v40 = vld [vmem:[%s2505_s27 + $0x40] sm:$0xf]  ;;  %v581_v59 = vshrl.u32 %v2649_v16, 16  ;;  %v517_v4 = vrot.slane %v1831_v54, 1  ;;  %v2816_v16 = vld [vmem:[%s2934_s1 + $0x210] sm:$0xff]  }
  0x2c   : > { %2099 = vmatpush3.bf16.msra.mxu0 %v2285_v0  ;;  %v469_v0 = vshll.u32 %v1822_v55, 16  ;;  %v465_v7 = vor.u32 %v464_v10, %v460_v61  ;;  %v2784_v54 = vld [vmem:[%s2505_s27 + $0x28] sm:$0xf] }
  0x2d   : > { %2139 = vmatpush3.bf16.msra.mxu1 %v2286_v1  ;;  %2100 = vmatprep.subr.bf16.mxu0 %v2295_v20  ;;  %v2627_v1 = vrot.slane %v1841_v46, 1  ;;  %v1886_v20 = vcombine.low %v515_v12, %v516_v13  ;;  %v340_v46 = vld [vmem:[%s2505_s27 + $0x38] sm:$0xe]  ;;  %v1893_v12 = vcombine.low %v2673_v29, %v324_v30 }
  0x2e   : > { %2140 = vmatprep.subr.bf16.mxu1 %v2296_v21  ;;  %v471_v11 = vrot.slane %v469_v0, 1  ;;  %v2315_v21 = vld [vmem:[%s2934_s1 + $0x168] sm:$0xff]   ;;  %v1832_v55 = vcombine.low %v340_v46, %v332_v33 }
  0x2f   : > { %1374 = vmatmul.mubr.bf16.gmra.mrb[4].mxu0 %v1875_v35  ;;  %v1824_v35 = vcombine.low %v324_v30, %v332_v33 }
  0x30   : > { %2101 = vmatpush3.bf16.msra.mxu0 %v2297_v24  ;;  %1439 = vmatmul.mubr.bf16.gmra.mrb[4].mxu1 %v1877_v34  ;;  %v472_v17 = vor.u32 %v471_v11, %v467_v63  ;;  %v2316_v24 = vld [vmem:[%s2934_s1 + $0x1e8] sm:$0xff]   ;;  %v1823_v34 = vcombine.low %v2673_v29, %v331_v31  ;;  %v2329_v63 = vld [vmem:[%s2934_s1 + $0x130] sm:$0xff]   ;;  %v2715_v11 = vld [vmem:[%s2505_s27 + $0x44] sm:$0x1] }
  0x31   : > { %2141 = vmatpush3.bf16.msra.mxu1 %v2298_v28  ;;  %2102 = vmatprep.subr.bf16.mxu0 %v2299_v36  ;;  %v2318_v28 = vld [vmem:[%s2934_s1 + $0x1a8] sm:$0xff]   ;;  %v1775_v36 = vld [vmem:[%s2505_s27 + $0x38] sm:$0xf]  ;;  %v481_v49 = vshrl.u32 %v1824_v35, 16  ;;  %v483_v52 = vshll.u32 %v1824_v35, 16  ;;  %v2755_v30 = vcombine.low %v1776_v40, %v2715_v11 }
  0x32   : > { %2142 = vmatprep.subr.bf16.mxu1 %v2300_v37  ;;  %1446 = vmatprep.mubr.bf16.mxu1 %v1887_v58  ;;  %v1885_v8 = vcombine.low %v465_v7, %v472_v17  ;;  %v574_v37 = vshrl.u32 %v2639_v9, 16  ;;  %v1896_v44 = vcombine.low %v1775_v36, %v1776_v40  ;;  %v474_v47 = vshrl.u32 %v1823_v34, 16  ;;  %v2327_v58 = vld [vmem:[%s2934_s1 + $0x170] sm:$0xff]  }
  0x33   : > { %v476_v48 = vshll.u32 %v1823_v34, 16  ;;  %v485_v61 = vrot.slane %v483_v52, 1  ;;  %v2752_v29 = vld [vmem:[%s2505_s27 + $0x14] sm:$0x1]  ;;  %v1787_v34 = vld [vmem:[%s2505_s27 + $0x18] sm:$0xe]  ;;  %v1844_v52 = vcombine.low %v1788_v45, %v2621_v57 }
  0x34   : > { %2103 = vmatpush3.bf16.msra.mxu0 %v2301_v42  ;;  %1381 = vmatprep.mubr.bf16.mxu0 %v1885_v8  ;;  %v2682_v42 = vrot.slane %v576_v22, 1  ;;  %v2732_v8 = vcombine.low %v1775_v36, %v2709_v3  ;;  %v1843_v46 = vcombine.low %v1787_v34, %v2615_v53  ;;  %v2795_v53 = vld [vmem:[%s2934_s1 + $0x208] sm:$0xff]   ;;  %v1792_v45 = vld [vmem:[%s2505_s27 + $0x40] sm:$0xe] }
  0x35   : > { %2143 = vmatpush3.bf16.msra.mxu1 %v2302_v43  ;;  %2104 = vmatprep.subr.bf16.mxu0 %v2311_v5  ;;  %v2689_v43 = vcombine.low %v2610_v50, %v2658_v23  ;;  %v2699_v50 = vcombine.low %v2618_v56, %v2685_v38  ;;  %v478_v60 = vrot.slane %v476_v48, 1  ;;  %v518_v5 = vrot.slane %v1832_v55, 1  ;;  %v2330_v56 = vld [vmem:[%s2934_s1 + $0x1b0] sm:$0xff]   ;;  %v2787_v55 = vld [vmem:[%s2505_s27 + $0x24] sm:$0x1] }
  0x36   : > { %2144 = vmatprep.subr.bf16.mxu1 %v2312_v6  ;;  %v486_v10 = vor.u32 %v485_v61, %v481_v49  ;;  %v611_v48 = vshll.u32 %v2755_v30, 16  ;;  %v641_v61 = vrot.slane %v1843_v46, 1 }
  0x37   : > { %1382 = vmatmul.mubr.bf16.gmra.mrb[8].mxu0 %v1884_v19  ;;  %v590_v0 = vshll.u32 %v2689_v43, 16  ;;  %v479_v6 = vor.u32 %v478_v60, %v474_v47  ;;  %v1895_v13 = vcombine.low %v517_v4, %v518_v5  ;;  %v597_v7 = vshll.u32 %v2699_v50, 16  ;;  %v2332_v19 = vld [vmem:[%s2934_s1 + $0x1f8] sm:$0xff]   ;;  %v2779_v47 = vld [vmem:[%s2505_s27 + $0x20] sm:$0xf] }
  0x38   : > { %2105 = vmatpush3.bf16.msra.mxu0 %v2313_v14  ;;  %1447 = vmatmul.mubr.bf16.gmra.mrb[8].mxu1 %v1886_v20  ;;  %v2331_v14 = vld [vmem:[%s2934_s1 + $0x178] sm:$0xff]   ;;  %v588_v22 = vshrl.u32 %v2689_v43, 16  ;;  %v1851_v57 = vcombine.low %v2779_v47, %v2787_v55  ;;  %v642_v4 = vrot.slane %v1844_v52, 1 }
  0x39   : > { %2145 = vmatpush3.bf16.msra.mxu1 %v2314_v15  ;;  %2106 = vmatprep.subr.bf16.mxu0 %v2315_v21  ;;  %v585_v15 = vrot.slane %v583_v27, 1  ;;  %v1894_v17 = vcombine.low %v479_v6, %v486_v10  ;;  %v2333_v20 = vld [vmem:[%s2934_s1 + $0x138] sm:$0xff]   ;;  %v1871_v21 = vcombine.low %v2627_v1, %v2629_v2  ;;  %v565_v27 = vor.u32 %v2651_v18, %v560_v41  ;;  %v2746_v2 = vld [vmem:[%s2505_s27 + $0x10] sm:$0xf] }
  0x3a   : > { %2146 = vmatprep.subr.bf16.mxu1 %v2316_v24  ;;  %1454 = vmatprep.mubr.bf16.mxu1 %v1896_v44  ;;  %v2334_v24 = vld [vmem:[%s2934_s1 + $0x1b8] sm:$0xff]   ;;  %v572_v1 = vor.u32 %v2663_v25, %v567_v51  ;;  %v1849_v39 = vcombine.low %v2746_v2, %v2752_v29  ;;  %v2767_v51 = vld [vmem:[%s2934_s1 + $0x200] sm:$0xff]   ;;  %v595_v18 = vshrl.u32 %v2699_v50, 16  ;;  %v604_v25 = vshll.u32 %v2732_v8, 16 }
  0x3b   : > { %1389 = vmatprep.mubr.bf16.mxu0 %v1894_v17  ;;  %v2772_v35 = vrot.slane %v597_v7, 1  ;;  %v702_v5 = vshrl.u32 %v1851_v57, 16  ;;  %v586_v6 = vor.u32 %v585_v15, %v581_v59  ;;  %v1789_v59 = vld [vmem:[%s2505_s27 + $0x28] sm:$0xe]  ;;  %v1790_v15 = vld [vmem:[%s2505_s27 + $0x30] sm:$0xe] }
  0x3c   : > { %2107 = vmatpush3.bf16.msra.mxu0 %v2317_v26  ;;  %v2737_v26 = vrot.slane %v590_v0, 1  ;;  %v688_v31 = vshrl.u32 %v1849_v39, 16  ;;  %v690_v33 = vshll.u32 %v1849_v39, 16  ;;  %v1870_v36 = vcombine.low %v565_v27, %v572_v1  ;;  %v2826_v27 = vld [vmem:[%s2505_s27 + $0x38] sm:$0xf] }
  0x3d   : > { %2147 = vmatpush3.bf16.msra.mxu1 %v2318_v28  ;;  %2108 = vmatprep.subr.bf16.mxu0 %v2327_v58  ;;  %v2749_v28 = vld [vmem:[%s2505_s27 + $0x18] sm:$0xf]  ;;  %v579_v58 = vor.u32 %v2682_v42, %v574_v37  ;;  %v2805_v37 = vrot.slane %v604_v25, 1  ;;  %v609_v1 = vshrl.u32 %v2755_v30, 16 }
  0x3e   : > { %2148 = vmatprep.subr.bf16.mxu1 %v2328_v62  ;;  %v1850_v41 = vcombine.low %v2749_v28, %v2758_v32  ;;  %v692_v49 = vrot.slane %v690_v33, 1  ;;  %v2798_v62 = vld [vmem:[%s2505_s27 + $0x2c] sm:$0x1]  ;;  %v1872_v10 = vcombine.low %v2746_v2, %v2749_v28  ;;  %v2832_v39 = vld [vmem:[%s2934_s1 + $0x218] sm:$0xff]  }
  0x3f   : > { %1390 = vmatmul.mubr.bf16.gmra.mrb[12].mxu0 %v1893_v12  ;;  %v1852_v9 = vcombine.low %v2784_v54, %v2798_v62  ;;  %v1880_v12 = vcombine.low %v641_v61, %v642_v4  ;;  %v1879_v28 = vcombine.low %v579_v58, %v586_v6  ;;  %v2857_v58 = vld [vmem:[%s2505_s27 + $0x40] sm:$0xf]  ;;  %v1881_v61 = vcombine.low %v2779_v47, %v2784_v54 }
  0x40   : > { %2109 = vmatpush3.bf16.msra.mxu0 %v2329_v63  ;;  %1455 = vmatmul.mubr.bf16.gmra.mrb[12].mxu1 %v1895_v13  ;;  %v695_v40 = vshrl.u32 %v1850_v41, 16  ;;  %v697_v44 = vshll.u32 %v1850_v41, 16  ;;  %v602_v63 = vshrl.u32 %v2732_v8, 16  ;;  %v693_v0 = vor.u32 %v692_v49, %v688_v31  ;;  %v2835_v41 = vld [vmem:[%s2505_s27 + $0x34] sm:$0x1] }
  0x41   : > { %2149 = vmatpush3.bf16.msra.mxu1 %v2330_v56  ;;  %2110 = vmatprep.subr.bf16.mxu0 %v2331_v14  ;;  %v704_v56 = vshll.u32 %v1851_v57, 16  ;;  %v709_v13 = vshrl.u32 %v1852_v9, 16  ;;  %v711_v14 = vshll.u32 %v1852_v9, 16 }
  0x42   : > { %2150 = vmatprep.subr.bf16.mxu1 %v2332_v19  ;;  %1495 = vmatprep.mubr.bf16.mxu0 %v1871_v21  ;;  %v699_v60 = vrot.slane %v697_v44, 1  ;;  %v1846_v21 = vcombine.low %v1790_v15, %v2685_v38  ;;  %v1791_v44 = vld [vmem:[%s2505_s27 + $0x38] sm:$0xe] }
  0x43   : > { %v706_v17 = vrot.slane %v704_v56, 1  ;;  %v713_v19 = vrot.slane %v711_v14, 1  ;;  %v1847_v50 = vcombine.low %v1791_v44, %v2709_v3 }
  0x44   : > { %2111 = vmatpush3.bf16.msra.mxu0 %v2333_v20  ;;  %v700_v42 = vor.u32 %v699_v60, %v695_v40  ;;  %v1845_v20 = vcombine.low %v1789_v59, %v2658_v23  ;;  %v2838_v23 = vld [vmem:[%s2505_s27 + $0x3c] sm:$0x1]  ;;  %v644_v31 = vrot.slane %v1846_v21, 1  ;;  %v600_v40 = vor.u32 %v2772_v35, %v595_v18  ;;  %v2860_v60 = vld [vmem:[%s2505_s27 + $0x48] sm:$0xf] }
  0x45   : > { %2151 = vmatpush3.bf16.msra.mxu1 %v2334_v24  ;;  %2188 = vmatprep.subr.bf16.mxu0 %v2767_v51  ;;  %v2823_v24 = vld [vmem:[%s2505_s27 + $0x30] sm:$0xf]  ;;  %v707_v2 = vor.u32 %v706_v17, %v702_v5  ;;  %v714_v38 = vor.u32 %v713_v19, %v709_v13  ;;  %v1854_v34 = vcombine.low %v2826_v27, %v2838_v23  ;;  %v2865_v18 = vld [vmem:[%s2505_s27 + $0x44] sm:$0x1]  ;;  %v2868_v35 = vld [vmem:[%s2505_s27 + $0x4c] sm:$0x1] }
  0x46   : > { %2212 = vmatprep.subr.bf16.mxu1 %v2767_v51  ;;  %v1873_v7 = vcombine.low %v693_v0, %v700_v42  ;;  %v643_v25 = vrot.slane %v1845_v20, 1  ;;  %v1853_v33 = vcombine.low %v2823_v24, %v2835_v41  ;;  %v1855_v0 = vcombine.low %v2857_v58, %v2865_v18  ;;  %v1810_v17 = vld [vmem:[%s2505_s27 + $0x18] sm:$0xe] }
  0x47   : > { %1496 = vmatmul.mubr.bf16.vlgmr.msra.gmra.mrb[16].mxu0 %v1870_v36  ;;  %v593_v36 = vor.u32 %v2737_v26, %v588_v22  ;;  %v723_v43 = vshrl.u32 %v1854_v34, 16  ;;  %v725_v22 = vshll.u32 %v1854_v34, 16  ;;  %v1848_v26 = vcombine.low %v1792_v45, %v2715_v11  ;;  %v2354_v11 = vld [vmem:[%s2934_s1 + $0x220] sm:$0xff]  }
  0x48   : > { %2189 = vmatpush3.bf16.msra.mxu0 %v2767_v51  ;;  %1503 = vmatprep.mubr.bf16.mxu0 %v1880_v12  ;;  %v1889_v46 = vcombine.low %v643_v25, %v644_v31  ;;  %v716_v49 = vshrl.u32 %v1853_v33, 16  ;;  %v718_v52 = vshll.u32 %v1853_v33, 16  ;;  %v1856_v4 = vcombine.low %v2860_v60, %v2868_v35  ;;  %v1811_v31 = vld [vmem:[%s2505_s27 + $0x20] sm:$0xe]  ;;  %v1812_v33 = vld [vmem:[%s2505_s27 + $0x28] sm:$0xe] }
  0x49   : > { %2190 = vmatprep.subr.bf16.mxu0 %v2795_v53  ;;  %1560 = vmatprep.mubr.bf16.mxu1 %v1873_v7  ;;  %v727_v3 = vrot.slane %v725_v22, 1  ;;  %v645_v9 = vrot.slane %v1847_v50, 1  ;;  %v646_v47 = vrot.slane %v1848_v26, 1  ;;  %v730_v42 = vshrl.u32 %v1855_v0, 16  ;;  %v1809_v7 = vld [vmem:[%s2505_s27 + $0x10] sm:$0xe] }
  0x4a   : > { %1561 = vmatmul.mubr.bf16.vlgmr.msra.gmra.mrb[16].mxu1 %v1872_v10  ;;  %v720_v57 = vrot.slane %v718_v52, 1  ;;  %v732_v5 = vshll.u32 %v1855_v0, 16  ;;  %v1888_v6 = vcombine.low %v593_v36, %v600_v40  ;;  %v737_v10 = vshrl.u32 %v1856_v4, 16  ;;  %v1815_v36 = vld [vmem:[%s2505_s27 + $0x40] sm:$0xe] }
  0x4b   : > { %2220 = vmatpush3.bf16.msra.mxu1 %v2767_v51  ;;  %v1882_v51 = vcombine.low %v707_v2, %v714_v38  ;;  %v728_v56 = vor.u32 %v727_v3, %v723_v43  ;;  %v739_v12 = vshll.u32 %v1856_v4, 16  ;;  %v1898_v13 = vcombine.low %v645_v9, %v646_v47  ;;  %v1813_v2 = vld [vmem:[%s2505_s27 + $0x30] sm:$0xe]  ;;  %v1816_v40 = vld [vmem:[%s2505_s27 + $0x48] sm:$0xe] }
  0x4c   : > { %2191 = vmatpush3.bf16.msra.mxu0 %v2795_v53  ;;  %2213 = vmatprep.subr.bf16.mxu1 %v2795_v53  ;;  %v721_v54 = vor.u32 %v720_v57, %v716_v49  ;;  %v734_v14 = vrot.slane %v732_v5, 1  ;;  %v1857_v19 = vcombine.low %v1809_v7, %v2752_v29  ;;  %v1858_v21 = vcombine.low %v1810_v17, %v2758_v32 }
  0x4d   : > { %2192 = vmatprep.subr.bf16.mxu0 %v2816_v16  ;;  %1568 = vmatprep.mubr.bf16.mxu1 %v1882_v51  ;;  %v741_v15 = vrot.slane %v739_v12, 1  ;;  %v607_v38 = vor.u32 %v2805_v37, %v602_v63  ;;  %v1890_v29 = vcombine.low %v2823_v24, %v2826_v27  ;;  %v1861_v63 = vcombine.low %v1813_v2, %v2835_v41  ;;  %v2363_v37 = vld [vmem:[%s2934_s1 + $0x230] sm:$0xff]   ;;  %v2364_v41 = vld [vmem:[%s2934_s1 + $0x238] sm:$0xff]  }
  0x4e   : > { %v1891_v59 = vcombine.low %v721_v54, %v728_v56  ;;  %v735_v20 = vor.u32 %v734_v14, %v730_v42  ;;  %v767_v32 = vrot.slane %v1857_v19, 1  ;;  %v768_v34 = vrot.slane %v1858_v21, 1 }
  0x4f   : > { %1504 = vmatmul.mubr.bf16.gmra.mrb[20].mxu0 %v1879_v28  ;;  %2221 = vmatpush3.bf16.msra.mxu1 %v2795_v53  ;;  %v613_v53 = vrot.slane %v611_v48, 1  ;;  %v2355_v48 = vld [vmem:[%s2934_s1 + $0x228] sm:$0xff]   ;;  %v1814_v28 = vld [vmem:[%s2505_s27 + $0x38] sm:$0xe]  ;;  %v1859_v24 = vcombine.low %v1811_v31, %v2787_v55  ;;  %v1860_v27 = vcombine.low %v1812_v33, %v2798_v62  ;;  %v1863_v62 = vcombine.low %v1815_v36, %v2865_v18 }
  0x50   : > { %2193 = vmatpush3.bf16.msra.mxu0 %v2816_v16  ;;  %2214 = vmatprep.subr.bf16.mxu1 %v2816_v16  ;;  %v1862_v30 = vcombine.low %v1814_v28, %v2838_v23  ;;  %v771_v23 = vrot.slane %v1861_v63, 1  ;;  %v1864_v51 = vcombine.low %v1816_v40, %v2868_v35 }
  0x51   : > { %2194 = vmatprep.subr.bf16.mxu0 %v2832_v39  ;;  %1511 = vmatprep.mubr.bf16.mxu0 %v1889_v46  ;;  %v614_v25 = vor.u32 %v613_v53, %v609_v1  ;;  %v769_v45 = vrot.slane %v1859_v24, 1  ;;  %v770_v55 = vrot.slane %v1860_v27, 1  ;;  %v1899_v46 = vcombine.low %v2857_v58, %v2860_v60  ;;  %v1865_v60 = vld [vmem:[%s2935_s2] ss:$0 sm:$0xff] }
  0x52   : > { %1569 = vmatmul.mubr.bf16.gmra.mrb[20].mxu1 %v1881_v61  ;;  %v772_v44 = vrot.slane %v1862_v30, 1  ;;  %v773_v43 = vrot.slane %v1863_v62, 1  ;;  %v774_v22 = vrot.slane %v1864_v51, 1 }
  0x53   : > { %2222 = vmatpush3.bf16.msra.mxu1 %v2816_v16  ;;  %1576 = vmatprep.mubr.bf16.mxu1 %v1891_v59  ;;  %v742_v16 = vor.u32 %v741_v15, %v737_v10  ;;  %v1897_v1 = vcombine.low %v607_v38, %v614_v25  ;;  %v1883_v52 = vcombine.low %v769_v45, %v770_v55 }
  0x54   : > { %2195 = vmatpush3.bf16.msra.mxu0 %v2832_v39  ;;  %2215 = vmatprep.subr.bf16.mxu1 %v2832_v39  ;;  %v1892_v49 = vcombine.low %v771_v23, %v772_v44  ;;  %v1901_v50 = vcombine.low %v773_v43, %v774_v22 }
  0x55   : > { %2196 = vmatprep.subr.bf16.mxu0 %v2354_v11  ;;  %v1900_v8 = vcombine.low %v735_v20, %v742_v16 }
  0x57   : > { %1512 = vmatmul.mubr.bf16.gmra.mrb[24].mxu0 %v1888_v6  ;;  %2223 = vmatpush3.bf16.msra.mxu1 %v2832_v39  ;;  %v1874_v39 = vcombine.low %v767_v32, %v768_v34 }
  0x58   : > { %2197 = vmatpush3.bf16.msra.mxu0 %v2354_v11  ;;  %1519 = vmatprep.mubr.bf16.mxu0 %v1898_v13 }
  0x59   : > { %2198 = vmatprep.subr.bf16.mxu0 %v2355_v48  ;;  %2216 = vmatprep.subr.bf16.mxu1 %v2354_v11 }
  0x5a   : > { %1577 = vmatmul.mubr.bf16.gmra.mrb[24].mxu1 %v1890_v29 }
  0x5b   : > { %2224 = vmatpush3.bf16.msra.mxu1 %v2354_v11  ;;  %1584 = vmatprep.mubr.bf16.mxu1 %v1900_v8 }
  0x5c   : > { %2199 = vmatpush3.bf16.msra.mxu0 %v2355_v48  ;;  %2217 = vmatprep.subr.bf16.mxu1 %v2355_v48 }
  0x5d   : > { %2200 = vmatprep.subr.bf16.mxu0 %v2363_v37 }
  0x5f   : > { %1520 = vmatmul.mubr.bf16.gmra.mrb[28].mxu0 %v1897_v1  ;;  %2225 = vmatpush3.bf16.msra.mxu1 %v2355_v48 }
  0x60   : > { %2201 = vmatpush3.bf16.msra.mxu0 %v2363_v37  ;;  %2204 = vmatprep.mubr.bf16.mxu0 %v1874_v39 }
  0x61   : > { %2202 = vmatprep.subr.bf16.mxu0 %v2364_v41  ;;  %2218 = vmatprep.subr.bf16.mxu1 %v2363_v37 }
  0x62   : > { %1585 = vmatmul.mubr.bf16.gmra.mrb[28].mxu1 %v1899_v46 }
  0x63   : > { %2226 = vmatpush3.bf16.msra.mxu1 %v2363_v37  ;;  %2208 = vmatprep.mubr.bf16.mxu1 %v1892_v49 }
  0x64   : > { %2203 = vmatpush3.bf16.msra.mxu0 %v2364_v41  ;;  %2219 = vmatprep.subr.bf16.mxu1 %v2364_v41 }
  0x67   : > { %2205 = vmatmul.mubr.bf16.vlgmr.msra.gmra.mrb[32].mxu0 %v1883_v52  ;;  %2227 = vmatpush3.bf16.msra.mxu1 %v2364_v41 }
  0x6a   : > { %2209 = vmatmul.mubr.bf16.vlgmr.msra.gmra.mrb[32].mxu1 %v1901_v50 }
  0xfa   : > { %v2032_v26 = vpop.f32.mrb[0].mxu0 }
  0xfb   : > { %v2072_v58 = vpop.f32.mrb[0].mxu1  ;;  %v2033_v18 = vpop.f32.mrb[1].mxu0 }
  0xfc   : > { %v2073_v35 = vpop.f32.mrb[1].mxu1  ;;  %v2034_v61 = vadd.f32 %v2033_v18, %v2032_v26  ;;  %v2035_v0 = vpop.f32.mrb[2].mxu0 }
  0xfd   : > { %v2074_v57 = vadd.f32 %v2073_v35, %v2072_v58  ;;  %v2075_v4 = vpop.f32.mrb[2].mxu1  ;;  %v2036_v3 = vpop.f32.mrb[3].mxu0 }
  0xfe   : > { %v2076_v11 = vpop.f32.mrb[3].mxu1  ;;  %v1368_v9 = vadd.f32 %v2034_v61, %v1865_v60  ;;  %v2037_v47 = vadd.f32 %v2036_v3, %v2035_v0 }
  0xff   : > { %v2077_v54 = vadd.f32 %v2076_v11, %v2075_v4 }
 0x100   : > { %v1433_v42 = vadd.f32 %v2074_v57, %v1368_v9  ;;  %v1371_v5 = vadd.f32 %v2037_v47, %v1865_v60 }
 0x102   : > { %v1436_v53 = vadd.f32 %v2077_v54, %v1371_v5  ;;  %v2038_v13 = vpop.f32.mrb[4].mxu0 }
 0x103   : > { %v2078_v56 = vpop.f32.mrb[4].mxu1  ;;  %v2039_v7 = vpop.f32.mrb[5].mxu0 }
 0x104   : > { %v2079_v6 = vpop.f32.mrb[5].mxu1  ;;  %v2040_v59 = vadd.f32 %v2039_v7, %v2038_v13  ;;  %v2041_v48 = vpop.f32.mrb[6].mxu0 }
 0x105   : > { %v2080_v10 = vadd.f32 %v2079_v6, %v2078_v56  ;;  %v2081_v12 = vpop.f32.mrb[6].mxu1  ;;  %v2042_v15 = vpop.f32.mrb[7].mxu0 }
 0x106   : > { %v2082_v14 = vpop.f32.mrb[7].mxu1  ;;  %v1376_v19 = vadd.f32 %v2040_v59, %v1865_v60  ;;  %v2043_v20 = vadd.f32 %v2042_v15, %v2041_v48 }
 0x107   : > { %v2083_v17 = vadd.f32 %v2082_v14, %v2081_v12 }
 0x108   : > { %v1441_v21 = vadd.f32 %v2080_v10, %v1376_v19  ;;  %v1379_v2 = vadd.f32 %v2043_v20, %v1865_v60 }
 0x10a   : > { %v1444_v28 = vadd.f32 %v2083_v17, %v1379_v2  ;;  %v2044_v25 = vpop.f32.mrb[8].mxu0 }
 0x10b   : > { %v2084_v16 = vpop.f32.mrb[8].mxu1  ;;  %v2045_v29 = vpop.f32.mrb[9].mxu0 }
 0x10c   : > { %v2085_v38 = vpop.f32.mrb[9].mxu1  ;;  %v2046_v34 = vadd.f32 %v2045_v29, %v2044_v25  ;;  %v2047_v8 = vpop.f32.mrb[10].mxu0 }
 0x10d   : > { %v2086_v31 = vadd.f32 %v2085_v38, %v2084_v16  ;;  %v2087_v33 = vpop.f32.mrb[10].mxu1  ;;  %v2048_v30 = vpop.f32.mrb[11].mxu0 }
 0x10e   : > { %v2088_v32 = vpop.f32.mrb[11].mxu1  ;;  %v1384_v37 = vadd.f32 %v2046_v34, %v1865_v60  ;;  %v2049_v24 = vadd.f32 %v2048_v30, %v2047_v8 }
 0x10f   : > { %v2089_v63 = vadd.f32 %v2088_v32, %v2087_v33 }
 0x110   : > { %v1449_v27 = vadd.f32 %v2086_v31, %v1384_v37  ;;  %v1387_v1 = vadd.f32 %v2049_v24, %v1865_v60 }
 0x112   : > { %v1452_v36 = vadd.f32 %v2089_v63, %v1387_v1  ;;  %v2050_v41 = vpop.f32.mrb[12].mxu0 }
 0x113   : > { %v2090_v39 = vpop.f32.mrb[12].mxu1  ;;  %v2051_v45 = vpop.f32.mrb[13].mxu0 }
 0x114   : > { %v2091_v40 = vpop.f32.mrb[13].mxu1  ;;  %v2052_v62 = vadd.f32 %v2051_v45, %v2050_v41  ;;  %v2053_v51 = vpop.f32.mrb[14].mxu0 }
 0x115   : > { %v2092_v23 = vadd.f32 %v2091_v40, %v2090_v39  ;;  %v2093_v44 = vpop.f32.mrb[14].mxu1  ;;  %v2054_v49 = vpop.f32.mrb[15].mxu0 }
 0x116   : > { %v2094_v55 = vpop.f32.mrb[15].mxu1  ;;  %v1392_v52 = vadd.f32 %v2052_v62, %v1865_v60  ;;  %v2055_v43 = vadd.f32 %v2054_v49, %v2053_v51 }
 0x117   : > { %v2095_v46 = vadd.f32 %v2094_v55, %v2093_v44 }
 0x118   : > { %v1457_v22 = vadd.f32 %v2092_v23, %v1392_v52  ;;  %v1395_v50 = vadd.f32 %v2055_v43, %v1865_v60 }
 0x11a   : > { %v1460_v26 = vadd.f32 %v2095_v46, %v1395_v50  ;;  %v2112_v58 = vpop.f32.mrb[16].mxu0 }
 0x11b   : > { %v2113_v18 = vpop.f32.mrb[17].mxu0 }
 0x11c   : > { %v2114_v35 = vadd.f32 %v2113_v18, %v2112_v58  ;;  %v2115_v61 = vpop.f32.mrb[18].mxu0 }
 0x11d   : > { %v2116_v57 = vpop.f32.mrb[19].mxu0  ;;  %v2152_v3 = vpop.f32.mrb[16].mxu1 }
 0x11e   : > { %v1498_v0 = vadd.f32 %v2114_v35, %v1433_v42  ;;  %v2117_v4 = vadd.f32 %v2116_v57, %v2115_v61  ;;  %v2153_v11 = vpop.f32.mrb[17].mxu1 }
 0x11f   : > { %v2154_v47 = vadd.f32 %v2153_v11, %v2152_v3  ;;  %v2155_v54 = vpop.f32.mrb[18].mxu1 }
 0x120   : > { %v1501_v9 = vadd.f32 %v2117_v4, %v1436_v53  ;;  %v2156_v5 = vpop.f32.mrb[19].mxu1 }
 0x121   : > { %v2157_v6 = vadd.f32 %v2156_v5, %v2155_v54  ;;  %v1563_v12 = vadd.f32 %v2154_v47, %v1498_v0 }
 0x122   : > { %v2118_v56 = vpop.f32.mrb[20].mxu0 }
 0x123   : > { %v2119_v10 = vpop.f32.mrb[21].mxu0  ;;  %v1566_v7 = vadd.f32 %v2157_v6, %v1501_v9 }
 0x124   : > { %v2120_v13 = vadd.f32 %v2119_v10, %v2118_v56  ;;  %v2121_v60 = vpop.f32.mrb[22].mxu0 }
 0x125   : > { %v2122_v14 = vpop.f32.mrb[23].mxu0  ;;  %v2158_v48 = vpop.f32.mrb[20].mxu1 }
 0x126   : > { %v1506_v17 = vadd.f32 %v2120_v13, %v1441_v21  ;;  %v2123_v59 = vadd.f32 %v2122_v14, %v2121_v60  ;;  %v2159_v15 = vpop.f32.mrb[21].mxu1 }
 0x127   : > { %v2160_v19 = vadd.f32 %v2159_v15, %v2158_v48  ;;  %v2161_v20 = vpop.f32.mrb[22].mxu1 }
 0x128   : > { %v1509_v42 = vadd.f32 %v2123_v59, %v1444_v28  ;;  %v2162_v2 = vpop.f32.mrb[23].mxu1 }
 0x129   : > { %v2163_v16 = vadd.f32 %v2162_v2, %v2161_v20  ;;  %v1571_v25 = vadd.f32 %v2160_v19, %v1506_v17 }
 0x12a   : > { %v2124_v53 = vpop.f32.mrb[24].mxu0 }
 0x12b   : > { %v2125_v38 = vpop.f32.mrb[25].mxu0  ;;  %v1574_v32 = vadd.f32 %v2163_v16, %v1509_v42 }
 0x12c   : > { %v2126_v31 = vadd.f32 %v2125_v38, %v2124_v53  ;;  %v2127_v33 = vpop.f32.mrb[26].mxu0 }
 0x12d   : > { %v2128_v29 = vpop.f32.mrb[27].mxu0  ;;  %v2164_v63 = vpop.f32.mrb[24].mxu1 }
 0x12e   : > { %v1514_v34 = vadd.f32 %v2126_v31, %v1449_v27  ;;  %v2129_v8 = vadd.f32 %v2128_v29, %v2127_v33  ;;  %v2165_v30 = vpop.f32.mrb[25].mxu1 }
 0x12f   : > { %v2166_v37 = vadd.f32 %v2165_v30, %v2164_v63  ;;  %v2167_v24 = vpop.f32.mrb[26].mxu1 }
 0x130   : > { %v1517_v21 = vadd.f32 %v2129_v8, %v1452_v36  ;;  %v2168_v1 = vpop.f32.mrb[27].mxu1 }
 0x131   : > { %v2169_v39 = vadd.f32 %v2168_v1, %v2167_v24  ;;  %v1579_v41 = vadd.f32 %v2166_v37, %v1514_v34 }
 0x132   : > { %v2130_v28 = vpop.f32.mrb[28].mxu0 }
 0x133   : > { %v2131_v40 = vpop.f32.mrb[29].mxu0  ;;  %v1582_v55 = vadd.f32 %v2169_v39, %v1517_v21 }
 0x134   : > { %v2132_v23 = vadd.f32 %v2131_v40, %v2130_v28  ;;  %v2133_v44 = vpop.f32.mrb[30].mxu0 }
 0x135   : > { %v2134_v45 = vpop.f32.mrb[31].mxu0  ;;  %v2170_v46 = vpop.f32.mrb[28].mxu1 }
 0x136   : > { %v1522_v62 = vadd.f32 %v2132_v23, %v1457_v22  ;;  %v2135_v51 = vadd.f32 %v2134_v45, %v2133_v44  ;;  %v2171_v27 = vpop.f32.mrb[29].mxu1 }
 0x137   : > { %v2172_v52 = vadd.f32 %v2171_v27, %v2170_v46  ;;  %v2173_v43 = vpop.f32.mrb[30].mxu1 }
 0x138   : > { %v1525_v49 = vadd.f32 %v2135_v51, %v1460_v26  ;;  %v2174_v36 = vpop.f32.mrb[31].mxu1 }
 0x139   : > { %v2175_v58 = vadd.f32 %v2174_v36, %v2173_v43  ;;  %v1587_v35 = vadd.f32 %v2172_v52, %v1522_v62 }
 0x13a   : > { %v2206_v50 = vpop.f32.mrb[32].mxu0 }
 0x13b   : > { %v1636_v18 = vadd.f32 %v2206_v50, %v1571_v25  ;;  %v1627_v61 = vpop.f32.mrb[33].mxu0  ;;  %v1590_v3 = vadd.f32 %v2175_v58, %v1525_v49 }
 0x13c   : > { %v1628_v57 = vadd.f32 %v1627_v61, %v1563_v12  ;;  %v2207_v0 = vpop.f32.mrb[34].mxu0 }
 0x13d   : > { %v1639_v4 = vadd.f32 %v2207_v0, %v1574_v32  ;;  %v1630_v11 = vpop.f32.mrb[35].mxu0  ;;  %v1660_v22 = vmax.f32 %v1636_v18, 0.0  ;;  %v2210_v47 = vpop.f32.mrb[32].mxu1 }
 0x13e   : > { %v1631_v9 = vadd.f32 %v1630_v11, %v1566_v7  ;;  %v1652_v5 = vadd.f32 %v2210_v47, %v1587_v35  ;;  %v1658_v26 = vmax.f32 %v1628_v57, 0.0  ;;  %v1643_v56 = vpop.f32.mrb[33].mxu1 }
 0x13f   : > { %v1661_v54 = vmax.f32 %v1639_v4, 0.0  ;;  %v1644_v10 = vadd.f32 %v1643_v56, %v1579_v41  ;;  %v2211_v12 = vpop.f32.mrb[34].mxu1 }
 0x140   : > { %v1659_v6 = vmax.f32 %v1631_v9, 0.0  ;;  %v1655_v60 = vadd.f32 %v2211_v12, %v1590_v3  ;;  %v1646_v17 = vpop.f32.mrb[35].mxu1  ;;  %v1664_v7 = vmax.f32 %v1652_v5, 0.0 }
 0x141   : > { %v2001_v13 = vpack.c.bf16 %v1661_v54, %v1660_v22  ;;  %v1647_v59 = vadd.f32 %v1646_v17, %v1582_v55  ;;  %v1662_v15 = vmax.f32 %v1644_v10, 0.0 }
 0x142   : > { %v1996_v14 = vpack.c.bf16 %v1659_v6, %v1658_v26  ;;  %v1665_v48 = vmax.f32 %v1655_v60, 0.0 }
 0x143   : > { %2013 = vst [vmem:[%s170_s19 + $0x8] sm:$0xff] %v2001_v13   ;;  %v1663_v42 = vmax.f32 %v1647_v59, 0.0 }
 0x144   : > { %1997 = vst [vmem:[%s170_s19] sm:$0xff] %v1996_v14   ;;  %v2011_v19 = vpack.c.bf16 %v1665_v48, %v1664_v7 }
 0x145   : > { %v2006_v20 = vpack.c.bf16 %v1663_v42, %v1662_v15 }
 0x146   : > { %2015 = vst [vmem:[%s170_s19 + $0x18] sm:$0xff] %v2011_v19  }
 0x147   : > { %2014 = vst [vmem:[%s170_s19 + $0x10] sm:$0xff] %v2006_v20  }
 0x148 PF: > { %s13_s12 = sadd.s32 1, %s2375_s12  }
 0x149   : > { %p10_p4 = scmp.ge.s32.totalorder %s13_s12, 6  }
 0x14b   :  { %12 = sbr.rel (!%p10_p4) target bundleno = 1 (0x1), region = 64 }

// kernel: vgg_perceptual_loss.23
= control target key start
LH: loop header
LB: loop body
LE: loop exit
PB: predicated region body
PF: predicated region fallthrough
CT: control target
= control target key end

     0   :  { %7 = vsyncpa [#allocation3], 0  ;;  %s380_s9 = smov 0   ;;  %s424_s0 = inlined_call_operand.vmem [shape: bf16[4,4,4,256], index: 0, kind: input, shape index: {}, may-alias: {0,1}]   ;;  %s425_s1 = inlined_call_operand.vmem [shape: bf16[4,4,4,256], index: 1, kind: input, shape index: {}, may-alias: {0,1}]   ;;  %s426_s2 = inlined_call_operand.hbm [shape: f32[1,1], index: 2, kind: output, shape index: {}]  }
   0x1 LB: > { %s386_s10 = sadd.s32 4294967295, %s361_s9   ;;  %p288_p0 = scmp.ge.s32.totalorder %s361_s9, 1  ;;  %s361_s9 = sphi %s380_s9, %s13_s9  }
   0x2   : > { %p122_p1 = scmp.lt.s32.totalorder %s361_s9, 3 }
   0x4   : > { %p123_p2 = pnand %p288_p0, %p122_p1 }
   0x5   : > { %p145_p3 = scmp.lt.s32.totalorder (!%p123_p2), %s386_s10, 3  ;;  %s150_s11 = sadd.s32 (!%p123_p2), 2, %s386_s10  ;;  %vm200_vm0 = vcmask (!%p123_p2), 1043456  }
   0x6   : > { %126 = sbr.rel (%p123_p2) target bundleno = 255 (0xff), region = 28  ;;  %p151_p4 = scmp.lt.s32.totalorder (!%p123_p2), %s150_s11, 3 }
   0x7   : > { %p326_p5 = scmp.eq.s32.totalorder (!%p123_p2), %s386_s10, 0  ;;  %s363_s21 = smov (!%p123_p2), 0.0  }
   0x8   : > { %p327_p6 = scmp.eq.s32.totalorder (!%p123_p2), %s386_s10, 1  ;;  %s339_s27 = scalar_lea.hbm (!%p123_p2), %s426_s2, 16 }
   0x9   : > { %p340_p7 = scmp.ne.s32.totalorder (!%p123_p2), %s426_s2, %s339_s27  ;;  %p345_p10 = scmp.lt.u32.totalorder (!%p123_p2), %s339_s27, %s426_s2 }
   0xb   : > { %p341_p8 = pnand (!%p123_p2), %p340_p7, %p327_p6 }
   0xd   : > { %s146_s12 = scalar_select %p145_p3, %s386_s10, 3 }
   0xe   : > { %s428_s11 = smov (!%p151_p4, %s150_s11), 3  ;;  %321 = sst [smem:[#allocation2]] (%p326_p5), %s363_s21 }
   0xf   : > { %s298_s13 = sshll.u32 %s146_s12, 4  ;;  %s299_s17 = sshll.u32 %s428_s11, 4 }
  0x10   : > { %s149_s16 = scalar_lea.vmem %s424_s0, %s298_s13  ;;  %s155_s20 = scalar_lea.vmem %s425_s1, %s299_s17 }
  0x11   : > { %v301_v0 = vld [vmem:[%s149_s16] sm:$0xff]   ;;  %v316_v1 = vld [vmem:[%s149_s16 + $0x8] sm:$0xff]   ;;  %s183_s22 = sld [smem:[#allocation2]]  ;;  %p342_p9 = pneg %p341_p8 }
  0x12   : > { %v302_v2 = vunpack.c.l.bf16 %v301_v0  ;;  %v303_v3 = vunpack.c.h.bf16 %v301_v0  ;;  %v306_v4 = vunpack.c.l.bf16 %v316_v1  ;;  %v309_v5 = vld [vmem:[%s155_s20] sm:$0xff]   ;;  %v317_v6 = vld [vmem:[%s155_s20 + $0x8] sm:$0xff]   ;;  %v307_v10 = vunpack.c.h.bf16 %v316_v1 }
  0x13   : > { %v310_v7 = vunpack.c.l.bf16 %v309_v5  ;;  %v311_v8 = vunpack.c.h.bf16 %v309_v5  ;;  %v314_v9 = vunpack.c.l.bf16 %v317_v6  ;;  %v315_v11 = vunpack.c.h.bf16 %v317_v6  ;;  %p347_p11 = pnand %p345_p10, %p342_p9 }
  0x15   : > { %v179_v12 = vsub.f32 %v302_v2, %v310_v7  ;;  %v180_v13 = vsub.f32 %v303_v3, %v311_v8  ;;  %v181_v14 = vsub.f32 %v306_v4, %v314_v9  ;;  %v182_v17 = vsub.f32 %v307_v10, %v315_v11 }
  0x17   : > { %v184_v15 = vmul.f32 %v179_v12, %v179_v12  ;;  %v185_v16 = vmul.f32 %v180_v13, %v180_v13  ;;  %v186_v18 = vmul.f32 %v181_v14, %v181_v14  ;;  %v187_v25 = vmul.f32 %v182_v17, %v182_v17 }
  0x19   : > { %v192_v19 = vcombine.high %v184_v15, %v184_v15  ;;  %v193_v20 = vcombine.high %v185_v16, %v185_v16  ;;  %v201_v21 = vsel %vm200_vm0, %v184_v15, 0.0  ;;  %v204_v23 = vsel %vm200_vm0, %v185_v16, 0.0 }
  0x1a   : > { %v194_v26 = vcombine.high %v186_v18, %v186_v18  ;;  %v208_v29 = vsel %vm200_vm0, %v186_v18, 0.0  ;;  %v195_v31 = vcombine.high %v187_v25, %v187_v25  ;;  %v212_v34 = vsel %vm200_vm0, %v187_v25, 0.0 }
  0x1b   : > { %v202_v22 = vsel %vm200_vm0, %v192_v19, 0.0  ;;  %v206_v27 = vsel %vm200_vm0, %v193_v20, 0.0 }
  0x1c   : > { %v203_v24 = vadd.f32 %v202_v22, %v201_v21  ;;  %v210_v32 = vsel %vm200_vm0, %v194_v26, 0.0  ;;  %v214_v36 = vsel %vm200_vm0, %v195_v31, 0.0 }
  0x1e   : > { %v205_v28 = vadd.f32 %v204_v23, %v203_v24 }
  0x20   : > { %v207_v30 = vadd.f32 %v206_v27, %v205_v28 }
  0x22   : > { %v209_v33 = vadd.f32 %v208_v29, %v207_v30 }
  0x24   : > { %v211_v35 = vadd.f32 %v210_v32, %v209_v33 }
  0x26   : > { %v213_v37 = vadd.f32 %v212_v34, %v211_v35 }
  0x28   : > { %v215_v38 = vadd.f32 %v214_v36, %v213_v37 }
  0x2a   : > { %216 = vadd.xlane.f32.xlu0 %v215_v38 }
  0xb7   : > { %v217_v39 = vpop.xlane.xlu0 %216 }
  0xb8   : > { %v218_v40 = vrot.slane %v217_v39, 4 }
  0xba   : > { %v219_v41 = vadd.f32 %v218_v40, %v217_v39 }
  0xbc   : > { %v220_v42 = vrot.slane %v219_v41, 2 }
  0xbe   : > { %v221_v43 = vadd.f32 %v220_v42, %v219_v41 }
  0xc0   : > { %v222_v44 = vrot.slane %v221_v43, 1 }
  0xc2   : > { %v223_v45 = vadd.f32 %v222_v44, %v221_v43 }
  0xc4   : > { %318 = vpush %v223_v45 }
  0xf5   : > { %s319_s23 = spop %318 }
  0xf6   : > { %s225_s24 = sadd.f32 %s319_s23, %s183_s22 }
  0xf8   : > { %227 = sst [smem:[#allocation2]] %s225_s24 }
  0xf9   : > { %350 = shalt.err (!%p347_p11)
}
  0xfa   : > { %s364_s4 = smov [#allocation2]  }
  0xfb   : > { %323 = dma.smem_to_hbm (%p327_p6), %s364_s4, 16, %s426_s2, [#allocation3]  }
  0xfc   : > { %356 = dma.done.wait (%p327_p6), [#allocation3], 16  }
  0xfd   : > { %358 = vsyncadd (%p327_p6), [#allocation3], 4294967280 }
  0xfe   : > { %241 = sfence }
  0xff PF: > { %s13_s9 = sadd.s32 1, %s361_s9  }
 0x100   : > { %p10_p12 = scmp.ge.s32.totalorder %s13_s9, 4  }
 0x102   :  { %12 = sbr.rel (!%p10_p12) target bundleno = 1 (0x1), region = 64 }
 0x109   :  { %247 = vsyncpa [#allocation3], 1 }
 0x10a   :  { %249 = vsyncpa [#allocation3 + $0x1], 1 }

// kernel: vgg_perceptual_loss.20
= control target key start
LH: loop header
LB: loop body
LE: loop exit
PB: predicated region body
PF: predicated region fallthrough
CT: control target
= control target key end

     0   :  { %s2348_s12 = smov 0   ;;  %s2885_s0 = inlined_call_operand.vmem [shape: bf16[4,6,6,128], index: 0, kind: input, shape index: {}]   ;;  %s2886_s1 = inlined_call_operand.vmem [shape: bf16[1152,256], index: 1, kind: input, shape index: {}]   ;;  %s2887_s2 = inlined_call_operand.vmem [shape: f32[1,256], index: 2, kind: input, shape index: {}]   ;;  %s2888_s3 = inlined_call_operand.vmem [shape: bf16[4,4,4,256], index: 3, kind: output, shape index: {}]  }
   0x1 LB: > { %s1832_s13 = sadd.s32 4294967295, %s2324_s12   ;;  %p1836_p0 = scmp.ge.s32.totalorder %s2324_s12, 1  ;;  %s2324_s12 = sphi %s2348_s12, %s13_s12  }
   0x2   : > { %p137_p1 = scmp.lt.s32.totalorder %s2324_s12, 5 }
   0x4   : > { %p138_p2 = pnand %p1836_p0, %p137_p1 }
   0x5   : > { %v2078_v0 = vld [vmem:[%s2886_s1 + $0x4] ss:$8 sps:$4 sm:$0xff] (!%p138_p2)   ;;  %v2082_v2 = vld [vmem:[%s2886_s1] ss:$8 sps:$4 sm:$0xff] (!%p138_p2)   ;;  %v2084_v4 = vld [vmem:[%s2886_s1 + $0x14] ss:$8 sps:$4 sm:$0xff] (!%p138_p2)   ;;  %v540_v42 = vlaneseq (!%p138_p2) }
   0x6   : > { %141 = sbr.rel (%p138_p2) target bundleno = 394 (0x18a), region = 32  ;;  %v2080_v1 = vld [vmem:[%s2886_s1 + $0x204] ss:$8 sps:$4 sm:$0xff] (!%p138_p2)   ;;  %1528 = vmatprep.subr.bf16.mxu1 (!%p138_p2), %v2078_v0  ;;  %v2083_v3 = vld [vmem:[%s2886_s1 + $0x200] ss:$8 sps:$4 sm:$0xff] (!%p138_p2)   ;;  %p161_p3 = scmp.lt.s32.totalorder (!%p138_p2), %s1832_s13, 3 }
   0x7   : > { %1614 = vmatprep.subr.bf16.mxu0 (!%p138_p2), %v2080_v1  ;;  %1529 = vmatpush1.bf16.msra.mxu1 (!%p138_p2), %v2082_v2  ;;  %v2086_v5 = vld [vmem:[%s2886_s1 + $0x214] ss:$8 sps:$4 sm:$0xff] (!%p138_p2)   ;;  %v2088_v6 = vld [vmem:[%s2886_s1 + $0x10] ss:$8 sps:$4 sm:$0xff] (!%p138_p2)   ;;  %v2090_v8 = vld [vmem:[%s2886_s1 + $0x24] ss:$8 sps:$4 sm:$0xff] (!%p138_p2)  }
   0x8   : > { %1615 = vmatpush1.bf16.msra.mxu0 (!%p138_p2), %v2083_v3  ;;  %1530 = vmatprep.subr.bf16.mxu1 (!%p138_p2), %v2084_v4  ;;  %v2089_v7 = vld [vmem:[%s2886_s1 + $0x210] ss:$8 sps:$4 sm:$0xff] (!%p138_p2)   ;;  %v2092_v9 = vld [vmem:[%s2886_s1 + $0x224] ss:$8 sps:$4 sm:$0xff] (!%p138_p2)   ;;  %v2094_v10 = vld [vmem:[%s2886_s1 + $0x20] ss:$8 sps:$4 sm:$0xff] (!%p138_p2)  }
   0x9   : > { %1616 = vmatprep.subr.bf16.mxu0 (!%p138_p2), %v2086_v5  ;;  %v2095_v11 = vld [vmem:[%s2886_s1 + $0x220] ss:$8 sps:$4 sm:$0xff] (!%p138_p2)   ;;  %v2096_v12 = vld [vmem:[%s2886_s1 + $0x34] ss:$8 sps:$4 sm:$0xff] (!%p138_p2)   ;;  %v2100_v14 = vld [vmem:[%s2886_s1 + $0x30] ss:$8 sps:$4 sm:$0xff] (!%p138_p2)  }
   0xa   : > { %v2098_v13 = vld [vmem:[%s2886_s1 + $0x234] ss:$8 sps:$4 sm:$0xff] (!%p138_p2)   ;;  %v2101_v15 = vld [vmem:[%s2886_s1 + $0x230] ss:$8 sps:$4 sm:$0xff] (!%p138_p2)   ;;  %v2102_v16 = vld [vmem:[%s2886_s1 + $0x44] ss:$8 sps:$4 sm:$0xff] (!%p138_p2)  }
   0xb   : > { %1531 = vmatpush1.bf16.msra.mxu1 (!%p138_p2), %v2088_v6  ;;  %v2104_v17 = vld [vmem:[%s2886_s1 + $0x244] ss:$8 sps:$4 sm:$0xff] (!%p138_p2)   ;;  %v2106_v18 = vld [vmem:[%s2886_s1 + $0x40] ss:$8 sps:$4 sm:$0xff] (!%p138_p2)   ;;  %v2108_v20 = vld [vmem:[%s2886_s1 + $0x54] ss:$8 sps:$4 sm:$0xff] (!%p138_p2)  }
   0xc   : > { %1617 = vmatpush1.bf16.msra.mxu0 (!%p138_p2), %v2089_v7  ;;  %1532 = vmatprep.subr.bf16.mxu1 (!%p138_p2), %v2090_v8  ;;  %v2107_v19 = vld [vmem:[%s2886_s1 + $0x240] ss:$8 sps:$4 sm:$0xff] (!%p138_p2)   ;;  %v2110_v21 = vld [vmem:[%s2886_s1 + $0x254] ss:$8 sps:$4 sm:$0xff] (!%p138_p2)   ;;  %v2112_v22 = vld [vmem:[%s2886_s1 + $0x50] ss:$8 sps:$4 sm:$0xff] (!%p138_p2)  }
   0xd   : > { %1618 = vmatprep.subr.bf16.mxu0 %v2092_v9  ;;  %v2113_v23 = vld [vmem:[%s2886_s1 + $0x250] ss:$8 sps:$4 sm:$0xff]   ;;  %v2114_v24 = vld [vmem:[%s2886_s1 + $0x64] ss:$8 sps:$4 sm:$0xff]   ;;  %v2118_v26 = vld [vmem:[%s2886_s1 + $0x60] ss:$8 sps:$4 sm:$0xff]  }
   0xe   : > { %v2116_v25 = vld [vmem:[%s2886_s1 + $0x264] ss:$8 sps:$4 sm:$0xff]   ;;  %v2119_v27 = vld [vmem:[%s2886_s1 + $0x260] ss:$8 sps:$4 sm:$0xff]   ;;  %v2120_v28 = vld [vmem:[%s2886_s1 + $0x74] ss:$8 sps:$4 sm:$0xff]  }
   0xf   : > { %1533 = vmatpush1.bf16.msra.mxu1 %v2094_v10  ;;  %v2122_v29 = vld [vmem:[%s2886_s1 + $0x274] ss:$8 sps:$4 sm:$0xff]   ;;  %v2124_v30 = vld [vmem:[%s2886_s1 + $0x70] ss:$8 sps:$4 sm:$0xff]   ;;  %v2126_v32 = vld [vmem:[%s2886_s1 + $0x84] ss:$8 sps:$4 sm:$0xff]  }
  0x10   : > { %1619 = vmatpush1.bf16.msra.mxu0 %v2095_v11  ;;  %1534 = vmatprep.subr.bf16.mxu1 %v2096_v12  ;;  %v2125_v31 = vld [vmem:[%s2886_s1 + $0x270] ss:$8 sps:$4 sm:$0xff]   ;;  %v2128_v33 = vld [vmem:[%s2886_s1 + $0x284] ss:$8 sps:$4 sm:$0xff]   ;;  %v2130_v34 = vld [vmem:[%s2886_s1 + $0x80] ss:$8 sps:$4 sm:$0xff]  }
  0x11   : > { %1620 = vmatprep.subr.bf16.mxu0 %v2098_v13  ;;  %v2131_v35 = vld [vmem:[%s2886_s1 + $0x280] ss:$8 sps:$4 sm:$0xff]   ;;  %v2132_v36 = vld [vmem:[%s2886_s1 + $0x94] ss:$8 sps:$4 sm:$0xff]   ;;  %s2890_s13 = smov (!%p161_p3, %s1832_s13), 3  ;;  %v2509_v48 = vshrl.u32 %v540_v42, 7 }
  0x12   : > { %v2134_v37 = vld [vmem:[%s2886_s1 + $0x294] ss:$8 sps:$4 sm:$0xff]   ;;  %v2136_v38 = vld [vmem:[%s2886_s1 + $0x90] ss:$8 sps:$4 sm:$0xff]   ;;  %v2138_v40 = vld [vmem:[%s2886_s1 + $0xa4] ss:$8 sps:$4 sm:$0xff]  }
  0x13   : > { %1535 = vmatpush1.bf16.msra.mxu1 %v2100_v14  ;;  %v2137_v39 = vld [vmem:[%s2886_s1 + $0x290] ss:$8 sps:$4 sm:$0xff]   ;;  %v2140_v41 = vld [vmem:[%s2886_s1 + $0x2a4] ss:$8 sps:$4 sm:$0xff]   ;;  %s2067_s23 = smul.u32 24, %s2890_s13  ;;  %s2046_s15 = sshll.u32 %s2890_s13, 4 }
  0x14   : > { %1621 = vmatpush1.bf16.msra.mxu0 %v2101_v15  ;;  %1536 = vmatprep.subr.bf16.mxu1 %v2102_v16  ;;  %v2142_v43 = vld [vmem:[%s2886_s1 + $0xa0] ss:$8 sps:$4 sm:$0xff]   ;;  %v2144_v45 = vld [vmem:[%s2886_s1 + $0xb4] ss:$8 sps:$4 sm:$0xff]   ;;  %v2148_v47 = vld [vmem:[%s2886_s1 + $0xb0] ss:$8 sps:$4 sm:$0xff]   ;;  %s170_s18 = scalar_lea.vmem %s2888_s3, %s2046_s15 }
  0x15   : > { %1622 = vmatprep.subr.bf16.mxu0 %v2104_v17  ;;  %v2143_v44 = vld [vmem:[%s2886_s1 + $0x2a0] ss:$8 sps:$4 sm:$0xff]   ;;  %v2146_v46 = vld [vmem:[%s2886_s1 + $0x2b4] ss:$8 sps:$4 sm:$0xff]   ;;  %s2507_s9 = scalar_lea.vmem %s2885_s0, %s2067_s23  ;;  %v2149_v49 = vld [vmem:[%s2886_s1 + $0x2b0] ss:$8 sps:$4 sm:$0xff]  }
  0x16   : > { %v2150_v50 = vld [vmem:[%s2886_s1 + $0xc4] ss:$8 sps:$4 sm:$0xff]   ;;  %v2326_v52 = vmov 1983009808   ;;  %v2154_v55 = vld [vmem:[%s2886_s1 + $0xc0] ss:$8 sps:$4 sm:$0xff]  }
  0x17   : > { %1537 = vmatpush1.bf16.msra.mxu1 %v2106_v18  ;;  %v2152_v51 = vld [vmem:[%s2886_s1 + $0x2c4] ss:$8 sps:$4 sm:$0xff]   ;;  %v538_v53 = vunpack.c.l.s4 %v2326_v52  ;;  %v2174_v54 = vld [vmem:[%s2507_s9] ss:$0 sps:$4 sm:$0x77]  }
  0x18   : > { %1623 = vmatpush1.bf16.msra.mxu0 %v2107_v19  ;;  %1538 = vmatprep.subr.bf16.mxu1 %v2108_v20  ;;  %v2155_v56 = vld [vmem:[%s2886_s1 + $0x2c0] ss:$8 sps:$4 sm:$0xff]   ;;  %v2175_v57 = vld [vmem:[%s2507_s9 + $0x4] ss:$0 sps:$4 sm:$0x77]   ;;  %v368_v62 = vshrl.u32 %v2174_v54, 16 }
  0x19   : > { %1624 = vmatprep.subr.bf16.mxu0 %v2110_v21  ;;  %v2176_v58 = vld [vmem:[%s2507_s9 + $0x8] ss:$0 sps:$4 sm:$0x77]   ;;  %v2156_v59 = vld [vmem:[%s2886_s1 + $0xd4] ss:$8 sps:$4 sm:$0xff]   ;;  %v370_v63 = vshll.u32 %v2174_v54, 16  ;;  %v539_v0 = vunpack.c.0.s8 %v538_v53 }
  0x1a   : > { %v2158_v60 = vld [vmem:[%s2886_s1 + $0x2d4] ss:$8 sps:$4 sm:$0xff]   ;;  %v2177_v61 = vld [vmem:[%s2507_s9 + $0xc] ss:$0 sps:$4 sm:$0x77]   ;;  %v375_v2 = vshrl.u32 %v2175_v57, 16 }
  0x1b   : > { %1539 = vmatpush1.bf16.msra.mxu1 %v2112_v22  ;;  %v317_v1 = vld [vmem:[%s2507_s9] sm:$0x3]  ;;  %v377_v3 = vshll.u32 %v2175_v57, 16  ;;  %v382_v4 = vshrl.u32 %v2176_v58, 16  ;;  %v384_v5 = vshll.u32 %v2176_v58, 16  ;;  %v372_v8 = vrot.slane %v370_v63, 1 }
  0x1c   : > { %1625 = vmatpush1.bf16.msra.mxu0 %v2113_v23  ;;  %1540 = vmatprep.subr.bf16.mxu1 %v2114_v24  ;;  %v318_v6 = vld [vmem:[%s2507_s9 + $0x4] sm:$0x3]  ;;  %v319_v7 = vld [vmem:[%s2507_s9 + $0x8] sm:$0x3]  ;;  %v389_v9 = vshrl.u32 %v2177_v61, 16  ;;  %v391_v10 = vshll.u32 %v2177_v61, 16  ;;  %v2553_v20 = vsub.s32 %v539_v0, %v2509_v48 }
  0x1d   : > { %1626 = vmatprep.subr.bf16.mxu0 %v2116_v25  ;;  %v2160_v11 = vld [vmem:[%s2886_s1 + $0xd0] ss:$8 sps:$4 sm:$0xff]   ;;  %v320_v13 = vld [vmem:[%s2507_s9 + $0xc] sm:$0x3]  ;;  %v379_v14 = vrot.slane %v377_v3, 1  ;;  %v386_v15 = vrot.slane %v384_v5, 1  ;;  %v373_v18 = vor.u32 %v372_v8, %v368_v62 }
  0x1e   : > { %v2161_v12 = vld [vmem:[%s2886_s1 + $0x2d0] ss:$8 sps:$4 sm:$0xff]   ;;  %v2162_v16 = vld [vmem:[%s2886_s1 + $0xe4] ss:$8 sps:$4 sm:$0xff]   ;;  %v393_v19 = vrot.slane %v391_v10, 1 }
  0x1f   : > { %1541 = vmatpush1.bf16.msra.mxu1 %v2118_v26  ;;  %v2164_v17 = vld [vmem:[%s2886_s1 + $0x2e4] ss:$8 sps:$4 sm:$0xff]   ;;  %v380_v21 = vor.u32 %v379_v14, %v375_v2  ;;  %v387_v22 = vor.u32 %v386_v15, %v382_v4  ;;  %v535_v24 = vcombine.low %v317_v1, %v373_v18  ;;  %v2166_v26 = vld [vmem:[%s2886_s1 + $0xe0] ss:$8 sps:$4 sm:$0xff]   ;;  %v2173_v61 = vld [vmem:[%s2886_s1 + $0x2f0] ss:$8 sps:$4 sm:$0xff]  }
  0x20   : > { %1627 = vmatpush1.bf16.msra.mxu0 %v2119_v27  ;;  %1542 = vmatprep.subr.bf16.mxu1 %v2120_v28  ;;  %v394_v23 = vor.u32 %v393_v19, %v389_v9  ;;  %v2181_v25 = vld [vmem:[%s2507_s9 + $0x4] ss:$0 sps:$4 sm:$0x77]   ;;  %v2167_v27 = vld [vmem:[%s2886_s1 + $0x2e0] ss:$8 sps:$4 sm:$0xff]  }
  0x21   : > { %1628 = vmatprep.subr.bf16.mxu0 %v2122_v29  ;;  %v576_v28 = vcombine.low %v318_v6, %v380_v21  ;;  %v617_v29 = vcombine.low %v319_v7, %v387_v22  ;;  %v2187_v54 = vld [vmem:[%s2507_s9 + $0xc] ss:$0 sps:$4 sm:$0x66]   ;;  %v2188_v58 = vld [vmem:[%s2507_s9 + $0x10] ss:$0 sps:$4 sm:$0x66]  }
  0x22   : > { %v2180_v3 = vld [vmem:[%s2886_s1 + $0x104] ss:$8 sps:$4 sm:$0xff]   ;;  %v465_v5 = vrot.slane %v2187_v54, 1  ;;  %v466_v6 = vrot.slane %v2188_v58, 1  ;;  %v2178_v14 = vld [vmem:[%s2886_s1 + $0x100] ss:$8 sps:$4 sm:$0xff]  }
  0x23   : > { %1543 = vmatpush1.bf16.msra.mxu1 %v2124_v30  ;;  %v2182_v30 = vld [vmem:[%s2507_s9 + $0x8] ss:$0 sps:$4 sm:$0x77]   ;;  %v2191_v10 = vld [vmem:[%s2886_s1 + $0x304] ss:$8 sps:$4 sm:$0xff]  }
  0x24   : > { %1629 = vmatpush1.bf16.msra.mxu0 %v2125_v31  ;;  %1544 = vmatprep.subr.bf16.mxu1 %v2126_v32  ;;  %v2183_v31 = vld [vmem:[%s2507_s9 + $0xc] ss:$0 sps:$4 sm:$0x77]   ;;  %v2168_v32 = vld [vmem:[%s2886_s1 + $0xf4] ss:$8 sps:$4 sm:$0xff]   ;;  %v433_v42 = vshll.u32 %v2182_v30, 16 }
  0x25   : > { %1630 = vmatprep.subr.bf16.mxu0 %v2128_v33  ;;  %v2170_v33 = vld [vmem:[%s2886_s1 + $0x2f4] ss:$8 sps:$4 sm:$0xff]   ;;  %v2236_v54 = vld [vmem:[%s2886_s1 + $0x184] ss:$8 sps:$4 sm:$0xff]  }
  0x26   : > { %v2194_v19 = vld [vmem:[%s2886_s1 + $0x114] ss:$8 sps:$4 sm:$0xff]  }
  0x27   : > { %1545 = vmatpush1.bf16.msra.mxu1 %v2130_v34  ;;  %v543_v34 = vrot.slane %v535_v24, %v2553_v20  ;;  %v2242_v58 = vld [vmem:[%s2886_s1 + $0x194] ss:$8 sps:$4 sm:$0xff]  }
  0x28   : > { %1631 = vmatpush1.bf16.msra.mxu0 %v2131_v35  ;;  %1546 = vmatprep.subr.bf16.mxu1 %v2132_v36  ;;  %v658_v35 = vcombine.low %v320_v13, %v394_v23  ;;  %v2184_v36 = vld [vmem:[%s2507_s9 + $0x10] ss:$0 sps:$4 sm:$0x77]  }
  0x29   : > { %1632 = vmatprep.subr.bf16.mxu0 %v2134_v37  ;;  %v424_v37 = vshrl.u32 %v2181_v25, 16  ;;  %v445_v52 = vshrl.u32 %v2184_v36, 16  ;;  %v447_v53 = vshll.u32 %v2184_v36, 16  ;;  %v2204_v36 = vld [vmem:[%s2886_s1 + $0x130] ss:$8 sps:$4 sm:$0xff]  }
  0x2b   : > { %1547 = vmatpush1.bf16.msra.mxu1 %v2136_v38  ;;  %v426_v38 = vshll.u32 %v2181_v25, 16  ;;  %v449_v0 = vrot.slane %v447_v53, 1  ;;  %v2192_v25 = vld [vmem:[%s2886_s1 + $0x110] ss:$8 sps:$4 sm:$0xff]  }
  0x2c   : > { %1633 = vmatpush1.bf16.msra.mxu0 %v2137_v39  ;;  %1548 = vmatprep.subr.bf16.mxu1 %v2138_v40  ;;  %v584_v39 = vrot.slane %v576_v28, %v2553_v20  ;;  %v625_v40 = vrot.slane %v617_v29, %v2553_v20  ;;  %v2189_v28 = vld [vmem:[%s2886_s1 + $0x300] ss:$8 sps:$4 sm:$0xff]   ;;  %v2197_v29 = vld [vmem:[%s2886_s1 + $0x314] ss:$8 sps:$4 sm:$0xff]   ;;  %v2228_v53 = vld [vmem:[%s2886_s1 + $0x170] ss:$8 sps:$4 sm:$0xff]  }
  0x2d   : > { %1634 = vmatprep.subr.bf16.mxu0 %v2140_v41  ;;  %v431_v41 = vshrl.u32 %v2182_v30, 16  ;;  %v450_v7 = vor.u32 %v449_v0, %v445_v52  ;;  %v2227_v52 = vld [vmem:[%s2886_s1 + $0x364] ss:$8 sps:$4 sm:$0xff]   ;;  %v2246_v0 = vld [vmem:[%s2886_s1 + $0x1a0] ss:$8 sps:$4 sm:$0xff]  }
  0x2f   : > { %1549 = vmatpush1.bf16.msra.mxu1 %v2142_v43  ;;  %v2185_v43 = vld [vmem:[%s2507_s9 + $0x4] ss:$0 sps:$4 sm:$0x66]  }
  0x30   : > { %1635 = vmatpush1.bf16.msra.mxu0 %v2143_v44  ;;  %1550 = vmatprep.subr.bf16.mxu1 %v2144_v45  ;;  %v666_v44 = vrot.slane %v658_v35, %v2553_v20  ;;  %v428_v45 = vrot.slane %v426_v38, 1  ;;  %v2203_v35 = vld [vmem:[%s2886_s1 + $0x324] ss:$8 sps:$4 sm:$0xff]   ;;  %v2201_v38 = vld [vmem:[%s2886_s1 + $0x320] ss:$8 sps:$4 sm:$0xff]  }
  0x31   : > { %1636 = vmatprep.subr.bf16.mxu0 %v2146_v46  ;;  %v438_v46 = vshrl.u32 %v2183_v31, 16 }
  0x33   : > { %1551 = vmatpush1.bf16.msra.mxu1 %v2148_v47  ;;  %v440_v47 = vshll.u32 %v2183_v31, 16 }
  0x34   : > { %1637 = vmatpush1.bf16.msra.mxu0 %v2149_v49  ;;  %1552 = vmatprep.subr.bf16.mxu1 %v2150_v50  ;;  %v2186_v49 = vld [vmem:[%s2507_s9 + $0x8] ss:$0 sps:$4 sm:$0x66]   ;;  %v1888_v50 = vcombine.low %v543_v34, %v584_v39  ;;  %v2195_v34 = vld [vmem:[%s2886_s1 + $0x310] ss:$8 sps:$4 sm:$0xff]  }
  0x35   : > { %1638 = vmatprep.subr.bf16.mxu0 %v2152_v51  ;;  %v435_v51 = vrot.slane %v433_v42, 1  ;;  %v442_v57 = vrot.slane %v440_v47, 1  ;;  %v464_v1 = vrot.slane %v2186_v49, 1  ;;  %v2209_v39 = vld [vmem:[%s2886_s1 + $0x334] ss:$8 sps:$4 sm:$0xff]  }
  0x36   : > { %v720_v62 = vrot.slane %v1888_v50, %v2553_v20  ;;  %v2207_v42 = vld [vmem:[%s2886_s1 + $0x330] ss:$8 sps:$4 sm:$0xff]   ;;  %v2221_v47 = vld [vmem:[%s2886_s1 + $0x354] ss:$8 sps:$4 sm:$0xff]   ;;  %v2222_v49 = vld [vmem:[%s2886_s1 + $0x160] ss:$8 sps:$4 sm:$0xff]  }
  0x37   : > { %1553 = vmatpush1.bf16.msra.mxu1 %v2154_v55  ;;  %v1890_v55 = vcombine.low %v625_v40, %v666_v44  ;;  %v436_v63 = vor.u32 %v435_v51, %v431_v41  ;;  %v443_v4 = vor.u32 %v442_v57, %v438_v46  ;;  %v2210_v40 = vld [vmem:[%s2886_s1 + $0x140] ss:$8 sps:$4 sm:$0xff]   ;;  %v2218_v41 = vld [vmem:[%s2886_s1 + $0x154] ss:$8 sps:$4 sm:$0xff]   ;;  %v2216_v44 = vld [vmem:[%s2886_s1 + $0x150] ss:$8 sps:$4 sm:$0xff]  }
  0x38   : > { %1639 = vmatpush1.bf16.msra.mxu0 %v2155_v56  ;;  %1554 = vmatprep.subr.bf16.mxu1 %v2156_v59  ;;  %v429_v56 = vor.u32 %v428_v45, %v424_v37  ;;  %v463_v59 = vrot.slane %v2185_v43, 1  ;;  %v2212_v37 = vld [vmem:[%s2886_s1 + $0x144] ss:$8 sps:$4 sm:$0xff]   ;;  %v2213_v46 = vld [vmem:[%s2886_s1 + $0x340] ss:$8 sps:$4 sm:$0xff]  }
  0x39   : > { %1640 = vmatprep.subr.bf16.mxu0 %v2158_v60  ;;  %v2172_v60 = vld [vmem:[%s2886_s1 + $0xf0] ss:$8 sps:$4 sm:$0xff]   ;;  %v734_v2 = vrot.slane %v1890_v55, %v2553_v20  ;;  %v593_v9 = vcombine.low %v436_v63, %v464_v1  ;;  %v2215_v43 = vld [vmem:[%s2886_s1 + $0x344] ss:$8 sps:$4 sm:$0xff]   ;;  %v2230_v50 = vld [vmem:[%s2886_s1 + $0x174] ss:$8 sps:$4 sm:$0xff]  }
  0x3a   : > { %v552_v8 = vcombine.low %v429_v56, %v463_v59  ;;  %v2224_v45 = vld [vmem:[%s2886_s1 + $0x164] ss:$8 sps:$4 sm:$0xff]   ;;  %v2219_v51 = vld [vmem:[%s2886_s1 + $0x350] ss:$8 sps:$4 sm:$0xff]   ;;  %v2225_v55 = vld [vmem:[%s2886_s1 + $0x360] ss:$8 sps:$4 sm:$0xff]  }
  0x3b   : > { %1555 = vmatpush1.bf16.msra.mxu1 %v2160_v11  ;;  %v743_v11 = vcombine.high %v720_v62, %v734_v2  ;;  %v742_v13 = vcombine.low %v720_v62, %v734_v2  ;;  %v2233_v56 = vld [vmem:[%s2886_s1 + $0x374] ss:$8 sps:$4 sm:$0xff]   ;;  %v2234_v57 = vld [vmem:[%s2886_s1 + $0x180] ss:$8 sps:$4 sm:$0xff]   ;;  %v2231_v59 = vld [vmem:[%s2886_s1 + $0x370] ss:$8 sps:$4 sm:$0xff]  }
  0x3c   : > { %1641 = vmatpush1.bf16.msra.mxu0 %v2161_v12  ;;  %1556 = vmatprep.subr.bf16.mxu1 %v2162_v16  ;;  %v634_v12 = vcombine.low %v443_v4, %v465_v5  ;;  %v560_v15 = vrot.slane %v552_v8, %v2553_v20  ;;  %v601_v16 = vrot.slane %v593_v9, %v2553_v20  ;;  %v2248_v62 = vld [vmem:[%s2886_s1 + $0x1a4] ss:$8 sps:$4 sm:$0xff]   ;;  %v2237_v63 = vld [vmem:[%s2886_s1 + $0x380] ss:$8 sps:$4 sm:$0xff]   ;;  %v2254_v4 = vld [vmem:[%s2886_s1 + $0x1b4] ss:$8 sps:$4 sm:$0xff]  }
  0x3d   : > { %1642 = vmatprep.subr.bf16.mxu0 %v2164_v17  ;;  %v675_v17 = vcombine.low %v450_v7, %v466_v6  ;;  %1560 = vmatprep.mubr.bf16.mxu1 %v743_v11  ;;  %v1840_v1 = vld [vmem:[%s2507_s9 + $0x4] sm:$0x3]  ;;  %v1841_v2 = vld [vmem:[%s2507_s9 + $0x8] sm:$0x3]  ;;  %v1842_v9 = vld [vmem:[%s2507_s9 + $0xc] sm:$0x3] }
  0x3e   : > { %v642_v18 = vrot.slane %v634_v12, %v2553_v20  ;;  %v1892_v22 = vcombine.low %v560_v15, %v601_v16  ;;  %v2282_v5 = vld [vmem:[%s2507_s9] ss:$0 sps:$4 sm:$0x66]   ;;  %v2283_v6 = vld [vmem:[%s2507_s9 + $0x4] ss:$0 sps:$4 sm:$0x66]  }
  0x3f   : > { %1557 = vmatpush1.bf16.msra.mxu1 %v2166_v26  ;;  %v683_v21 = vrot.slane %v675_v17, %v2553_v20  ;;  %v2200_v26 = vld [vmem:[%s2886_s1 + $0x124] ss:$8 sps:$4 sm:$0xff]   ;;  %v2284_v7 = vld [vmem:[%s2507_s9 + $0x8] ss:$0 sps:$4 sm:$0x66]   ;;  %v407_v11 = vrot.slane %v2282_v5, 1 }
  0x40   : > { %1643 = vmatpush1.bf16.msra.mxu0 %v2167_v27  ;;  %1558 = vmatprep.subr.bf16.mxu1 %v2168_v32  ;;  %v756_v24 = vrot.slane %v1892_v22, %v2553_v20  ;;  %v2198_v32 = vld [vmem:[%s2886_s1 + $0x120] ss:$8 sps:$4 sm:$0xff]   ;;  %v2285_v8 = vld [vmem:[%s2507_s9 + $0xc] ss:$0 sps:$4 sm:$0x66]   ;;  %v408_v12 = vrot.slane %v2283_v6, 1 }
  0x41   : > { %1644 = vmatprep.subr.bf16.mxu0 %v2170_v33  ;;  %v1894_v23 = vcombine.low %v642_v18, %v683_v21  ;;  %v2206_v33 = vld [vmem:[%s2886_s1 + $0x134] ss:$8 sps:$4 sm:$0xff]   ;;  %v409_v15 = vrot.slane %v2284_v7, 1  ;;  %v410_v16 = vrot.slane %v2285_v8, 1  ;;  %v2251_v17 = vld [vmem:[%s2886_s1 + $0x3a4] ss:$8 sps:$4 sm:$0xff]  }
  0x42   : > { %v2260_v18 = vld [vmem:[%s2886_s1 + $0x1c4] ss:$8 sps:$4 sm:$0xff]   ;;  %v577_v21 = vcombine.low %v408_v12, %v1841_v2  ;;  %v2261_v5 = vld [vmem:[%s2886_s1 + $0x3c0] ss:$8 sps:$4 sm:$0xff]   ;;  %v2269_v6 = vld [vmem:[%s2886_s1 + $0x3d4] ss:$8 sps:$4 sm:$0xff]  }
  0x43   : > { %1559 = vmatpush1.bf16.msra.mxu1 %v2172_v60  ;;  %v770_v27 = vrot.slane %v1894_v23, %v2553_v20  ;;  %v2240_v60 = vld [vmem:[%s2886_s1 + $0x190] ss:$8 sps:$4 sm:$0xff]   ;;  %v618_v22 = vcombine.low %v409_v15, %v1842_v9  ;;  %v2278_v12 = vld [vmem:[%s2886_s1 + $0x1f4] ss:$8 sps:$4 sm:$0xff]  }
  0x44   : > { %1645 = vmatpush1.bf16.msra.mxu0 %v2173_v61  ;;  %1571 = vmatprep.subr.bf16.mxu1 %v2180_v3  ;;  %v2239_v61 = vld [vmem:[%s2886_s1 + $0x384] ss:$8 sps:$4 sm:$0xff]   ;;  %v2245_v3 = vld [vmem:[%s2886_s1 + $0x394] ss:$8 sps:$4 sm:$0xff]  }
  0x45   : > { %1657 = vmatprep.subr.bf16.mxu0 %v2191_v10  ;;  %v779_v30 = vcombine.high %v756_v24, %v770_v27  ;;  %v778_v31 = vcombine.low %v756_v24, %v770_v27  ;;  %v1843_v10 = vld [vmem:[%s2507_s9 + $0x10] sm:$0x3]  ;;  %v2286_v24 = vld [vmem:[%s2507_s9 + $0x8] ss:$0 sps:$4 sm:$0x77]   ;;  %v591_v27 = vrot.slane %v577_v21, %v2553_v20 }
  0x46   : > { %1561 = vmatmul.mubr.bf16.vlgmr.msra.gmra.mrb[0].mxu1 %v742_v13  ;;  %v2243_v13 = vld [vmem:[%s2886_s1 + $0x390] ss:$8 sps:$4 sm:$0xff]   ;;  %v659_v23 = vcombine.low %v410_v16, %v1843_v10  ;;  %v2270_v10 = vld [vmem:[%s2886_s1 + $0x1e0] ss:$8 sps:$4 sm:$0xff]  }
  0x47   : > { %1572 = vmatpush1.bf16.msra.mxu1 %v2178_v14  ;;  %1646 = vmatprep.mubr.bf16.mxu0 %v779_v30  ;;  %v2252_v14 = vld [vmem:[%s2886_s1 + $0x1b0] ss:$8 sps:$4 sm:$0xff]   ;;  %v2249_v30 = vld [vmem:[%s2886_s1 + $0x3a0] ss:$8 sps:$4 sm:$0xff]  }
  0x48   : > { %1573 = vmatprep.subr.bf16.mxu1 %v2194_v19  ;;  %1647 = vmatmul.mubr.bf16.vlgmr.msra.gmra.mrb[0].mxu0 %v778_v31  ;;  %v536_v19 = vcombine.low %v407_v11, %v1840_v1  ;;  %v632_v31 = vrot.slane %v618_v22, %v2553_v20 }
  0x49   : > { %1658 = vmatpush1.bf16.msra.mxu0 %v2189_v28  ;;  %v2288_v28 = vld [vmem:[%s2507_s9 + $0x10] ss:$0 sps:$4 sm:$0x77]  }
  0x4a   : > { %1659 = vmatprep.subr.bf16.mxu0 %v2197_v29  ;;  %v2289_v29 = vld [vmem:[%s2507_s9 + $0x14] ss:$0 sps:$4 sm:$0x77]  }
  0x4b   : > { %1574 = vmatpush1.bf16.msra.mxu1 %v2192_v25  ;;  %v2287_v25 = vld [vmem:[%s2507_s9 + $0xc] ss:$0 sps:$4 sm:$0x77]  }
  0x4c   : > { %1575 = vmatprep.subr.bf16.mxu1 %v2200_v26  ;;  %v550_v26 = vrot.slane %v536_v19, %v2553_v20  ;;  %v2275_v19 = vld [vmem:[%s2886_s1 + $0x3e4] ss:$8 sps:$4 sm:$0xff]  }
  0x4d   : > { %1660 = vmatpush1.bf16.msra.mxu0 %v2195_v34  ;;  %v482_v34 = vshll.u32 %v2286_v24, 16 }
  0x4e   : > { %1661 = vmatprep.subr.bf16.mxu0 %v2203_v35  ;;  %v2257_v35 = vld [vmem:[%s2886_s1 + $0x3b4] ss:$8 sps:$4 sm:$0xff]  }
  0x4f   : > { %1576 = vmatpush1.bf16.msra.mxu1 %v2198_v32  ;;  %v673_v32 = vrot.slane %v659_v23, %v2553_v20 }
  0x50   : > { %1577 = vmatprep.subr.bf16.mxu1 %v2206_v33  ;;  %v480_v33 = vshrl.u32 %v2286_v24, 16  ;;  %v2273_v24 = vld [vmem:[%s2886_s1 + $0x3e0] ss:$8 sps:$4 sm:$0xff]  }
  0x51   : > { %1662 = vmatpush1.bf16.msra.mxu0 %v2201_v38  ;;  %v487_v38 = vshrl.u32 %v2287_v25, 16 }
  0x52   : > { %1663 = vmatprep.subr.bf16.mxu0 %v2209_v39  ;;  %v489_v39 = vshll.u32 %v2287_v25, 16  ;;  %v2281_v25 = vld [vmem:[%s2886_s1 + $0x3f4] ss:$8 sps:$4 sm:$0xff]  }
  0x53   : > { %1578 = vmatpush1.bf16.msra.mxu1 %v2204_v36  ;;  %v2258_v36 = vld [vmem:[%s2886_s1 + $0x1c0] ss:$8 sps:$4 sm:$0xff]  }
  0x54   : > { %1579 = vmatprep.subr.bf16.mxu1 %v2212_v37  ;;  %v1889_v37 = vcombine.low %v550_v26, %v591_v27  ;;  %v2279_v26 = vld [vmem:[%s2886_s1 + $0x3f0] ss:$8 sps:$4 sm:$0xff]   ;;  %v2292_v27 = vld [vmem:[%s2886_s1 + $0x404] ss:$8 sps:$4 sm:$0xff]  }
  0x55   : > { %1664 = vmatpush1.bf16.msra.mxu0 %v2207_v42  ;;  %v484_v42 = vrot.slane %v482_v34, 1  ;;  %v2296_v34 = vld [vmem:[%s2886_s1 + $0x420] ss:$8 sps:$4 sm:$0xff]  }
  0x56   : > { %1665 = vmatprep.subr.bf16.mxu0 %v2215_v43  ;;  %v494_v43 = vshrl.u32 %v2288_v28, 16 }
  0x57   : > { %1580 = vmatpush1.bf16.msra.mxu1 %v2210_v40  ;;  %v2266_v40 = vld [vmem:[%s2886_s1 + $0x1d4] ss:$8 sps:$4 sm:$0xff]  }
  0x58   : > { %1581 = vmatprep.subr.bf16.mxu1 %v2218_v41  ;;  %v1891_v41 = vcombine.low %v632_v31, %v673_v32  ;;  %v2293_v31 = vld [vmem:[%s2886_s1 + $0x410] ss:$8 sps:$4 sm:$0xff]   ;;  %v2327_v32 = vmov 0  }
  0x59   : > { %1666 = vmatpush1.bf16.msra.mxu0 %v2213_v46  ;;  %v491_v46 = vrot.slane %v489_v39, 1  ;;  %v2317_v39 = vld [vmem:[%s2507_s9 + $0x14] ss:$0 sps:$4 sm:$0x66]  }
  0x5a   : > { %1667 = vmatprep.subr.bf16.mxu0 %v2221_v47  ;;  %v501_v47 = vshrl.u32 %v2289_v29, 16 }
  0x5b   : > { %1582 = vmatpush1.bf16.msra.mxu1 %v2216_v44  ;;  %v496_v44 = vshll.u32 %v2288_v28, 16 }
  0x5c   : > { %1583 = vmatprep.subr.bf16.mxu1 %v2224_v45  ;;  %v727_v45 = vrot.slane %v1889_v37, %v2553_v20  ;;  %v2315_v37 = vld [vmem:[%s2507_s9 + $0xc] ss:$0 sps:$4 sm:$0x66]  }
  0x5d   : > { %1668 = vmatpush1.bf16.msra.mxu0 %v2219_v51  ;;  %v741_v51 = vrot.slane %v1891_v41, %v2553_v20  ;;  %v2304_v41 = vld [vmem:[%s2886_s1 + $0x444] ss:$8 sps:$4 sm:$0xff]  }
  0x5e   : > { %1669 = vmatprep.subr.bf16.mxu0 %v2227_v52  ;;  %v1852_v52 = vld [vmem:[%s2507_s9 + $0x8] sm:$0x3] }
  0x5f   : > { %1584 = vmatpush1.bf16.msra.mxu1 %v2222_v49  ;;  %v503_v49 = vshll.u32 %v2289_v29, 16  ;;  %v744_v22 = vcombine.low %v727_v45, %v741_v51  ;;  %v2290_v29 = vld [vmem:[%s2886_s1 + $0x400] ss:$8 sps:$4 sm:$0xff]  }
  0x60   : > { %1585 = vmatprep.subr.bf16.mxu1 %v2230_v50  ;;  %v2255_v50 = vld [vmem:[%s2886_s1 + $0x3b0] ss:$8 sps:$4 sm:$0xff]  }
  0x61   : > { %1670 = vmatpush1.bf16.msra.mxu0 %v2225_v55  ;;  %v498_v55 = vrot.slane %v496_v44, 1 }
  0x62   : > { %1671 = vmatprep.subr.bf16.mxu0 %v2233_v56  ;;  %v2263_v56 = vld [vmem:[%s2886_s1 + $0x3c4] ss:$8 sps:$4 sm:$0xff]  }
  0x63   : > { %1586 = vmatpush1.bf16.msra.mxu1 %v2228_v53  ;;  %v1853_v53 = vld [vmem:[%s2507_s9 + $0xc] sm:$0x3] }
  0x64   : > { %1587 = vmatprep.subr.bf16.mxu1 %v2236_v54  ;;  %v485_v54 = vor.u32 %v484_v42, %v480_v33  ;;  %v2298_v33 = vld [vmem:[%s2886_s1 + $0x424] ss:$8 sps:$4 sm:$0xff]  }
  0x65   : > { %1672 = vmatpush1.bf16.msra.mxu0 %v2231_v59  ;;  %v492_v59 = vor.u32 %v491_v46, %v487_v38  ;;  %v2316_v38 = vld [vmem:[%s2507_s9 + $0x10] ss:$0 sps:$4 sm:$0x66]   ;;  %v2302_v46 = vld [vmem:[%s2886_s1 + $0x440] ss:$8 sps:$4 sm:$0xff]  }
  0x66   : > { %1673 = vmatprep.subr.bf16.mxu0 %v2239_v61  ;;  %v745_v61 = vcombine.high %v727_v45, %v741_v51  ;;  %v553_v2 = vcombine.low %v1852_v52, %v485_v54  ;;  %v521_v44 = vrot.slane %v2316_v38, 1  ;;  %v522_v45 = vrot.slane %v2317_v39, 1  ;;  %v2310_v54 = vld [vmem:[%s2886_s1 + $0x464] ss:$8 sps:$4 sm:$0xff]  }
  0x67   : > { %1588 = vmatpush1.bf16.msra.mxu1 %v2234_v57  ;;  %v2264_v57 = vld [vmem:[%s2886_s1 + $0x1d0] ss:$8 sps:$4 sm:$0xff]  }
  0x68   : > { %1589 = vmatprep.subr.bf16.mxu1 %v2242_v58  ;;  %v1854_v58 = vld [vmem:[%s2507_s9 + $0x10] sm:$0x3]  ;;  %1603 = vmatprep.mubr.bf16.mxu1 %v745_v61  ;;  %v567_v7 = vrot.slane %v553_v2, %v2553_v20  ;;  %v657_v51 = vrot.slane %v521_v44, %v2553_v20  ;;  %v698_v52 = vrot.slane %v522_v45, %v2553_v20 }
  0x69   : > { %1674 = vmatpush1.bf16.msra.mxu0 %v2237_v63  ;;  %v499_v63 = vor.u32 %v498_v55, %v494_v43  ;;  %v520_v43 = vrot.slane %v2315_v37, 1  ;;  %v2311_v61 = vld [vmem:[%s2886_s1 + $0x470] ss:$8 sps:$4 sm:$0xff]  }
  0x6a   : > { %1675 = vmatprep.subr.bf16.mxu0 %v2245_v3  ;;  %v594_v3 = vcombine.low %v1853_v53, %v492_v59  ;;  %v2305_v53 = vld [vmem:[%s2886_s1 + $0x450] ss:$8 sps:$4 sm:$0xff]  }
  0x6b   : > { %1590 = vmatpush1.bf16.msra.mxu1 %v2240_v60  ;;  %v505_v60 = vrot.slane %v503_v49, 1 }
  0x6c   : > { %1591 = vmatprep.subr.bf16.mxu1 %v2248_v62  ;;  %v1855_v62 = vld [vmem:[%s2507_s9 + $0x14] sm:$0x3]  ;;  %v608_v8 = vrot.slane %v594_v3, %v2553_v20  ;;  %v702_v3 = vsub.s32 0, %v2509_v48 }
  0x6d   : > { %1676 = vmatpush1.bf16.msra.mxu0 %v2243_v13  ;;  %v506_v1 = vor.u32 %v505_v60, %v501_v47  ;;  %v2307_v47 = vld [vmem:[%s2886_s1 + $0x454] ss:$8 sps:$4 sm:$0xff]  }
  0x6e   : > { %1677 = vmatprep.subr.bf16.mxu0 %v2251_v17  ;;  %v2267_v17 = vld [vmem:[%s2886_s1 + $0x3d0] ss:$8 sps:$4 sm:$0xff]  }
  0x6f   : > { %1592 = vmatpush1.bf16.msra.mxu1 %v2246_v0  ;;  %v2272_v0 = vld [vmem:[%s2886_s1 + $0x1e4] ss:$8 sps:$4 sm:$0xff]   ;;  %v676_v9 = vcombine.low %v1855_v62, %v506_v1 }
  0x70   : > { %1593 = vmatprep.subr.bf16.mxu1 %v2254_v4  ;;  %v635_v4 = vcombine.low %v1854_v58, %v499_v63  ;;  %v2313_v58 = vld [vmem:[%s2886_s1 + $0x474] ss:$8 sps:$4 sm:$0xff]  }
  0x71   : > { %1678 = vmatpush1.bf16.msra.mxu0 %v2249_v30  ;;  %v690_v13 = vrot.slane %v676_v9, %v2553_v20  ;;  %v2295_v30 = vld [vmem:[%s2886_s1 + $0x414] ss:$8 sps:$4 sm:$0xff]  }
  0x72   : > { %1679 = vmatprep.subr.bf16.mxu0 %v2257_v35  ;;  %v649_v11 = vrot.slane %v635_v4, %v2553_v20  ;;  %v2301_v35 = vld [vmem:[%s2886_s1 + $0x434] ss:$8 sps:$4 sm:$0xff]   ;;  %v316_v4 = vld [vmem:[%s2887_s2] sm:$0x3] }
  0x73   : > { %1594 = vmatpush1.bf16.msra.mxu1 %v2252_v14  ;;  %v1893_v14 = vcombine.low %v567_v7, %v608_v8 }
  0x74   : > { %1595 = vmatprep.subr.bf16.mxu1 %v2260_v18  ;;  %v1895_v15 = vcombine.low %v649_v11, %v690_v13  ;;  %v2276_v18 = vld [vmem:[%s2886_s1 + $0x1f0] ss:$8 sps:$4 sm:$0xff]  }
  0x75   : > { %1680 = vmatpush1.bf16.msra.mxu0 %v2255_v50  ;;  %v763_v16 = vrot.slane %v1893_v14, %v2553_v20  ;;  %v616_v50 = vrot.slane %v520_v43, %v2553_v20 }
  0x76   : > { %1681 = vmatprep.subr.bf16.mxu0 %v2263_v56  ;;  %v777_v21 = vrot.slane %v1895_v15, %v2553_v20  ;;  %v783_v56 = vcombine.low %v657_v51, %v698_v52 }
  0x77   : > { %1596 = vmatpush1.bf16.msra.mxu1 %v2258_v36  ;;  %v2314_v36 = vld [vmem:[%s2507_s9 + $0x8] ss:$0 sps:$4 sm:$0x66]  }
  0x78   : > { %1597 = vmatprep.subr.bf16.mxu1 %v2266_v40  ;;  %v781_v23 = vcombine.high %v763_v16, %v777_v21  ;;  %v780_v28 = vcombine.low %v763_v16, %v777_v21  ;;  %v2299_v40 = vld [vmem:[%s2886_s1 + $0x430] ss:$8 sps:$4 sm:$0xff]   ;;  %v519_v42 = vrot.slane %v2314_v36, 1  ;;  %v797_v60 = vrot.slane %v783_v56, %v2553_v20 }
  0x79   : > { %1682 = vmatpush1.bf16.msra.mxu0 %v2261_v5  ;;  %v706_v5 = vsub.s32 1, %v2509_v48 }
  0x7a   : > { %1683 = vmatprep.subr.bf16.mxu0 %v2269_v6  ;;  %1689 = vmatprep.mubr.bf16.mxu0 %v781_v23  ;;  %v575_v49 = vrot.slane %v519_v42, %v2553_v20  ;;  %v703_v6 = vrot.slane %v316_v4, %v702_v3 }
  0x7b   : > { %1598 = vmatpush1.bf16.msra.mxu1 %v2264_v57  ;;  %v2308_v57 = vld [vmem:[%s2886_s1 + $0x460] ss:$8 sps:$4 sm:$0xff]   ;;  %v707_v7 = vrot.slane %v316_v4, %v706_v5 }
  0x7c   : > { %1599 = vmatprep.subr.bf16.mxu1 %v2272_v0  ;;  %v782_v55 = vcombine.low %v575_v49, %v616_v50 }
  0x7d   : > { %1684 = vmatpush1.bf16.msra.mxu0 %v2267_v17 }
  0x7e   : > { %1685 = vmatprep.subr.bf16.mxu0 %v2275_v19  ;;  %v790_v59 = vrot.slane %v782_v55, %v2553_v20 }
  0x7f   : > { %1600 = vmatpush1.bf16.msra.mxu1 %v2270_v10 }
  0x80   : > { %1601 = vmatprep.subr.bf16.mxu1 %v2278_v12  ;;  %v798_v62 = vcombine.low %v790_v59, %v797_v60 }
  0x81   : > { %1686 = vmatpush1.bf16.msra.mxu0 %v2273_v24 }
  0x82   : > { %1687 = vmatprep.subr.bf16.mxu0 %v2281_v25 }
  0x83   : > { %1602 = vmatpush1.bf16.msra.mxu1 %v2276_v18 }
  0x85   : > { %1688 = vmatpush1.bf16.msra.mxu0 %v2279_v26 }
  0x86   : > { %1604 = vmatmul.mubr.bf16.vlgmr.msra.gmra.mrb[0].mxu1 %v744_v22  ;;  %1700 = vmatprep.subr.bf16.mxu0 %v2292_v27 }
  0x88   : > { %1690 = vmatmul.mubr.bf16.vlgmr.msra.gmra.mrb[0].mxu0 %v780_v28 }
  0x89   : > { %1701 = vmatpush1.bf16.msra.mxu0 %v2290_v29  ;;  %1732 = vmatprep.mubr.bf16.mxu0 %v2327_v32 }
  0x8a   : > { %1702 = vmatprep.subr.bf16.mxu0 %v2295_v30 }
  0x8d   : > { %1703 = vmatpush1.bf16.msra.mxu0 %v2293_v31 }
  0x8e   : > { %1704 = vmatprep.subr.bf16.mxu0 %v2298_v33 }
  0x91   : > { %1705 = vmatpush1.bf16.msra.mxu0 %v2296_v34 }
  0x92   : > { %1706 = vmatprep.subr.bf16.mxu0 %v2301_v35 }
  0x95   : > { %1707 = vmatpush1.bf16.msra.mxu0 %v2299_v40 }
  0x96   : > { %1708 = vmatprep.subr.bf16.mxu0 %v2304_v41 }
  0x99   : > { %1709 = vmatpush1.bf16.msra.mxu0 %v2302_v46 }
  0x9a   : > { %1710 = vmatprep.subr.bf16.mxu0 %v2307_v47 }
  0x9d   : > { %1711 = vmatpush1.bf16.msra.mxu0 %v2305_v53 }
  0x9e   : > { %1712 = vmatprep.subr.bf16.mxu0 %v2310_v54 }
  0xa1   : > { %1713 = vmatpush1.bf16.msra.mxu0 %v2308_v57 }
  0xa2   : > { %1714 = vmatprep.subr.bf16.mxu0 %v2313_v58 }
  0xa5   : > { %1715 = vmatpush1.bf16.msra.mxu0 %v2311_v61 }
  0xa8   : > { %1733 = vmatmul.mubr.bf16.vlgmr.msra.gmra.mrb[0].mxu0 %v798_v62 }
 0x159   : > { %v1605_v63 = vpop.f32.mrb[0].mxu1 }
 0x15a   : > { %v1607_v0 = vpop.f32.mrb[1].mxu1  ;;  %v2047_v8 = vadd.f32 %v1605_v63, %v703_v6 }
 0x15b   : > { %v1609_v1 = vpop.f32.mrb[2].mxu1  ;;  %v2049_v9 = vadd.f32 %v1607_v0, %v707_v7 }
 0x15c   : > { %v1611_v2 = vpop.f32.mrb[3].mxu1  ;;  %v2051_v11 = vadd.f32 %v1609_v1, %v703_v6 }
 0x15d   : > { %v2053_v14 = vadd.f32 %v1611_v2, %v707_v7 }
 0x17b   : > { %v1734_v10 = vpop.f32.mrb[0].mxu0 }
 0x17c   : > { %v2048_v12 = vadd.f32 %v2047_v8, %v1734_v10  ;;  %v1736_v13 = vpop.f32.mrb[1].mxu0 }
 0x17d   : > { %v2050_v15 = vadd.f32 %v2049_v9, %v1736_v13  ;;  %v1738_v16 = vpop.f32.mrb[2].mxu0 }
 0x17e   : > { %v1743_v17 = vmax.f32 %v2048_v12, 0.0  ;;  %v2052_v18 = vadd.f32 %v2051_v11, %v1738_v16  ;;  %v1740_v19 = vpop.f32.mrb[3].mxu0 }
 0x17f   : > { %v1744_v21 = vmax.f32 %v2050_v15, 0.0  ;;  %v2054_v22 = vadd.f32 %v2053_v14, %v1740_v19 }
 0x180   : > { %v1745_v48 = vmax.f32 %v2052_v18, 0.0 }
 0x181   : > { %v2040_v23 = vpack.c.bf16 %v1744_v21, %v1743_v17  ;;  %v1746_v24 = vmax.f32 %v2054_v22, 0.0 }
 0x183   : > { %v1759_v25 = vrot.slane %v2040_v23, %v2553_v20  ;;  %2042 = vst.sshfl [vmem:[%s170_s18] sm:$0x33 pattern:$0x76325410] %v2040_v23  ;;  %v2041_v26 = vpack.c.bf16 %v1746_v24, %v1745_v48 }
 0x185   : > { %v1767_v27 = vcombine.high %v1759_v25, %v1759_v25  ;;  %v1766_v28 = vrot.slane %v2041_v26, %v2553_v20  ;;  %2043 = vst.sshfl [vmem:[%s170_s18 + $0x8] sm:$0x33 pattern:$0x76325410] %v2041_v26 }
 0x187   : > { %1774 = vst [vmem:[%s170_s18 + $0x4] sm:$0xf] %v1767_v27  ;;  %v1768_v29 = vcombine.high %v1766_v28, %v1766_v28 }
 0x189   : > { %1776 = vst [vmem:[%s170_s18 + $0xc] sm:$0xf] %v1768_v29 }
 0x18a PF: > { %s13_s12 = sadd.s32 1, %s2324_s12  }
 0x18b   : > { %p10_p4 = scmp.ge.s32.totalorder %s13_s12, 6  }
 0x18d   :  { %12 = sbr.rel (!%p10_p4) target bundleno = 1 (0x1), region = 64 }

// kernel: vgg_perceptual_loss.21
= control target key start
LH: loop header
LB: loop body
LE: loop exit
PB: predicated region body
PF: predicated region fallthrough
CT: control target
= control target key end

     0   :  { %s4263_s12 = smov 0   ;;  %s5323_s0 = inlined_call_operand.vmem [shape: bf16[4,6,6,256], index: 0, kind: input, shape index: {}]   ;;  %s5324_s1 = inlined_call_operand.vmem [shape: bf16[2304,256], index: 1, kind: input, shape index: {}]   ;;  %s5325_s2 = inlined_call_operand.vmem [shape: f32[1,256], index: 2, kind: input, shape index: {}]   ;;  %s5326_s3 = inlined_call_operand.vmem [shape: bf16[4,4,4,256], index: 3, kind: output, shape index: {}]  }
   0x1 LB: > { %s3281_s13 = sadd.s32 4294967295, %s4240_s12   ;;  %p3285_p0 = scmp.ge.s32.totalorder %s4240_s12, 1  ;;  %s4240_s12 = sphi %s4263_s12, %s13_s12  }
   0x2   : > { %p137_p1 = scmp.lt.s32.totalorder %s4240_s12, 5 }
   0x4   : > { %p138_p2 = pnand %p3285_p0, %p137_p1 }
   0x5   : > { %v3754_v0 = vld [vmem:[%s5324_s1 + $0x4] ss:$8 sps:$4 sm:$0xff] (!%p138_p2)   ;;  %v3758_v2 = vld [vmem:[%s5324_s1] ss:$8 sps:$4 sm:$0xff] (!%p138_p2)   ;;  %v3760_v4 = vld [vmem:[%s5324_s1 + $0x14] ss:$8 sps:$4 sm:$0xff] (!%p138_p2)   ;;  %v882_v44 = vlaneseq (!%p138_p2) }
   0x6   : > { %141 = sbr.rel (%p138_p2) target bundleno = 554 (0x22a), region = 32  ;;  %v3756_v1 = vld [vmem:[%s5324_s1 + $0x404] ss:$8 sps:$4 sm:$0xff] (!%p138_p2)   ;;  %2805 = vmatprep.subr.bf16.mxu1 (!%p138_p2), %v3754_v0  ;;  %v3759_v3 = vld [vmem:[%s5324_s1 + $0x400] ss:$8 sps:$4 sm:$0xff] (!%p138_p2)   ;;  %p161_p3 = scmp.lt.s32.totalorder (!%p138_p2), %s3281_s13, 3 }
   0x7   : > { %2977 = vmatprep.subr.bf16.mxu0 (!%p138_p2), %v3756_v1  ;;  %2806 = vmatpush1.bf16.msra.mxu1 (!%p138_p2), %v3758_v2  ;;  %v3762_v5 = vld [vmem:[%s5324_s1 + $0x414] ss:$8 sps:$4 sm:$0xff] (!%p138_p2)   ;;  %v3764_v6 = vld [vmem:[%s5324_s1 + $0x10] ss:$8 sps:$4 sm:$0xff] (!%p138_p2)   ;;  %v3766_v8 = vld [vmem:[%s5324_s1 + $0x24] ss:$8 sps:$4 sm:$0xff] (!%p138_p2)  }
   0x8   : > { %2978 = vmatpush1.bf16.msra.mxu0 (!%p138_p2), %v3759_v3  ;;  %2807 = vmatprep.subr.bf16.mxu1 (!%p138_p2), %v3760_v4  ;;  %v3765_v7 = vld [vmem:[%s5324_s1 + $0x410] ss:$8 sps:$4 sm:$0xff] (!%p138_p2)   ;;  %v3768_v9 = vld [vmem:[%s5324_s1 + $0x424] ss:$8 sps:$4 sm:$0xff] (!%p138_p2)   ;;  %v3770_v10 = vld [vmem:[%s5324_s1 + $0x20] ss:$8 sps:$4 sm:$0xff] (!%p138_p2)  }
   0x9   : > { %2979 = vmatprep.subr.bf16.mxu0 (!%p138_p2), %v3762_v5  ;;  %v3771_v11 = vld [vmem:[%s5324_s1 + $0x420] ss:$8 sps:$4 sm:$0xff] (!%p138_p2)   ;;  %v3772_v12 = vld [vmem:[%s5324_s1 + $0x34] ss:$8 sps:$4 sm:$0xff] (!%p138_p2)   ;;  %v3776_v14 = vld [vmem:[%s5324_s1 + $0x30] ss:$8 sps:$4 sm:$0xff] (!%p138_p2)  }
   0xa   : > { %v3774_v13 = vld [vmem:[%s5324_s1 + $0x434] ss:$8 sps:$4 sm:$0xff] (!%p138_p2)   ;;  %v3777_v15 = vld [vmem:[%s5324_s1 + $0x430] ss:$8 sps:$4 sm:$0xff] (!%p138_p2)   ;;  %v3778_v16 = vld [vmem:[%s5324_s1 + $0x44] ss:$8 sps:$4 sm:$0xff] (!%p138_p2)  }
   0xb   : > { %2808 = vmatpush1.bf16.msra.mxu1 (!%p138_p2), %v3764_v6  ;;  %v3780_v17 = vld [vmem:[%s5324_s1 + $0x444] ss:$8 sps:$4 sm:$0xff] (!%p138_p2)   ;;  %v3782_v18 = vld [vmem:[%s5324_s1 + $0x40] ss:$8 sps:$4 sm:$0xff] (!%p138_p2)   ;;  %v3784_v20 = vld [vmem:[%s5324_s1 + $0x54] ss:$8 sps:$4 sm:$0xff] (!%p138_p2)  }
   0xc   : > { %2980 = vmatpush1.bf16.msra.mxu0 (!%p138_p2), %v3765_v7  ;;  %2809 = vmatprep.subr.bf16.mxu1 (!%p138_p2), %v3766_v8  ;;  %v3783_v19 = vld [vmem:[%s5324_s1 + $0x440] ss:$8 sps:$4 sm:$0xff] (!%p138_p2)   ;;  %v3786_v21 = vld [vmem:[%s5324_s1 + $0x454] ss:$8 sps:$4 sm:$0xff] (!%p138_p2)   ;;  %v3788_v22 = vld [vmem:[%s5324_s1 + $0x50] ss:$8 sps:$4 sm:$0xff] (!%p138_p2)  }
   0xd   : > { %2981 = vmatprep.subr.bf16.mxu0 %v3768_v9  ;;  %v3789_v23 = vld [vmem:[%s5324_s1 + $0x450] ss:$8 sps:$4 sm:$0xff]   ;;  %v3790_v24 = vld [vmem:[%s5324_s1 + $0x64] ss:$8 sps:$4 sm:$0xff]   ;;  %v3794_v26 = vld [vmem:[%s5324_s1 + $0x60] ss:$8 sps:$4 sm:$0xff]  }
   0xe   : > { %v3792_v25 = vld [vmem:[%s5324_s1 + $0x464] ss:$8 sps:$4 sm:$0xff]   ;;  %v3795_v27 = vld [vmem:[%s5324_s1 + $0x460] ss:$8 sps:$4 sm:$0xff]   ;;  %v3796_v28 = vld [vmem:[%s5324_s1 + $0x74] ss:$8 sps:$4 sm:$0xff]  }
   0xf   : > { %2810 = vmatpush1.bf16.msra.mxu1 %v3770_v10  ;;  %v3798_v29 = vld [vmem:[%s5324_s1 + $0x474] ss:$8 sps:$4 sm:$0xff]   ;;  %v3800_v30 = vld [vmem:[%s5324_s1 + $0x70] ss:$8 sps:$4 sm:$0xff]   ;;  %v3802_v32 = vld [vmem:[%s5324_s1 + $0x84] ss:$8 sps:$4 sm:$0xff]  }
  0x10   : > { %2982 = vmatpush1.bf16.msra.mxu0 %v3771_v11  ;;  %2811 = vmatprep.subr.bf16.mxu1 %v3772_v12  ;;  %v3801_v31 = vld [vmem:[%s5324_s1 + $0x470] ss:$8 sps:$4 sm:$0xff]   ;;  %v3804_v33 = vld [vmem:[%s5324_s1 + $0x484] ss:$8 sps:$4 sm:$0xff]   ;;  %v3806_v34 = vld [vmem:[%s5324_s1 + $0x80] ss:$8 sps:$4 sm:$0xff]  }
  0x11   : > { %2983 = vmatprep.subr.bf16.mxu0 %v3774_v13  ;;  %v3807_v35 = vld [vmem:[%s5324_s1 + $0x480] ss:$8 sps:$4 sm:$0xff]   ;;  %v3808_v36 = vld [vmem:[%s5324_s1 + $0x94] ss:$8 sps:$4 sm:$0xff]   ;;  %s5328_s13 = smov (!%p161_p3, %s3281_s13), 3  ;;  %v4416_v50 = vshrl.u32 %v882_v44, 7 }
  0x12   : > { %v3810_v37 = vld [vmem:[%s5324_s1 + $0x494] ss:$8 sps:$4 sm:$0xff]   ;;  %v3812_v38 = vld [vmem:[%s5324_s1 + $0x90] ss:$8 sps:$4 sm:$0xff]   ;;  %v3814_v40 = vld [vmem:[%s5324_s1 + $0xa4] ss:$8 sps:$4 sm:$0xff]  }
  0x13   : > { %2812 = vmatpush1.bf16.msra.mxu1 %v3776_v14  ;;  %v3813_v39 = vld [vmem:[%s5324_s1 + $0x490] ss:$8 sps:$4 sm:$0xff]   ;;  %v3816_v41 = vld [vmem:[%s5324_s1 + $0x4a4] ss:$8 sps:$4 sm:$0xff]   ;;  %v4242_v42 = vmov 1983009808  }
  0x14   : > { %2984 = vmatpush1.bf16.msra.mxu0 %v3777_v15  ;;  %2813 = vmatprep.subr.bf16.mxu1 %v3778_v16  ;;  %v880_v43 = vunpack.c.l.s4 %v4242_v42  ;;  %s3744_s23 = smul.u32 48, %s5328_s13  ;;  %v3818_v45 = vld [vmem:[%s5324_s1 + $0xa0] ss:$8 sps:$4 sm:$0xff]   ;;  %v3820_v47 = vld [vmem:[%s5324_s1 + $0xb4] ss:$8 sps:$4 sm:$0xff]   ;;  %s3695_s7 = sshll.u32 %s5328_s13, 4 }
  0x15   : > { %2985 = vmatprep.subr.bf16.mxu0 %v3780_v17  ;;  %v3819_v46 = vld [vmem:[%s5324_s1 + $0x4a0] ss:$8 sps:$4 sm:$0xff]   ;;  %v3822_v48 = vld [vmem:[%s5324_s1 + $0x4b4] ss:$8 sps:$4 sm:$0xff]   ;;  %v3824_v51 = vld [vmem:[%s5324_s1 + $0xb0] ss:$8 sps:$4 sm:$0xff]   ;;  %s170_s10 = scalar_lea.vmem %s5326_s3, %s3695_s7 }
  0x16   : > { %v881_v49 = vunpack.c.0.s8 %v880_v43  ;;  %v3825_v52 = vld [vmem:[%s5324_s1 + $0x4b0] ss:$8 sps:$4 sm:$0xff]   ;;  %s4427_s11 = scalar_lea.vmem %s5323_s0, %s3744_s23  ;;  %v3826_v54 = vld [vmem:[%s5324_s1 + $0xc4] ss:$8 sps:$4 sm:$0xff]   ;;  %v3830_v60 = vld [vmem:[%s5324_s1 + $0xc0] ss:$8 sps:$4 sm:$0xff]  }
  0x17   : > { %2814 = vmatpush1.bf16.msra.mxu1 %v3782_v18  ;;  %v3696_v53 = vld.sshfl [vmem:[%s4427_s11] sm:$0xf pattern:$0x76325410]  ;;  %v3293_v62 = vld [vmem:[%s4427_s11 + $0x8] sm:$0x77] }
  0x18   : > { %2986 = vmatpush1.bf16.msra.mxu0 %v3783_v19  ;;  %2815 = vmatprep.subr.bf16.mxu1 %v3784_v20  ;;  %v3699_v55 = vld.sshfl [vmem:[%s4427_s11 + $0x8] sm:$0xf pattern:$0x76325410]  ;;  %v4439_v58 = vsub.s32 %v881_v49, %v4416_v50  ;;  %v3294_v1 = vld [vmem:[%s4427_s11 + $0x10] sm:$0x77]  ;;  %v3345_v4 = vcombine.low %v3293_v62, %v3293_v62  ;;  %v3346_v5 = vcombine.high %v3293_v62, %v3293_v62 }
  0x19   : > { %2987 = vmatprep.subr.bf16.mxu0 %v3786_v21  ;;  %v3828_v56 = vld [vmem:[%s5324_s1 + $0x4c4] ss:$8 sps:$4 sm:$0xff]   ;;  %v3702_v57 = vld.sshfl [vmem:[%s4427_s11 + $0x10] sm:$0xf pattern:$0x76325410]  ;;  %v3385_v59 = vcombine.low %v3696_v53, %v3699_v55  ;;  %v3347_v8 = vcombine.low %v3294_v1, %v3294_v1  ;;  %v3348_v9 = vcombine.high %v3294_v1, %v3294_v1 }
  0x1a   : > { %v3705_v61 = vld.sshfl [vmem:[%s4427_s11 + $0x18] sm:$0xf pattern:$0x76325410]  ;;  %v3296_v3 = vld [vmem:[%s4427_s11 + $0x20] sm:$0x77] }
  0x1b   : > { %2816 = vmatpush1.bf16.msra.mxu1 %v3788_v22  ;;  %v3387_v63 = vcombine.low %v3702_v57, %v3705_v61  ;;  %v4447_v0 = vrot.slane %v3385_v59, %v4439_v58  ;;  %v3295_v2 = vld [vmem:[%s4427_s11 + $0x18] sm:$0x77]  ;;  %v3831_v6 = vld [vmem:[%s5324_s1 + $0x4c0] ss:$8 sps:$4 sm:$0xff]   ;;  %v3351_v14 = vcombine.low %v3296_v3, %v3296_v3  ;;  %v663_v15 = vshrl.u32 %v3345_v4, 16 }
  0x1c   : > { %2988 = vmatpush1.bf16.msra.mxu0 %v3789_v23  ;;  %2817 = vmatprep.subr.bf16.mxu1 %v3790_v24  ;;  %v3832_v7 = vld [vmem:[%s5324_s1 + $0xd4] ss:$8 sps:$4 sm:$0xff]   ;;  %v3349_v10 = vcombine.low %v3295_v2, %v3295_v2  ;;  %v3350_v13 = vcombine.high %v3295_v2, %v3295_v2  ;;  %v3836_v16 = vld [vmem:[%s5324_s1 + $0xd0] ss:$8 sps:$4 sm:$0xff]   ;;  %v3352_v18 = vcombine.high %v3296_v3, %v3296_v3  ;;  %v665_v19 = vshll.u32 %v3345_v4, 16 }
  0x1d   : > { %2989 = vmatprep.subr.bf16.mxu0 %v3792_v25  ;;  %v3834_v11 = vld [vmem:[%s5324_s1 + $0x4d4] ss:$8 sps:$4 sm:$0xff]   ;;  %v4462_v12 = vrot.slane %v3387_v63, %v4439_v58  ;;  %v3837_v17 = vld [vmem:[%s5324_s1 + $0x4d0] ss:$8 sps:$4 sm:$0xff]   ;;  %v670_v20 = vshrl.u32 %v3346_v5, 16  ;;  %v672_v21 = vshll.u32 %v3346_v5, 16 }
  0x1e   : > { %v3838_v22 = vld [vmem:[%s5324_s1 + $0xe4] ss:$8 sps:$4 sm:$0xff]   ;;  %v677_v24 = vshrl.u32 %v3347_v8, 16  ;;  %v679_v25 = vshll.u32 %v3347_v8, 16  ;;  %v707_v43 = vshll.u32 %v3351_v14, 16 }
  0x1f   : > { %2818 = vmatpush1.bf16.msra.mxu1 %v3794_v26  ;;  %v1218_v23 = vcombine.high %v4447_v0, %v4462_v12  ;;  %v684_v26 = vshrl.u32 %v3348_v9, 16  ;;  %v3842_v44 = vld [vmem:[%s5324_s1 + $0xe0] ss:$8 sps:$4 sm:$0xff]   ;;  %v3848_v62 = vld [vmem:[%s5324_s1 + $0xf0] ss:$8 sps:$4 sm:$0xff]   ;;  %v1217_v8 = vcombine.low %v4447_v0, %v4462_v12 }
  0x20   : > { %2990 = vmatpush1.bf16.msra.mxu0 %v3795_v27  ;;  %2819 = vmatprep.subr.bf16.mxu1 %v3796_v28  ;;  %v3840_v27 = vld [vmem:[%s5324_s1 + $0x4e4] ss:$8 sps:$4 sm:$0xff]   ;;  %v667_v28 = vrot.slane %v665_v19, 1  ;;  %v709_v55 = vrot.slane %v707_v43, 1  ;;  %v3849_v63 = vld [vmem:[%s5324_s1 + $0x4f0] ss:$8 sps:$4 sm:$0xff]  }
  0x21   : > { %2991 = vmatprep.subr.bf16.mxu0 %v3798_v29  ;;  %v674_v29 = vrot.slane %v672_v21, 1  ;;  %2837 = vmatprep.mubr.bf16.mxu1 %v1218_v23  ;;  %v3852_v3 = vld [vmem:[%s5324_s1 + $0x104] ss:$8 sps:$4 sm:$0xff]   ;;  %v3864_v12 = vld [vmem:[%s5324_s1 + $0x110] ss:$8 sps:$4 sm:$0xff]  }
  0x22   : > { %v3863_v4 = vld [vmem:[%s5324_s1 + $0x504] ss:$8 sps:$4 sm:$0xff]   ;;  %v3869_v19 = vld [vmem:[%s5324_s1 + $0x514] ss:$8 sps:$4 sm:$0xff]  }
  0x23   : > { %2820 = vmatpush1.bf16.msra.mxu1 %v3800_v30  ;;  %v686_v30 = vshll.u32 %v3348_v9, 16  ;;  %v3850_v9 = vld [vmem:[%s5324_s1 + $0x100] ss:$8 sps:$4 sm:$0xff]   ;;  %v3878_v21 = vld [vmem:[%s5324_s1 + $0x134] ss:$8 sps:$4 sm:$0xff]  }
  0x24   : > { %2992 = vmatpush1.bf16.msra.mxu0 %v3801_v31  ;;  %2821 = vmatprep.subr.bf16.mxu1 %v3802_v32  ;;  %v691_v31 = vshrl.u32 %v3349_v10, 16  ;;  %v681_v32 = vrot.slane %v679_v25, 1  ;;  %v3875_v23 = vld [vmem:[%s5324_s1 + $0x524] ss:$8 sps:$4 sm:$0xff]   ;;  %v466_v43 = vld [vmem:[%s4427_s11 + $0x10] sm:$0x77] }
  0x25   : > { %2993 = vmatprep.subr.bf16.mxu0 %v3804_v33  ;;  %v693_v33 = vshll.u32 %v3349_v10, 16  ;;  %v3884_v25 = vld [vmem:[%s5324_s1 + $0x144] ss:$8 sps:$4 sm:$0xff]  }
  0x27   : > { %2822 = vmatpush1.bf16.msra.mxu1 %v3806_v34  ;;  %v698_v34 = vshrl.u32 %v3350_v13, 16 }
  0x28   : > { %2994 = vmatpush1.bf16.msra.mxu0 %v3807_v35  ;;  %2823 = vmatprep.subr.bf16.mxu1 %v3808_v36  ;;  %v700_v35 = vshll.u32 %v3350_v13, 16  ;;  %v668_v36 = vor.u32 %v667_v28, %v663_v15  ;;  %v3872_v15 = vld [vmem:[%s5324_s1 + $0x124] ss:$8 sps:$4 sm:$0xff]   ;;  %v3882_v28 = vld [vmem:[%s5324_s1 + $0x140] ss:$8 sps:$4 sm:$0xff]  }
  0x29   : > { %2995 = vmatprep.subr.bf16.mxu0 %v3810_v37  ;;  %v675_v37 = vor.u32 %v674_v29, %v670_v20  ;;  %v3870_v20 = vld [vmem:[%s5324_s1 + $0x120] ss:$8 sps:$4 sm:$0xff]   ;;  %v3890_v29 = vld [vmem:[%s5324_s1 + $0x154] ss:$8 sps:$4 sm:$0xff]  }
  0x2a   : > { %v702_v42 = vrot.slane %v700_v35, 1  ;;  %v3893_v35 = vld [vmem:[%s5324_s1 + $0x554] ss:$8 sps:$4 sm:$0xff]  }
  0x2b   : > { %2824 = vmatpush1.bf16.msra.mxu1 %v3812_v38  ;;  %v688_v38 = vrot.slane %v686_v30, 1  ;;  %v904_v49 = vcombine.low %v668_v36, %v675_v37  ;;  %v3879_v30 = vld [vmem:[%s5324_s1 + $0x530] ss:$8 sps:$4 sm:$0xff]   ;;  %v3894_v36 = vld [vmem:[%s5324_s1 + $0x160] ss:$8 sps:$4 sm:$0xff]  }
  0x2c   : > { %2996 = vmatpush1.bf16.msra.mxu0 %v3813_v39  ;;  %2825 = vmatprep.subr.bf16.mxu1 %v3814_v40  ;;  %v705_v39 = vshrl.u32 %v3351_v14, 16  ;;  %v682_v40 = vor.u32 %v681_v32, %v677_v24  ;;  %v3876_v24 = vld [vmem:[%s5324_s1 + $0x130] ss:$8 sps:$4 sm:$0xff]  }
  0x2d   : > { %2997 = vmatprep.subr.bf16.mxu0 %v3816_v41  ;;  %v695_v41 = vrot.slane %v693_v33, 1  ;;  %v912_v57 = vrot.slane %v904_v49, %v4439_v58  ;;  %v3888_v32 = vld [vmem:[%s5324_s1 + $0x150] ss:$8 sps:$4 sm:$0xff]   ;;  %v3896_v33 = vld [vmem:[%s5324_s1 + $0x164] ss:$8 sps:$4 sm:$0xff]  }
  0x2e   : > { %v3891_v37 = vld [vmem:[%s5324_s1 + $0x550] ss:$8 sps:$4 sm:$0xff]   ;;  %v3908_v49 = vld [vmem:[%s5324_s1 + $0x184] ss:$8 sps:$4 sm:$0xff]  }
  0x2f   : > { %2826 = vmatpush1.bf16.msra.mxu1 %v3818_v45  ;;  %v3843_v45 = vld [vmem:[%s5324_s1 + $0x4e0] ss:$8 sps:$4 sm:$0xff]   ;;  %v696_v53 = vor.u32 %v695_v41, %v691_v31  ;;  %v3887_v31 = vld [vmem:[%s5324_s1 + $0x544] ss:$8 sps:$4 sm:$0xff]  }
  0x30   : > { %2998 = vmatpush1.bf16.msra.mxu0 %v3819_v46  ;;  %2827 = vmatprep.subr.bf16.mxu1 %v3820_v47  ;;  %v689_v46 = vor.u32 %v688_v38, %v684_v26  ;;  %v712_v47 = vshrl.u32 %v3352_v18, 16  ;;  %v3873_v26 = vld [vmem:[%s5324_s1 + $0x520] ss:$8 sps:$4 sm:$0xff]   ;;  %v3902_v38 = vld [vmem:[%s5324_s1 + $0x174] ss:$8 sps:$4 sm:$0xff]  }
  0x31   : > { %2999 = vmatprep.subr.bf16.mxu0 %v3822_v48  ;;  %v714_v48 = vshll.u32 %v3352_v18, 16  ;;  %v464_v41 = vld [vmem:[%s4427_s11] sm:$0x77] }
  0x32   : > { %v980_v59 = vcombine.low %v682_v40, %v689_v46  ;;  %v3900_v40 = vld [vmem:[%s5324_s1 + $0x170] ss:$8 sps:$4 sm:$0xff]   ;;  %v3322_v46 = vcombine.high %v464_v41, %v464_v41 }
  0x33   : > { %2828 = vmatpush1.bf16.msra.mxu1 %v3824_v51  ;;  %v3844_v51 = vld [vmem:[%s5324_s1 + $0xf4] ss:$8 sps:$4 sm:$0xff]  }
  0x34   : > { %3000 = vmatpush1.bf16.msra.mxu0 %v3825_v52  ;;  %2829 = vmatprep.subr.bf16.mxu1 %v3826_v54  ;;  %v3846_v52 = vld [vmem:[%s5324_s1 + $0x4f4] ss:$8 sps:$4 sm:$0xff]   ;;  %v703_v54 = vor.u32 %v702_v42, %v698_v34  ;;  %v988_v2 = vrot.slane %v980_v59, %v4439_v58  ;;  %v3885_v34 = vld [vmem:[%s5324_s1 + $0x540] ss:$8 sps:$4 sm:$0xff]   ;;  %v546_v59 = vshrl.u32 %v3322_v46, 16 }
  0x35   : > { %3001 = vmatprep.subr.bf16.mxu0 %v3828_v56  ;;  %v716_v56 = vrot.slane %v714_v48, 1  ;;  %v465_v42 = vld [vmem:[%s4427_s11 + $0x8] sm:$0x77] }
  0x36   : > { %v1056_v61 = vcombine.low %v696_v53, %v703_v54  ;;  %v3324_v48 = vcombine.high %v465_v42, %v465_v42 }
  0x37   : > { %2830 = vmatpush1.bf16.msra.mxu1 %v3830_v60  ;;  %v710_v60 = vor.u32 %v709_v55, %v705_v39  ;;  %v717_v1 = vor.u32 %v716_v56, %v712_v47  ;;  %v3899_v39 = vld [vmem:[%s5324_s1 + $0x564] ss:$8 sps:$4 sm:$0xff]   ;;  %v3323_v47 = vcombine.low %v465_v42, %v465_v42  ;;  %v3897_v55 = vld [vmem:[%s5324_s1 + $0x560] ss:$8 sps:$4 sm:$0xff]  }
  0x38   : > { %3002 = vmatpush1.bf16.msra.mxu0 %v3831_v6  ;;  %2831 = vmatprep.subr.bf16.mxu1 %v3832_v7  ;;  %v1064_v5 = vrot.slane %v1056_v61, %v4439_v58  ;;  %v3393_v7 = vcombine.low %v912_v57, %v988_v2  ;;  %v3905_v61 = vld [vmem:[%s5324_s1 + $0x574] ss:$8 sps:$4 sm:$0xff]   ;;  %v562_v2 = vshll.u32 %v3324_v48, 16 }
  0x39   : > { %3003 = vmatprep.subr.bf16.mxu0 %v3834_v11  ;;  %v1132_v6 = vcombine.low %v710_v60, %v717_v1  ;;  %v3866_v11 = vld [vmem:[%s5324_s1 + $0x114] ss:$8 sps:$4 sm:$0xff]   ;;  %v548_v60 = vshll.u32 %v3322_v46, 16  ;;  %v560_v1 = vshrl.u32 %v3324_v48, 16  ;;  %v3918_v46 = vld [vmem:[%s5324_s1 + $0x1a0] ss:$8 sps:$4 sm:$0xff]  }
  0x3a   : > { %v1267_v14 = vrot.slane %v3393_v7, %v4439_v58 }
  0x3b   : > { %2832 = vmatpush1.bf16.msra.mxu1 %v3836_v16  ;;  %v1140_v10 = vrot.slane %v1132_v6, %v4439_v58  ;;  %v550_v6 = vrot.slane %v548_v60, 1 }
  0x3c   : > { %3004 = vmatpush1.bf16.msra.mxu0 %v3837_v17  ;;  %2833 = vmatprep.subr.bf16.mxu1 %v3838_v22  ;;  %v3861_v17 = vld [vmem:[%s5324_s1 + $0x500] ss:$8 sps:$4 sm:$0xff]   ;;  %v3867_v22 = vld [vmem:[%s5324_s1 + $0x510] ss:$8 sps:$4 sm:$0xff]  }
  0x3d   : > { %3005 = vmatprep.subr.bf16.mxu0 %v3840_v27  ;;  %v3395_v13 = vcombine.low %v1064_v5, %v1140_v10  ;;  %v3881_v27 = vld [vmem:[%s5324_s1 + $0x534] ss:$8 sps:$4 sm:$0xff]  }
  0x3e   : > { %v3914_v10 = vld [vmem:[%s5324_s1 + $0x194] ss:$8 sps:$4 sm:$0xff]  }
  0x3f   : > { %2834 = vmatpush1.bf16.msra.mxu1 %v3842_v44  ;;  %v1281_v0 = vrot.slane %v3395_v13, %v4439_v58  ;;  %v467_v44 = vld [vmem:[%s4427_s11 + $0x18] sm:$0x77]  ;;  %v564_v13 = vrot.slane %v562_v2, 1 }
  0x40   : > { %3006 = vmatpush1.bf16.msra.mxu0 %v3843_v45  ;;  %2835 = vmatprep.subr.bf16.mxu1 %v3844_v51  ;;  %v3321_v45 = vcombine.low %v464_v41, %v464_v41  ;;  %v3325_v51 = vcombine.low %v466_v43, %v466_v43  ;;  %v4598_v53 = vcombine.low %v467_v44, %v467_v44  ;;  %v3917_v41 = vld [vmem:[%s5324_s1 + $0x594] ss:$8 sps:$4 sm:$0xff]  }
  0x41   : > { %3007 = vmatprep.subr.bf16.mxu0 %v3846_v52  ;;  %v1290_v16 = vcombine.high %v1267_v14, %v1281_v0  ;;  %v1289_v18 = vcombine.low %v1267_v14, %v1281_v0  ;;  %v3326_v52 = vcombine.high %v466_v43, %v466_v43  ;;  %v4600_v54 = vcombine.high %v467_v44, %v467_v44 }
  0x42   : > { %v539_v56 = vshrl.u32 %v3321_v45, 16  ;;  %v541_v57 = vshll.u32 %v3321_v45, 16  ;;  %v567_v7 = vshrl.u32 %v3325_v51, 16 }
  0x43   : > { %2836 = vmatpush1.bf16.msra.mxu1 %v3848_v62  ;;  %3009 = vmatprep.mubr.bf16.mxu0 %v1290_v16  ;;  %v553_v62 = vshrl.u32 %v3323_v47, 16  ;;  %v574_v14 = vshrl.u32 %v3326_v52, 16  ;;  %v576_v0 = vshll.u32 %v3326_v52, 16  ;;  %v551_v16 = vor.u32 %v550_v6, %v546_v59  ;;  %v3926_v52 = vld [vmem:[%s5324_s1 + $0x1b4] ss:$8 sps:$4 sm:$0xff]  }
  0x44   : > { %3008 = vmatpush1.bf16.msra.mxu0 %v3849_v63  ;;  %2848 = vmatprep.subr.bf16.mxu1 %v3852_v3  ;;  %v555_v63 = vshll.u32 %v3323_v47, 16  ;;  %v3903_v3 = vld [vmem:[%s5324_s1 + $0x570] ss:$8 sps:$4 sm:$0xff]   ;;  %v543_v5 = vrot.slane %v541_v57, 1 }
  0x45   : > { %3020 = vmatprep.subr.bf16.mxu0 %v3863_v4  ;;  %v3906_v4 = vld [vmem:[%s5324_s1 + $0x180] ss:$8 sps:$4 sm:$0xff]   ;;  %v3915_v57 = vld [vmem:[%s5324_s1 + $0x590] ss:$8 sps:$4 sm:$0xff]  }
  0x46   : > { %2838 = vmatmul.mubr.bf16.vlgmr.msra.gmra.mrb[0].mxu1 %v1217_v8  ;;  %v569_v8 = vshll.u32 %v3325_v51, 16 }
  0x47   : > { %2849 = vmatpush1.bf16.msra.mxu1 %v3850_v9  ;;  %3010 = vmatmul.mubr.bf16.vlgmr.msra.gmra.mrb[0].mxu0 %v1289_v18  ;;  %v3911_v9 = vld [vmem:[%s5324_s1 + $0x584] ss:$8 sps:$4 sm:$0xff]   ;;  %v581_v18 = vshrl.u32 %v4598_v53, 16 }
  0x48   : > { %2850 = vmatprep.subr.bf16.mxu1 %v3866_v11  ;;  %3021 = vmatpush1.bf16.msra.mxu0 %v3861_v17  ;;  %v557_v11 = vrot.slane %v555_v63, 1  ;;  %v571_v17 = vrot.slane %v569_v8, 1  ;;  %v3923_v63 = vld [vmem:[%s5324_s1 + $0x5a4] ss:$8 sps:$4 sm:$0xff]  }
  0x49   : > { %3022 = vmatprep.subr.bf16.mxu0 %v3869_v19  ;;  %v3297_v19 = vld [vmem:[%s4427_s11 + $0x8] sm:$0x66] }
  0x4b   : > { %2851 = vmatpush1.bf16.msra.mxu1 %v3864_v12  ;;  %v3912_v12 = vld [vmem:[%s5324_s1 + $0x190] ss:$8 sps:$4 sm:$0xff]  }
  0x4c   : > { %2852 = vmatprep.subr.bf16.mxu1 %v3872_v15  ;;  %3023 = vmatpush1.bf16.msra.mxu0 %v3867_v22  ;;  %v544_v15 = vor.u32 %v543_v5, %v539_v56  ;;  %v578_v22 = vrot.slane %v576_v0, 1 }
  0x4d   : > { %3024 = vmatprep.subr.bf16.mxu0 %v3875_v23  ;;  %v583_v23 = vshll.u32 %v4598_v53, 16 }
  0x4f   : > { %2853 = vmatpush1.bf16.msra.mxu1 %v3870_v20  ;;  %v558_v20 = vor.u32 %v557_v11, %v553_v62 }
  0x50   : > { %2854 = vmatprep.subr.bf16.mxu1 %v3878_v21  ;;  %3025 = vmatpush1.bf16.msra.mxu0 %v3873_v26  ;;  %v565_v21 = vor.u32 %v564_v13, %v560_v1  ;;  %v572_v26 = vor.u32 %v571_v17, %v567_v7  ;;  %v3921_v13 = vld [vmem:[%s5324_s1 + $0x5a0] ss:$8 sps:$4 sm:$0xff]  }
  0x51   : > { %3026 = vmatprep.subr.bf16.mxu0 %v3881_v27  ;;  %v588_v27 = vshrl.u32 %v4600_v54, 16 }
  0x53   : > { %2855 = vmatpush1.bf16.msra.mxu1 %v3876_v24  ;;  %v3298_v24 = vld [vmem:[%s4427_s11 + $0x10] sm:$0x66] }
  0x54   : > { %2856 = vmatprep.subr.bf16.mxu1 %v3884_v25  ;;  %3027 = vmatpush1.bf16.msra.mxu0 %v3879_v30  ;;  %v3920_v25 = vld [vmem:[%s5324_s1 + $0x1a4] ss:$8 sps:$4 sm:$0xff]   ;;  %v3299_v30 = vld [vmem:[%s4427_s11 + $0x18] sm:$0x66]  ;;  %v3356_v45 = vcombine.high %v3298_v24, %v3298_v24 }
  0x55   : > { %3028 = vmatprep.subr.bf16.mxu0 %v3887_v31  ;;  %v579_v31 = vor.u32 %v578_v22, %v574_v14  ;;  %v3357_v48 = vcombine.low %v3299_v30, %v3299_v30  ;;  %v3938_v22 = vld [vmem:[%s5324_s1 + $0x1d4] ss:$8 sps:$4 sm:$0xff]  }
  0x56   : > { %v741_v62 = vrot.slane %v3356_v45, 1  ;;  %v3951_v45 = vld [vmem:[%s5324_s1 + $0x5f0] ss:$8 sps:$4 sm:$0xff]  }
  0x57   : > { %2857 = vmatpush1.bf16.msra.mxu1 %v3882_v28  ;;  %v590_v28 = vshll.u32 %v4600_v54, 16  ;;  %v1023_v44 = vcombine.low %v572_v26, %v579_v31  ;;  %v742_v1 = vrot.slane %v3357_v48, 1  ;;  %v3933_v31 = vld [vmem:[%s5324_s1 + $0x5c0] ss:$8 sps:$4 sm:$0xff]  }
  0x58   : > { %2858 = vmatprep.subr.bf16.mxu1 %v3890_v29  ;;  %3029 = vmatpush1.bf16.msra.mxu0 %v3885_v34  ;;  %v871_v29 = vcombine.low %v544_v15, %v551_v16  ;;  %v3300_v34 = vld [vmem:[%s4427_s11 + $0x20] sm:$0x66]  ;;  %v3929_v16 = vld [vmem:[%s5324_s1 + $0x5b4] ss:$8 sps:$4 sm:$0xff]  }
  0x59   : > { %3030 = vmatprep.subr.bf16.mxu0 %v3893_v35  ;;  %v3353_v35 = vcombine.low %v3297_v19, %v3297_v19  ;;  %v3359_v51 = vcombine.low %v3300_v34, %v3300_v34  ;;  %v1037_v53 = vrot.slane %v1023_v44, %v4439_v58  ;;  %v3978_v44 = vld [vmem:[%s5324_s1 + $0x214] ss:$8 sps:$4 sm:$0xff]  }
  0x5b   : > { %2859 = vmatpush1.bf16.msra.mxu1 %v3888_v32  ;;  %v585_v32 = vrot.slane %v583_v23, 1  ;;  %v738_v56 = vrot.slane %v3353_v35, 1  ;;  %v3927_v23 = vld [vmem:[%s5324_s1 + $0x5b0] ss:$8 sps:$4 sm:$0xff]   ;;  %v3950_v35 = vld [vmem:[%s5324_s1 + $0x1f4] ss:$8 sps:$4 sm:$0xff]  }
  0x5c   : > { %2860 = vmatprep.subr.bf16.mxu1 %v3896_v33  ;;  %3031 = vmatpush1.bf16.msra.mxu0 %v3891_v37  ;;  %v947_v33 = vcombine.low %v558_v20, %v565_v21  ;;  %v592_v37 = vrot.slane %v590_v28, 1  ;;  %v3936_v28 = vld [vmem:[%s5324_s1 + $0x1d0] ss:$8 sps:$4 sm:$0xff]  }
  0x5d   : > { %3032 = vmatprep.subr.bf16.mxu0 %v3899_v39  ;;  %v3354_v39 = vcombine.high %v3297_v19, %v3297_v19  ;;  %v586_v42 = vor.u32 %v585_v32, %v581_v18  ;;  %v3930_v18 = vld [vmem:[%s5324_s1 + $0x1c0] ss:$8 sps:$4 sm:$0xff]  }
  0x5e   : > { %v961_v43 = vrot.slane %v947_v33, %v4439_v58  ;;  %v593_v47 = vor.u32 %v592_v37, %v588_v27  ;;  %v3935_v27 = vld [vmem:[%s5324_s1 + $0x5c4] ss:$8 sps:$4 sm:$0xff]   ;;  %v3941_v33 = vld [vmem:[%s5324_s1 + $0x5d4] ss:$8 sps:$4 sm:$0xff]  }
  0x5f   : > { %2861 = vmatpush1.bf16.msra.mxu1 %v3894_v36  ;;  %v3909_v36 = vld [vmem:[%s5324_s1 + $0x580] ss:$8 sps:$4 sm:$0xff]   ;;  %v739_v60 = vrot.slane %v3354_v39, 1  ;;  %v3947_v37 = vld [vmem:[%s5324_s1 + $0x5e4] ss:$8 sps:$4 sm:$0xff]  }
  0x60   : > { %2862 = vmatprep.subr.bf16.mxu1 %v3902_v38  ;;  %3033 = vmatpush1.bf16.msra.mxu0 %v3897_v55  ;;  %v885_v38 = vrot.slane %v871_v29, %v4439_v58  ;;  %v3360_v55 = vcombine.high %v3300_v34, %v3300_v34  ;;  %v1099_v59 = vcombine.low %v586_v42, %v593_v47  ;;  %v3942_v34 = vld [vmem:[%s5324_s1 + $0x1e0] ss:$8 sps:$4 sm:$0xff]   ;;  %v3964_v39 = vld [vmem:[%s5324_s1 + $0x204] ss:$8 sps:$4 sm:$0xff]   ;;  %v3976_v47 = vld [vmem:[%s5324_s1 + $0x210] ss:$8 sps:$4 sm:$0xff]  }
  0x61   : > { %3034 = vmatprep.subr.bf16.mxu0 %v3905_v61  ;;  %v905_v7 = vcombine.low %v738_v56, %v739_v60  ;;  %v3987_v56 = vld [vmem:[%s5324_s1 + $0x624] ss:$8 sps:$4 sm:$0xff]  }
  0x62   : > { %v3386_v54 = vcombine.low %v885_v38, %v961_v43  ;;  %v1113_v5 = vrot.slane %v1099_v59, %v4439_v58  ;;  %v745_v6 = vrot.slane %v3360_v55, 1  ;;  %v3948_v38 = vld [vmem:[%s5324_s1 + $0x1f0] ss:$8 sps:$4 sm:$0xff]   ;;  %v3962_v43 = vld [vmem:[%s5324_s1 + $0x200] ss:$8 sps:$4 sm:$0xff]  }
  0x63   : > { %2863 = vmatpush1.bf16.msra.mxu1 %v3900_v40  ;;  %v3355_v40 = vcombine.low %v3298_v24, %v3298_v24  ;;  %v919_v0 = vrot.slane %v905_v7, %v4439_v58  ;;  %v3979_v55 = vld [vmem:[%s5324_s1 + $0x610] ss:$8 sps:$4 sm:$0xff]   ;;  %v3996_v59 = vld [vmem:[%s5324_s1 + $0x244] ss:$8 sps:$4 sm:$0xff]  }
  0x64   : > { %2864 = vmatprep.subr.bf16.mxu1 %v3908_v49  ;;  %3035 = vmatpush1.bf16.msra.mxu0 %v3903_v3  ;;  %v3358_v49 = vcombine.high %v3299_v30, %v3299_v30  ;;  %v744_v3 = vrot.slane %v3359_v51, 1  ;;  %v3388_v14 = vcombine.low %v1037_v53, %v1113_v5  ;;  %v3944_v30 = vld [vmem:[%s5324_s1 + $0x1e4] ss:$8 sps:$4 sm:$0xff]   ;;  %v3973_v51 = vld [vmem:[%s5324_s1 + $0x600] ss:$8 sps:$4 sm:$0xff]  }
  0x65   : > { %3036 = vmatprep.subr.bf16.mxu0 %v3911_v9  ;;  %v740_v61 = vrot.slane %v3355_v40, 1  ;;  %v3932_v9 = vld [vmem:[%s5324_s1 + $0x1c4] ss:$8 sps:$4 sm:$0xff]   ;;  %v3945_v40 = vld [vmem:[%s5324_s1 + $0x5e0] ss:$8 sps:$4 sm:$0xff]  }
  0x66   : > { %v743_v2 = vrot.slane %v3358_v49, 1  ;;  %v1133_v15 = vcombine.low %v744_v3, %v745_v6  ;;  %v1216_v19 = vrot.slane %v3388_v14, %v4439_v58  ;;  %v3984_v49 = vld [vmem:[%s5324_s1 + $0x224] ss:$8 sps:$4 sm:$0xff]   ;;  %v3982_v53 = vld [vmem:[%s5324_s1 + $0x220] ss:$8 sps:$4 sm:$0xff]  }
  0x67   : > { %2865 = vmatpush1.bf16.msra.mxu1 %v3906_v4  ;;  %v3924_v4 = vld [vmem:[%s5324_s1 + $0x1b0] ss:$8 sps:$4 sm:$0xff]   ;;  %v981_v8 = vcombine.low %v740_v61, %v741_v62  ;;  %v468_v60 = vld [vmem:[%s4427_s11] sm:$0x66]  ;;  %v469_v61 = vld [vmem:[%s4427_s11 + $0x8] sm:$0x66] }
  0x68   : > { %2866 = vmatprep.subr.bf16.mxu1 %v3914_v10  ;;  %3037 = vmatpush1.bf16.msra.mxu0 %v3909_v36  ;;  %v1202_v10 = vrot.slane %v3386_v54, %v4439_v58  ;;  %v1057_v11 = vcombine.low %v742_v1, %v743_v2  ;;  %v1147_v20 = vrot.slane %v1133_v15, %v4439_v58  ;;  %v3939_v36 = vld [vmem:[%s5324_s1 + $0x5d0] ss:$8 sps:$4 sm:$0xff]   ;;  %v3990_v54 = vld [vmem:[%s5324_s1 + $0x234] ss:$8 sps:$4 sm:$0xff]   ;;  %v3985_v5 = vld [vmem:[%s5324_s1 + $0x620] ss:$8 sps:$4 sm:$0xff]  }
  0x69   : > { %3038 = vmatprep.subr.bf16.mxu0 %v3917_v41  ;;  %v3953_v41 = vld [vmem:[%s5324_s1 + $0x5f4] ss:$8 sps:$4 sm:$0xff]   ;;  %v3329_v1 = vcombine.low %v468_v60, %v468_v60  ;;  %v3330_v2 = vcombine.high %v468_v60, %v468_v60  ;;  %v3331_v3 = vcombine.low %v469_v61, %v469_v61  ;;  %v3994_v15 = vld [vmem:[%s5324_s1 + $0x240] ss:$8 sps:$4 sm:$0xff]   ;;  %v4015_v60 = vld [vmem:[%s5324_s1 + $0x670] ss:$8 sps:$4 sm:$0xff]  }
  0x6a   : > { %v1071_v17 = vrot.slane %v1057_v11, %v4439_v58  ;;  %v1220_v24 = vcombine.high %v1202_v10, %v1216_v19  ;;  %v1219_v42 = vcombine.low %v1202_v10, %v1216_v19  ;;  %v470_v62 = vld [vmem:[%s4427_s11 + $0x10] sm:$0x66] }
  0x6b   : > { %2867 = vmatpush1.bf16.msra.mxu1 %v3912_v12  ;;  %v995_v12 = vrot.slane %v981_v8, %v4439_v58  ;;  %v3993_v6 = vld [vmem:[%s5324_s1 + $0x634] ss:$8 sps:$4 sm:$0xff]   ;;  %v3333_v7 = vcombine.low %v470_v62, %v470_v62  ;;  %v3334_v8 = vcombine.high %v470_v62, %v470_v62  ;;  %v614_v11 = vrot.slane %v3329_v1, 1  ;;  %v4024_v62 = vld [vmem:[%s5324_s1 + $0x290] ss:$8 sps:$4 sm:$0xff]  }
  0x6c   : > { %2868 = vmatprep.subr.bf16.mxu1 %v3920_v25  ;;  %3039 = vmatpush1.bf16.msra.mxu0 %v3915_v57  ;;  %v3396_v25 = vcombine.low %v1071_v17, %v1147_v20  ;;  %v3988_v57 = vld [vmem:[%s5324_s1 + $0x230] ss:$8 sps:$4 sm:$0xff]   ;;  %v616_v14 = vrot.slane %v3331_v3, 1  ;;  %v4002_v20 = vld [vmem:[%s5324_s1 + $0x254] ss:$8 sps:$4 sm:$0xff]  }
  0x6d   : > { %3040 = vmatprep.subr.bf16.mxu0 %v3923_v63  ;;  %v3394_v21 = vcombine.low %v919_v0, %v995_v12  ;;  %2880 = vmatprep.mubr.bf16.mxu1 %v1220_v24  ;;  %v471_v63 = vld [vmem:[%s4427_s11 + $0x18] sm:$0x66]  ;;  %v619_v17 = vrot.slane %v3334_v8, 1  ;;  %v4021_v1 = vld [vmem:[%s5324_s1 + $0x680] ss:$8 sps:$4 sm:$0xff]  }
  0x6e   : > { %v1288_v29 = vrot.slane %v3396_v25, %v4439_v58  ;;  %v3336_v10 = vcombine.high %v471_v63, %v471_v63  ;;  %v3991_v12 = vld [vmem:[%s5324_s1 + $0x630] ss:$8 sps:$4 sm:$0xff]   ;;  %v4030_v3 = vld [vmem:[%s5324_s1 + $0x2a0] ss:$8 sps:$4 sm:$0xff]   ;;  %v4044_v8 = vld [vmem:[%s5324_s1 + $0x2c4] ss:$8 sps:$4 sm:$0xff]  }
  0x6f   : > { %2869 = vmatpush1.bf16.msra.mxu1 %v3918_v46  ;;  %v1274_v26 = vrot.slane %v3394_v21, %v4439_v58  ;;  %v3975_v46 = vld [vmem:[%s5324_s1 + $0x604] ss:$8 sps:$4 sm:$0xff]  }
  0x70   : > { %2870 = vmatprep.subr.bf16.mxu1 %v3926_v52  ;;  %3041 = vmatpush1.bf16.msra.mxu0 %v3921_v13  ;;  %v3981_v52 = vld [vmem:[%s5324_s1 + $0x614] ss:$8 sps:$4 sm:$0xff]   ;;  %v615_v13 = vrot.slane %v3330_v2, 1  ;;  %v621_v19 = vrot.slane %v3336_v10, 1 }
  0x71   : > { %3042 = vmatprep.subr.bf16.mxu0 %v3929_v16  ;;  %v1292_v32 = vcombine.high %v1274_v26, %v1288_v29  ;;  %v1291_v48 = vcombine.low %v1274_v26, %v1288_v29  ;;  %v618_v16 = vrot.slane %v3333_v7, 1  ;;  %v4789_v26 = vld.sshfl [vmem:[%s4427_s11 + $0x18] sm:$0xf pattern:$0x76325410] }
  0x72   : > { %v887_v21 = vcombine.low %v614_v11, %v615_v13  ;;  %v4029_v2 = vld [vmem:[%s5324_s1 + $0x694] ss:$8 sps:$4 sm:$0xff]   ;;  %v4036_v7 = vld [vmem:[%s5324_s1 + $0x2b0] ss:$8 sps:$4 sm:$0xff]   ;;  %v4042_v11 = vld [vmem:[%s5324_s1 + $0x2c0] ss:$8 sps:$4 sm:$0xff]  }
  0x73   : > { %2871 = vmatpush1.bf16.msra.mxu1 %v3924_v4  ;;  %3052 = vmatprep.mubr.bf16.mxu0 %v1292_v32  ;;  %v3332_v4 = vcombine.high %v469_v61, %v469_v61  ;;  %v1039_v24 = vcombine.low %v618_v16, %v619_v17  ;;  %v4000_v32 = vld [vmem:[%s5324_s1 + $0x250] ss:$8 sps:$4 sm:$0xff]   ;;  %v4023_v61 = vld [vmem:[%s5324_s1 + $0x684] ss:$8 sps:$4 sm:$0xff]   ;;  %v4041_v10 = vld [vmem:[%s5324_s1 + $0x6b4] ss:$8 sps:$4 sm:$0xff]  }
  0x74   : > { %2872 = vmatprep.subr.bf16.mxu1 %v3932_v9  ;;  %3043 = vmatpush1.bf16.msra.mxu0 %v3927_v23  ;;  %v3335_v9 = vcombine.low %v471_v63, %v471_v63  ;;  %v4786_v23 = vld.sshfl [vmem:[%s4427_s11 + $0x10] sm:$0xf pattern:$0x76325410]  ;;  %v4032_v63 = vld [vmem:[%s5324_s1 + $0x2a4] ss:$8 sps:$4 sm:$0xff]  }
  0x75   : > { %3044 = vmatprep.subr.bf16.mxu0 %v3935_v27  ;;  %v617_v0 = vrot.slane %v3332_v4, 1  ;;  %v3999_v27 = vld [vmem:[%s5324_s1 + $0x644] ss:$8 sps:$4 sm:$0xff]   ;;  %v4038_v4 = vld [vmem:[%s5324_s1 + $0x2b4] ss:$8 sps:$4 sm:$0xff]  }
  0x76   : > { %v4050_v13 = vld [vmem:[%s5324_s1 + $0x2d4] ss:$8 sps:$4 sm:$0xff]   ;;  %v4045_v16 = vld [vmem:[%s5324_s1 + $0x6c0] ss:$8 sps:$4 sm:$0xff]  }
  0x77   : > { %2873 = vmatpush1.bf16.msra.mxu1 %v3930_v18  ;;  %v620_v18 = vrot.slane %v3335_v9, 1  ;;  %v4033_v9 = vld [vmem:[%s5324_s1 + $0x6a0] ss:$8 sps:$4 sm:$0xff]   ;;  %v4053_v17 = vld [vmem:[%s5324_s1 + $0x6d4] ss:$8 sps:$4 sm:$0xff]  }
  0x78   : > { %2874 = vmatprep.subr.bf16.mxu1 %v3938_v22  ;;  %3045 = vmatpush1.bf16.msra.mxu0 %v3933_v31  ;;  %v963_v22 = vcombine.low %v616_v14, %v617_v0  ;;  %v3397_v31 = vcombine.low %v4786_v23, %v4789_v26  ;;  %v4039_v14 = vld [vmem:[%s5324_s1 + $0x6b0] ss:$8 sps:$4 sm:$0xff]   ;;  %v4047_v0 = vld [vmem:[%s5324_s1 + $0x6c4] ss:$8 sps:$4 sm:$0xff]  }
  0x79   : > { %3046 = vmatprep.subr.bf16.mxu0 %v3941_v33  ;;  %v1115_v25 = vcombine.low %v620_v18, %v621_v19  ;;  %v1047_v33 = vrot.slane %v1039_v24, %v4439_v58  ;;  %v4051_v18 = vld [vmem:[%s5324_s1 + $0x6d0] ss:$8 sps:$4 sm:$0xff]   ;;  %v4054_v19 = vld [vmem:[%s5324_s1 + $0x2e0] ss:$8 sps:$4 sm:$0xff]  }
  0x7a   : > { %v971_v29 = vrot.slane %v963_v22, %v4439_v58  ;;  %v4059_v22 = vld [vmem:[%s5324_s1 + $0x6e4] ss:$8 sps:$4 sm:$0xff]   ;;  %v4060_v24 = vld [vmem:[%s5324_s1 + $0x2f0] ss:$8 sps:$4 sm:$0xff]  }
  0x7b   : > { %2875 = vmatpush1.bf16.msra.mxu1 %v3936_v28  ;;  %v895_v28 = vrot.slane %v887_v21, %v4439_v58  ;;  %v4062_v21 = vld [vmem:[%s5324_s1 + $0x2f4] ss:$8 sps:$4 sm:$0xff]  }
  0x7c   : > { %2876 = vmatprep.subr.bf16.mxu1 %v3944_v30  ;;  %3047 = vmatpush1.bf16.msra.mxu0 %v3939_v36  ;;  %v4797_v30 = vld.sshfl [vmem:[%s4427_s11 + $0x20] sm:$0xf pattern:$0x76325410] }
  0x7d   : > { %3048 = vmatprep.subr.bf16.mxu0 %v3947_v37  ;;  %v4008_v36 = vld [vmem:[%s5324_s1 + $0x264] ss:$8 sps:$4 sm:$0xff]   ;;  %v3389_v37 = vcombine.low %v895_v28, %v971_v29  ;;  %v3306_v29 = vld [vmem:[%s4427_s11 + $0x18] sm:$0x77] }
  0x7f   : > { %2877 = vmatpush1.bf16.msra.mxu1 %v3942_v34  ;;  %v1123_v34 = vrot.slane %v1115_v25, %v4439_v58  ;;  %v4076_v25 = vld [vmem:[%s5324_s1 + $0x304] ss:$8 sps:$4 sm:$0xff]  }
  0x80   : > { %2878 = vmatprep.subr.bf16.mxu1 %v3950_v35  ;;  %3049 = vmatpush1.bf16.msra.mxu0 %v3945_v40  ;;  %v3707_v35 = vld.sshfl [vmem:[%s4427_s11 + $0x28] sm:$0xf pattern:$0x76325410] }
  0x81   : > { %3050 = vmatprep.subr.bf16.mxu0 %v3953_v41  ;;  %v3997_v40 = vld [vmem:[%s5324_s1 + $0x640] ss:$8 sps:$4 sm:$0xff]   ;;  %v3391_v41 = vcombine.low %v1047_v33, %v1123_v34 }
  0x82   : > { %v3307_v34 = vld [vmem:[%s4427_s11 + $0x20] sm:$0x77] }
  0x83   : > { %2879 = vmatpush1.bf16.msra.mxu1 %v3948_v38  ;;  %v3399_v38 = vcombine.low %v4797_v30, %v3707_v35  ;;  %v3308_v35 = vld [vmem:[%s4427_s11 + $0x28] sm:$0x77] }
  0x84   : > { %2891 = vmatprep.subr.bf16.mxu1 %v3964_v39  ;;  %3051 = vmatpush1.bf16.msra.mxu0 %v3951_v45  ;;  %v4812_v39 = vrot.slane %v3397_v31, %v4439_v58  ;;  %v4006_v45 = vld [vmem:[%s5324_s1 + $0x260] ss:$8 sps:$4 sm:$0xff]  }
  0x85   : > { %3063 = vmatprep.subr.bf16.mxu0 %v3975_v46  ;;  %v4830_v46 = vrot.slane %v3391_v41, %v4439_v58  ;;  %v3373_v41 = vcombine.low %v3307_v34, %v3307_v34 }
  0x86   : > { %2881 = vmatmul.mubr.bf16.vlgmr.msra.gmra.mrb[0].mxu1 %v1219_v42  ;;  %v4005_v42 = vld [vmem:[%s5324_s1 + $0x654] ss:$8 sps:$4 sm:$0xff]  }
  0x87   : > { %2892 = vmatpush1.bf16.msra.mxu1 %v3962_v43  ;;  %3053 = vmatmul.mubr.bf16.vlgmr.msra.gmra.mrb[0].mxu0 %v1291_v48  ;;  %v4821_v43 = vrot.slane %v3389_v37, %v4439_v58  ;;  %v3372_v37 = vcombine.high %v3306_v29, %v3306_v29 }
  0x88   : > { %2893 = vmatprep.subr.bf16.mxu1 %v3978_v44  ;;  %3064 = vmatpush1.bf16.msra.mxu0 %v3973_v51  ;;  %v4824_v44 = vrot.slane %v3399_v38, %v4439_v58  ;;  %v4057_v38 = vld [vmem:[%s5324_s1 + $0x6e0] ss:$8 sps:$4 sm:$0xff]  }
  0x89   : > { %3065 = vmatprep.subr.bf16.mxu0 %v3981_v52  ;;  %v1254_v51 = vcombine.high %v4821_v43, %v4830_v46  ;;  %v4011_v52 = vld [vmem:[%s5324_s1 + $0x664] ss:$8 sps:$4 sm:$0xff]  }
  0x8a   : > { %v1326_v48 = vcombine.high %v4812_v39, %v4824_v44 }
  0x8b   : > { %2894 = vmatpush1.bf16.msra.mxu1 %v3976_v47  ;;  %v4014_v47 = vld [vmem:[%s5324_s1 + $0x274] ss:$8 sps:$4 sm:$0xff]   ;;  %2923 = vmatprep.mubr.bf16.mxu1 %v1254_v51 }
  0x8c   : > { %2895 = vmatprep.subr.bf16.mxu1 %v3984_v49  ;;  %3066 = vmatpush1.bf16.msra.mxu0 %v3979_v55  ;;  %v4003_v49 = vld [vmem:[%s5324_s1 + $0x650] ss:$8 sps:$4 sm:$0xff]   ;;  %v4009_v55 = vld [vmem:[%s5324_s1 + $0x660] ss:$8 sps:$4 sm:$0xff]  }
  0x8d   : > { %3067 = vmatprep.subr.bf16.mxu0 %v3987_v56  ;;  %3095 = vmatprep.mubr.bf16.mxu0 %v1326_v48  ;;  %v4017_v56 = vld [vmem:[%s5324_s1 + $0x674] ss:$8 sps:$4 sm:$0xff]  }
  0x8f   : > { %2896 = vmatpush1.bf16.msra.mxu1 %v3982_v53  ;;  %v4012_v53 = vld [vmem:[%s5324_s1 + $0x270] ss:$8 sps:$4 sm:$0xff]  }
  0x90   : > { %2897 = vmatprep.subr.bf16.mxu1 %v3990_v54  ;;  %3068 = vmatpush1.bf16.msra.mxu0 %v3985_v5  ;;  %v4020_v54 = vld [vmem:[%s5324_s1 + $0x284] ss:$8 sps:$4 sm:$0xff]   ;;  %v4027_v5 = vld [vmem:[%s5324_s1 + $0x690] ss:$8 sps:$4 sm:$0xff]  }
  0x91   : > { %3069 = vmatprep.subr.bf16.mxu0 %v3993_v6  ;;  %v4035_v6 = vld [vmem:[%s5324_s1 + $0x6a4] ss:$8 sps:$4 sm:$0xff]  }
  0x93   : > { %2898 = vmatpush1.bf16.msra.mxu1 %v3988_v57  ;;  %v4018_v57 = vld [vmem:[%s5324_s1 + $0x280] ss:$8 sps:$4 sm:$0xff]  }
  0x94   : > { %2899 = vmatprep.subr.bf16.mxu1 %v3996_v59  ;;  %3070 = vmatpush1.bf16.msra.mxu0 %v3991_v12  ;;  %v4026_v59 = vld [vmem:[%s5324_s1 + $0x294] ss:$8 sps:$4 sm:$0xff]   ;;  %v4048_v12 = vld [vmem:[%s5324_s1 + $0x2d0] ss:$8 sps:$4 sm:$0xff]  }
  0x95   : > { %3071 = vmatprep.subr.bf16.mxu0 %v3999_v27  ;;  %v3697_v27 = vld.sshfl [vmem:[%s4427_s11 + $0x8] sm:$0xf pattern:$0x76325410] }
  0x96   : > { %v3390_v33 = vcombine.low %v3697_v27, %v4786_v23 }
  0x97   : > { %2900 = vmatpush1.bf16.msra.mxu1 %v3994_v15  ;;  %v4056_v15 = vld [vmem:[%s5324_s1 + $0x2e4] ss:$8 sps:$4 sm:$0xff]  }
  0x98   : > { %2901 = vmatprep.subr.bf16.mxu1 %v4002_v20  ;;  %3072 = vmatpush1.bf16.msra.mxu0 %v3997_v40  ;;  %v3392_v20 = vcombine.low %v4789_v26, %v4797_v30  ;;  %v3305_v26 = vld [vmem:[%s4427_s11 + $0x10] sm:$0x77]  ;;  %v4971_v23 = vrot.slane %v3390_v33, %v4439_v58 }
  0x99   : > { %3073 = vmatprep.subr.bf16.mxu0 %v4005_v42  ;;  %v3369_v30 = vcombine.low %v3305_v26, %v3305_v26  ;;  %v3370_v31 = vcombine.high %v3305_v26, %v3305_v26  ;;  %v4065_v40 = vld [vmem:[%s5324_s1 + $0x6f4] ss:$8 sps:$4 sm:$0xff]   ;;  %v3374_v42 = vcombine.high %v3307_v34, %v3307_v34  ;;  %v4083_v33 = vld [vmem:[%s5324_s1 + $0x710] ss:$8 sps:$4 sm:$0xff]  }
  0x9a   : > { %v4952_v28 = vrot.slane %v3392_v20, %v4439_v58  ;;  %v4085_v20 = vld [vmem:[%s5324_s1 + $0x714] ss:$8 sps:$4 sm:$0xff]  }
  0x9b   : > { %2902 = vmatpush1.bf16.msra.mxu1 %v4000_v32  ;;  %v1253_v32 = vcombine.low %v4821_v43, %v4830_v46  ;;  %v4968_v43 = vcombine.high %v3308_v35, %v3308_v35  ;;  %v787_v46 = vshrl.u32 %v3369_v30, 16  ;;  %v794_v48 = vshrl.u32 %v3370_v31, 16 }
  0x9c   : > { %2903 = vmatprep.subr.bf16.mxu1 %v4008_v36  ;;  %3074 = vmatpush1.bf16.msra.mxu0 %v4003_v49  ;;  %v3371_v36 = vcombine.low %v3306_v29, %v3306_v29  ;;  %v4074_v49 = vld [vmem:[%s5324_s1 + $0x300] ss:$8 sps:$4 sm:$0xff]   ;;  %v796_v51 = vshll.u32 %v3370_v31, 16  ;;  %v4094_v29 = vld [vmem:[%s5324_s1 + $0x334] ss:$8 sps:$4 sm:$0xff]  }
  0x9d   : > { %3075 = vmatprep.subr.bf16.mxu0 %v4011_v52 }
  0x9e   : > { %v801_v52 = vshrl.u32 %v3371_v36, 16 }
  0x9f   : > { %2904 = vmatpush1.bf16.msra.mxu1 %v4006_v45  ;;  %v4966_v45 = vcombine.low %v3308_v35, %v3308_v35  ;;  %v4091_v35 = vld [vmem:[%s5324_s1 + $0x724] ss:$8 sps:$4 sm:$0xff]  }
  0xa0   : > { %2905 = vmatprep.subr.bf16.mxu1 %v4014_v47  ;;  %3076 = vmatpush1.bf16.msra.mxu0 %v4009_v55  ;;  %v789_v47 = vshll.u32 %v3369_v30, 16  ;;  %v4082_v55 = vld [vmem:[%s5324_s1 + $0x314] ss:$8 sps:$4 sm:$0xff]  }
  0xa1   : > { %3077 = vmatprep.subr.bf16.mxu0 %v4017_v56  ;;  %v1256_v56 = vcombine.high %v4971_v23, %v4952_v28 }
  0xa3   : > { %2906 = vmatpush1.bf16.msra.mxu1 %v4012_v53  ;;  %v803_v53 = vshll.u32 %v3371_v36, 16  ;;  %v4092_v36 = vld [vmem:[%s5324_s1 + $0x330] ss:$8 sps:$4 sm:$0xff]  }
  0xa4   : > { %2907 = vmatprep.subr.bf16.mxu1 %v4020_v54  ;;  %3078 = vmatpush1.bf16.msra.mxu0 %v4015_v60  ;;  %v808_v54 = vshrl.u32 %v3372_v37, 16  ;;  %v810_v60 = vshll.u32 %v3372_v37, 16 }
  0xa5   : > { %3079 = vmatprep.subr.bf16.mxu0 %v4023_v61  ;;  %v4063_v61 = vld [vmem:[%s5324_s1 + $0x6f0] ss:$8 sps:$4 sm:$0xff]  }
  0xa7   : > { %2908 = vmatpush1.bf16.msra.mxu1 %v4018_v57  ;;  %v1255_v57 = vcombine.low %v4971_v23, %v4952_v28  ;;  %v4183_v28 = vld [vmem:[%s5324_s1 + $0x814] ss:$8 sps:$4 sm:$0xff]   ;;  %v4181_v23 = vld [vmem:[%s5324_s1 + $0x810] ss:$8 sps:$4 sm:$0xff]  }
  0xa8   : > { %2909 = vmatprep.subr.bf16.mxu1 %v4026_v59  ;;  %3080 = vmatpush1.bf16.msra.mxu0 %v4021_v1  ;;  %v791_v59 = vrot.slane %v789_v47, 1  ;;  %v815_v1 = vshrl.u32 %v3373_v41, 16 }
  0xa9   : > { %3081 = vmatprep.subr.bf16.mxu0 %v4029_v2  ;;  %v817_v2 = vshll.u32 %v3373_v41, 16  ;;  %v4100_v41 = vld [vmem:[%s5324_s1 + $0x344] ss:$8 sps:$4 sm:$0xff]  }
  0xab   : > { %2910 = vmatpush1.bf16.msra.mxu1 %v4024_v62  ;;  %v798_v62 = vrot.slane %v796_v51, 1  ;;  %v4095_v51 = vld [vmem:[%s5324_s1 + $0x730] ss:$8 sps:$4 sm:$0xff]  }
  0xac   : > { %2911 = vmatprep.subr.bf16.mxu1 %v4032_v63  ;;  %3082 = vmatpush1.bf16.msra.mxu0 %v4027_v5  ;;  %v805_v63 = vrot.slane %v803_v53, 1  ;;  %v812_v5 = vrot.slane %v810_v60, 1  ;;  %v4103_v53 = vld [vmem:[%s5324_s1 + $0x744] ss:$8 sps:$4 sm:$0xff]   ;;  %v3310_v60 = vld [vmem:[%s4427_s11 + $0x18] sm:$0x66] }
  0xad   : > { %3083 = vmatprep.subr.bf16.mxu0 %v4035_v6  ;;  %v822_v6 = vshrl.u32 %v3374_v42, 16 }
  0xaf   : > { %2912 = vmatpush1.bf16.msra.mxu1 %v4030_v3  ;;  %v4079_v3 = vld [vmem:[%s5324_s1 + $0x704] ss:$8 sps:$4 sm:$0xff]  }
  0xb0   : > { %2913 = vmatprep.subr.bf16.mxu1 %v4038_v4  ;;  %3084 = vmatpush1.bf16.msra.mxu0 %v4033_v9  ;;  %v792_v4 = vor.u32 %v791_v59, %v787_v46  ;;  %v4080_v9 = vld [vmem:[%s5324_s1 + $0x310] ss:$8 sps:$4 sm:$0xff]   ;;  %v4098_v46 = vld [vmem:[%s5324_s1 + $0x340] ss:$8 sps:$4 sm:$0xff]  }
  0xb1   : > { %3085 = vmatprep.subr.bf16.mxu0 %v4041_v10  ;;  %v4088_v10 = vld [vmem:[%s5324_s1 + $0x324] ss:$8 sps:$4 sm:$0xff]   ;;  %v3309_v59 = vld [vmem:[%s4427_s11 + $0x10] sm:$0x66] }
  0xb3   : > { %2914 = vmatpush1.bf16.msra.mxu1 %v4036_v7  ;;  %v824_v7 = vshll.u32 %v3374_v42, 16  ;;  %v4089_v42 = vld [vmem:[%s5324_s1 + $0x720] ss:$8 sps:$4 sm:$0xff]  }
  0xb4   : > { %2915 = vmatprep.subr.bf16.mxu1 %v4044_v8  ;;  %3086 = vmatpush1.bf16.msra.mxu0 %v4039_v14  ;;  %v1325_v8 = vcombine.low %v4812_v39, %v4824_v44  ;;  %v819_v14 = vrot.slane %v817_v2, 1  ;;  %v4077_v39 = vld [vmem:[%s5324_s1 + $0x700] ss:$8 sps:$4 sm:$0xff]   ;;  %v3378_v2 = vcombine.high %v3309_v59, %v3309_v59 }
  0xb5   : > { %3087 = vmatprep.subr.bf16.mxu0 %v4047_v0  ;;  %v813_v0 = vor.u32 %v812_v5, %v808_v54  ;;  %v4104_v54 = vld [vmem:[%s5324_s1 + $0x350] ss:$8 sps:$4 sm:$0xff]   ;;  %v3380_v5 = vcombine.high %v3310_v60, %v3310_v60 }
  0xb6   : > { %v820_v44 = vor.u32 %v819_v14, %v815_v1  ;;  %v3377_v1 = vcombine.low %v3309_v59, %v3309_v59  ;;  %v4137_v59 = vld [vmem:[%s5324_s1 + $0x7a0] ss:$8 sps:$4 sm:$0xff]  }
  0xb7   : > { %2916 = vmatpush1.bf16.msra.mxu1 %v4042_v11  ;;  %v799_v11 = vor.u32 %v798_v62, %v794_v48  ;;  %v4101_v62 = vld [vmem:[%s5324_s1 + $0x740] ss:$8 sps:$4 sm:$0xff]  }
  0xb8   : > { %2917 = vmatprep.subr.bf16.mxu1 %v4050_v13  ;;  %3088 = vmatpush1.bf16.msra.mxu0 %v4045_v16  ;;  %v806_v13 = vor.u32 %v805_v63, %v801_v52  ;;  %v831_v16 = vshll.u32 %v4966_v45, 16  ;;  %v3312_v63 = vld [vmem:[%s4427_s11 + $0x28] sm:$0x66] }
  0xb9   : > { %3089 = vmatprep.subr.bf16.mxu0 %v4053_v17  ;;  %v836_v17 = vshrl.u32 %v4968_v43, 16 }
  0xbb   : > { %2918 = vmatpush1.bf16.msra.mxu1 %v4048_v12  ;;  %v826_v12 = vrot.slane %v824_v7, 1 }
  0xbc   : > { %2919 = vmatprep.subr.bf16.mxu1 %v4056_v15  ;;  %3090 = vmatpush1.bf16.msra.mxu0 %v4051_v18  ;;  %v829_v15 = vshrl.u32 %v4966_v45, 16  ;;  %v838_v18 = vshll.u32 %v4968_v43, 16  ;;  %v4097_v43 = vld [vmem:[%s5324_s1 + $0x734] ss:$8 sps:$4 sm:$0xff]  }
  0xbd   : > { %3091 = vmatprep.subr.bf16.mxu0 %v4059_v22  ;;  %v833_v22 = vrot.slane %v831_v16, 1 }
  0xbe   : > { %v840_v26 = vrot.slane %v838_v18, 1 }
  0xbf   : > { %2920 = vmatpush1.bf16.msra.mxu1 %v4054_v19  ;;  %v922_v19 = vcombine.low %v792_v4, %v799_v11  ;;  %v834_v30 = vor.u32 %v833_v22, %v829_v15  ;;  %v4109_v4 = vld [vmem:[%s5324_s1 + $0x754] ss:$8 sps:$4 sm:$0xff]   ;;  %v862_v11 = vrot.slane %v3377_v1, 1  ;;  %v4116_v22 = vld [vmem:[%s5324_s1 + $0x370] ss:$8 sps:$4 sm:$0xff]  }
  0xc0   : > { %2921 = vmatprep.subr.bf16.mxu1 %v4062_v21  ;;  %3092 = vmatpush1.bf16.msra.mxu0 %v4057_v38  ;;  %v827_v21 = vor.u32 %v826_v12, %v822_v6  ;;  %v841_v34 = vor.u32 %v840_v26, %v836_v17  ;;  %v865_v12 = vrot.slane %v3380_v5, 1  ;;  %v4124_v26 = vld [vmem:[%s5324_s1 + $0x384] ss:$8 sps:$4 sm:$0xff]   ;;  %v4157_v5 = vld [vmem:[%s5324_s1 + $0x7d4] ss:$8 sps:$4 sm:$0xff]  }
  0xc1   : > { %3093 = vmatprep.subr.bf16.mxu0 %v4065_v40  ;;  %v936_v27 = vrot.slane %v922_v19, %v4439_v58  ;;  %v4115_v19 = vld [vmem:[%s5324_s1 + $0x764] ss:$8 sps:$4 sm:$0xff]  }
  0xc2   : > { %v1150_v38 = vcombine.low %v834_v30, %v841_v34  ;;  %v4113_v30 = vld [vmem:[%s5324_s1 + $0x760] ss:$8 sps:$4 sm:$0xff]   ;;  %v4151_v1 = vld [vmem:[%s5324_s1 + $0x7c4] ss:$8 sps:$4 sm:$0xff]  }
  0xc3   : > { %2922 = vmatpush1.bf16.msra.mxu1 %v4060_v24  ;;  %v998_v24 = vcombine.low %v806_v13, %v813_v0  ;;  %v863_v13 = vrot.slane %v3378_v2, 1  ;;  %v4118_v0 = vld [vmem:[%s5324_s1 + $0x374] ss:$8 sps:$4 sm:$0xff]   ;;  %v4122_v34 = vld [vmem:[%s5324_s1 + $0x380] ss:$8 sps:$4 sm:$0xff]  }
  0xc4   : > { %2934 = vmatprep.subr.bf16.mxu1 %v4076_v25  ;;  %3094 = vmatpush1.bf16.msra.mxu0 %v4063_v61  ;;  %v4086_v25 = vld [vmem:[%s5324_s1 + $0x320] ss:$8 sps:$4 sm:$0xff]   ;;  %v1164_v45 = vrot.slane %v1150_v38, %v4439_v58  ;;  %v4119_v38 = vld [vmem:[%s5324_s1 + $0x770] ss:$8 sps:$4 sm:$0xff]  }
  0xc5   : > { %3106 = vmatprep.subr.bf16.mxu0 %v4079_v3  ;;  %v1012_v31 = vrot.slane %v998_v24, %v4439_v58  ;;  %v3311_v61 = vld [vmem:[%s4427_s11 + $0x20] sm:$0x66]  ;;  %v3379_v3 = vcombine.low %v3310_v60, %v3310_v60  ;;  %v938_v18 = vcombine.low %v862_v11, %v863_v13  ;;  %v4145_v60 = vld [vmem:[%s5324_s1 + $0x7b4] ss:$8 sps:$4 sm:$0xff]   ;;  %v4152_v2 = vld [vmem:[%s5324_s1 + $0x3d0] ss:$8 sps:$4 sm:$0xff]  }
  0xc6   : > { %2924 = vmatmul.mubr.bf16.vlgmr.msra.gmra.mrb[0].mxu1 %v1253_v32  ;;  %v1074_v32 = vcombine.low %v820_v44, %v827_v21  ;;  %v3381_v6 = vcombine.low %v3311_v61, %v3311_v61  ;;  %v3382_v7 = vcombine.high %v3311_v61, %v3311_v61  ;;  %v4107_v44 = vld [vmem:[%s5324_s1 + $0x750] ss:$8 sps:$4 sm:$0xff]   ;;  %v4146_v61 = vld [vmem:[%s5324_s1 + $0x3c0] ss:$8 sps:$4 sm:$0xff]   ;;  %v4169_v13 = vld [vmem:[%s5324_s1 + $0x7f4] ss:$8 sps:$4 sm:$0xff]  }
  0xc7   : > { %2935 = vmatpush1.bf16.msra.mxu1 %v4074_v49  ;;  %2966 = vmatprep.mubr.bf16.mxu1 %v1256_v56  ;;  %v3398_v40 = vcombine.low %v936_v27, %v1012_v31  ;;  %v4106_v49 = vld [vmem:[%s5324_s1 + $0x354] ss:$8 sps:$4 sm:$0xff]   ;;  %v864_v14 = vrot.slane %v3379_v3, 1  ;;  %v945_v24 = vrot.slane %v938_v18, %v4439_v58  ;;  %v4160_v3 = vld [vmem:[%s5324_s1 + $0x3e4] ss:$8 sps:$4 sm:$0xff]  }
  0xc8   : > { %2936 = vmatprep.subr.bf16.mxu1 %v4082_v55  ;;  %3096 = vmatmul.mubr.bf16.vlgmr.msra.gmra.mrb[0].mxu0 %v1325_v8  ;;  %v1088_v37 = vrot.slane %v1074_v32, %v4439_v58  ;;  %v4112_v55 = vld [vmem:[%s5324_s1 + $0x364] ss:$8 sps:$4 sm:$0xff]   ;;  %v3383_v8 = vcombine.low %v3312_v63, %v3312_v63  ;;  %v866_v15 = vrot.slane %v3381_v6, 1  ;;  %v867_v16 = vrot.slane %v3382_v7, 1  ;;  %v4121_v32 = vld [vmem:[%s5324_s1 + $0x774] ss:$8 sps:$4 sm:$0xff]  }
  0xc9   : > { %3107 = vmatpush1.bf16.msra.mxu0 %v4077_v39  ;;  %v5039_v48 = vrot.slane %v3398_v40, %v4439_v58  ;;  %v4158_v6 = vld [vmem:[%s5324_s1 + $0x3e0] ss:$8 sps:$4 sm:$0xff]   ;;  %v4166_v7 = vld [vmem:[%s5324_s1 + $0x3f4] ss:$8 sps:$4 sm:$0xff]  }
  0xca   : > { %3108 = vmatprep.subr.bf16.mxu0 %v4085_v20  ;;  %v3400_v47 = vcombine.low %v1088_v37, %v1164_v45  ;;  %v868_v39 = vrot.slane %v3383_v8, 1  ;;  %v1014_v20 = vcombine.low %v864_v14, %v865_v12  ;;  %v1090_v21 = vcombine.low %v866_v15, %v867_v16  ;;  %v4155_v8 = vld [vmem:[%s5324_s1 + $0x7d0] ss:$8 sps:$4 sm:$0xff]   ;;  %v4161_v11 = vld [vmem:[%s5324_s1 + $0x7e0] ss:$8 sps:$4 sm:$0xff]  }
  0xcb   : > { %2937 = vmatpush1.bf16.msra.mxu1 %v4080_v9  ;;  %v4110_v9 = vld [vmem:[%s5324_s1 + $0x360] ss:$8 sps:$4 sm:$0xff]   ;;  %v4167_v14 = vld [vmem:[%s5324_s1 + $0x7f0] ss:$8 sps:$4 sm:$0xff]   ;;  %v4195_v18 = vld [vmem:[%s5324_s1 + $0x854] ss:$8 sps:$4 sm:$0xff]  }
  0xcc   : > { %2938 = vmatprep.subr.bf16.mxu1 %v4088_v10  ;;  %v5048_v52 = vrot.slane %v3400_v47, %v4439_v58  ;;  %v3384_v10 = vcombine.high %v3312_v63, %v3312_v63  ;;  %v1021_v27 = vrot.slane %v1014_v20, %v4439_v58  ;;  %v4133_v47 = vld [vmem:[%s5324_s1 + $0x794] ss:$8 sps:$4 sm:$0xff]   ;;  %v4143_v63 = vld [vmem:[%s5324_s1 + $0x7b0] ss:$8 sps:$4 sm:$0xff]   ;;  %v4178_v15 = vld [vmem:[%s5324_s1 + $0x800] ss:$8 sps:$4 sm:$0xff]  }
  0xcd   : > { %3109 = vmatpush1.bf16.msra.mxu0 %v4083_v33  ;;  %v4198_v20 = vld [vmem:[%s5324_s1 + $0x864] ss:$8 sps:$4 sm:$0xff]  }
  0xce   : > { %3110 = vmatprep.subr.bf16.mxu0 %v4091_v35  ;;  %v1328_v56 = vcombine.high %v5039_v48, %v5048_v52  ;;  %v869_v17 = vrot.slane %v3384_v10, 1  ;;  %v1329_v33 = vcombine.low %v945_v24, %v1021_v27  ;;  %v4164_v10 = vld [vmem:[%s5324_s1 + $0x3f0] ss:$8 sps:$4 sm:$0xff]   ;;  %v1327_v12 = vcombine.low %v5039_v48, %v5048_v52  ;;  %v4184_v48 = vld [vmem:[%s5324_s1 + $0x820] ss:$8 sps:$4 sm:$0xff]  }
  0xcf   : > { %2939 = vmatpush1.bf16.msra.mxu1 %v4086_v25  ;;  %v4189_v52 = vld [vmem:[%s5324_s1 + $0x834] ss:$8 sps:$4 sm:$0xff]   ;;  %v4199_v24 = vld [vmem:[%s5324_s1 + $0x870] ss:$8 sps:$4 sm:$0xff]  }
  0xd0   : > { %2940 = vmatprep.subr.bf16.mxu1 %v4094_v29  ;;  %3138 = vmatprep.mubr.bf16.mxu0 %v1328_v56  ;;  %v1166_v25 = vcombine.low %v868_v39, %v869_v17  ;;  %v1097_v29 = vrot.slane %v1090_v21, %v4439_v58  ;;  %v5106_v37 = vrot.slane %v1329_v33, %v4439_v58  ;;  %v4148_v56 = vld [vmem:[%s5324_s1 + $0x3c4] ss:$8 sps:$4 sm:$0xff]   ;;  %v4187_v39 = vld [vmem:[%s5324_s1 + $0x830] ss:$8 sps:$4 sm:$0xff]   ;;  %v4190_v17 = vld [vmem:[%s5324_s1 + $0x840] ss:$8 sps:$4 sm:$0xff]  }
  0xd1   : > { %3111 = vmatpush1.bf16.msra.mxu0 %v4089_v42  ;;  %v4128_v42 = vld [vmem:[%s5324_s1 + $0x390] ss:$8 sps:$4 sm:$0xff]   ;;  %v4196_v21 = vld [vmem:[%s5324_s1 + $0x860] ss:$8 sps:$4 sm:$0xff]   ;;  %v4207_v27 = vld [vmem:[%s5324_s1 + $0x894] ss:$8 sps:$4 sm:$0xff]  }
  0xd2   : > { %3112 = vmatprep.subr.bf16.mxu0 %v4097_v43  ;;  %v1173_v31 = vrot.slane %v1166_v25, %v4439_v58  ;;  %v4136_v43 = vld [vmem:[%s5324_s1 + $0x3a4] ss:$8 sps:$4 sm:$0xff]   ;;  %v4211_v33 = vld [vmem:[%s5324_s1 + $0x8b0] ss:$8 sps:$4 sm:$0xff]  }
  0xd3   : > { %2941 = vmatpush1.bf16.msra.mxu1 %v4092_v36  ;;  %v4130_v36 = vld [vmem:[%s5324_s1 + $0x394] ss:$8 sps:$4 sm:$0xff]   ;;  %v4204_v25 = vld [vmem:[%s5324_s1 + $0x884] ss:$8 sps:$4 sm:$0xff]  }
  0xd4   : > { %2942 = vmatprep.subr.bf16.mxu1 %v4100_v41  ;;  %v1330_v35 = vcombine.low %v1097_v29, %v1173_v31  ;;  %v4127_v41 = vld [vmem:[%s5324_s1 + $0x784] ss:$8 sps:$4 sm:$0xff]   ;;  %v4205_v29 = vld [vmem:[%s5324_s1 + $0x890] ss:$8 sps:$4 sm:$0xff]   ;;  %v4208_v31 = vld [vmem:[%s5324_s1 + $0x8a0] ss:$8 sps:$4 sm:$0xff]  }
  0xd5   : > { %3113 = vmatpush1.bf16.msra.mxu0 %v4095_v51  ;;  %v4142_v51 = vld [vmem:[%s5324_s1 + $0x3b4] ss:$8 sps:$4 sm:$0xff]  }
  0xd6   : > { %3114 = vmatprep.subr.bf16.mxu0 %v4103_v53  ;;  %v5112_v40 = vrot.slane %v1330_v35, %v4439_v58  ;;  %v4131_v53 = vld [vmem:[%s5324_s1 + $0x790] ss:$8 sps:$4 sm:$0xff]   ;;  %v4214_v35 = vld [vmem:[%s5324_s1 + $0x8c0] ss:$8 sps:$4 sm:$0xff]  }
  0xd7   : > { %2943 = vmatpush1.bf16.msra.mxu1 %v4098_v46  ;;  %v4125_v46 = vld [vmem:[%s5324_s1 + $0x780] ss:$8 sps:$4 sm:$0xff]  }
  0xd8   : > { %2944 = vmatprep.subr.bf16.mxu1 %v4106_v49  ;;  %v1345_v45 = vcombine.low %v5106_v37, %v5112_v40  ;;  %v4134_v49 = vld [vmem:[%s5324_s1 + $0x3a0] ss:$8 sps:$4 sm:$0xff]   ;;  %v1346_v16 = vcombine.high %v5106_v37, %v5112_v40 }
  0xd9   : > { %3115 = vmatpush1.bf16.msra.mxu0 %v4101_v62  ;;  %v4154_v62 = vld [vmem:[%s5324_s1 + $0x3d4] ss:$8 sps:$4 sm:$0xff]  }
  0xda   : > { %3116 = vmatprep.subr.bf16.mxu0 %v4109_v4  ;;  %v4149_v4 = vld [vmem:[%s5324_s1 + $0x7c0] ss:$8 sps:$4 sm:$0xff]  }
  0xdb   : > { %2945 = vmatpush1.bf16.msra.mxu1 %v4104_v54  ;;  %v4139_v54 = vld [vmem:[%s5324_s1 + $0x7a4] ss:$8 sps:$4 sm:$0xff]  }
  0xdc   : > { %2946 = vmatprep.subr.bf16.mxu1 %v4112_v55  ;;  %v4140_v55 = vld [vmem:[%s5324_s1 + $0x3b0] ss:$8 sps:$4 sm:$0xff]  }
  0xdd   : > { %3117 = vmatpush1.bf16.msra.mxu0 %v4107_v44  ;;  %v4192_v44 = vld [vmem:[%s5324_s1 + $0x844] ss:$8 sps:$4 sm:$0xff]  }
  0xde   : > { %3118 = vmatprep.subr.bf16.mxu0 %v4115_v19  ;;  %v4193_v19 = vld [vmem:[%s5324_s1 + $0x850] ss:$8 sps:$4 sm:$0xff]  }
  0xdf   : > { %2947 = vmatpush1.bf16.msra.mxu1 %v4110_v9  ;;  %v4163_v9 = vld [vmem:[%s5324_s1 + $0x7e4] ss:$8 sps:$4 sm:$0xff]  }
  0xe0   : > { %2948 = vmatprep.subr.bf16.mxu1 %v4118_v0  ;;  %v4180_v0 = vld [vmem:[%s5324_s1 + $0x804] ss:$8 sps:$4 sm:$0xff]  }
  0xe1   : > { %3119 = vmatpush1.bf16.msra.mxu0 %v4113_v30  ;;  %v4210_v30 = vld [vmem:[%s5324_s1 + $0x8a4] ss:$8 sps:$4 sm:$0xff]  }
  0xe2   : > { %3120 = vmatprep.subr.bf16.mxu0 %v4121_v32  ;;  %v4213_v32 = vld [vmem:[%s5324_s1 + $0x8b4] ss:$8 sps:$4 sm:$0xff]  }
  0xe3   : > { %2949 = vmatpush1.bf16.msra.mxu1 %v4116_v22  ;;  %v4201_v22 = vld [vmem:[%s5324_s1 + $0x874] ss:$8 sps:$4 sm:$0xff]  }
  0xe4   : > { %2950 = vmatprep.subr.bf16.mxu1 %v4124_v26  ;;  %v4202_v26 = vld [vmem:[%s5324_s1 + $0x880] ss:$8 sps:$4 sm:$0xff]  }
  0xe5   : > { %3121 = vmatpush1.bf16.msra.mxu0 %v4119_v38  ;;  %v4217_v38 = vld [vmem:[%s5324_s1 + $0x8d0] ss:$8 sps:$4 sm:$0xff]  }
  0xe6   : > { %3122 = vmatprep.subr.bf16.mxu0 %v4127_v41  ;;  %v4222_v41 = vld [vmem:[%s5324_s1 + $0x8e4] ss:$8 sps:$4 sm:$0xff]  }
  0xe7   : > { %2951 = vmatpush1.bf16.msra.mxu1 %v4122_v34  ;;  %v4216_v34 = vld [vmem:[%s5324_s1 + $0x8c4] ss:$8 sps:$4 sm:$0xff]  }
  0xe8   : > { %2952 = vmatprep.subr.bf16.mxu1 %v4130_v36  ;;  %v4219_v36 = vld [vmem:[%s5324_s1 + $0x8d4] ss:$8 sps:$4 sm:$0xff]  }
  0xe9   : > { %3123 = vmatpush1.bf16.msra.mxu0 %v4125_v46  ;;  %v4223_v46 = vld [vmem:[%s5324_s1 + $0x8f0] ss:$8 sps:$4 sm:$0xff]  }
  0xea   : > { %3124 = vmatprep.subr.bf16.mxu0 %v4133_v47 }
  0xeb   : > { %2953 = vmatpush1.bf16.msra.mxu1 %v4128_v42  ;;  %v4220_v42 = vld [vmem:[%s5324_s1 + $0x8e0] ss:$8 sps:$4 sm:$0xff]  }
  0xec   : > { %2954 = vmatprep.subr.bf16.mxu1 %v4136_v43  ;;  %v4225_v43 = vld [vmem:[%s5324_s1 + $0x8f4] ss:$8 sps:$4 sm:$0xff]  }
  0xed   : > { %3125 = vmatpush1.bf16.msra.mxu0 %v4131_v53 }
  0xee   : > { %3126 = vmatprep.subr.bf16.mxu0 %v4139_v54  ;;  %v1177_v54 = vsub.s32 0, %v4416_v50 }
  0xef   : > { %2955 = vmatpush1.bf16.msra.mxu1 %v4134_v49 }
  0xf0   : > { %2956 = vmatprep.subr.bf16.mxu1 %v4142_v51 }
  0xf1   : > { %3127 = vmatpush1.bf16.msra.mxu0 %v4137_v59 }
  0xf2   : > { %3128 = vmatprep.subr.bf16.mxu0 %v4145_v60 }
  0xf3   : > { %2957 = vmatpush1.bf16.msra.mxu1 %v4140_v55  ;;  %v459_v55 = vld [vmem:[%s5325_s2] sm:$0x3] }
  0xf4   : > { %2958 = vmatprep.subr.bf16.mxu1 %v4148_v56  ;;  %v1181_v56 = vsub.s32 1, %v4416_v50  ;;  %v1178_v59 = vrot.slane %v459_v55, %v1177_v54 }
  0xf5   : > { %3129 = vmatpush1.bf16.msra.mxu0 %v4143_v63 }
  0xf6   : > { %3130 = vmatprep.subr.bf16.mxu0 %v4151_v1  ;;  %v1182_v60 = vrot.slane %v459_v55, %v1181_v56 }
  0xf7   : > { %2959 = vmatpush1.bf16.msra.mxu1 %v4146_v61 }
  0xf8   : > { %2960 = vmatprep.subr.bf16.mxu1 %v4154_v62 }
  0xf9   : > { %3131 = vmatpush1.bf16.msra.mxu0 %v4149_v4 }
  0xfa   : > { %3132 = vmatprep.subr.bf16.mxu0 %v4157_v5 }
  0xfb   : > { %2961 = vmatpush1.bf16.msra.mxu1 %v4152_v2 }
  0xfc   : > { %2962 = vmatprep.subr.bf16.mxu1 %v4160_v3 }
  0xfd   : > { %3133 = vmatpush1.bf16.msra.mxu0 %v4155_v8 }
  0xfe   : > { %3134 = vmatprep.subr.bf16.mxu0 %v4163_v9 }
  0xff   : > { %2963 = vmatpush1.bf16.msra.mxu1 %v4158_v6 }
 0x100   : > { %2964 = vmatprep.subr.bf16.mxu1 %v4166_v7 }
 0x101   : > { %3135 = vmatpush1.bf16.msra.mxu0 %v4161_v11 }
 0x102   : > { %3136 = vmatprep.subr.bf16.mxu0 %v4169_v13 }
 0x103   : > { %2965 = vmatpush1.bf16.msra.mxu1 %v4164_v10 }
 0x105   : > { %3137 = vmatpush1.bf16.msra.mxu0 %v4167_v14 }
 0x106   : > { %2967 = vmatmul.mubr.bf16.vlgmr.msra.gmra.mrb[0].mxu1 %v1255_v57  ;;  %3149 = vmatprep.subr.bf16.mxu0 %v4180_v0  ;;  %v4186_v57 = vld [vmem:[%s5324_s1 + $0x824] ss:$8 sps:$4 sm:$0xff]  }
 0x108   : > { %3139 = vmatmul.mubr.bf16.vlgmr.msra.gmra.mrb[0].mxu0 %v1327_v12 }
 0x109   : > { %3150 = vmatpush1.bf16.msra.mxu0 %v4178_v15  ;;  %3181 = vmatprep.mubr.bf16.mxu0 %v1346_v16 }
 0x10a   : > { %3151 = vmatprep.subr.bf16.mxu0 %v4183_v28 }
 0x10d   : > { %3152 = vmatpush1.bf16.msra.mxu0 %v4181_v23 }
 0x10e   : > { %3153 = vmatprep.subr.bf16.mxu0 %v4186_v57 }
 0x111   : > { %3154 = vmatpush1.bf16.msra.mxu0 %v4184_v48 }
 0x112   : > { %3155 = vmatprep.subr.bf16.mxu0 %v4189_v52 }
 0x115   : > { %3156 = vmatpush1.bf16.msra.mxu0 %v4187_v39 }
 0x116   : > { %3157 = vmatprep.subr.bf16.mxu0 %v4192_v44 }
 0x119   : > { %3158 = vmatpush1.bf16.msra.mxu0 %v4190_v17 }
 0x11a   : > { %3159 = vmatprep.subr.bf16.mxu0 %v4195_v18 }
 0x11d   : > { %3160 = vmatpush1.bf16.msra.mxu0 %v4193_v19 }
 0x11e   : > { %3161 = vmatprep.subr.bf16.mxu0 %v4198_v20 }
 0x121   : > { %3162 = vmatpush1.bf16.msra.mxu0 %v4196_v21 }
 0x122   : > { %3163 = vmatprep.subr.bf16.mxu0 %v4201_v22 }
 0x125   : > { %3164 = vmatpush1.bf16.msra.mxu0 %v4199_v24 }
 0x126   : > { %3165 = vmatprep.subr.bf16.mxu0 %v4204_v25 }
 0x129   : > { %3166 = vmatpush1.bf16.msra.mxu0 %v4202_v26 }
 0x12a   : > { %3167 = vmatprep.subr.bf16.mxu0 %v4207_v27 }
 0x12d   : > { %3168 = vmatpush1.bf16.msra.mxu0 %v4205_v29 }
 0x12e   : > { %3169 = vmatprep.subr.bf16.mxu0 %v4210_v30 }
 0x131   : > { %3170 = vmatpush1.bf16.msra.mxu0 %v4208_v31 }
 0x132   : > { %3171 = vmatprep.subr.bf16.mxu0 %v4213_v32 }
 0x135   : > { %3172 = vmatpush1.bf16.msra.mxu0 %v4211_v33 }
 0x136   : > { %3173 = vmatprep.subr.bf16.mxu0 %v4216_v34 }
 0x139   : > { %3174 = vmatpush1.bf16.msra.mxu0 %v4214_v35 }
 0x13a   : > { %3175 = vmatprep.subr.bf16.mxu0 %v4219_v36 }
 0x13d   : > { %3176 = vmatpush1.bf16.msra.mxu0 %v4217_v38 }
 0x13e   : > { %3177 = vmatprep.subr.bf16.mxu0 %v4222_v41 }
 0x141   : > { %3178 = vmatpush1.bf16.msra.mxu0 %v4220_v42 }
 0x142   : > { %3179 = vmatprep.subr.bf16.mxu0 %v4225_v43 }
 0x145   : > { %3180 = vmatpush1.bf16.msra.mxu0 %v4223_v46 }
 0x148   : > { %3182 = vmatmul.mubr.bf16.vlgmr.msra.gmra.mrb[0].mxu0 %v1345_v45 }
 0x1d9   : > { %v2968_v47 = vpop.f32.mrb[0].mxu1 }
 0x1da   : > { %v2970_v49 = vpop.f32.mrb[1].mxu1  ;;  %v3708_v61 = vadd.f32 %v2968_v47, %v1178_v59 }
 0x1db   : > { %v2972_v51 = vpop.f32.mrb[2].mxu1  ;;  %v3710_v62 = vadd.f32 %v2970_v49, %v1182_v60 }
 0x1dc   : > { %v2974_v53 = vpop.f32.mrb[3].mxu1  ;;  %v3712_v37 = vadd.f32 %v2972_v51, %v1178_v59 }
 0x1dd   : > { %v3714_v1 = vadd.f32 %v2974_v53, %v1182_v60 }
 0x21b   : > { %v3183_v63 = vpop.f32.mrb[0].mxu0 }
 0x21c   : > { %v3709_v40 = vadd.f32 %v3708_v61, %v3183_v63  ;;  %v3185_v45 = vpop.f32.mrb[1].mxu0 }
 0x21d   : > { %v3711_v2 = vadd.f32 %v3710_v62, %v3185_v45  ;;  %v3187_v3 = vpop.f32.mrb[2].mxu0 }
 0x21e   : > { %v3192_v4 = vmax.f32 %v3709_v40, 0.0  ;;  %v3713_v5 = vadd.f32 %v3712_v37, %v3187_v3  ;;  %v3189_v6 = vpop.f32.mrb[3].mxu0 }
 0x21f   : > { %v3193_v7 = vmax.f32 %v3711_v2, 0.0  ;;  %v3715_v8 = vadd.f32 %v3714_v1, %v3189_v6 }
 0x220   : > { %v3194_v50 = vmax.f32 %v3713_v5, 0.0 }
 0x221   : > { %v3689_v9 = vpack.c.bf16 %v3193_v7, %v3192_v4  ;;  %v3195_v10 = vmax.f32 %v3715_v8, 0.0 }
 0x223   : > { %v3208_v11 = vrot.slane %v3689_v9, %v4439_v58  ;;  %3691 = vst.sshfl [vmem:[%s170_s10] sm:$0x33 pattern:$0x76325410] %v3689_v9  ;;  %v3690_v13 = vpack.c.bf16 %v3195_v10, %v3194_v50 }
 0x225   : > { %v3216_v14 = vcombine.high %v3208_v11, %v3208_v11  ;;  %v3215_v0 = vrot.slane %v3690_v13, %v4439_v58  ;;  %3692 = vst.sshfl [vmem:[%s170_s10 + $0x8] sm:$0x33 pattern:$0x76325410] %v3690_v13 }
 0x227   : > { %3223 = vst [vmem:[%s170_s10 + $0x4] sm:$0xf] %v3216_v14  ;;  %v3217_v12 = vcombine.high %v3215_v0, %v3215_v0 }
 0x229   : > { %3225 = vst [vmem:[%s170_s10 + $0xc] sm:$0xf] %v3217_v12 }
 0x22a PF: > { %s13_s12 = sadd.s32 1, %s4240_s12  }
 0x22b   : > { %p10_p4 = scmp.ge.s32.totalorder %s13_s12, 6  }
 0x22d   :  { %12 = sbr.rel (!%p10_p4) target bundleno = 1 (0x1), region = 64 }

</bundles_post_ra>
